<compile_context>
chip_gen: v7x
topology: tpu7x:2x2x1
jax: 0.10.0
libtpu: 0.0.40
codegen_flags: <defaults>
</compile_context>

<pallas_src>
import functools

import numpy as np
import jax
import jax.numpy as jnp
from jax import lax
from jax.experimental import pallas as pl
from jax.experimental.pallas import tpu as pltpu

EMBED = 32
NHEAD = 4
HEAD_DIM = EMBED // NHEAD
FFN = 2048          # PyTorch TransformerEncoderLayer default dim_feedforward
SEQ = 7 * 7
SEQ_PAD = 56        # SEQ rounded up to a sublane multiple (8)
LN_EPS = 1e-5
NUM_LAYERS = 2


def _round_up(n, m):
    return (n + m - 1) // m * m


# ----------------------------------------------------------------------------
# Fused Conv2d(3x3, stride 1, pad 1) + ReLU + MaxPool2d(2,2), channel-major,
# gridded over a lane-dense (128-multiple) pixel axis.
# ----------------------------------------------------------------------------
def conv_pool_kernel(t_ref, w_ref, b_ref, o_ref):
    w = w_ref[...]                                        # (C_out, 9*C_in) bf16
    z = jnp.dot(w, t_ref[0], preferred_element_type=jnp.float32)
    for t in range(1, 4):
        z = jnp.maximum(z, jnp.dot(w, t_ref[t],
                                   preferred_element_type=jnp.float32))
    # max over the 4 pool taps, + bias, ReLU  (== pool(relu(conv)); ReLU monotone)
    o_ref[...] = jnp.maximum(z + b_ref[...], 0.0).astype(o_ref.dtype)


def _pool_taps(x_cm, n_pad):
    # x_cm: channel-major activations (C, B, H, W).
    # Returns (4, 9*C, n_pad) bf16: tap t = a*2+c, row (dy*3+dx)*C + ci,
    # column b*Ho*Wo + i*Wo + j (zero-padded up to n_pad lanes).
    C, B, H, W = x_cm.shape
    Ho, Wo = H // 2, W // 2
    N = B * Ho * Wo
    xp = jnp.pad(x_cm, ((0, 0), (0, 0), (1, 1), (1, 1)))
    taps = []
    for a in (0, 1):
        for c in (0, 1):
            slabs = []
            for dy in range(3):
                for dx in range(3):
                    s = xp[:, :, a + dy: a + dy + 2 * Ho: 2,
                              c + dx: c + dx + 2 * Wo: 2]        # (C, B, Ho, Wo)
                    slabs.append(s)
            t = jnp.stack(slabs, axis=0).reshape(9 * C, N)
            taps.append(jnp.pad(t, ((0, 0), (0, n_pad - N))))
    return jnp.stack(taps, axis=0).astype(jnp.bfloat16)


def conv_pool_relu(x_cm, wm, bm, out_dtype):
    # x_cm: (C_in, B, H, W);  wm: (C_out, 9*C_in) bf16;  bm: (C_out, 1) f32
    # returns (C_out, B*(H//2)*(W//2)) channel-major, column order (b, y, x).
    C, B, H, W = x_cm.shape
    Ho, Wo = H // 2, W // 2
    N = B * Ho * Wo
    TN = min(512, _round_up(N, 128))          # lane-dense pixel tile
    n_pad = _round_up(N, TN)
    C_out = wm.shape[0]
    taps = _pool_taps(x_cm, n_pad)            # (4, 9C, n_pad) bf16

    out = pl.pallas_call(
        conv_pool_kernel,
        out_shape=jax.ShapeDtypeStruct((C_out, n_pad), out_dtype),
        grid=(n_pad // TN,),
        in_specs=[
            pl.BlockSpec((4, 9 * C, TN), lambda j: (0, 0, j)),
            pl.BlockSpec((C_out, 9 * C), lambda j: (0, 0)),    # resident weights
            pl.BlockSpec((C_out, 1), lambda j: (0, 0)),        # resident bias
        ],
        out_specs=pl.BlockSpec((C_out, TN), lambda j: (0, j)),
        compiler_params=pltpu.CompilerParams(
            dimension_semantics=("parallel",)),
    )(taps, wm, bm)
    return out[:, :N]


# ----------------------------------------------------------------------------
# Transformer encoder (2 layers) + masked mean over sequence + fc, one kernel,
# batch-group grid marked "parallel".
# ----------------------------------------------------------------------------
def _layernorm(x, g, b):
    mu = jnp.mean(x, axis=-1, keepdims=True)
    xc = x - mu
    var = jnp.mean(xc * xc, axis=-1, keepdims=True)
    return xc * lax.rsqrt(var + LN_EPS) * g + b


def transformer_kernel(x_ref, wqkv_ref, bqkv_ref, wout_ref, bout_ref,
                       g1_ref, be1_ref, w1_ref, b1_ref, w2_ref, b2_ref,
                       g2_ref, be2_ref, pool_ref, fcw_ref, fcb_ref,
                       o_ref, *, bb):
    D, SP = EMBED, SEQ_PAD
    scale = 1.0 / (HEAD_DIM ** 0.5)
    # tokens arrive channel-major (D, bb*SP); one small in-VMEM transpose.
    h = x_ref[0].T                                       # (bb*SP, D) f32
    # mask for the (SP - SEQ) zero-padded key positions of every sample block
    kpos = lax.broadcasted_iota(jnp.int32, (1, SP), 1)
    kmask = jnp.where(kpos < SEQ, 0.0, -1e30).astype(jnp.float32)

    for l in range(NUM_LAYERS):
        # fused QKV projection on all stacked tokens (bf16 MXU, f32 acc)
        qkv = jnp.dot(h.astype(jnp.bfloat16), wqkv_ref[l],
                      preferred_element_type=jnp.float32) + bqkv_ref[l]

        # block-diagonal self-attention: 8-aligned per-sample static blocks
        blocks = []
        for i in range(bb):
            qkv_i = qkv[i * SP:(i + 1) * SP]             # (SP, 3D)
            heads = []
            for hh in range(NHEAD):
                lo = hh * HEAD_DIM
                q = qkv_i[:, lo:lo + HEAD_DIM] * scale
                k = qkv_i[:, D + lo:D + lo + HEAD_DIM]
                v = qkv_i[:, 2 * D + lo:2 * D + lo + HEAD_DIM]
                s = lax.dot_general(q, k, (((1,), (1,)), ((), ())),
                                    preferred_element_type=jnp.float32)
                s = s + kmask
                s = s - jnp.max(s, axis=-1, keepdims=True)
                e = jnp.exp(s)
                p = e * pl.reciprocal(jnp.sum(e, axis=-1, keepdims=True),
                                      approx=True)
                heads.append(jnp.dot(p, v, preferred_element_type=jnp.float32))
            blocks.append(jnp.concatenate(heads, axis=-1))       # (SP, D)
        o = blocks[0] if bb == 1 else jnp.concatenate(blocks, axis=0)
        # single concat-heads out-projection (K=32) instead of 4 K=8 matmuls
        attn = jnp.dot(o.astype(jnp.bfloat16), wout_ref[l],
                       preferred_element_type=jnp.float32) + bout_ref[l]

        # residual + LN1, FFN (bf16 intermediate), residual + LN2
        y = _layernorm(h + attn, g1_ref[l], be1_ref[l])
        h1 = jnp.dot(y.astype(jnp.bfloat16), w1_ref[l],
                     preferred_element_type=jnp.float32).astype(jnp.bfloat16)
        h1 = jnp.maximum(h1 + b1_ref[l], 0)
        ff = jnp.dot(h1, w2_ref[l],
                     preferred_element_type=jnp.float32) + b2_ref[l]
        h = _layernorm(y + ff, g2_ref[l], be2_ref[l])

    # masked mean over the 49 valid tokens of each sample (constant matrix),
    # then the fc head.
    m = jnp.dot(pool_ref[...], h, preferred_element_type=jnp.float32)   # (bb, D)
    o_ref[0] = (jnp.dot(m, fcw_ref[...], preferred_element_type=jnp.float32)
                + fcb_ref[...])                                          # (bb, 10)


def _pick_bb(batch, max_bb=8):
    # Large bb fills MXU rows in the FFN matmuls (v5e/v6e); keep >=2 grid
    # steps when possible so v7x megacore can shard samples across 2 TCs.
    if batch <= 1:
        return max(batch, 1)
    best = 1
    for bb in range(1, min(batch // 2, max_bb) + 1):
        if batch % bb == 0:
            best = bb
    return best


def transformer_head(tok_cm, prep):
    # tok_cm: (D, B, SEQ) channel-major tokens from conv2
    D, B, S = tok_cm.shape
    bb = _pick_bb(B)
    g = B // bb
    SP = SEQ_PAD

    xg = jnp.pad(tok_cm, ((0, 0), (0, 0), (0, SP - S)))      # (D, B, SP)
    xg = xg.reshape(D, g, bb * SP).transpose(1, 0, 2)        # (g, D, bb*SP)

    # constant masked-mean matrix (1/SEQ on valid rows, 0 on padded rows)
    pool = np.zeros((bb, bb * SP), np.float32)
    for i in range(bb):
        pool[i, i * SP:i * SP + SEQ] = 1.0 / SEQ
    pool = jnp.asarray(pool)

    weights = (prep["wqkv"], prep["bqkv"], prep["wout"], prep["bout"],
               prep["ln1_g"], prep["ln1_b"], prep["w1"], prep["b1"],
               prep["w2"], prep["b2"], prep["ln2_g"], prep["ln2_b"],
               pool, prep["fc_w"], prep["fc_b"])

    in_specs = [pl.BlockSpec((1, D, bb * SP), lambda i: (i, 0, 0))]
    # weights: full-array blocks, constant index map -> stay resident in VMEM
    in_specs += [pl.BlockSpec(w.shape, lambda i, n=w.ndim: (0,) * n)
                 for w in weights]

    out = pl.pallas_call(
        functools.partial(transformer_kernel, bb=bb),
        out_shape=jax.ShapeDtypeStruct((g, bb, 10), jnp.float32),
        grid=(g,),
        in_specs=in_specs,
        out_specs=pl.BlockSpec((1, bb, 10), lambda i: (i, 0, 0)),
        compiler_params=pltpu.CompilerParams(
            dimension_semantics=("parallel",)),
    )(xg, *weights)
    return out.reshape(B, 10)


# ----------------------------------------------------------------------------
# Parameters: synthetic init (PyTorch layout) + one-time kernel-ready prep
# ----------------------------------------------------------------------------
def init_params(key):
    keys = iter(jax.random.split(key, 32))

    def nrm(shape, scale=0.05):
        return scale * jax.random.normal(next(keys), shape, dtype=jnp.float32)

    params = {
        "conv1_w": nrm((16, 1, 3, 3)),  "conv1_b": nrm((16,)),
        "conv2_w": nrm((32, 16, 3, 3)), "conv2_b": nrm((32,)),
        "fc_w": nrm((10, EMBED)),       "fc_b": nrm((10,)),
        "layers": [],
    }
    for _ in range(NUM_LAYERS):
        params["layers"].append({
            "in_proj_w": nrm((3 * EMBED, EMBED)),
            "in_proj_b": nrm((3 * EMBED,)),
            "out_proj_w": nrm((EMBED, EMBED)),
            "out_proj_b": nrm((EMBED,)),
            "ln1_g": jnp.ones((EMBED,), jnp.float32),
            "ln1_b": jnp.zeros((EMBED,), jnp.float32),
            "lin1_w": nrm((FFN, EMBED)),
            "lin1_b": nrm((FFN,)),
            "lin2_w": nrm((EMBED, FFN)),
            "lin2_b": nrm((EMBED,)),
            "ln2_g": jnp.ones((EMBED,), jnp.float32),
            "ln2_b": jnp.zeros((EMBED,), jnp.float32),
        })
    return params


def prepare_params(params):
    """One-time weight packing (transposes / reshapes / bf16 casts), off the hot path."""
    layers = params["layers"]

    def stack(fn):
        return jnp.stack([fn(l) for l in layers], axis=0)

    return {
        # conv weights (C_out, 9*C_in) bf16, row order (dy, dx, ci); bias (C_out, 1) f32
        "wm1": params["conv1_w"].transpose(0, 2, 3, 1).reshape(16, 9)
                                 .astype(jnp.bfloat16),
        "bm1": params["conv1_b"].reshape(16, 1),
        "wm2": params["conv2_w"].transpose(0, 2, 3, 1).reshape(32, 16 * 9)
                                 .astype(jnp.bfloat16),
        "bm2": params["conv2_b"].reshape(32, 1),
        # transformer weights, stacked over layers; big matrices in bf16
        "wqkv": stack(lambda l: l["in_proj_w"].T).astype(jnp.bfloat16),   # (L, D, 3D)
        "bqkv": stack(lambda l: l["in_proj_b"].reshape(1, 3 * EMBED)),
        "wout": stack(lambda l: l["out_proj_w"].T).astype(jnp.bfloat16),  # (L, D, D)
        "bout": stack(lambda l: l["out_proj_b"].reshape(1, EMBED)),
        "ln1_g": stack(lambda l: l["ln1_g"].reshape(1, EMBED)),
        "ln1_b": stack(lambda l: l["ln1_b"].reshape(1, EMBED)),
        "w1": stack(lambda l: l["lin1_w"].T).astype(jnp.bfloat16),        # (L, D, FFN)
        "b1": stack(lambda l: l["lin1_b"].reshape(1, FFN)).astype(jnp.bfloat16),
        "w2": stack(lambda l: l["lin2_w"].T).astype(jnp.bfloat16),        # (L, FFN, D)
        "b2": stack(lambda l: l["lin2_b"].reshape(1, EMBED)),
        "ln2_g": stack(lambda l: l["ln2_g"].reshape(1, EMBED)),
        "ln2_b": stack(lambda l: l["ln2_b"].reshape(1, EMBED)),
        "fc_w": params["fc_w"].T,                                          # (D, 10)
        "fc_b": params["fc_b"].reshape(1, 10),
    }


# ----------------------------------------------------------------------------
# Full forward
# ----------------------------------------------------------------------------
def forward(prep, x):
    # x: (B, 1, 28, 28) NCHW
    B = x.shape[0]
    x_cm = x.transpose(1, 0, 2, 3)                                    # (1, B, 28, 28)
    o1 = conv_pool_relu(x_cm, prep["wm1"], prep["bm1"], jnp.bfloat16)  # (16, B*196)
    x2_cm = o1.reshape(16, B, 14, 14)                                 # channel-major, no HBM transpose
    o2 = conv_pool_relu(x2_cm, prep["wm2"], prep["bm2"], jnp.float32)  # (32, B*49)
    # PyTorch: flatten(2).permute(2,0,1) -> (S, B, D); we keep channel-major
    # (D, B, S) and transpose to token-major inside the transformer kernel.
    tok_cm = o2.reshape(32, B, SEQ)
    return transformer_head(tok_cm, prep)                             # (B, 10)


if __name__ == "__main__":
    key = jax.random.PRNGKey(0)
    pkey, xkey = jax.random.split(key)
    params = init_params(pkey)
    prep = prepare_params(params)          # one-time weight packing, outside jit
    x = jax.random.normal(xkey, (2, 1, 28, 28), dtype=jnp.float32)
    out = jax.block_until_ready(jax.jit(forward)(prep, x))
    assert out.shape == (2, 10) and out.dtype == jnp.float32
    assert bool(jnp.all(jnp.isfinite(out)))
    print("KERNEL_OK")
</pallas_src>

<mosaic_0001>
module attributes {stable_mosaic.version = 11 : i64} {
  func.func @conv_pool_kernel(%arg0: i32, %arg1: memref<4x9x512xbf16, #tpu.memory_space<vmem>>, %arg2: memref<16x9xbf16, #tpu.memory_space<vmem>>, %arg3: memref<16x1xf32, #tpu.memory_space<vmem>>, %arg4: memref<16x512xbf16, #tpu.memory_space<vmem>>) attributes {dimension_semantics = [#tpu.dimension_semantics<parallel>], iteration_bounds = array<i64: 1>, scalar_prefetch = 0 : i64, scratch_operands = 0 : i64, tpu.core_type = #tpu.core_type<tc>, window_params = [{transform_indices = @transform_0, window_bounds = array<i64: 4, 9, 512>}, {pipeline_mode = #tpu.pipeline_mode<synchronous>, transform_indices = @transform_1, window_bounds = array<i64: 16, 9>}, {pipeline_mode = #tpu.pipeline_mode<synchronous>, transform_indices = @transform_2, window_bounds = array<i64: 16, 1>}, {transform_indices = @transform_3, window_bounds = array<i64: 16, 512>}]} {
    %c0 = arith.constant 0 : index
    %c0_0 = arith.constant 0 : index
    %0 = vector.load %arg2[%c0, %c0_0] : memref<16x9xbf16, #tpu.memory_space<vmem>>, vector<16x9xbf16>
    %c0_1 = arith.constant 0 : index
    %c0_2 = arith.constant 0 : index
    %c0_3 = arith.constant 0 : index
    %1 = vector.load %arg1[%c0_1, %c0_2, %c0_3] : memref<4x9x512xbf16, #tpu.memory_space<vmem>>, vector<1x9x512xbf16>
    %2 = vector.shape_cast %1 : vector<1x9x512xbf16> to vector<9x512xbf16>
    %cst = arith.constant dense<0.000000e+00> : vector<16x512xf32>
    %3 = tpu.matmul %0, %2, %cst {dimension_numbers = #tpu.dot_dimension_numbers<[1], [0], [0], [1], [0, 0, 1, 1], [], []>} : vector<16x9xbf16>, vector<9x512xbf16>, vector<16x512xf32> -> vector<16x512xf32>
    %c1 = arith.constant 1 : index
    %c0_4 = arith.constant 0 : index
    %c0_5 = arith.constant 0 : index
    %4 = vector.load %arg1[%c1, %c0_4, %c0_5] : memref<4x9x512xbf16, #tpu.memory_space<vmem>>, vector<1x9x512xbf16>
    %5 = vector.shape_cast %4 : vector<1x9x512xbf16> to vector<9x512xbf16>
    %cst_6 = arith.constant dense<0.000000e+00> : vector<16x512xf32>
    %6 = tpu.matmul %0, %5, %cst_6 {dimension_numbers = #tpu.dot_dimension_numbers<[1], [0], [0], [1], [0, 0, 1, 1], [], []>} : vector<16x9xbf16>, vector<9x512xbf16>, vector<16x512xf32> -> vector<16x512xf32>
    %7 = arith.maximumf %3, %6 : vector<16x512xf32>
    %c2 = arith.constant 2 : index
    %c0_7 = arith.constant 0 : index
    %c0_8 = arith.constant 0 : index
    %8 = vector.load %arg1[%c2, %c0_7, %c0_8] : memref<4x9x512xbf16, #tpu.memory_space<vmem>>, vector<1x9x512xbf16>
    %9 = vector.shape_cast %8 : vector<1x9x512xbf16> to vector<9x512xbf16>
    %cst_9 = arith.constant dense<0.000000e+00> : vector<16x512xf32>
    %10 = tpu.matmul %0, %9, %cst_9 {dimension_numbers = #tpu.dot_dimension_numbers<[1], [0], [0], [1], [0, 0, 1, 1], [], []>} : vector<16x9xbf16>, vector<9x512xbf16>, vector<16x512xf32> -> vector<16x512xf32>
    %11 = arith.maximumf %7, %10 : vector<16x512xf32>
    %c3 = arith.constant 3 : index
    %c0_10 = arith.constant 0 : index
    %c0_11 = arith.constant 0 : index
    %12 = vector.load %arg1[%c3, %c0_10, %c0_11] : memref<4x9x512xbf16, #tpu.memory_space<vmem>>, vector<1x9x512xbf16>
    %13 = vector.shape_cast %12 : vector<1x9x512xbf16> to vector<9x512xbf16>
    %cst_12 = arith.constant dense<0.000000e+00> : vector<16x512xf32>
    %14 = tpu.matmul %0, %13, %cst_12 {dimension_numbers = #tpu.dot_dimension_numbers<[1], [0], [0], [1], [0, 0, 1, 1], [], []>} : vector<16x9xbf16>, vector<9x512xbf16>, vector<16x512xf32> -> vector<16x512xf32>
    %15 = arith.maximumf %11, %14 : vector<16x512xf32>
    %c0_13 = arith.constant 0 : index
    %c0_14 = arith.constant 0 : index
    %16 = vector.load %arg3[%c0_13, %c0_14] : memref<16x1xf32, #tpu.memory_space<vmem>>, vector<16x1xf32>
    %17 = vector.broadcast %16 : vector<16x1xf32> to vector<16x512xf32>
    %18 = arith.addf %15, %17 : vector<16x512xf32>
    %cst_15 = arith.constant 0.000000e+00 : f32
    %19 = vector.broadcast %cst_15 : f32 to vector<16x512xf32>
    %20 = arith.maximumf %18, %19 : vector<16x512xf32>
    %21 = arith.truncf %20 : vector<16x512xf32> to vector<16x512xbf16>
    %c0_16 = arith.constant 0 : index
    %c0_17 = arith.constant 0 : index
    %22 = vector.load %arg4[%c0_16, %c0_17] : memref<16x512xbf16, #tpu.memory_space<vmem>>, vector<16x512xbf16>
    tpu.vector_store %arg4[%c0_16, %c0_17], %21 {strides = array<i32>} : memref<16x512xbf16, #tpu.memory_space<vmem>>, vector<16x512xbf16>,
    return
  }
  func.func @transform_0(%arg0: i32) -> (i32, i32, i32) {
    %c0_i32 = arith.constant 0 : i32
    %c0_i32_0 = arith.constant 0 : i32
    %c0_i32_1 = arith.constant 0 : i32
    return %c0_i32, %c0_i32_0, %arg0 : i32, i32, i32
  }
  func.func @transform_1(%arg0: i32) -> (i32, i32) {
    %c0_i32 = arith.constant 0 : i32
    %c0_i32_0 = arith.constant 0 : i32
    %c0_i32_1 = arith.constant 0 : i32
    return %c0_i32, %c0_i32_0 : i32, i32
  }
  func.func @transform_2(%arg0: i32) -> (i32, i32) {
    %c0_i32 = arith.constant 0 : i32
    %c0_i32_0 = arith.constant 0 : i32
    %c0_i32_1 = arith.constant 0 : i32
    return %c0_i32, %c0_i32_0 : i32, i32
  }
  func.func @transform_3(%arg0: i32) -> (i32, i32) {
    %c0_i32 = arith.constant 0 : i32
    %c0_i32_0 = arith.constant 0 : i32
    return %c0_i32, %arg0 : i32, i32
  }
}

module attributes {stable_mosaic.version = 11 : i64} {
  func.func @conv_pool_kernel(%arg0: i32, %arg1: memref<4x144x128xbf16, #tpu.memory_space<vmem>>, %arg2: memref<32x144xbf16, #tpu.memory_space<vmem>>, %arg3: memref<32x1xf32, #tpu.memory_space<vmem>>, %arg4: memref<32x128xf32, #tpu.memory_space<vmem>>) attributes {dimension_semantics = [#tpu.dimension_semantics<parallel>], iteration_bounds = array<i64: 1>, scalar_prefetch = 0 : i64, scratch_operands = 0 : i64, tpu.core_type = #tpu.core_type<tc>, window_params = [{transform_indices = @transform_0, window_bounds = array<i64: 4, 144, 128>}, {pipeline_mode = #tpu.pipeline_mode<synchronous>, transform_indices = @transform_1, window_bounds = array<i64: 32, 144>}, {pipeline_mode = #tpu.pipeline_mode<synchronous>, transform_indices = @transform_2, window_bounds = array<i64: 32, 1>}, {transform_indices = @transform_3, window_bounds = array<i64: 32, 128>}]} {
    %c0 = arith.constant 0 : index
    %c0_0 = arith.constant 0 : index
    %0 = vector.load %arg2[%c0, %c0_0] : memref<32x144xbf16, #tpu.memory_space<vmem>>, vector<32x144xbf16>
    %c0_1 = arith.constant 0 : index
    %c0_2 = arith.constant 0 : index
    %c0_3 = arith.constant 0 : index
    %1 = vector.load %arg1[%c0_1, %c0_2, %c0_3] : memref<4x144x128xbf16, #tpu.memory_space<vmem>>, vector<1x144x128xbf16>
    %2 = vector.shape_cast %1 : vector<1x144x128xbf16> to vector<144x128xbf16>
    %cst = arith.constant dense<0.000000e+00> : vector<32x128xf32>
    %3 = tpu.matmul %0, %2, %cst {dimension_numbers = #tpu.dot_dimension_numbers<[1], [0], [0], [1], [0, 0, 1, 1], [], []>} : vector<32x144xbf16>, vector<144x128xbf16>, vector<32x128xf32> -> vector<32x128xf32>
    %c1 = arith.constant 1 : index
    %c0_4 = arith.constant 0 : index
    %c0_5 = arith.constant 0 : index
    %4 = vector.load %arg1[%c1, %c0_4, %c0_5] : memref<4x144x128xbf16, #tpu.memory_space<vmem>>, vector<1x144x128xbf16>
    %5 = vector.shape_cast %4 : vector<1x144x128xbf16> to vector<144x128xbf16>
    %cst_6 = arith.constant dense<0.000000e+00> : vector<32x128xf32>
    %6 = tpu.matmul %0, %5, %cst_6 {dimension_numbers = #tpu.dot_dimension_numbers<[1], [0], [0], [1], [0, 0, 1, 1], [], []>} : vector<32x144xbf16>, vector<144x128xbf16>, vector<32x128xf32> -> vector<32x128xf32>
    %7 = arith.maximumf %3, %6 : vector<32x128xf32>
    %c2 = arith.constant 2 : index
    %c0_7 = arith.constant 0 : index
    %c0_8 = arith.constant 0 : index
    %8 = vector.load %arg1[%c2, %c0_7, %c0_8] : memref<4x144x128xbf16, #tpu.memory_space<vmem>>, vector<1x144x128xbf16>
    %9 = vector.shape_cast %8 : vector<1x144x128xbf16> to vector<144x128xbf16>
    %cst_9 = arith.constant dense<0.000000e+00> : vector<32x128xf32>
    %10 = tpu.matmul %0, %9, %cst_9 {dimension_numbers = #tpu.dot_dimension_numbers<[1], [0], [0], [1], [0, 0, 1, 1], [], []>} : vector<32x144xbf16>, vector<144x128xbf16>, vector<32x128xf32> -> vector<32x128xf32>
    %11 = arith.maximumf %7, %10 : vector<32x128xf32>
    %c3 = arith.constant 3 : index
    %c0_10 = arith.constant 0 : index
    %c0_11 = arith.constant 0 : index
    %12 = vector.load %arg1[%c3, %c0_10, %c0_11] : memref<4x144x128xbf16, #tpu.memory_space<vmem>>, vector<1x144x128xbf16>
    %13 = vector.shape_cast %12 : vector<1x144x128xbf16> to vector<144x128xbf16>
    %cst_12 = arith.constant dense<0.000000e+00> : vector<32x128xf32>
    %14 = tpu.matmul %0, %13, %cst_12 {dimension_numbers = #tpu.dot_dimension_numbers<[1], [0], [0], [1], [0, 0, 1, 1], [], []>} : vector<32x144xbf16>, vector<144x128xbf16>, vector<32x128xf32> -> vector<32x128xf32>
    %15 = arith.maximumf %11, %14 : vector<32x128xf32>
    %c0_13 = arith.constant 0 : index
    %c0_14 = arith.constant 0 : index
    %16 = vector.load %arg3[%c0_13, %c0_14] : memref<32x1xf32, #tpu.memory_space<vmem>>, vector<32x1xf32>
    %17 = vector.broadcast %16 : vector<32x1xf32> to vector<32x128xf32>
    %18 = arith.addf %15, %17 : vector<32x128xf32>
    %cst_15 = arith.constant 0.000000e+00 : f32
    %19 = vector.broadcast %cst_15 : f32 to vector<32x128xf32>
    %20 = arith.maximumf %18, %19 : vector<32x128xf32>
    %c0_16 = arith.constant 0 : index
    %c0_17 = arith.constant 0 : index
    %21 = vector.load %arg4[%c0_16, %c0_17] : memref<32x128xf32, #tpu.memory_space<vmem>>, vector<32x128xf32>
    tpu.vector_store %arg4[%c0_16, %c0_17], %20 {strides = array<i32>} : memref<32x128xf32, #tpu.memory_space<vmem>>, vector<32x128xf32>,
    return
  }
  func.func @transform_0(%arg0: i32) -> (i32, i32, i32) {
    %c0_i32 = arith.constant 0 : i32
    %c0_i32_0 = arith.constant 0 : i32
    %c0_i32_1 = arith.constant 0 : i32
    return %c0_i32, %c0_i32_0, %arg0 : i32, i32, i32
  }
  func.func @transform_1(%arg0: i32) -> (i32, i32) {
    %c0_i32 = arith.constant 0 : i32
    %c0_i32_0 = arith.constant 0 : i32
    %c0_i32_1 = arith.constant 0 : i32
    return %c0_i32, %c0_i32_0 : i32, i32
  }
  func.func @transform_2(%arg0: i32) -> (i32, i32) {
    %c0_i32 = arith.constant 0 : i32
    %c0_i32_0 = arith.constant 0 : i32
    %c0_i32_1 = arith.constant 0 : i32
    return %c0_i32, %c0_i32_0 : i32, i32
  }
  func.func @transform_3(%arg0: i32) -> (i32, i32) {
    %c0_i32 = arith.constant 0 : i32
    %c0_i32_0 = arith.constant 0 : i32
    return %c0_i32, %arg0 : i32, i32
  }
}

module attributes {stable_mosaic.version = 11 : i64} {
  func.func @transformer_kernel(%arg0: i32, %arg1: memref<1x32x56xf32, #tpu.memory_space<vmem>>, %arg2: memref<2x32x96xbf16, #tpu.memory_space<vmem>>, %arg3: memref<2x1x96xf32, #tpu.memory_space<vmem>>, %arg4: memref<2x32x32xbf16, #tpu.memory_space<vmem>>, %arg5: memref<2x1x32xf32, #tpu.memory_space<vmem>>, %arg6: memref<2x1x32xf32, #tpu.memory_space<vmem>>, %arg7: memref<2x1x32xf32, #tpu.memory_space<vmem>>, %arg8: memref<2x32x2048xbf16, #tpu.memory_space<vmem>>, %arg9: memref<2x1x2048xbf16, #tpu.memory_space<vmem>>, %arg10: memref<2x2048x32xbf16, #tpu.memory_space<vmem>>, %arg11: memref<2x1x32xf32, #tpu.memory_space<vmem>>, %arg12: memref<2x1x32xf32, #tpu.memory_space<vmem>>, %arg13: memref<2x1x32xf32, #tpu.memory_space<vmem>>, %arg14: memref<1x56xf32, #tpu.memory_space<vmem>>, %arg15: memref<32x10xf32, #tpu.memory_space<vmem>>, %arg16: memref<1x10xf32, #tpu.memory_space<vmem>>, %arg17: memref<1x1x10xf32, #tpu.memory_space<vmem>>) attributes {dimension_semantics = [#tpu.dimension_semantics<parallel>], iteration_bounds = array<i64: 2>, scalar_prefetch = 0 : i64, scratch_operands = 0 : i64, tpu.core_type = #tpu.core_type<tc>, window_params = [{transform_indices = @transform_0, window_bounds = array<i64: 1, 32, 56>}, {pipeline_mode = #tpu.pipeline_mode<synchronous>, transform_indices = @transform_1, window_bounds = array<i64: 2, 32, 96>}, {pipeline_mode = #tpu.pipeline_mode<synchronous>, transform_indices = @transform_2, window_bounds = array<i64: 2, 1, 96>}, {pipeline_mode = #tpu.pipeline_mode<synchronous>, transform_indices = @transform_3, window_bounds = array<i64: 2, 32, 32>}, {pipeline_mode = #tpu.pipeline_mode<synchronous>, transform_indices = @transform_4, window_bounds = array<i64: 2, 1, 32>}, {pipeline_mode = #tpu.pipeline_mode<synchronous>, transform_indices = @transform_5, window_bounds = array<i64: 2, 1, 32>}, {pipeline_mode = #tpu.pipeline_mode<synchronous>, transform_indices = @transform_6, window_bounds = array<i64: 2, 1, 32>}, {pipeline_mode = #tpu.pipeline_mode<synchronous>, transform_indices = @transform_7, window_bounds = array<i64: 2, 32, 2048>}, {pipeline_mode = #tpu.pipeline_mode<synchronous>, transform_indices = @transform_8, window_bounds = array<i64: 2, 1, 2048>}, {pipeline_mode = #tpu.pipeline_mode<synchronous>, transform_indices = @transform_9, window_bounds = array<i64: 2, 2048, 32>}, {pipeline_mode = #tpu.pipeline_mode<synchronous>, transform_indices = @transform_10, window_bounds = array<i64: 2, 1, 32>}, {pipeline_mode = #tpu.pipeline_mode<synchronous>, transform_indices = @transform_11, window_bounds = array<i64: 2, 1, 32>}, {pipeline_mode = #tpu.pipeline_mode<synchronous>, transform_indices = @transform_12, window_bounds = array<i64: 2, 1, 32>}, {pipeline_mode = #tpu.pipeline_mode<synchronous>, transform_indices = @transform_13, window_bounds = array<i64: 1, 56>}, {pipeline_mode = #tpu.pipeline_mode<synchronous>, transform_indices = @transform_14, window_bounds = array<i64: 32, 10>}, {pipeline_mode = #tpu.pipeline_mode<synchronous>, transform_indices = @transform_15, window_bounds = array<i64: 1, 10>}, {transform_indices = @transform_16, window_bounds = array<i64: 1, 1, 10>}]} {
    %c0 = arith.constant 0 : index
    %c0_0 = arith.constant 0 : index
    %c0_1 = arith.constant 0 : index
    %0 = vector.load %arg1[%c0, %c0_0, %c0_1] : memref<1x32x56xf32, #tpu.memory_space<vmem>>, vector<1x32x56xf32>
    %1 = vector.shape_cast %0 : vector<1x32x56xf32> to vector<32x56xf32>
    %2 = tpu.transpose %1, [1, 0] : vector<32x56xf32> -> vector<56x32xf32>
    %3 = tpu.iota {dimensions = array<i32: 1>} : vector<1x56xi32>
    %c49_i32 = arith.constant 49 : i32
    %4 = vector.broadcast %c49_i32 : i32 to vector<1x56xi32>
    %5 = arith.cmpi slt, %3, %4 : vector<1x56xi32>
    %cst = arith.constant 0.000000e+00 : f32
    %cst_2 = arith.constant -1.000000e+30 : f32
    %6 = vector.broadcast %cst : f32 to vector<1x56xf32>
    %7 = vector.broadcast %cst_2 : f32 to vector<1x56xf32>
    %8 = arith.select %5, %6, %7 : vector<1x56xi1>, vector<1x56xf32>
    %9 = arith.truncf %2 : vector<56x32xf32> to vector<56x32xbf16>
    %c0_3 = arith.constant 0 : index
    %c0_4 = arith.constant 0 : index
    %c0_5 = arith.constant 0 : index
    %10 = vector.load %arg2[%c0_3, %c0_4, %c0_5] : memref<2x32x96xbf16, #tpu.memory_space<vmem>>, vector<1x32x96xbf16>
    %11 = vector.shape_cast %10 : vector<1x32x96xbf16> to vector<32x96xbf16>
    %cst_6 = arith.constant dense<0.000000e+00> : vector<56x96xf32>
    %12 = tpu.matmul %9, %11, %cst_6 {dimension_numbers = #tpu.dot_dimension_numbers<[1], [0], [0], [1], [0, 0, 1, 1], [], []>} : vector<56x32xbf16>, vector<32x96xbf16>, vector<56x96xf32> -> vector<56x96xf32>
    %c0_7 = arith.constant 0 : index
    %c0_8 = arith.constant 0 : index
    %c0_9 = arith.constant 0 : index
    %13 = vector.load %arg3[%c0_7, %c0_8, %c0_9] : memref<2x1x96xf32, #tpu.memory_space<vmem>>, vector<1x1x96xf32>
    %14 = vector.shape_cast %13 : vector<1x1x96xf32> to vector<1x96xf32>
    %15 = vector.broadcast %14 : vector<1x96xf32> to vector<56x96xf32>
    %16 = arith.addf %12, %15 : vector<56x96xf32>
    %17 = vector.extract_strided_slice %16 {offsets = [0, 0], sizes = [56, 8], strides = [1, 1]} : vector<56x96xf32> to vector<56x8xf32>
    %cst_10 = arith.constant 0.353553385 : f32
    %18 = vector.broadcast %cst_10 : f32 to vector<56x8xf32>
    %19 = arith.mulf %17, %18 : vector<56x8xf32>
    %20 = vector.extract_strided_slice %16 {offsets = [0, 32], sizes = [56, 8], strides = [1, 1]} : vector<56x96xf32> to vector<56x8xf32>
    %21 = vector.extract_strided_slice %16 {offsets = [0, 64], sizes = [56, 8], strides = [1, 1]} : vector<56x96xf32> to vector<56x8xf32>
    %cst_11 = arith.constant dense<0.000000e+00> : vector<56x56xf32>
    %22 = tpu.matmul %19, %20, %cst_11 {dimension_numbers = #tpu.dot_dimension_numbers<[1], [1], [0], [0], [0, 0, 1, 0], [], []>} : vector<56x8xf32>, vector<56x8xf32>, vector<56x56xf32> -> vector<56x56xf32>
    %23 = vector.broadcast %8 : vector<1x56xf32> to vector<56x56xf32>
    %24 = arith.addf %22, %23 : vector<56x56xf32>
    %cst_12 = arith.constant dense<0xFF800000> : vector<56xf32>
    %25 = vector.multi_reduction <maximumf>, %24, %cst_12 [1] : vector<56x56xf32> to vector<56xf32>
    %26 = vector.shape_cast %25 : vector<56xf32> to vector<56x1xf32>
    %27 = vector.broadcast %26 : vector<56x1xf32> to vector<56x56xf32>
    %28 = arith.subf %24, %27 : vector<56x56xf32>
    %29 = math.exp %28 : vector<56x56xf32>
    %cst_13 = arith.constant dense<0.000000e+00> : vector<56xf32>
    %30 = vector.multi_reduction <add>, %29, %cst_13 [1] : vector<56x56xf32> to vector<56xf32>
    %31 = vector.shape_cast %30 : vector<56xf32> to vector<56x1xf32>
    %32 = tpu.reciprocal %31 {approx = true} : vector<56x1xf32> -> vector<56x1xf32>
    %33 = vector.broadcast %32 : vector<56x1xf32> to vector<56x56xf32>
    %34 = arith.mulf %29, %33 : vector<56x56xf32>
    %cst_14 = arith.constant dense<0.000000e+00> : vector<56x8xf32>
    %35 = tpu.matmul %34, %21, %cst_14 {dimension_numbers = #tpu.dot_dimension_numbers<[1], [0], [0], [1], [0, 0, 1, 1], [], []>} : vector<56x56xf32>, vector<56x8xf32>, vector<56x8xf32> -> vector<56x8xf32>
    %36 = vector.extract_strided_slice %16 {offsets = [0, 8], sizes = [56, 8], strides = [1, 1]} : vector<56x96xf32> to vector<56x8xf32>
    %cst_15 = arith.constant 0.353553385 : f32
    %37 = vector.broadcast %cst_15 : f32 to vector<56x8xf32>
    %38 = arith.mulf %36, %37 : vector<56x8xf32>
    %39 = vector.extract_strided_slice %16 {offsets = [0, 40], sizes = [56, 8], strides = [1, 1]} : vector<56x96xf32> to vector<56x8xf32>
    %40 = vector.extract_strided_slice %16 {offsets = [0, 72], sizes = [56, 8], strides = [1, 1]} : vector<56x96xf32> to vector<56x8xf32>
    %cst_16 = arith.constant dense<0.000000e+00> : vector<56x56xf32>
    %41 = tpu.matmul %38, %39, %cst_16 {dimension_numbers = #tpu.dot_dimension_numbers<[1], [1], [0], [0], [0, 0, 1, 0], [], []>} : vector<56x8xf32>, vector<56x8xf32>, vector<56x56xf32> -> vector<56x56xf32>
    %42 = vector.broadcast %8 : vector<1x56xf32> to vector<56x56xf32>
    %43 = arith.addf %41, %42 : vector<56x56xf32>
    %cst_17 = arith.constant dense<0xFF800000> : vector<56xf32>
    %44 = vector.multi_reduction <maximumf>, %43, %cst_17 [1] : vector<56x56xf32> to vector<56xf32>
    %45 = vector.shape_cast %44 : vector<56xf32> to vector<56x1xf32>
    %46 = vector.broadcast %45 : vector<56x1xf32> to vector<56x56xf32>
    %47 = arith.subf %43, %46 : vector<56x56xf32>
    %48 = math.exp %47 : vector<56x56xf32>
    %cst_18 = arith.constant dense<0.000000e+00> : vector<56xf32>
    %49 = vector.multi_reduction <add>, %48, %cst_18 [1] : vector<56x56xf32> to vector<56xf32>
    %50 = vector.shape_cast %49 : vector<56xf32> to vector<56x1xf32>
    %51 = tpu.reciprocal %50 {approx = true} : vector<56x1xf32> -> vector<56x1xf32>
    %52 = vector.broadcast %51 : vector<56x1xf32> to vector<56x56xf32>
    %53 = arith.mulf %48, %52 : vector<56x56xf32>
    %cst_19 = arith.constant dense<0.000000e+00> : vector<56x8xf32>
    %54 = tpu.matmul %53, %40, %cst_19 {dimension_numbers = #tpu.dot_dimension_numbers<[1], [0], [0], [1], [0, 0, 1, 1], [], []>} : vector<56x56xf32>, vector<56x8xf32>, vector<56x8xf32> -> vector<56x8xf32>
    %55 = vector.extract_strided_slice %16 {offsets = [0, 16], sizes = [56, 8], strides = [1, 1]} : vector<56x96xf32> to vector<56x8xf32>
    %cst_20 = arith.constant 0.353553385 : f32
    %56 = vector.broadcast %cst_20 : f32 to vector<56x8xf32>
    %57 = arith.mulf %55, %56 : vector<56x8xf32>
    %58 = vector.extract_strided_slice %16 {offsets = [0, 48], sizes = [56, 8], strides = [1, 1]} : vector<56x96xf32> to vector<56x8xf32>
    %59 = vector.extract_strided_slice %16 {offsets = [0, 80], sizes = [56, 8], strides = [1, 1]} : vector<56x96xf32> to vector<56x8xf32>
    %cst_21 = arith.constant dense<0.000000e+00> : vector<56x56xf32>
    %60 = tpu.matmul %57, %58, %cst_21 {dimension_numbers = #tpu.dot_dimension_numbers<[1], [1], [0], [0], [0, 0, 1, 0], [], []>} : vector<56x8xf32>, vector<56x8xf32>, vector<56x56xf32> -> vector<56x56xf32>
    %61 = vector.broadcast %8 : vector<1x56xf32> to vector<56x56xf32>
    %62 = arith.addf %60, %61 : vector<56x56xf32>
    %cst_22 = arith.constant dense<0xFF800000> : vector<56xf32>
    %63 = vector.multi_reduction <maximumf>, %62, %cst_22 [1] : vector<56x56xf32> to vector<56xf32>
    %64 = vector.shape_cast %63 : vector<56xf32> to vector<56x1xf32>
    %65 = vector.broadcast %64 : vector<56x1xf32> to vector<56x56xf32>
    %66 = arith.subf %62, %65 : vector<56x56xf32>
    %67 = math.exp %66 : vector<56x56xf32>
    %cst_23 = arith.constant dense<0.000000e+00> : vector<56xf32>
    %68 = vector.multi_reduction <add>, %67, %cst_23 [1] : vector<56x56xf32> to vector<56xf32>
    %69 = vector.shape_cast %68 : vector<56xf32> to vector<56x1xf32>
    %70 = tpu.reciprocal %69 {approx = true} : vector<56x1xf32> -> vector<56x1xf32>
    %71 = vector.broadcast %70 : vector<56x1xf32> to vector<56x56xf32>
    %72 = arith.mulf %67, %71 : vector<56x56xf32>
    %cst_24 = arith.constant dense<0.000000e+00> : vector<56x8xf32>
    %73 = tpu.matmul %72, %59, %cst_24 {dimension_numbers = #tpu.dot_dimension_numbers<[1], [0], [0], [1], [0, 0, 1, 1], [], []>} : vector<56x56xf32>, vector<56x8xf32>, vector<56x8xf32> -> vector<56x8xf32>
    %74 = vector.extract_strided_slice %16 {offsets = [0, 24], sizes = [56, 8], strides = [1, 1]} : vector<56x96xf32> to vector<56x8xf32>
    %cst_25 = arith.constant 0.353553385 : f32
    %75 = vector.broadcast %cst_25 : f32 to vector<56x8xf32>
    %76 = arith.mulf %74, %75 : vector<56x8xf32>
    %77 = vector.extract_strided_slice %16 {offsets = [0, 56], sizes = [56, 8], strides = [1, 1]} : vector<56x96xf32> to vector<56x8xf32>
    %78 = vector.extract_strided_slice %16 {offsets = [0, 88], sizes = [56, 8], strides = [1, 1]} : vector<56x96xf32> to vector<56x8xf32>
    %cst_26 = arith.constant dense<0.000000e+00> : vector<56x56xf32>
    %79 = tpu.matmul %76, %77, %cst_26 {dimension_numbers = #tpu.dot_dimension_numbers<[1], [1], [0], [0], [0, 0, 1, 0], [], []>} : vector<56x8xf32>, vector<56x8xf32>, vector<56x56xf32> -> vector<56x56xf32>
    %80 = vector.broadcast %8 : vector<1x56xf32> to vector<56x56xf32>
    %81 = arith.addf %79, %80 : vector<56x56xf32>
    %cst_27 = arith.constant dense<0xFF800000> : vector<56xf32>
    %82 = vector.multi_reduction <maximumf>, %81, %cst_27 [1] : vector<56x56xf32> to vector<56xf32>
    %83 = vector.shape_cast %82 : vector<56xf32> to vector<56x1xf32>
    %84 = vector.broadcast %83 : vector<56x1xf32> to vector<56x56xf32>
    %85 = arith.subf %81, %84 : vector<56x56xf32>
    %86 = math.exp %85 : vector<56x56xf32>
    %cst_28 = arith.constant dense<0.000000e+00> : vector<56xf32>
    %87 = vector.multi_reduction <add>, %86, %cst_28 [1] : vector<56x56xf32> to vector<56xf32>
    %88 = vector.shape_cast %87 : vector<56xf32> to vector<56x1xf32>
    %89 = tpu.reciprocal %88 {approx = true} : vector<56x1xf32> -> vector<56x1xf32>
    %90 = vector.broadcast %89 : vector<56x1xf32> to vector<56x56xf32>
    %91 = arith.mulf %86, %90 : vector<56x56xf32>
    %cst_29 = arith.constant dense<0.000000e+00> : vector<56x8xf32>
    %92 = tpu.matmul %91, %78, %cst_29 {dimension_numbers = #tpu.dot_dimension_numbers<[1], [0], [0], [1], [0, 0, 1, 1], [], []>} : vector<56x56xf32>, vector<56x8xf32>, vector<56x8xf32> -> vector<56x8xf32>
    %93 = tpu.concatenate %35, %54, %73, %92 in 1 : vector<56x8xf32>, vector<56x8xf32>, vector<56x8xf32>, vector<56x8xf32> -> vector<56x32xf32>
    %94 = arith.truncf %93 : vector<56x32xf32> to vector<56x32xbf16>
    %c0_30 = arith.constant 0 : index
    %c0_31 = arith.constant 0 : index
    %c0_32 = arith.constant 0 : index
    %95 = vector.load %arg4[%c0_30, %c0_31, %c0_32] : memref<2x32x32xbf16, #tpu.memory_space<vmem>>, vector<1x32x32xbf16>
    %96 = vector.shape_cast %95 : vector<1x32x32xbf16> to vector<32x32xbf16>
    %cst_33 = arith.constant dense<0.000000e+00> : vector<56x32xf32>
    %97 = tpu.matmul %94, %96, %cst_33 {dimension_numbers = #tpu.dot_dimension_numbers<[1], [0], [0], [1], [0, 0, 1, 1], [], []>} : vector<56x32xbf16>, vector<32x32xbf16>, vector<56x32xf32> -> vector<56x32xf32>
    %c0_34 = arith.constant 0 : index
    %c0_35 = arith.constant 0 : index
    %c0_36 = arith.constant 0 : index
    %98 = vector.load %arg5[%c0_34, %c0_35, %c0_36] : memref<2x1x32xf32, #tpu.memory_space<vmem>>, vector<1x1x32xf32>
    %99 = vector.shape_cast %98 : vector<1x1x32xf32> to vector<1x32xf32>
    %100 = vector.broadcast %99 : vector<1x32xf32> to vector<56x32xf32>
    %101 = arith.addf %97, %100 : vector<56x32xf32>
    %102 = arith.addf %2, %101 : vector<56x32xf32>
    %c0_37 = arith.constant 0 : index
    %c0_38 = arith.constant 0 : index
    %c0_39 = arith.constant 0 : index
    %103 = vector.load %arg6[%c0_37, %c0_38, %c0_39] : memref<2x1x32xf32, #tpu.memory_space<vmem>>, vector<1x1x32xf32>
    %104 = vector.shape_cast %103 : vector<1x1x32xf32> to vector<1x32xf32>
    %c0_40 = arith.constant 0 : index
    %c0_41 = arith.constant 0 : index
    %c0_42 = arith.constant 0 : index
    %105 = vector.load %arg7[%c0_40, %c0_41, %c0_42] : memref<2x1x32xf32, #tpu.memory_space<vmem>>, vector<1x1x32xf32>
    %106 = vector.shape_cast %105 : vector<1x1x32xf32> to vector<1x32xf32>
    %cst_43 = arith.constant dense<0.000000e+00> : vector<56xf32>
    %107 = vector.multi_reduction <add>, %102, %cst_43 [1] : vector<56x32xf32> to vector<56xf32>
    %108 = vector.shape_cast %107 : vector<56xf32> to vector<56x1xf32>
    %cst_44 = arith.constant 3.200000e+01 : f32
    %109 = vector.broadcast %cst_44 : f32 to vector<56x1xf32>
    %110 = arith.divf %108, %109 : vector<56x1xf32>
    %111 = vector.broadcast %110 : vector<56x1xf32> to vector<56x32xf32>
    %112 = arith.subf %102, %111 : vector<56x32xf32>
    %113 = arith.mulf %112, %112 : vector<56x32xf32>
    %cst_45 = arith.constant dense<0.000000e+00> : vector<56xf32>
    %114 = vector.multi_reduction <add>, %113, %cst_45 [1] : vector<56x32xf32> to vector<56xf32>
    %115 = vector.shape_cast %114 : vector<56xf32> to vector<56x1xf32>
    %cst_46 = arith.constant 3.200000e+01 : f32
    %116 = vector.broadcast %cst_46 : f32 to vector<56x1xf32>
    %117 = arith.divf %115, %116 : vector<56x1xf32>
    %cst_47 = arith.constant 9.99999974E-6 : f32
    %118 = vector.broadcast %cst_47 : f32 to vector<56x1xf32>
    %119 = arith.addf %117, %118 : vector<56x1xf32>
    %120 = math.rsqrt %119 : vector<56x1xf32>
    %121 = vector.broadcast %120 : vector<56x1xf32> to vector<56x32xf32>
    %122 = arith.mulf %112, %121 : vector<56x32xf32>
    %123 = vector.broadcast %104 : vector<1x32xf32> to vector<56x32xf32>
    %124 = arith.mulf %122, %123 : vector<56x32xf32>
    %125 = vector.broadcast %106 : vector<1x32xf32> to vector<56x32xf32>
    %126 = arith.addf %124, %125 : vector<56x32xf32>
    %127 = arith.truncf %126 : vector<56x32xf32> to vector<56x32xbf16>
    %c0_48 = arith.constant 0 : index
    %c0_49 = arith.constant 0 : index
    %c0_50 = arith.constant 0 : index
    %128 = vector.load %arg8[%c0_48, %c0_49, %c0_50] : memref<2x32x2048xbf16, #tpu.memory_space<vmem>>, vector<1x32x2048xbf16>
    %129 = vector.shape_cast %128 : vector<1x32x2048xbf16> to vector<32x2048xbf16>
    %cst_51 = arith.constant dense<0.000000e+00> : vector<56x2048xf32>
    %130 = tpu.matmul %127, %129, %cst_51 {dimension_numbers = #tpu.dot_dimension_numbers<[1], [0], [0], [1], [0, 0, 1, 1], [], []>} : vector<56x32xbf16>, vector<32x2048xbf16>, vector<56x2048xf32> -> vector<56x2048xf32>
    %131 = arith.truncf %130 : vector<56x2048xf32> to vector<56x2048xbf16>
    %c0_52 = arith.constant 0 : index
    %c0_53 = arith.constant 0 : index
    %c0_54 = arith.constant 0 : index
    %132 = vector.load %arg9[%c0_52, %c0_53, %c0_54] : memref<2x1x2048xbf16, #tpu.memory_space<vmem>>, vector<1x1x2048xbf16>
    %133 = vector.shape_cast %132 : vector<1x1x2048xbf16> to vector<1x2048xbf16>
    %134 = vector.broadcast %133 : vector<1x2048xbf16> to vector<56x2048xbf16>
    %135 = arith.addf %131, %134 : vector<56x2048xbf16>
    %cst_55 = arith.constant 0.000000e+00 : bf16
    %136 = vector.broadcast %cst_55 : bf16 to vector<56x2048xbf16>
    %137 = arith.maximumf %135, %136 : vector<56x2048xbf16>
    %c0_56 = arith.constant 0 : index
    %c0_57 = arith.constant 0 : index
    %c0_58 = arith.constant 0 : index
    %138 = vector.load %arg10[%c0_56, %c0_57, %c0_58] : memref<2x2048x32xbf16, #tpu.memory_space<vmem>>, vector<1x2048x32xbf16>
    %139 = vector.shape_cast %138 : vector<1x2048x32xbf16> to vector<2048x32xbf16>
    %cst_59 = arith.constant dense<0.000000e+00> : vector<56x32xf32>
    %140 = tpu.matmul %137, %139, %cst_59 {dimension_numbers = #tpu.dot_dimension_numbers<[1], [0], [0], [1], [0, 0, 1, 1], [], []>} : vector<56x2048xbf16>, vector<2048x32xbf16>, vector<56x32xf32> -> vector<56x32xf32>
    %c0_60 = arith.constant 0 : index
    %c0_61 = arith.constant 0 : index
    %c0_62 = arith.constant 0 : index
    %141 = vector.load %arg11[%c0_60, %c0_61, %c0_62] : memref<2x1x32xf32, #tpu.memory_space<vmem>>, vector<1x1x32xf32>
    %142 = vector.shape_cast %141 : vector<1x1x32xf32> to vector<1x32xf32>
    %143 = vector.broadcast %142 : vector<1x32xf32> to vector<56x32xf32>
    %144 = arith.addf %140, %143 : vector<56x32xf32>
    %145 = arith.addf %126, %144 : vector<56x32xf32>
    %c0_63 = arith.constant 0 : index
    %c0_64 = arith.constant 0 : index
    %c0_65 = arith.constant 0 : index
    %146 = vector.load %arg12[%c0_63, %c0_64, %c0_65] : memref<2x1x32xf32, #tpu.memory_space<vmem>>, vector<1x1x32xf32>
    %147 = vector.shape_cast %146 : vector<1x1x32xf32> to vector<1x32xf32>
    %c0_66 = arith.constant 0 : index
    %c0_67 = arith.constant 0 : index
    %c0_68 = arith.constant 0 : index
    %148 = vector.load %arg13[%c0_66, %c0_67, %c0_68] : memref<2x1x32xf32, #tpu.memory_space<vmem>>, vector<1x1x32xf32>
    %149 = vector.shape_cast %148 : vector<1x1x32xf32> to vector<1x32xf32>
    %cst_69 = arith.constant dense<0.000000e+00> : vector<56xf32>
    %150 = vector.multi_reduction <add>, %145, %cst_69 [1] : vector<56x32xf32> to vector<56xf32>
    %151 = vector.shape_cast %150 : vector<56xf32> to vector<56x1xf32>
    %cst_70 = arith.constant 3.200000e+01 : f32
    %152 = vector.broadcast %cst_70 : f32 to vector<56x1xf32>
    %153 = arith.divf %151, %152 : vector<56x1xf32>
    %154 = vector.broadcast %153 : vector<56x1xf32> to vector<56x32xf32>
    %155 = arith.subf %145, %154 : vector<56x32xf32>
    %156 = arith.mulf %155, %155 : vector<56x32xf32>
    %cst_71 = arith.constant dense<0.000000e+00> : vector<56xf32>
    %157 = vector.multi_reduction <add>, %156, %cst_71 [1] : vector<56x32xf32> to vector<56xf32>
    %158 = vector.shape_cast %157 : vector<56xf32> to vector<56x1xf32>
    %cst_72 = arith.constant 3.200000e+01 : f32
    %159 = vector.broadcast %cst_72 : f32 to vector<56x1xf32>
    %160 = arith.divf %158, %159 : vector<56x1xf32>
    %cst_73 = arith.constant 9.99999974E-6 : f32
    %161 = vector.broadcast %cst_73 : f32 to vector<56x1xf32>
    %162 = arith.addf %160, %161 : vector<56x1xf32>
    %163 = math.rsqrt %162 : vector<56x1xf32>
    %164 = vector.broadcast %163 : vector<56x1xf32> to vector<56x32xf32>
    %165 = arith.mulf %155, %164 : vector<56x32xf32>
    %166 = vector.broadcast %147 : vector<1x32xf32> to vector<56x32xf32>
    %167 = arith.mulf %165, %166 : vector<56x32xf32>
    %168 = vector.broadcast %149 : vector<1x32xf32> to vector<56x32xf32>
    %169 = arith.addf %167, %168 : vector<56x32xf32>
    %170 = arith.truncf %169 : vector<56x32xf32> to vector<56x32xbf16>
    %c1 = arith.constant 1 : index
    %c0_74 = arith.constant 0 : index
    %c0_75 = arith.constant 0 : index
    %171 = vector.load %arg2[%c1, %c0_74, %c0_75] : memref<2x32x96xbf16, #tpu.memory_space<vmem>>, vector<1x32x96xbf16>
    %172 = vector.shape_cast %171 : vector<1x32x96xbf16> to vector<32x96xbf16>
    %cst_76 = arith.constant dense<0.000000e+00> : vector<56x96xf32>
    %173 = tpu.matmul %170, %172, %cst_76 {dimension_numbers = #tpu.dot_dimension_numbers<[1], [0], [0], [1], [0, 0, 1, 1], [], []>} : vector<56x32xbf16>, vector<32x96xbf16>, vector<56x96xf32> -> vector<56x96xf32>
    %c1_77 = arith.constant 1 : index
    %c0_78 = arith.constant 0 : index
    %c0_79 = arith.constant 0 : index
    %174 = vector.load %arg3[%c1_77, %c0_78, %c0_79] : memref<2x1x96xf32, #tpu.memory_space<vmem>>, vector<1x1x96xf32>
    %175 = vector.shape_cast %174 : vector<1x1x96xf32> to vector<1x96xf32>
    %176 = vector.broadcast %175 : vector<1x96xf32> to vector<56x96xf32>
    %177 = arith.addf %173, %176 : vector<56x96xf32>
    %178 = vector.extract_strided_slice %177 {offsets = [0, 0], sizes = [56, 8], strides = [1, 1]} : vector<56x96xf32> to vector<56x8xf32>
    %cst_80 = arith.constant 0.353553385 : f32
    %179 = vector.broadcast %cst_80 : f32 to vector<56x8xf32>
    %180 = arith.mulf %178, %179 : vector<56x8xf32>
    %181 = vector.extract_strided_slice %177 {offsets = [0, 32], sizes = [56, 8], strides = [1, 1]} : vector<56x96xf32> to vector<56x8xf32>
    %182 = vector.extract_strided_slice %177 {offsets = [0, 64], sizes = [56, 8], strides = [1, 1]} : vector<56x96xf32> to vector<56x8xf32>
    %cst_81 = arith.constant dense<0.000000e+00> : vector<56x56xf32>
    %183 = tpu.matmul %180, %181, %cst_81 {dimension_numbers = #tpu.dot_dimension_numbers<[1], [1], [0], [0], [0, 0, 1, 0], [], []>} : vector<56x8xf32>, vector<56x8xf32>, vector<56x56xf32> -> vector<56x56xf32>
    %184 = vector.broadcast %8 : vector<1x56xf32> to vector<56x56xf32>
    %185 = arith.addf %183, %184 : vector<56x56xf32>
    %cst_82 = arith.constant dense<0xFF800000> : vector<56xf32>
    %186 = vector.multi_reduction <maximumf>, %185, %cst_82 [1] : vector<56x56xf32> to vector<56xf32>
    %187 = vector.shape_cast %186 : vector<56xf32> to vector<56x1xf32>
    %188 = vector.broadcast %187 : vector<56x1xf32> to vector<56x56xf32>
    %189 = arith.subf %185, %188 : vector<56x56xf32>
    %190 = math.exp %189 : vector<56x56xf32>
    %cst_83 = arith.constant dense<0.000000e+00> : vector<56xf32>
    %191 = vector.multi_reduction <add>, %190, %cst_83 [1] : vector<56x56xf32> to vector<56xf32>
    %192 = vector.shape_cast %191 : vector<56xf32> to vector<56x1xf32>
    %193 = tpu.reciprocal %192 {approx = true} : vector<56x1xf32> -> vector<56x1xf32>
    %194 = vector.broadcast %193 : vector<56x1xf32> to vector<56x56xf32>
    %195 = arith.mulf %190, %194 : vector<56x56xf32>
    %cst_84 = arith.constant dense<0.000000e+00> : vector<56x8xf32>
    %196 = tpu.matmul %195, %182, %cst_84 {dimension_numbers = #tpu.dot_dimension_numbers<[1], [0], [0], [1], [0, 0, 1, 1], [], []>} : vector<56x56xf32>, vector<56x8xf32>, vector<56x8xf32> -> vector<56x8xf32>
    %197 = vector.extract_strided_slice %177 {offsets = [0, 8], sizes = [56, 8], strides = [1, 1]} : vector<56x96xf32> to vector<56x8xf32>
    %cst_85 = arith.constant 0.353553385 : f32
    %198 = vector.broadcast %cst_85 : f32 to vector<56x8xf32>
    %199 = arith.mulf %197, %198 : vector<56x8xf32>
    %200 = vector.extract_strided_slice %177 {offsets = [0, 40], sizes = [56, 8], strides = [1, 1]} : vector<56x96xf32> to vector<56x8xf32>
    %201 = vector.extract_strided_slice %177 {offsets = [0, 72], sizes = [56, 8], strides = [1, 1]} : vector<56x96xf32> to vector<56x8xf32>
    %cst_86 = arith.constant dense<0.000000e+00> : vector<56x56xf32>
    %202 = tpu.matmul %199, %200, %cst_86 {dimension_numbers = #tpu.dot_dimension_numbers<[1], [1], [0], [0], [0, 0, 1, 0], [], []>} : vector<56x8xf32>, vector<56x8xf32>, vector<56x56xf32> -> vector<56x56xf32>
    %203 = vector.broadcast %8 : vector<1x56xf32> to vector<56x56xf32>
    %204 = arith.addf %202, %203 : vector<56x56xf32>
    %cst_87 = arith.constant dense<0xFF800000> : vector<56xf32>
    %205 = vector.multi_reduction <maximumf>, %204, %cst_87 [1] : vector<56x56xf32> to vector<56xf32>
    %206 = vector.shape_cast %205 : vector<56xf32> to vector<56x1xf32>
    %207 = vector.broadcast %206 : vector<56x1xf32> to vector<56x56xf32>
    %208 = arith.subf %204, %207 : vector<56x56xf32>
    %209 = math.exp %208 : vector<56x56xf32>
    %cst_88 = arith.constant dense<0.000000e+00> : vector<56xf32>
    %210 = vector.multi_reduction <add>, %209, %cst_88 [1] : vector<56x56xf32> to vector<56xf32>
    %211 = vector.shape_cast %210 : vector<56xf32> to vector<56x1xf32>
    %212 = tpu.reciprocal %211 {approx = true} : vector<56x1xf32> -> vector<56x1xf32>
    %213 = vector.broadcast %212 : vector<56x1xf32> to vector<56x56xf32>
    %214 = arith.mulf %209, %213 : vector<56x56xf32>
    %cst_89 = arith.constant dense<0.000000e+00> : vector<56x8xf32>
    %215 = tpu.matmul %214, %201, %cst_89 {dimension_numbers = #tpu.dot_dimension_numbers<[1], [0], [0], [1], [0, 0, 1, 1], [], []>} : vector<56x56xf32>, vector<56x8xf32>, vector<56x8xf32> -> vector<56x8xf32>
    %216 = vector.extract_strided_slice %177 {offsets = [0, 16], sizes = [56, 8], strides = [1, 1]} : vector<56x96xf32> to vector<56x8xf32>
    %cst_90 = arith.constant 0.353553385 : f32
    %217 = vector.broadcast %cst_90 : f32 to vector<56x8xf32>
    %218 = arith.mulf %216, %217 : vector<56x8xf32>
    %219 = vector.extract_strided_slice %177 {offsets = [0, 48], sizes = [56, 8], strides = [1, 1]} : vector<56x96xf32> to vector<56x8xf32>
    %220 = vector.extract_strided_slice %177 {offsets = [0, 80], sizes = [56, 8], strides = [1, 1]} : vector<56x96xf32> to vector<56x8xf32>
    %cst_91 = arith.constant dense<0.000000e+00> : vector<56x56xf32>
    %221 = tpu.matmul %218, %219, %cst_91 {dimension_numbers = #tpu.dot_dimension_numbers<[1], [1], [0], [0], [0, 0, 1, 0], [], []>} : vector<56x8xf32>, vector<56x8xf32>, vector<56x56xf32> -> vector<56x56xf32>
    %222 = vector.broadcast %8 : vector<1x56xf32> to vector<56x56xf32>
    %223 = arith.addf %221, %222 : vector<56x56xf32>
    %cst_92 = arith.constant dense<0xFF800000> : vector<56xf32>
    %224 = vector.multi_reduction <maximumf>, %223, %cst_92 [1] : vector<56x56xf32> to vector<56xf32>
    %225 = vector.shape_cast %224 : vector<56xf32> to vector<56x1xf32>
    %226 = vector.broadcast %225 : vector<56x1xf32> to vector<56x56xf32>
    %227 = arith.subf %223, %226 : vector<56x56xf32>
    %228 = math.exp %227 : vector<56x56xf32>
    %cst_93 = arith.constant dense<0.000000e+00> : vector<56xf32>
    %229 = vector.multi_reduction <add>, %228, %cst_93 [1] : vector<56x56xf32> to vector<56xf32>
    %230 = vector.shape_cast %229 : vector<56xf32> to vector<56x1xf32>
    %231 = tpu.reciprocal %230 {approx = true} : vector<56x1xf32> -> vector<56x1xf32>
    %232 = vector.broadcast %231 : vector<56x1xf32> to vector<56x56xf32>
    %233 = arith.mulf %228, %232 : vector<56x56xf32>
    %cst_94 = arith.constant dense<0.000000e+00> : vector<56x8xf32>
    %234 = tpu.matmul %233, %220, %cst_94 {dimension_numbers = #tpu.dot_dimension_numbers<[1], [0], [0], [1], [0, 0, 1, 1], [], []>} : vector<56x56xf32>, vector<56x8xf32>, vector<56x8xf32> -> vector<56x8xf32>
    %235 = vector.extract_strided_slice %177 {offsets = [0, 24], sizes = [56, 8], strides = [1, 1]} : vector<56x96xf32> to vector<56x8xf32>
    %cst_95 = arith.constant 0.353553385 : f32
    %236 = vector.broadcast %cst_95 : f32 to vector<56x8xf32>
    %237 = arith.mulf %235, %236 : vector<56x8xf32>
    %238 = vector.extract_strided_slice %177 {offsets = [0, 56], sizes = [56, 8], strides = [1, 1]} : vector<56x96xf32> to vector<56x8xf32>
    %239 = vector.extract_strided_slice %177 {offsets = [0, 88], sizes = [56, 8], strides = [1, 1]} : vector<56x96xf32> to vector<56x8xf32>
    %cst_96 = arith.constant dense<0.000000e+00> : vector<56x56xf32>
    %240 = tpu.matmul %237, %238, %cst_96 {dimension_numbers = #tpu.dot_dimension_numbers<[1], [1], [0], [0], [0, 0, 1, 0], [], []>} : vector<56x8xf32>, vector<56x8xf32>, vector<56x56xf32> -> vector<56x56xf32>
    %241 = vector.broadcast %8 : vector<1x56xf32> to vector<56x56xf32>
    %242 = arith.addf %240, %241 : vector<56x56xf32>
    %cst_97 = arith.constant dense<0xFF800000> : vector<56xf32>
    %243 = vector.multi_reduction <maximumf>, %242, %cst_97 [1] : vector<56x56xf32> to vector<56xf32>
    %244 = vector.shape_cast %243 : vector<56xf32> to vector<56x1xf32>
    %245 = vector.broadcast %244 : vector<56x1xf32> to vector<56x56xf32>
    %246 = arith.subf %242, %245 : vector<56x56xf32>
    %247 = math.exp %246 : vector<56x56xf32>
    %cst_98 = arith.constant dense<0.000000e+00> : vector<56xf32>
    %248 = vector.multi_reduction <add>, %247, %cst_98 [1] : vector<56x56xf32> to vector<56xf32>
    %249 = vector.shape_cast %248 : vector<56xf32> to vector<56x1xf32>
    %250 = tpu.reciprocal %249 {approx = true} : vector<56x1xf32> -> vector<56x1xf32>
    %251 = vector.broadcast %250 : vector<56x1xf32> to vector<56x56xf32>
    %252 = arith.mulf %247, %251 : vector<56x56xf32>
    %cst_99 = arith.constant dense<0.000000e+00> : vector<56x8xf32>
    %253 = tpu.matmul %252, %239, %cst_99 {dimension_numbers = #tpu.dot_dimension_numbers<[1], [0], [0], [1], [0, 0, 1, 1], [], []>} : vector<56x56xf32>, vector<56x8xf32>, vector<56x8xf32> -> vector<56x8xf32>
    %254 = tpu.concatenate %196, %215, %234, %253 in 1 : vector<56x8xf32>, vector<56x8xf32>, vector<56x8xf32>, vector<56x8xf32> -> vector<56x32xf32>
    %255 = arith.truncf %254 : vector<56x32xf32> to vector<56x32xbf16>
    %c1_100 = arith.constant 1 : index
    %c0_101 = arith.constant 0 : index
    %c0_102 = arith.constant 0 : index
    %256 = vector.load %arg4[%c1_100, %c0_101, %c0_102] : memref<2x32x32xbf16, #tpu.memory_space<vmem>>, vector<1x32x32xbf16>
    %257 = vector.shape_cast %256 : vector<1x32x32xbf16> to vector<32x32xbf16>
    %cst_103 = arith.constant dense<0.000000e+00> : vector<56x32xf32>
    %258 = tpu.matmul %255, %257, %cst_103 {dimension_numbers = #tpu.dot_dimension_numbers<[1], [0], [0], [1], [0, 0, 1, 1], [], []>} : vector<56x32xbf16>, vector<32x32xbf16>, vector<56x32xf32> -> vector<56x32xf32>
    %c1_104 = arith.constant 1 : index
    %c0_105 = arith.constant 0 : index
    %c0_106 = arith.constant 0 : index
    %259 = vector.load %arg5[%c1_104, %c0_105, %c0_106] : memref<2x1x32xf32, #tpu.memory_space<vmem>>, vector<1x1x32xf32>
    %260 = vector.shape_cast %259 : vector<1x1x32xf32> to vector<1x32xf32>
    %261 = vector.broadcast %260 : vector<1x32xf32> to vector<56x32xf32>
    %262 = arith.addf %258, %261 : vector<56x32xf32>
    %263 = arith.addf %169, %262 : vector<56x32xf32>
    %c1_107 = arith.constant 1 : index
    %c0_108 = arith.constant 0 : index
    %c0_109 = arith.constant 0 : index
    %264 = vector.load %arg6[%c1_107, %c0_108, %c0_109] : memref<2x1x32xf32, #tpu.memory_space<vmem>>, vector<1x1x32xf32>
    %265 = vector.shape_cast %264 : vector<1x1x32xf32> to vector<1x32xf32>
    %c1_110 = arith.constant 1 : index
    %c0_111 = arith.constant 0 : index
    %c0_112 = arith.constant 0 : index
    %266 = vector.load %arg7[%c1_110, %c0_111, %c0_112] : memref<2x1x32xf32, #tpu.memory_space<vmem>>, vector<1x1x32xf32>
    %267 = vector.shape_cast %266 : vector<1x1x32xf32> to vector<1x32xf32>
    %cst_113 = arith.constant dense<0.000000e+00> : vector<56xf32>
    %268 = vector.multi_reduction <add>, %263, %cst_113 [1] : vector<56x32xf32> to vector<56xf32>
    %269 = vector.shape_cast %268 : vector<56xf32> to vector<56x1xf32>
    %cst_114 = arith.constant 3.200000e+01 : f32
    %270 = vector.broadcast %cst_114 : f32 to vector<56x1xf32>
    %271 = arith.divf %269, %270 : vector<56x1xf32>
    %272 = vector.broadcast %271 : vector<56x1xf32> to vector<56x32xf32>
    %273 = arith.subf %263, %272 : vector<56x32xf32>
    %274 = arith.mulf %273, %273 : vector<56x32xf32>
    %cst_115 = arith.constant dense<0.000000e+00> : vector<56xf32>
    %275 = vector.multi_reduction <add>, %274, %cst_115 [1] : vector<56x32xf32> to vector<56xf32>
    %276 = vector.shape_cast %275 : vector<56xf32> to vector<56x1xf32>
    %cst_116 = arith.constant 3.200000e+01 : f32
    %277 = vector.broadcast %cst_116 : f32 to vector<56x1xf32>
    %278 = arith.divf %276, %277 : vector<56x1xf32>
    %cst_117 = arith.constant 9.99999974E-6 : f32
    %279 = vector.broadcast %cst_117 : f32 to vector<56x1xf32>
    %280 = arith.addf %278, %279 : vector<56x1xf32>
    %281 = math.rsqrt %280 : vector<56x1xf32>
    %282 = vector.broadcast %281 : vector<56x1xf32> to vector<56x32xf32>
    %283 = arith.mulf %273, %282 : vector<56x32xf32>
    %284 = vector.broadcast %265 : vector<1x32xf32> to vector<56x32xf32>
    %285 = arith.mulf %283, %284 : vector<56x32xf32>
    %286 = vector.broadcast %267 : vector<1x32xf32> to vector<56x32xf32>
    %287 = arith.addf %285, %286 : vector<56x32xf32>
    %288 = arith.truncf %287 : vector<56x32xf32> to vector<56x32xbf16>
    %c1_118 = arith.constant 1 : index
    %c0_119 = arith.constant 0 : index
    %c0_120 = arith.constant 0 : index
    %289 = vector.load %arg8[%c1_118, %c0_119, %c0_120] : memref<2x32x2048xbf16, #tpu.memory_space<vmem>>, vector<1x32x2048xbf16>
    %290 = vector.shape_cast %289 : vector<1x32x2048xbf16> to vector<32x2048xbf16>
    %cst_121 = arith.constant dense<0.000000e+00> : vector<56x2048xf32>
    %291 = tpu.matmul %288, %290, %cst_121 {dimension_numbers = #tpu.dot_dimension_numbers<[1], [0], [0], [1], [0, 0, 1, 1], [], []>} : vector<56x32xbf16>, vector<32x2048xbf16>, vector<56x2048xf32> -> vector<56x2048xf32>
    %292 = arith.truncf %291 : vector<56x2048xf32> to vector<56x2048xbf16>
    %c1_122 = arith.constant 1 : index
    %c0_123 = arith.constant 0 : index
    %c0_124 = arith.constant 0 : index
    %293 = vector.load %arg9[%c1_122, %c0_123, %c0_124] : memref<2x1x2048xbf16, #tpu.memory_space<vmem>>, vector<1x1x2048xbf16>
    %294 = vector.shape_cast %293 : vector<1x1x2048xbf16> to vector<1x2048xbf16>
    %295 = vector.broadcast %294 : vector<1x2048xbf16> to vector<56x2048xbf16>
    %296 = arith.addf %292, %295 : vector<56x2048xbf16>
    %cst_125 = arith.constant 0.000000e+00 : bf16
    %297 = vector.broadcast %cst_125 : bf16 to vector<56x2048xbf16>
    %298 = arith.maximumf %296, %297 : vector<56x2048xbf16>
    %c1_126 = arith.constant 1 : index
    %c0_127 = arith.constant 0 : index
    %c0_128 = arith.constant 0 : index
    %299 = vector.load %arg10[%c1_126, %c0_127, %c0_128] : memref<2x2048x32xbf16, #tpu.memory_space<vmem>>, vector<1x2048x32xbf16>
    %300 = vector.shape_cast %299 : vector<1x2048x32xbf16> to vector<2048x32xbf16>
    %cst_129 = arith.constant dense<0.000000e+00> : vector<56x32xf32>
    %301 = tpu.matmul %298, %300, %cst_129 {dimension_numbers = #tpu.dot_dimension_numbers<[1], [0], [0], [1], [0, 0, 1, 1], [], []>} : vector<56x2048xbf16>, vector<2048x32xbf16>, vector<56x32xf32> -> vector<56x32xf32>
    %c1_130 = arith.constant 1 : index
    %c0_131 = arith.constant 0 : index
    %c0_132 = arith.constant 0 : index
    %302 = vector.load %arg11[%c1_130, %c0_131, %c0_132] : memref<2x1x32xf32, #tpu.memory_space<vmem>>, vector<1x1x32xf32>
    %303 = vector.shape_cast %302 : vector<1x1x32xf32> to vector<1x32xf32>
    %304 = vector.broadcast %303 : vector<1x32xf32> to vector<56x32xf32>
    %305 = arith.addf %301, %304 : vector<56x32xf32>
    %306 = arith.addf %287, %305 : vector<56x32xf32>
    %c1_133 = arith.constant 1 : index
    %c0_134 = arith.constant 0 : index
    %c0_135 = arith.constant 0 : index
    %307 = vector.load %arg12[%c1_133, %c0_134, %c0_135] : memref<2x1x32xf32, #tpu.memory_space<vmem>>, vector<1x1x32xf32>
    %308 = vector.shape_cast %307 : vector<1x1x32xf32> to vector<1x32xf32>
    %c1_136 = arith.constant 1 : index
    %c0_137 = arith.constant 0 : index
    %c0_138 = arith.constant 0 : index
    %309 = vector.load %arg13[%c1_136, %c0_137, %c0_138] : memref<2x1x32xf32, #tpu.memory_space<vmem>>, vector<1x1x32xf32>
    %310 = vector.shape_cast %309 : vector<1x1x32xf32> to vector<1x32xf32>
    %cst_139 = arith.constant dense<0.000000e+00> : vector<56xf32>
    %311 = vector.multi_reduction <add>, %306, %cst_139 [1] : vector<56x32xf32> to vector<56xf32>
    %312 = vector.shape_cast %311 : vector<56xf32> to vector<56x1xf32>
    %cst_140 = arith.constant 3.200000e+01 : f32
    %313 = vector.broadcast %cst_140 : f32 to vector<56x1xf32>
    %314 = arith.divf %312, %313 : vector<56x1xf32>
    %315 = vector.broadcast %314 : vector<56x1xf32> to vector<56x32xf32>
    %316 = arith.subf %306, %315 : vector<56x32xf32>
    %317 = arith.mulf %316, %316 : vector<56x32xf32>
    %cst_141 = arith.constant dense<0.000000e+00> : vector<56xf32>
    %318 = vector.multi_reduction <add>, %317, %cst_141 [1] : vector<56x32xf32> to vector<56xf32>
    %319 = vector.shape_cast %318 : vector<56xf32> to vector<56x1xf32>
    %cst_142 = arith.constant 3.200000e+01 : f32
    %320 = vector.broadcast %cst_142 : f32 to vector<56x1xf32>
    %321 = arith.divf %319, %320 : vector<56x1xf32>
    %cst_143 = arith.constant 9.99999974E-6 : f32
    %322 = vector.broadcast %cst_143 : f32 to vector<56x1xf32>
    %323 = arith.addf %321, %322 : vector<56x1xf32>
    %324 = math.rsqrt %323 : vector<56x1xf32>
    %325 = vector.broadcast %324 : vector<56x1xf32> to vector<56x32xf32>
    %326 = arith.mulf %316, %325 : vector<56x32xf32>
    %327 = vector.broadcast %308 : vector<1x32xf32> to vector<56x32xf32>
    %328 = arith.mulf %326, %327 : vector<56x32xf32>
    %329 = vector.broadcast %310 : vector<1x32xf32> to vector<56x32xf32>
    %330 = arith.addf %328, %329 : vector<56x32xf32>
    %c0_144 = arith.constant 0 : index
    %c0_145 = arith.constant 0 : index
    %331 = vector.load %arg14[%c0_144, %c0_145] : memref<1x56xf32, #tpu.memory_space<vmem>>, vector<1x56xf32>
    %cst_146 = arith.constant dense<0.000000e+00> : vector<1x32xf32>
    %332 = tpu.matmul %331, %330, %cst_146 {dimension_numbers = #tpu.dot_dimension_numbers<[1], [0], [0], [1], [0, 0, 1, 1], [], []>} : vector<1x56xf32>, vector<56x32xf32>, vector<1x32xf32> -> vector<1x32xf32>
    %c0_147 = arith.constant 0 : index
    %c0_148 = arith.constant 0 : index
    %333 = vector.load %arg15[%c0_147, %c0_148] : memref<32x10xf32, #tpu.memory_space<vmem>>, vector<32x10xf32>
    %cst_149 = arith.constant dense<0.000000e+00> : vector<1x10xf32>
    %334 = tpu.matmul %332, %333, %cst_149 {dimension_numbers = #tpu.dot_dimension_numbers<[1], [0], [0], [1], [0, 0, 1, 1], [], []>} : vector<1x32xf32>, vector<32x10xf32>, vector<1x10xf32> -> vector<1x10xf32>
    %c0_150 = arith.constant 0 : index
    %c0_151 = arith.constant 0 : index
    %335 = vector.load %arg16[%c0_150, %c0_151] : memref<1x10xf32, #tpu.memory_space<vmem>>, vector<1x10xf32>
    %336 = arith.addf %334, %335 : vector<1x10xf32>
    %c0_152 = arith.constant 0 : index
    %c0_153 = arith.constant 0 : index
    %c0_154 = arith.constant 0 : index
    %337 = vector.load %arg17[%c0_152, %c0_153, %c0_154] : memref<1x1x10xf32, #tpu.memory_space<vmem>>, vector<1x1x10xf32>
    %338 = vector.shape_cast %337 : vector<1x1x10xf32> to vector<1x10xf32>
    %339 = vector.shape_cast %336 : vector<1x10xf32> to vector<1x1x10xf32>
    tpu.vector_store %arg17[%c0_152, %c0_153, %c0_154], %339 {strides = array<i32>} : memref<1x1x10xf32, #tpu.memory_space<vmem>>, vector<1x1x10xf32>,
    return
  }
  func.func @transform_0(%arg0: i32) -> (i32, i32, i32) {
    %c0_i32 = arith.constant 0 : i32
    %c0_i32_0 = arith.constant 0 : i32
    %c0_i32_1 = arith.constant 0 : i32
    return %arg0, %c0_i32, %c0_i32_0 : i32, i32, i32
  }
  func.func @transform_1(%arg0: i32) -> (i32, i32, i32) {
    %c0_i32 = arith.constant 0 : i32
    %c0_i32_0 = arith.constant 0 : i32
    %c0_i32_1 = arith.constant 0 : i32
    %c0_i32_2 = arith.constant 0 : i32
    return %c0_i32, %c0_i32_0, %c0_i32_1 : i32, i32, i32
  }
  func.func @transform_2(%arg0: i32) -> (i32, i32, i32) {
    %c0_i32 = arith.constant 0 : i32
    %c0_i32_0 = arith.constant 0 : i32
    %c0_i32_1 = arith.constant 0 : i32
    %c0_i32_2 = arith.constant 0 : i32
    return %c0_i32, %c0_i32_0, %c0_i32_1 : i32, i32, i32
  }
  func.func @transform_3(%arg0: i32) -> (i32, i32, i32) {
    %c0_i32 = arith.constant 0 : i32
    %c0_i32_0 = arith.constant 0 : i32
    %c0_i32_1 = arith.constant 0 : i32
    %c0_i32_2 = arith.constant 0 : i32
    return %c0_i32, %c0_i32_0, %c0_i32_1 : i32, i32, i32
  }
  func.func @transform_4(%arg0: i32) -> (i32, i32, i32) {
    %c0_i32 = arith.constant 0 : i32
    %c0_i32_0 = arith.constant 0 : i32
    %c0_i32_1 = arith.constant 0 : i32
    %c0_i32_2 = arith.constant 0 : i32
    return %c0_i32, %c0_i32_0, %c0_i32_1 : i32, i32, i32
  }
  func.func @transform_5(%arg0: i32) -> (i32, i32, i32) {
    %c0_i32 = arith.constant 0 : i32
    %c0_i32_0 = arith.constant 0 : i32
    %c0_i32_1 = arith.constant 0 : i32
    %c0_i32_2 = arith.constant 0 : i32
    return %c0_i32, %c0_i32_0, %c0_i32_1 : i32, i32, i32
  }
  func.func @transform_6(%arg0: i32) -> (i32, i32, i32) {
    %c0_i32 = arith.constant 0 : i32
    %c0_i32_0 = arith.constant 0 : i32
    %c0_i32_1 = arith.constant 0 : i32
    %c0_i32_2 = arith.constant 0 : i32
    return %c0_i32, %c0_i32_0, %c0_i32_1 : i32, i32, i32
  }
  func.func @transform_7(%arg0: i32) -> (i32, i32, i32) {
    %c0_i32 = arith.constant 0 : i32
    %c0_i32_0 = arith.constant 0 : i32
    %c0_i32_1 = arith.constant 0 : i32
    %c0_i32_2 = arith.constant 0 : i32
    return %c0_i32, %c0_i32_0, %c0_i32_1 : i32, i32, i32
  }
  func.func @transform_8(%arg0: i32) -> (i32, i32, i32) {
    %c0_i32 = arith.constant 0 : i32
    %c0_i32_0 = arith.constant 0 : i32
    %c0_i32_1 = arith.constant 0 : i32
    %c0_i32_2 = arith.constant 0 : i32
    return %c0_i32, %c0_i32_0, %c0_i32_1 : i32, i32, i32
  }
  func.func @transform_9(%arg0: i32) -> (i32, i32, i32) {
    %c0_i32 = arith.constant 0 : i32
    %c0_i32_0 = arith.constant 0 : i32
    %c0_i32_1 = arith.constant 0 : i32
    %c0_i32_2 = arith.constant 0 : i32
    return %c0_i32, %c0_i32_0, %c0_i32_1 : i32, i32, i32
  }
  func.func @transform_10(%arg0: i32) -> (i32, i32, i32) {
    %c0_i32 = arith.constant 0 : i32
    %c0_i32_0 = arith.constant 0 : i32
    %c0_i32_1 = arith.constant 0 : i32
    %c0_i32_2 = arith.constant 0 : i32
    return %c0_i32, %c0_i32_0, %c0_i32_1 : i32, i32, i32
  }
  func.func @transform_11(%arg0: i32) -> (i32, i32, i32) {
    %c0_i32 = arith.constant 0 : i32
    %c0_i32_0 = arith.constant 0 : i32
    %c0_i32_1 = arith.constant 0 : i32
    %c0_i32_2 = arith.constant 0 : i32
    return %c0_i32, %c0_i32_0, %c0_i32_1 : i32, i32, i32
  }
  func.func @transform_12(%arg0: i32) -> (i32, i32, i32) {
    %c0_i32 = arith.constant 0 : i32
    %c0_i32_0 = arith.constant 0 : i32
    %c0_i32_1 = arith.constant 0 : i32
    %c0_i32_2 = arith.constant 0 : i32
    return %c0_i32, %c0_i32_0, %c0_i32_1 : i32, i32, i32
  }
  func.func @transform_13(%arg0: i32) -> (i32, i32) {
    %c0_i32 = arith.constant 0 : i32
    %c0_i32_0 = arith.constant 0 : i32
    %c0_i32_1 = arith.constant 0 : i32
    return %c0_i32, %c0_i32_0 : i32, i32
  }
  func.func @transform_14(%arg0: i32) -> (i32, i32) {
    %c0_i32 = arith.constant 0 : i32
    %c0_i32_0 = arith.constant 0 : i32
    %c0_i32_1 = arith.constant 0 : i32
    return %c0_i32, %c0_i32_0 : i32, i32
  }
  func.func @transform_15(%arg0: i32) -> (i32, i32) {
    %c0_i32 = arith.constant 0 : i32
    %c0_i32_0 = arith.constant 0 : i32
    %c0_i32_1 = arith.constant 0 : i32
    return %c0_i32, %c0_i32_0 : i32, i32
  }
  func.func @transform_16(%arg0: i32) -> (i32, i32, i32) {
    %c0_i32 = arith.constant 0 : i32
    %c0_i32_0 = arith.constant 0 : i32
    %c0_i32_1 = arith.constant 0 : i32
    return %arg0, %c0_i32, %c0_i32_0 : i32, i32, i32
  }
}

</mosaic_0001>

<bundles_post_ra>
// kernel: forward.3
= control target key start
LH: loop header
LB: loop body
LE: loop exit
PB: predicated region body
PF: predicated region fallthrough
CT: control target
= control target key end

     0   :  { %vm46_vm0 = vcmask 1043456   ;;  %vm47_vm1 = vcmask 1044480   ;;  %v662_v1 = vmov 0   ;;  %v663_v2 = vmov 65535   ;;  %s788_s0 = inlined_call_operand.vmem [shape: bf16[4,9,512], index: 0, kind: input, shape index: {}]   ;;  %s789_s1 = inlined_call_operand.vmem [shape: bf16[16,9], index: 1, kind: input, shape index: {}]   ;;  %s790_s2 = inlined_call_operand.vmem [shape: f32[16,1], index: 2, kind: input, shape index: {}]   ;;  %s791_s3 = inlined_call_operand.vmem [shape: bf16[16,512], index: 3, kind: output, shape index: {}]  }
   0x1   :  { %v637_v0 = vld [vmem:[%s788_s0 + $0x4] ss:$16 sps:$4 sm:$0x1f]   ;;  %94 = vmatprep.mubr.bf16.mxu0 %v662_v1  ;;  %137 = vmatprep.mubr.bf16.mxu1 %v662_v1  ;;  %v48_v3 = vsel %vm46_vm0, 4294967295, %v663_v2  ;;  %vm42_vm2 = vcmask 72704   ;;  %v530_v36 = vld [vmem:[%s790_s2 + $0x8] sm:$0xff] }
   0x2   :  { %636 = vset.pattern.permute.xlu0 %v662_v1  ;;  %v690_v4 = vsel %vm47_vm1, %v48_v3, 0  ;;  %v639_v5 = vld [vmem:[%s788_s0 + $0xc] ss:$16 sps:$4 sm:$0x1f]   ;;  %v643_v10 = vld [vmem:[%s789_s1] sm:$0xff]  }
   0x3   :  { %v54_v6 = vand.u32 %v637_v0, %v690_v4  ;;  %v641_v7 = vld [vmem:[%s788_s0] ss:$16 sps:$4 sm:$0x1f]   ;;  %v642_v8 = vld [vmem:[%s788_s0 + $0x8] ss:$16 sps:$4 sm:$0x1f]   ;;  %v60_v9 = vand.u32 %v639_v5, %v690_v4 }
   0x4   :  { %v51_v11 = vand.u32 %v641_v7, %v690_v4  ;;  %v57_v12 = vand.u32 %v642_v8, %v690_v4  ;;  %v644_v13 = vld [vmem:[%s788_s0 + $0x20] ss:$16 sps:$4 sm:$0x1f]   ;;  %v646_v14 = vld [vmem:[%s788_s0 + $0x24] ss:$16 sps:$4 sm:$0x1f]  }
   0x5   :  { %62 = vmatprep.subr.bf16.mxu0 %v54_v6  ;;  %105 = vmatprep.subr.bf16.mxu1 %v60_v9  ;;  %v647_v15 = vld [vmem:[%s788_s0 + $0x28] ss:$16 sps:$4 sm:$0x1f]   ;;  %v173_v16 = vand.u32 %v646_v14, %v690_v4  ;;  %v649_v17 = vld [vmem:[%s788_s0 + $0x2c] ss:$16 sps:$4 sm:$0x1f]   ;;  %v170_v18 = vand.u32 %v644_v13, %v690_v4 }
   0x6   :  { %63 = vmatpush1.bf16.msra.mxu0 %v51_v11  ;;  %106 = vmatpush1.bf16.msra.mxu1 %v57_v12  ;;  %v176_v19 = vand.u32 %v647_v15, %v690_v4  ;;  %v652_v20 = vld [vmem:[%s788_s0 + $0x44] ss:$16 sps:$4 sm:$0x1f]   ;;  %v179_v21 = vand.u32 %v649_v17, %v690_v4  ;;  %v655_v23 = vld [vmem:[%s788_s0 + $0x4c] ss:$16 sps:$4 sm:$0x1f]  }
   0x7   :  { %181 = vmatprep.subr.bf16.mxu0 %v173_v16  ;;  %v300_v22 = vand.u32 %v652_v20, %v690_v4  ;;  %v650_v24 = vld [vmem:[%s788_s0 + $0x40] ss:$16 sps:$4 sm:$0x1f]   ;;  %v653_v25 = vld [vmem:[%s788_s0 + $0x48] ss:$16 sps:$4 sm:$0x1f]   ;;  %v306_v26 = vand.u32 %v655_v23, %v690_v4 }
   0x8   :  { %224 = vmatprep.subr.bf16.mxu1 %v179_v21  ;;  %v658_v27 = vld [vmem:[%s788_s0 + $0x64] ss:$16 sps:$4 sm:$0x1f]   ;;  %v661_v28 = vld [vmem:[%s788_s0 + $0x6c] ss:$16 sps:$4 sm:$0x1f]   ;;  %v297_v30 = vand.u32 %v650_v24, %v690_v4  ;;  %v303_v31 = vand.u32 %v653_v25, %v690_v4 }
   0x9   :  { %594 = vmatmul.mubr.msk.bf16.vlgmr.msra.gmra.mrb[0].mxu0 %vm42_vm2, %v643_v10  ;;  %595 = vmatmul.mubr.msk.bf16.vlgmr.msra.gmra.mrb[0].mxu1 %vm42_vm2, %v643_v10  ;;  %v529_v29 = vld [vmem:[%s790_s2] sm:$0xff]  ;;  %v427_v32 = vand.u32 %v658_v27, %v690_v4  ;;  %v433_v33 = vand.u32 %v661_v28, %v690_v4  ;;  %v659_v35 = vld [vmem:[%s788_s0 + $0x68] ss:$16 sps:$4 sm:$0x1f]  }
   0xa   :  { %182 = vmatpush1.bf16.msra.mxu0 %v170_v18  ;;  %225 = vmatpush1.bf16.msra.mxu1 %v176_v19  ;;  %v656_v34 = vld [vmem:[%s788_s0 + $0x60] ss:$16 sps:$4 sm:$0x1f]   ;;  %v430_v38 = vand.u32 %v659_v35, %v690_v4 }
   0xb   :  { %213 = vmatprep.mubr.bf16.mxu0 %v662_v1  ;;  %256 = vmatprep.mubr.bf16.mxu1 %v662_v1  ;;  %v424_v37 = vand.u32 %v656_v34, %v690_v4 }
   0xc   :  { %308 = vmatprep.subr.bf16.mxu0 %v300_v22  ;;  %351 = vmatprep.subr.bf16.mxu1 %v306_v26 }
   0xd   :  { %533 = vperm.xlu0 %636, %v529_v29  }
  0x11   :  { %604 = vmatmul.mubr.msk.bf16.vlgmr.msra.gmra.mrb[4].mxu0 %vm42_vm2, %v643_v10  ;;  %605 = vmatmul.mubr.msk.bf16.vlgmr.msra.gmra.mrb[4].mxu1 %vm42_vm2, %v643_v10 }
  0x12   :  { %309 = vmatpush1.bf16.msra.mxu0 %v297_v30  ;;  %352 = vmatpush1.bf16.msra.mxu1 %v303_v31 }
  0x13   :  { %340 = vmatprep.mubr.bf16.mxu0 %v662_v1  ;;  %383 = vmatprep.mubr.bf16.mxu1 %v662_v1 }
  0x14   :  { %435 = vmatprep.subr.bf16.mxu0 %v427_v32  ;;  %478 = vmatprep.subr.bf16.mxu1 %v433_v33 }
  0x15   :  { %538 = vperm.xlu0 %636, %v530_v36  }
  0x19   :  { %614 = vmatmul.mubr.msk.bf16.vlgmr.msra.gmra.mrb[8].mxu0 %vm42_vm2, %v643_v10  ;;  %615 = vmatmul.mubr.msk.bf16.vlgmr.msra.gmra.mrb[8].mxu1 %vm42_vm2, %v643_v10 }
  0x1a   :  { %436 = vmatpush1.bf16.msra.mxu0 %v424_v37  ;;  %479 = vmatpush1.bf16.msra.mxu1 %v430_v38 }
  0x1b   :  { %467 = vmatprep.mubr.bf16.mxu0 %v662_v1  ;;  %510 = vmatprep.mubr.bf16.mxu1 %v662_v1 }
  0x21   :  { %624 = vmatmul.mubr.msk.bf16.vlgmr.msra.gmra.mrb[12].mxu0 %vm42_vm2, %v643_v10  ;;  %625 = vmatmul.mubr.msk.bf16.vlgmr.msra.gmra.mrb[12].mxu1 %vm42_vm2, %v643_v10 }
  0x8c   :  { %v534_v15 = vpop.permute.xlu0 %533 }
  0x94   :  { %v539_v34 = vpop.permute.xlu0 %538 }
  0xdc   :  { %v96_v39 = vpop.f32.mrb[0].mxu0  ;;  %v139_v40 = vpop.f32.mrb[0].mxu1 }
  0xdd   :  { %v98_v41 = vpop.f32.mrb[1].mxu0  ;;  %v141_v42 = vpop.f32.mrb[1].mxu1 }
  0xde   :  { %v100_v43 = vpop.f32.mrb[2].mxu0  ;;  %v143_v44 = vpop.f32.mrb[2].mxu1 }
  0xdf   :  { %v102_v45 = vpop.f32.mrb[3].mxu0  ;;  %v145_v46 = vpop.f32.mrb[3].mxu1 }
  0xe4   :  { %v215_v47 = vpop.f32.mrb[4].mxu0  ;;  %v258_v48 = vpop.f32.mrb[4].mxu1 }
  0xe5   :  { %v267_v49 = vmax.f32 %v96_v39, %v215_v47  ;;  %v269_v50 = vmax.f32 %v139_v40, %v258_v48  ;;  %v217_v51 = vpop.f32.mrb[5].mxu0  ;;  %v260_v52 = vpop.f32.mrb[5].mxu1 }
  0xe6   :  { %v268_v53 = vmax.f32 %v98_v41, %v217_v51  ;;  %v270_v54 = vmax.f32 %v141_v42, %v260_v52  ;;  %v219_v55 = vpop.f32.mrb[6].mxu0  ;;  %v262_v56 = vpop.f32.mrb[6].mxu1 }
  0xe7   :  { %v271_v57 = vmax.f32 %v100_v43, %v219_v55  ;;  %v273_v58 = vmax.f32 %v143_v44, %v262_v56  ;;  %v221_v59 = vpop.f32.mrb[7].mxu0  ;;  %v264_v60 = vpop.f32.mrb[7].mxu1 }
  0xe8   :  { %v272_v61 = vmax.f32 %v102_v45, %v221_v59  ;;  %v274_v62 = vmax.f32 %v145_v46, %v264_v60 }
  0xec   :  { %v342_v63 = vpop.f32.mrb[8].mxu0  ;;  %v385_v0 = vpop.f32.mrb[8].mxu1 }
  0xed   :  { %v394_v1 = vmax.f32 %v267_v49, %v342_v63  ;;  %v396_v2 = vmax.f32 %v269_v50, %v385_v0  ;;  %v344_v3 = vpop.f32.mrb[9].mxu0  ;;  %v387_v4 = vpop.f32.mrb[9].mxu1 }
  0xee   :  { %v395_v5 = vmax.f32 %v268_v53, %v344_v3  ;;  %v397_v6 = vmax.f32 %v270_v54, %v387_v4  ;;  %v346_v7 = vpop.f32.mrb[10].mxu0  ;;  %v389_v8 = vpop.f32.mrb[10].mxu1 }
  0xef   :  { %v398_v9 = vmax.f32 %v271_v57, %v346_v7  ;;  %v400_v10 = vmax.f32 %v273_v58, %v389_v8  ;;  %v348_v11 = vpop.f32.mrb[11].mxu0  ;;  %v391_v12 = vpop.f32.mrb[11].mxu1 }
  0xf0   :  { %v399_v13 = vmax.f32 %v272_v61, %v348_v11  ;;  %v401_v14 = vmax.f32 %v274_v62, %v391_v12 }
  0xf4   :  { %v469_v16 = vpop.f32.mrb[12].mxu0  ;;  %v512_v17 = vpop.f32.mrb[12].mxu1 }
  0xf5   :  { %v521_v18 = vmax.f32 %v394_v1, %v469_v16  ;;  %v523_v19 = vmax.f32 %v396_v2, %v512_v17  ;;  %v471_v20 = vpop.f32.mrb[13].mxu0  ;;  %v514_v21 = vpop.f32.mrb[13].mxu1 }
  0xf6   :  { %v522_v22 = vmax.f32 %v395_v5, %v471_v20  ;;  %v524_v23 = vmax.f32 %v397_v6, %v514_v21  ;;  %v473_v24 = vpop.f32.mrb[14].mxu0  ;;  %v516_v25 = vpop.f32.mrb[14].mxu1 }
  0xf7   :  { %v541_v26 = vadd.f32 %v534_v15, %v521_v18  ;;  %v543_v27 = vadd.f32 %v534_v15, %v523_v19  ;;  %v525_v28 = vmax.f32 %v398_v9, %v473_v24  ;;  %v527_v29 = vmax.f32 %v400_v10, %v516_v25  ;;  %v475_v30 = vpop.f32.mrb[15].mxu0  ;;  %v518_v31 = vpop.f32.mrb[15].mxu1 }
  0xf8   :  { %v542_v32 = vadd.f32 %v534_v15, %v522_v22  ;;  %v544_v33 = vadd.f32 %v534_v15, %v524_v23  ;;  %v526_v35 = vmax.f32 %v399_v13, %v475_v30  ;;  %v528_v36 = vmax.f32 %v401_v14, %v518_v31 }
  0xf9   :  { %v549_v37 = vmax.f32 %v541_v26, 0.0  ;;  %v551_v38 = vmax.f32 %v543_v27, 0.0  ;;  %v545_v39 = vadd.f32 %v539_v34, %v525_v28  ;;  %v547_v40 = vadd.f32 %v539_v34, %v527_v29 }
  0xfa   :  { %v550_v41 = vmax.f32 %v542_v32, 0.0  ;;  %v552_v42 = vmax.f32 %v544_v33, 0.0  ;;  %v546_v43 = vadd.f32 %v539_v34, %v526_v35  ;;  %v548_v44 = vadd.f32 %v539_v34, %v528_v36 }
  0xfb   :  { %v553_v45 = vmax.f32 %v545_v39, 0.0  ;;  %v555_v46 = vmax.f32 %v547_v40, 0.0 }
  0xfc   :  { %v630_v47 = vpack.c.bf16 %v550_v41, %v549_v37  ;;  %v631_v48 = vpack.c.bf16 %v552_v42, %v551_v38  ;;  %v554_v49 = vmax.f32 %v546_v43, 0.0  ;;  %v556_v50 = vmax.f32 %v548_v44, 0.0 }
  0xfe   :  { %581 = vst [vmem:[%s791_s3] sm:$0xff] %v630_v47  ;;  %582 = vst [vmem:[%s791_s3 + $0x8] sm:$0xff] %v631_v48  ;;  %v632_v51 = vpack.c.bf16 %v554_v49, %v553_v45  ;;  %v633_v52 = vpack.c.bf16 %v556_v50, %v555_v46 }
 0x100   :  { %583 = vst [vmem:[%s791_s3 + $0x10] sm:$0xff] %v632_v51  ;;  %584 = vst [vmem:[%s791_s3 + $0x18] sm:$0xff] %v633_v52 }

// kernel: forward.4
= control target key start
LH: loop header
LB: loop body
LE: loop exit
PB: predicated region body
PF: predicated region fallthrough
CT: control target
= control target key end

     0   :  { %v730_v0 = vmov 0   ;;  %vm109_vm0 = vcmask 130048   ;;  %s959_s0 = inlined_call_operand.vmem [shape: bf16[4,144,128], index: 0, kind: input, shape index: {}]   ;;  %s960_s1 = inlined_call_operand.vmem [shape: bf16[32,144], index: 1, kind: input, shape index: {}]   ;;  %s961_s2 = inlined_call_operand.vmem [shape: f32[32,1], index: 2, kind: input, shape index: {}]   ;;  %s962_s3 = inlined_call_operand.vmem [shape: f32[32,128], index: 3, kind: output, shape index: {}]  }
   0x1   :  { %116 = vmatprep.subr.bf16.mxu0 %v730_v0  ;;  %238 = vmatprep.subr.bf16.mxu1 %v730_v0  ;;  %v688_v1 = vld [vmem:[%s959_s0] sm:$0xff]   ;;  %v689_v2 = vld [vmem:[%s959_s0 + $0x48] sm:$0xff]   ;;  %v691_v4 = vld [vmem:[%s959_s0 + $0x50] sm:$0xff]  }
   0x2   :  { %686 = vset.pattern.permute.xlu0 %v730_v0  ;;  %687 = vset.pattern.permute.xlu1 %v730_v0  ;;  %v690_v3 = vld [vmem:[%s959_s0 + $0x8] sm:$0xff]   ;;  %v692_v5 = vld [vmem:[%s959_s0 + $0x10] sm:$0xff]   ;;  %v693_v6 = vld [vmem:[%s959_s0 + $0x58] sm:$0xff]  }
   0x3   :  { %117 = vmatpush1.bf16.msra.mxu0 %v688_v1  ;;  %239 = vmatpush1.bf16.msra.mxu1 %v689_v2  ;;  %v694_v7 = vld [vmem:[%s959_s0 + $0x18] sm:$0xff]   ;;  %v695_v8 = vld [vmem:[%s959_s0 + $0x60] sm:$0xff]   ;;  %v697_v10 = vld [vmem:[%s959_s0 + $0x68] sm:$0xff]  }
   0x4   :  { %118 = vmatprep.subr.bf16.mxu0 %v730_v0  ;;  %240 = vmatprep.subr.bf16.mxu1 %v730_v0  ;;  %v696_v9 = vld [vmem:[%s959_s0 + $0x20] sm:$0xff]   ;;  %v698_v11 = vld [vmem:[%s959_s0 + $0x28] sm:$0xff]   ;;  %v699_v13 = vld [vmem:[%s959_s0 + $0x70] sm:$0xff]  }
   0x5   :  { %v799_v12 = vld [vmem:[%s960_s1 + $0x4] ss:$8 sps:$4 sm:$0xff]   ;;  %v700_v14 = vld [vmem:[%s959_s0 + $0x30] sm:$0xff]   ;;  %v701_v15 = vld [vmem:[%s959_s0 + $0x78] sm:$0xff]  }
   0x6   :  { %596 = vmatprep.mubr.msk.bf16.mxu0 %vm109_vm0, %v799_v12  ;;  %625 = vmatprep.mubr.msk.bf16.mxu1 %vm109_vm0, %v799_v12  ;;  %v702_v16 = vld [vmem:[%s959_s0 + $0x38] sm:$0xff]   ;;  %v703_v17 = vld [vmem:[%s959_s0 + $0x80] sm:$0xff]   ;;  %v705_v19 = vld [vmem:[%s959_s0 + $0x88] sm:$0xff]  }
   0x7   :  { %119 = vmatpush1.bf16.msra.mxu0 %v690_v3  ;;  %241 = vmatpush1.bf16.msra.mxu1 %v691_v4  ;;  %v704_v18 = vld [vmem:[%s959_s0 + $0x40] sm:$0xff]   ;;  %v709_v21 = vld [vmem:[%s959_s0 + $0x90] sm:$0xff]   ;;  %v710_v22 = vld [vmem:[%s959_s0 + $0xd8] sm:$0xff]  }
   0x8   :  { %120 = vmatprep.subr.bf16.mxu0 %v730_v0  ;;  %242 = vmatprep.subr.bf16.mxu1 %v730_v0  ;;  %v837_v20 = vld [vmem:[%s960_s1] ss:$8 sps:$4 sm:$0xff]   ;;  %v850_v23 = vld [vmem:[%s960_s1 + $0x14] ss:$8 sps:$4 sm:$0xff]   ;;  %v723_v28 = vld [vmem:[%s960_s1 + $0x10] ss:$8 sps:$4 sm:$0xff]  }
   0x9   :  { %v711_v24 = vld [vmem:[%s959_s0 + $0x98] sm:$0xff]   ;;  %v543_v25 = vld [vmem:[%s961_s2] sm:$0xff]  ;;  %v545_v27 = vld [vmem:[%s961_s2 + $0x10] sm:$0xff] }
   0xa   :  { %v712_v26 = vld [vmem:[%s959_s0 + $0xe0] sm:$0xff]   ;;  %549 = vperm.xlu0 %686, %v543_v25   ;;  %559 = vperm.xlu1 %687, %v545_v27   ;;  %v544_v30 = vld [vmem:[%s961_s2 + $0x8] sm:$0xff]  ;;  %v546_v33 = vld [vmem:[%s961_s2 + $0x18] sm:$0xff] }
   0xb   :  { %121 = vmatpush1.bf16.msra.mxu0 %v692_v5  ;;  %243 = vmatpush1.bf16.msra.mxu1 %v693_v6  ;;  %v713_v29 = vld [vmem:[%s959_s0 + $0xa0] sm:$0xff]   ;;  %v714_v31 = vld [vmem:[%s959_s0 + $0xe8] sm:$0xff]   ;;  %v716_v34 = vld [vmem:[%s959_s0 + $0xf0] sm:$0xff]  }
   0xc   :  { %122 = vmatprep.subr.bf16.mxu0 %v730_v0  ;;  %244 = vmatprep.subr.bf16.mxu1 %v730_v0  ;;  %v715_v32 = vld [vmem:[%s959_s0 + $0xa8] sm:$0xff]   ;;  %v717_v35 = vld [vmem:[%s959_s0 + $0xb0] sm:$0xff]   ;;  %v718_v36 = vld [vmem:[%s959_s0 + $0xf8] sm:$0xff]  }
   0xd   :  { %v719_v37 = vld [vmem:[%s959_s0 + $0xb8] sm:$0xff]   ;;  %v720_v38 = vld [vmem:[%s959_s0 + $0x100] sm:$0xff]   ;;  %v725_v40 = vld [vmem:[%s959_s0 + $0x108] sm:$0xff]  }
   0xe   :  { %554 = vperm.xlu0 %686, %v544_v30   ;;  %564 = vperm.xlu1 %687, %v546_v33   ;;  %v724_v39 = vld [vmem:[%s959_s0 + $0xc0] sm:$0xff]   ;;  %v726_v41 = vld [vmem:[%s959_s0 + $0xc8] sm:$0xff]   ;;  %v727_v42 = vld [vmem:[%s959_s0 + $0x110] sm:$0xff]  }
   0xf   :  { %123 = vmatpush1.bf16.msra.mxu0 %v694_v7  ;;  %245 = vmatpush1.bf16.msra.mxu1 %v695_v8  ;;  %v728_v43 = vld [vmem:[%s959_s0 + $0xd0] sm:$0xff]   ;;  %v729_v44 = vld [vmem:[%s959_s0 + $0x118] sm:$0xff]  }
  0x10   :  { %124 = vmatprep.subr.bf16.mxu0 %v730_v0  ;;  %246 = vmatprep.subr.bf16.mxu1 %v730_v0 }
  0x13   :  { %125 = vmatpush1.bf16.msra.mxu0 %v696_v9  ;;  %247 = vmatpush1.bf16.msra.mxu1 %v697_v10 }
  0x14   :  { %126 = vmatprep.subr.bf16.mxu0 %v730_v0  ;;  %248 = vmatprep.subr.bf16.mxu1 %v730_v0 }
  0x17   :  { %127 = vmatpush1.bf16.msra.mxu0 %v698_v11  ;;  %249 = vmatpush1.bf16.msra.mxu1 %v699_v13 }
  0x18   :  { %128 = vmatprep.subr.bf16.mxu0 %v730_v0  ;;  %250 = vmatprep.subr.bf16.mxu1 %v730_v0 }
  0x1b   :  { %129 = vmatpush1.bf16.msra.mxu0 %v700_v14  ;;  %251 = vmatpush1.bf16.msra.mxu1 %v701_v15 }
  0x1c   :  { %130 = vmatprep.subr.bf16.mxu0 %v730_v0  ;;  %252 = vmatprep.subr.bf16.mxu1 %v730_v0 }
  0x1f   :  { %131 = vmatpush1.bf16.msra.mxu0 %v702_v16  ;;  %253 = vmatpush1.bf16.msra.mxu1 %v703_v17 }
  0x20   :  { %132 = vmatprep.subr.bf16.mxu0 %v730_v0  ;;  %254 = vmatprep.subr.bf16.mxu1 %v730_v0 }
  0x23   :  { %133 = vmatpush1.bf16.msra.mxu0 %v704_v18  ;;  %255 = vmatpush1.bf16.msra.mxu1 %v705_v19 }
  0x24   :  { %364 = vmatprep.subr.bf16.mxu0 %v730_v0  ;;  %490 = vmatprep.subr.bf16.mxu1 %v730_v0 }
  0x26   :  { %149 = vmatmul.mubr.bf16.vlgmr.msra.gmra.mrb[0].mxu0 %v837_v20  ;;  %271 = vmatmul.mubr.bf16.vlgmr.msra.gmra.mrb[0].mxu1 %v837_v20 }
  0x27   :  { %365 = vmatpush1.bf16.msra.mxu0 %v709_v21  ;;  %491 = vmatpush1.bf16.msra.mxu1 %v710_v22 }
  0x28   :  { %366 = vmatprep.subr.bf16.mxu0 %v730_v0  ;;  %492 = vmatprep.subr.bf16.mxu1 %v730_v0 }
  0x29   :  { %597 = vmatprep.mubr.msk.bf16.mxu0 %vm109_vm0, %v850_v23  ;;  %626 = vmatprep.mubr.msk.bf16.mxu1 %vm109_vm0, %v850_v23 }
  0x2b   :  { %367 = vmatpush1.bf16.msra.mxu0 %v711_v24  ;;  %493 = vmatpush1.bf16.msra.mxu1 %v712_v26 }
  0x2c   :  { %368 = vmatprep.subr.bf16.mxu0 %v730_v0  ;;  %494 = vmatprep.subr.bf16.mxu1 %v730_v0 }
  0x2e   :  { %157 = vmatmul.mubr.bf16.gmra.mrb[4].mxu0 %v723_v28  ;;  %279 = vmatmul.mubr.bf16.gmra.mrb[4].mxu1 %v723_v28 }
  0x2f   :  { %369 = vmatpush1.bf16.msra.mxu0 %v713_v29  ;;  %495 = vmatpush1.bf16.msra.mxu1 %v714_v31 }
  0x30   :  { %370 = vmatprep.subr.bf16.mxu0 %v730_v0  ;;  %496 = vmatprep.subr.bf16.mxu1 %v730_v0 }
  0x31   :  { %654 = vmatprep.mubr.msk.bf16.mxu0 %vm109_vm0, %v799_v12  ;;  %683 = vmatprep.mubr.msk.bf16.mxu1 %vm109_vm0, %v799_v12 }
  0x33   :  { %371 = vmatpush1.bf16.msra.mxu0 %v715_v32  ;;  %497 = vmatpush1.bf16.msra.mxu1 %v716_v34 }
  0x34   :  { %372 = vmatprep.subr.bf16.mxu0 %v730_v0  ;;  %498 = vmatprep.subr.bf16.mxu1 %v730_v0 }
  0x37   :  { %373 = vmatpush1.bf16.msra.mxu0 %v717_v35  ;;  %499 = vmatpush1.bf16.msra.mxu1 %v718_v36 }
  0x38   :  { %374 = vmatprep.subr.bf16.mxu0 %v730_v0  ;;  %500 = vmatprep.subr.bf16.mxu1 %v730_v0 }
  0x3b   :  { %375 = vmatpush1.bf16.msra.mxu0 %v719_v37  ;;  %501 = vmatpush1.bf16.msra.mxu1 %v720_v38 }
  0x3c   :  { %376 = vmatprep.subr.bf16.mxu0 %v730_v0  ;;  %502 = vmatprep.subr.bf16.mxu1 %v730_v0 }
  0x3f   :  { %377 = vmatpush1.bf16.msra.mxu0 %v724_v39  ;;  %503 = vmatpush1.bf16.msra.mxu1 %v725_v40 }
  0x40   :  { %378 = vmatprep.subr.bf16.mxu0 %v730_v0  ;;  %504 = vmatprep.subr.bf16.mxu1 %v730_v0 }
  0x43   :  { %379 = vmatpush1.bf16.msra.mxu0 %v726_v41  ;;  %505 = vmatpush1.bf16.msra.mxu1 %v727_v42 }
  0x44   :  { %380 = vmatprep.subr.bf16.mxu0 %v730_v0  ;;  %506 = vmatprep.subr.bf16.mxu1 %v730_v0 }
  0x47   :  { %381 = vmatpush1.bf16.msra.mxu0 %v728_v43  ;;  %507 = vmatpush1.bf16.msra.mxu1 %v729_v44 }
  0x4a   :  { %397 = vmatmul.mubr.bf16.vlgmr.msra.gmra.mrb[8].mxu0 %v837_v20  ;;  %523 = vmatmul.mubr.bf16.vlgmr.msra.gmra.mrb[8].mxu1 %v837_v20 }
  0x4b   :  { %655 = vmatprep.mubr.msk.bf16.mxu0 %vm109_vm0, %v850_v23  ;;  %684 = vmatprep.mubr.msk.bf16.mxu1 %vm109_vm0, %v850_v23 }
  0x52   :  { %405 = vmatmul.mubr.bf16.gmra.mrb[12].mxu0 %v723_v28  ;;  %531 = vmatmul.mubr.bf16.gmra.mrb[12].mxu1 %v723_v28 }
  0x89   :  { %v550_v1 = vpop.permute.xlu0 %549  ;;  %v560_v18 = vpop.permute.xlu1 %559 }
  0x8d   :  { %v555_v13 = vpop.permute.xlu0 %554  ;;  %v565_v33 = vpop.permute.xlu1 %564 }
  0xf9   :  { %v150_v45 = vpop.f32.mrb[0].mxu0  ;;  %v272_v46 = vpop.f32.mrb[0].mxu1 }
  0xfa   :  { %v152_v47 = vpop.f32.mrb[1].mxu0  ;;  %v287_v48 = vmax.f32 %v150_v45, %v272_v46  ;;  %v274_v49 = vpop.f32.mrb[1].mxu1 }
  0xfb   :  { %v153_v50 = vpop.f32.mrb[2].mxu0  ;;  %v275_v51 = vpop.f32.mrb[2].mxu1 }
  0xfc   :  { %v155_v52 = vpop.f32.mrb[3].mxu0  ;;  %v288_v53 = vmax.f32 %v153_v50, %v275_v51  ;;  %v277_v54 = vpop.f32.mrb[3].mxu1 }
 0x101   :  { %v158_v55 = vpop.f32.mrb[4].mxu0  ;;  %v280_v57 = vpop.f32.mrb[4].mxu1 }
 0x102   :  { %v160_v56 = vpop.f32.mrb[5].mxu0  ;;  %v289_v58 = vmax.f32 %v158_v55, %v280_v57  ;;  %v282_v60 = vpop.f32.mrb[5].mxu1 }
 0x103   :  { %v161_v59 = vpop.f32.mrb[6].mxu0  ;;  %v283_v62 = vpop.f32.mrb[6].mxu1 }
 0x104   :  { %v163_v61 = vpop.f32.mrb[7].mxu0  ;;  %v290_v63 = vmax.f32 %v161_v59, %v283_v62  ;;  %v285_v0 = vpop.f32.mrb[7].mxu1 }
 0x11d   :  { %v398_v2 = vpop.f32.mrb[8].mxu0  ;;  %v524_v4 = vpop.f32.mrb[8].mxu1 }
 0x11e   :  { %v413_v3 = vmax.f32 %v287_v48, %v398_v2  ;;  %v400_v5 = vpop.f32.mrb[9].mxu0  ;;  %v526_v6 = vpop.f32.mrb[9].mxu1 }
 0x11f   :  { %v401_v7 = vpop.f32.mrb[10].mxu0  ;;  %v527_v10 = vpop.f32.mrb[10].mxu1 }
 0x120   :  { %v539_v8 = vmax.f32 %v413_v3, %v524_v4  ;;  %v414_v9 = vmax.f32 %v288_v53, %v401_v7  ;;  %v403_v11 = vpop.f32.mrb[11].mxu0  ;;  %v529_v12 = vpop.f32.mrb[11].mxu1 }
 0x122   :  { %v567_v14 = vadd.f32 %v550_v1, %v539_v8  ;;  %v540_v15 = vmax.f32 %v414_v9, %v527_v10 }
 0x124   :  { %v571_v16 = vmax.f32 %v567_v14, 0.0  ;;  %v568_v17 = vadd.f32 %v555_v13, %v540_v15 }
 0x125   :  { %v406_v19 = vpop.f32.mrb[12].mxu0  ;;  %v532_v22 = vpop.f32.mrb[12].mxu1 }
 0x126   :  { %575 = vst [vmem:[%s962_s3] sm:$0xff] %v571_v16  ;;  %v572_v20 = vmax.f32 %v568_v17, 0.0  ;;  %v415_v21 = vmax.f32 %v289_v58, %v406_v19  ;;  %v408_v23 = vpop.f32.mrb[13].mxu0  ;;  %v534_v24 = vpop.f32.mrb[13].mxu1 }
 0x127   :  { %v409_v25 = vpop.f32.mrb[14].mxu0  ;;  %v535_v28 = vpop.f32.mrb[14].mxu1 }
 0x128   :  { %576 = vst [vmem:[%s962_s3 + $0x8] sm:$0xff] %v572_v20  ;;  %v541_v26 = vmax.f32 %v415_v21, %v532_v22  ;;  %v416_v27 = vmax.f32 %v290_v63, %v409_v25  ;;  %v411_v29 = vpop.f32.mrb[15].mxu0  ;;  %v537_v30 = vpop.f32.mrb[15].mxu1 }
 0x12a   :  { %v569_v31 = vadd.f32 %v560_v18, %v541_v26  ;;  %v542_v32 = vmax.f32 %v416_v27, %v535_v28 }
 0x12c   :  { %v573_v34 = vmax.f32 %v569_v31, 0.0  ;;  %v570_v35 = vadd.f32 %v565_v33, %v542_v32 }
 0x12e   :  { %577 = vst [vmem:[%s962_s3 + $0x10] sm:$0xff] %v573_v34  ;;  %v574_v36 = vmax.f32 %v570_v35, 0.0 }
 0x130   :  { %578 = vst [vmem:[%s962_s3 + $0x18] sm:$0xff] %v574_v36 }

// kernel: forward.5
= control target key start
LH: loop header
LB: loop body
LE: loop exit
PB: predicated region body
PF: predicated region fallthrough
CT: control target
= control target key end

     0   :  { %s17990_s0 = inlined_call_operand.vmem [shape: f32[2,32,56], index: 0, kind: input, shape index: {}]   ;;  %s17991_s1 = inlined_call_operand.vmem [shape: bf16[2,32,96], index: 1, kind: input, shape index: {}]   ;;  %s17992_s2 = inlined_call_operand.vmem [shape: f32[2,1,96], index: 2, kind: input, shape index: {}]   ;;  %s17993_s3 = inlined_call_operand.vmem [shape: bf16[2,32,32], index: 3, kind: input, shape index: {}]   ;;  %s17994_s4 = inlined_call_operand.vmem [shape: f32[2,1,32], index: 4, kind: input, shape index: {}]   ;;  %s17995_s5 = inlined_call_operand.vmem [shape: f32[2,1,32], index: 5, kind: input, shape index: {}]   ;;  %s17996_s6 = inlined_call_operand.vmem [shape: f32[2,1,32], index: 6, kind: input, shape index: {}]   ;;  %s17997_s7 = inlined_call_operand.vmem [shape: bf16[2,32,2048], index: 7, kind: input, shape index: {}]   ;;  %s17998_s8 = inlined_call_operand.vmem [shape: bf16[2,1,2048], index: 8, kind: input, shape index: {}]   ;;  %s17999_s9 = inlined_call_operand.vmem [shape: bf16[2,2048,32], index: 9, kind: input, shape index: {}]   ;;  %s18000_s10 = inlined_call_operand.vmem [shape: f32[2,1,32], index: 10, kind: input, shape index: {}]   ;;  %s18001_s11 = inlined_call_operand.vmem [shape: f32[2,1,32], index: 11, kind: input, shape index: {}]   ;;  %s18002_s12 = inlined_call_operand.vmem [shape: f32[2,1,32], index: 12, kind: input, shape index: {}]   ;;  %s18003_s13 = inlined_call_operand.vmem [shape: f32[1,56], index: 13, kind: input, shape index: {}]   ;;  %s18004_s14 = inlined_call_operand.vmem [shape: f32[32,10], index: 14, kind: input, shape index: {}]   ;;  %s18005_s15 = inlined_call_operand.vmem [shape: f32[1,10], index: 15, kind: input, shape index: {}]   ;;  %s18006_s16 = inlined_call_operand.hbm [shape: f32[2,1,10], index: 16, kind: output, shape index: {}]  }
   0x1   :  { %18047 = sst [smem:[#allocation10_spill]] %s17990_s0 }
   0x2   :  { %18048 = sst [smem:[#allocation11_spill]] %s17991_s1 }
   0x3   :  { %21 = vsyncpa [#allocation3], 0 }
   0x4   :  { %23 = vsyncpa [#allocation3 + $0x1], 0  ;;  %s14124_s21 = smov 0   ;;  %s14126_s22 = smov 0  }
   0x5   :  { %s14128_s23 = smov 0   ;;  %s14130_s24 = smov 0  }
   0x6 LB: > { %18049 = sst [smem:[#allocation5_spill]] %s14012_s23  ;;  %s14145_s25 = sadd.s32 4294967295, %s14016_s24   ;;  %s14016_s24 = sphi %s14130_s24, %s18079_s24   ;;  %s14012_s23 = sphi %s14128_s23, %s18081_s23   ;;  %s14008_s22 = sphi %s14126_s22, %s18083_s22   ;;  %s14004_s21 = sphi %s14124_s21, %s18082_s21  }
   0x7   : > { %s10390_s26 = sadd.s32 4294967294, %s14016_s24   ;;  %s14149_s27 = sadd.s32 1, %s14016_s24  }
   0x8   : > { %18050 = sst [smem:[#allocation6_spill]] %s14149_s27  ;;  %s377_s28 = sadd.s32 1, %s14012_s23 }
   0x9   : > { %s374_s29 = ssub.s32 %s14016_s24, %s14149_s27  ;;  %p387_p0 = scmp.ne.s32.totalorder %s14012_s23, %s14008_s22 }
   0xa   : > { %p375_p1 = scmp.eq.s32.totalorder %s374_s29, 0  ;;  %p388_p2 = scmp.eq.s32.totalorder %s14145_s25, 1 }
   0xb   : > { %p393_p3 = scmp.ne.s32.totalorder %s14008_s22, %s14004_s21  ;;  %p394_p4 = scmp.eq.s32.totalorder %s10390_s26, 1 }
   0xc   : > { %s14160_s30 = scalar_select %p375_p1, %s14012_s23, %s377_s28  }
   0xd   : > { %p14162_p5 = por %p388_p2, %p387_p0  ;;  %p14166_p6 = por %p394_p4, %p393_p3 }
   0xe   : > { %18051 = sst [smem:[#allocation7_spill]] %s14160_s30  ;;  %p10393_p7 = scmp.ge.s32.totalorder %s14016_s24, 1 }
   0xf   : > { %s18053_s17 = scalar_select %p14166_p6, 1, 0 }
  0x10   : > { %p465_p8 = scmp.lt.s32.totalorder %s14016_s24, 3 }
  0x11   : > { %18054 = sst [smem:[#allocation8_spill]] %s18053_s17 }
  0x12   : > { %p466_p9 = pnand %p10393_p7, %p465_p8 }
  0x14   : > { %469 = sbr.rel (%p466_p9) target bundleno = 6803 (0x1a93), region = 84 }
  0x1b   : > { %p514_p10 = scmp.lt.s32.totalorder %s14145_s25, 1  ;;  %s18055_s28 = sld [smem:[#allocation10_spill]]  ;;  %vm587_vm0 = vcmask 261120   ;;  %v18041_v17 = vmov 0.0|0.0   ;;  %v10396_v19 = vld [vmem:[%s17992_s2] ss:$0 sm:$0xff] }
  0x1c   : > { %s18056_s1 = sld [smem:[#allocation11_spill]]  ;;  %12834 = vmatprep.subr.bf16.mxu1 %v18041_v17  ;;  %s18017_s30 = smov 64   ;;  %vm14021_vm1 = vmmov 0   ;;  %v18043_v37 = vmov 0.0   ;;  %vm692_vm2 = vcmask 64512   ;;  %vm828_vm5 = vcmask 457728  }
  0x1d   : > { %s515_s18 = scalar_select %p514_p10, %s14145_s25, 1  ;;  %12224 = vmatprep.mubr.msk.f32.mxu1 %vm14021_vm1, %v18043_v37  ;;  %vm14246_vm3 = vmpackc.low %vm692_vm2, %vm692_vm2  ;;  %vm2264_vm6 = vcmask 130048   ;;  %vm2272_vm7 = vcmask 195584   ;;  %vm10320_vm8 = vcmask 73728  }
  0x1e   : > { %s18037_s17 = smov 96   ;;  %s18033_s20 = smov 120  }
  0x1f   : > { %s11296_s19 = sshll.u32 %s515_s18, 5  ;;  %s18035_s18 = smov 88  }
  0x20   : > { %s18029_s26 = smov 72   ;;  %s18011_s23 = smov 56  }
  0x21   : > { %s518_s29 = scalar_lea.vmem %s18055_s28, %s11296_s19  ;;  %s18031_s19 = smov 80  }
  0x22   : > { %v520_v0 = vld [vmem:[%s518_s29] sm:$0xff]  ;;  %v521_v1 = vld [vmem:[%s518_s29 + $0x8] sm:$0xff]  ;;  %v522_v3 = vld [vmem:[%s518_s29 + $0x10] sm:$0xff]  ;;  %s18021_s28 = smov 112   ;;  %s18015_s27 = smov 48  }
  0x23   : > { %524 = vxpose.xlu0.b32.start [1/4] (short) (narrow) %v520_v0, 56  ;;  %v13406_v2 = vld [vmem:[%s18056_s1] sm:$0xff]   ;;  %v523_v4 = vld [vmem:[%s518_s29 + $0x18] sm:$0xff]  ;;  %v13407_v5 = vld [vmem:[%s18056_s1 + $0x8] sm:$0xff]   ;;  %s18019_s29 = smov 104  }
  0x24   : > { %12198 = vmatprep.subr.bf16.mxu0 %v13406_v2 }
  0x25   : > { %12199 = vmatpush3.bf16.msra.mxu0 %v13406_v2 }
  0x26   : > { %12200 = vmatprep.subr.bf16.mxu0 %v13407_v5 }
  0x27   : > { %525 = vxpose.xlu0.b32.cont [2/4] (short) (narrow) %v521_v1, 56 }
  0x29   : > { %12201 = vmatpush3.bf16.msra.mxu0 %v13407_v5  ;;  %v14023_v5 = vmov -1e+30  }
  0x2a   : > { %12846 = vmatprep.subr.bf16.mxu0 %v18041_v17 }
  0x2b   : > { %526 = vxpose.xlu0.b32.cont [3/4] (short) (narrow) %v522_v3, 56  ;;  %v556_v3 = vlaneseq }
  0x2f   : > { %527 = vxpose.xlu0.b32.end [4/4] (short) (narrow) %v523_v4, 56  ;;  %v557_v4 = vand.u32 127, %v556_v3 }
  0x31   : > { %vm558_vm4 = vcmp.lt.s32.totalorder %v557_v4, 49 }
  0xa3   : > { %v14183_v6 = vpop.trf.xlu0 }
  0xa7   : > { %v14185_v7 = vpop.trf.xlu0 }
  0xa8   : > { %v560_v8 = vpack.c.bf16 %v14185_v7, %v14183_v6 }
  0xaa   : > { %12202 = vmatprep.mubr.msk.bf16.mxu0 %vm587_vm0, %v560_v8  ;;  %v14309_v8 = vsel %vm558_vm4, 0.0, %v14023_v5 }
  0xab   : > { %v14190_v9 = vpop.trf.xlu0 }
  0xaf   : > { %v14192_v10 = vpop.trf.xlu0 }
  0xb0   : > { %v561_v11 = vpack.c.bf16 %v14192_v10, %v14190_v9 }
  0xb2   : > { %12203 = vmatmul.mubr.msk.bf16.vlgmr.msra.gmra.mrb[0].mxu0 %vm587_vm0, %v561_v11 }
  0xb3   : > { %v14197_v12 = vpop.trf.xlu0 }
  0xb7   : > { %v14199_v13 = vpop.trf.xlu0 }
  0xb8   : > { %v562_v14 = vpack.c.bf16 %v14199_v13, %v14197_v12 }
  0xba   : > { %12206 = vmatprep.mubr.msk.bf16.mxu0 %vm587_vm0, %v562_v14 }
  0xbb   : > { %v14204_v15 = vpop.trf.xlu0 }
  0xbc   : > { %v563_v16 = vpack.c.bf16 %v14204_v15, %v14204_v15 }
  0xbe   : > { %12207 = vmatmul.mubr.msk.bf16.gmra.mrb[4].mxu0 %vm587_vm0, %v563_v16 }
  0xbf   : > { %12259 = vmatprep.mubr.msk.f32.mxu0 %vm14021_vm1, %v18043_v37 }
 0x185   : > { %v12204_v18 = vpop.f32.mrb[0].mxu0 }
 0x186   : > { %v634_v20 = vpop.f32.mrb[1].mxu0  ;;  %v14214_v22 = vadd.f32 %v12204_v18, %v10396_v19 }
 0x187   : > { %v12205_v21 = vpop.f32.mrb[2].mxu0  ;;  %v635_v25 = vadd.f32 %v10396_v19, %v634_v20 }
 0x188   : > { %v14216_v23 = vadd.f32 %v12205_v21, %v10396_v19  ;;  %v637_v24 = vpop.f32.mrb[3].mxu0  ;;  %v14276_v62 = vmul.f32 0.35355338, %v14214_v22 }
 0x189   : > { %v638_v26 = vadd.f32 %v10396_v19, %v637_v24  ;;  %v14261_v60 = vmul.f32 0.35355338, %v635_v25 }
 0x18a   : > { %v14220_v27 = vpack.i.bf16 %v14216_v23, %v14214_v22  ;;  %v14283_v63 = vmul.f32 0.35355338, %v14216_v23 }
 0x18b   : > { %v14222_v28 = vpack.i.bf16 %v638_v26, %v635_v25  ;;  %v14269_v61 = vmul.f32 0.35355338, %v638_v26 }
 0x18c   : > { %13097 = vrot.lane.b32.xlu0 %v14220_v27, %s18017_s30 }
 0x18d   : > { %13077 = vrot.lane.b32.xlu1 %v14222_v28, %s18037_s17 }
 0x191   : > { %13082 = vrot.lane.b32.xlu1 %v14220_v27, %s18037_s17  ;;  %v12208_v29 = vpop.f32.mrb[4].mxu0 }
 0x192   : > { %v650_v30 = vpop.f32.mrb[5].mxu0  ;;  %v14234_v36 = vadd.f32 %v12208_v29, %v10396_v19 }
 0x193   : > { %v651_v31 = vadd.f32 %v10396_v19, %v650_v30  ;;  %v12209_v32 = vpop.f32.mrb[6].mxu0 }
 0x194   : > { %v653_v33 = vpop.f32.mrb[7].mxu0  ;;  %v14302_v2 = vmul.f32 0.35355338, %v14234_v36 }
 0x195   : > { %v654_v34 = vadd.f32 %v10396_v19, %v653_v33  ;;  %v14289_v0 = vmul.f32 0.35355338, %v651_v31 }
 0x197   : > { %v14230_v35 = vpack.i.bf16 %v654_v34, %v651_v31  ;;  %v14295_v1 = vmul.f32 0.35355338, %v654_v34 }
 0x199   : > { %13087 = vrot.lane.b32.xlu1 %v14230_v35, %s18037_s17 }
 0x19d   : > { %690 = vrot.lane.b32.xlu1 %v14234_v36, %s18037_s17  ;;  %s18066_s17 = smov 104  }
 0x1a1   : > { %13092 = vrot.lane.b32.xlu1 %v14222_v28, %s18017_s30 }
 0x1fe   : > { %v13098_v52 = vpop.permute.xlu0 %13097 }
 0x1ff   : > { %v13078_v38 = vpop.permute.xlu1 %13077  ;;  %v13100_v56 = vunpack.i.h.bf16 %v13098_v52  ;;  %v13099_v57 = vunpack.i.l.bf16 %v13098_v52 }
 0x200   : > { %v13080_v39 = vunpack.i.h.bf16 %v13078_v38  ;;  %v13079_v40 = vunpack.i.l.bf16 %v13078_v38 }
 0x201   : > { %v12850_v59 = vpack.c.bf16 %v13100_v56, %v13099_v57 }
 0x202   : > { %v12835_v42 = vpack.c.bf16 %v13080_v39, %v13079_v40 }
 0x203   : > { %v13083_v43 = vpop.permute.xlu1 %13082 }
 0x204   : > { %12837 = vmatpush3.bf16.xpose.msk.msra.mxu1 %vm14246_vm3, %v12835_v42  ;;  %v13085_v44 = vunpack.i.h.bf16 %v13083_v43  ;;  %v13084_v45 = vunpack.i.l.bf16 %v13083_v43 }
 0x205   : > { %12838 = vmatprep.subr.bf16.mxu1 %v18041_v17 }
 0x206   : > { %v12839_v46 = vpack.c.bf16 %v13085_v44, %v13084_v45 }
 0x20b   : > { %v13088_v47 = vpop.permute.xlu1 %13087 }
 0x20c   : > { %12841 = vmatpush3.bf16.xpose.msk.msra.mxu1 %vm14246_vm3, %v12839_v46  ;;  %v13090_v48 = vunpack.i.h.bf16 %v13088_v47  ;;  %v13089_v49 = vunpack.i.l.bf16 %v13088_v47 }
 0x20d   : > { %12842 = vmatprep.subr.bf16.mxu1 %v18041_v17 }
 0x20e   : > { %v12843_v51 = vpack.c.bf16 %v13090_v48, %v13089_v49 }
 0x20f   : > { %v691_v50 = vpop.permute.xlu1 %690 }
 0x213   : > { %v13093_v53 = vpop.permute.xlu1 %13092 }
 0x214   : > { %v13095_v54 = vunpack.i.h.bf16 %v13093_v53  ;;  %v13094_v55 = vunpack.i.l.bf16 %v13093_v53  ;;  %12845 = vmatpush3.bf16.xpose.msk.msra.mxu1 %vm14246_vm3, %v12843_v51 }
 0x215   : > { %12222 = vmatprep.subr.mxu1 %v18043_v37 }
 0x216   : > { %v12847_v58 = vpack.c.bf16 %v13095_v54, %v13094_v55 }
 0x218   : > { %12848 = vmatpush3.bf16.msra.mxu0 %v12847_v58 }
 0x219   : > { %12849 = vmatprep.subr.bf16.mxu0 %v18041_v17 }
 0x21c   : > { %12223 = vmatpush3.xpose.msk.msra.mxu1 %vm692_vm2, %v691_v50  ;;  %12851 = vmatpush3.bf16.msra.mxu0 %v12850_v59 }
 0x21d   : > { %12852 = vmatprep.subr.bf16.mxu0 %v18041_v17  ;;  %12867 = vmatprep.subr.bf16.mxu1 %v18041_v17 }
 0x21f   : > { %12225 = vmatmul.mubr.msk.f32.vlgmr.msra.gmra.mrb[0].mxu1 %vm692_vm2, %v14261_v60 }
 0x220   : > { %12227 = vmatprep.mubr.msk.f32.mxu1 %vm14021_vm1, %v18043_v37 }
 0x223   : > { %12228 = vmatmul.mubr.msk.f32.gmra.mrb[2].mxu1 %vm692_vm2, %v14269_v61 }
 0x224   : > { %12230 = vmatprep.mubr.msk.f32.mxu1 %vm14021_vm1, %v18043_v37 }
 0x227   : > { %12231 = vmatmul.mubr.msk.f32.gmra.mrb[4].mxu1 %vm692_vm2, %v14276_v62 }
 0x228   : > { %12233 = vmatprep.mubr.msk.f32.mxu1 %vm14021_vm1, %v18043_v37 }
 0x22b   : > { %12234 = vmatmul.mubr.msk.f32.gmra.mrb[6].mxu1 %vm692_vm2, %v14283_v63 }
 0x22c   : > { %12236 = vmatprep.mubr.msk.f32.mxu1 %vm14021_vm1, %v18043_v37 }
 0x22f   : > { %12237 = vmatmul.mubr.msk.f32.gmra.mrb[8].mxu1 %vm692_vm2, %v14289_v0 }
 0x230   : > { %12239 = vmatprep.mubr.msk.f32.mxu1 %vm14021_vm1, %v18043_v37 }
 0x233   : > { %12240 = vmatmul.mubr.msk.f32.gmra.mrb[10].mxu1 %vm692_vm2, %v14295_v1 }
 0x234   : > { %12242 = vmatprep.mubr.msk.f32.mxu1 %vm14021_vm1, %v18043_v37 }
 0x237   : > { %12243 = vmatmul.mubr.msk.f32.gmra.mrb[12].mxu1 %vm692_vm2, %v14302_v2 }
 0x238   : > { %12329 = vmatprep.mubr.msk.f32.mxu1 %vm14021_vm1, %v18043_v37 }
 0x2f2   : > { %v794_v11 = vpop.f32.mrb[0].mxu1 }
 0x2f3   : > { %v12226_v14 = vpop.f32.mrb[1].mxu1  ;;  %v795_v16 = vadd.f32 %v794_v11, %v14309_v8 }
 0x2f5   : > { %v829_v18 = vsel %vm828_vm5, %v795_v16, -inf }
 0x2f6   : > { %830 = vmax.xlane.f32.xlu0 %v829_v18  ;;  %v799_v19 = vpop.f32.mrb[2].mxu1 }
 0x2f7   : > { %v12229_v20 = vpop.f32.mrb[3].mxu1  ;;  %v800_v21 = vadd.f32 %v799_v19, %v14309_v8 }
 0x2f9   : > { %v832_v22 = vsel %vm828_vm5, %v800_v21, -inf }
 0x2fa   : > { %833 = vmax.xlane.f32.xlu1 %v832_v22  ;;  %v804_v23 = vpop.f32.mrb[4].mxu1 }
 0x2fb   : > { %v12232_v24 = vpop.f32.mrb[5].mxu1  ;;  %v805_v25 = vadd.f32 %v804_v23, %v14309_v8 }
 0x2fd   : > { %v835_v26 = vsel %vm828_vm5, %v805_v25, -inf }
 0x2fe   : > { %836 = vmax.xlane.f32.xlu1 %v835_v26  ;;  %v809_v29 = vpop.f32.mrb[6].mxu1 }
 0x2ff   : > { %v12235_v30 = vpop.f32.mrb[7].mxu1  ;;  %v810_v31 = vadd.f32 %v809_v29, %v14309_v8 }
 0x301   : > { %v838_v32 = vsel %vm828_vm5, %v810_v31, -inf }
 0x302   : > { %839 = vmax.xlane.f32.xlu1 %v838_v32  ;;  %v814_v33 = vpop.f32.mrb[8].mxu1 }
 0x303   : > { %v12238_v34 = vpop.f32.mrb[9].mxu1  ;;  %v815_v38 = vadd.f32 %v814_v33, %v14309_v8 }
 0x305   : > { %v841_v39 = vsel %vm828_vm5, %v815_v38, -inf }
 0x306   : > { %842 = vmax.xlane.f32.xlu1 %v841_v39  ;;  %v819_v40 = vpop.f32.mrb[10].mxu1 }
 0x307   : > { %v12241_v42 = vpop.f32.mrb[11].mxu1  ;;  %v14322_v43 = vadd.f32 %v819_v40, %v14309_v8 }
 0x309   : > { %v844_v44 = vsel %vm828_vm5, %v14322_v43, -inf }
 0x30a   : > { %845 = vmax.xlane.f32.xlu1 %v844_v44  ;;  %v824_v45 = vpop.f32.mrb[12].mxu1 }
 0x30b   : > { %v12244_v46 = vpop.f32.mrb[13].mxu1  ;;  %v825_v47 = vadd.f32 %v824_v45, %v14309_v8 }
 0x30c   : > { %13102 = vrot.lane.b32.xlu0 %v14230_v35, %s18017_s30 }
 0x30d   : > { %v847_v48 = vsel %vm828_vm5, %v825_v47, -inf }
 0x30e   : > { %848 = vmax.xlane.f32.xlu1 %v847_v48 }
 0x31f   : > { %918 = vrot.lane.b32.xlu1 %v14234_v36, %s18017_s30  ;;  %s18064_s30 = smov 72  }
 0x383   : > { %v831_v49 = vpop.xlane.xlu0 %830 }
 0x384   : > { %v850_v50 = vsub.f32 %v795_v16, %v831_v49 }
 0x386   : > { %v857_v51 = vmul.f32 1.442695, %v850_v50 }
 0x387   : > { %v834_v52 = vpop.xlane.xlu1 %833  ;;  %v13103_v53 = vpop.permute.xlu0 %13102 }
 0x388   : > { %13674 = vpow2.f32 %v857_v51  ;;  %v851_v54 = vsub.f32 %v800_v21, %v834_v52  ;;  %v13105_v55 = vunpack.i.h.bf16 %v13103_v53  ;;  %v13104_v56 = vunpack.i.l.bf16 %v13103_v53 }
 0x38a   : > { %v859_v57 = vmul.f32 1.442695, %v851_v54  ;;  %v12853_v58 = vpack.c.bf16 %v13105_v55, %v13104_v56 }
 0x38b   : > { %v837_v59 = vpop.xlane.xlu1 %836 }
 0x38c   : > { %13676 = vpow2.f32 %v859_v57  ;;  %v852_v4 = vsub.f32 %v805_v25, %v837_v59  ;;  %12854 = vmatpush3.bf16.msra.mxu0 %v12853_v58 }
 0x38d   : > { %12257 = vmatprep.subr.mxu0 %v18043_v37 }
 0x38e   : > { %v861_v5 = vmul.f32 1.442695, %v852_v4 }
 0x38f   : > { %v840_v11 = vpop.xlane.xlu1 %839 }
 0x390   : > { %13678 = vpow2.f32 %v861_v5  ;;  %v853_v14 = vsub.f32 %v810_v31, %v840_v11 }
 0x392   : > { %v14333_v16 = vpop.eup %13674  ;;  %v863_v18 = vmul.f32 1.442695, %v853_v14 }
 0x393   : > { %v843_v19 = vpop.xlane.xlu1 %842  ;;  %v871_v20 = vsel %vm828_vm5, %v14333_v16, 0.0 }
 0x394   : > { %13680 = vpow2.f32 %v863_v18  ;;  %v854_v21 = vsub.f32 %v815_v38, %v843_v19  ;;  %872 = vadd.xlane.f32.xlu1 %v871_v20 }
 0x396   : > { %v14337_v22 = vpop.eup %13676  ;;  %v865_v23 = vmul.f32 1.442695, %v854_v21 }
 0x397   : > { %v846_v24 = vpop.xlane.xlu1 %845  ;;  %v874_v25 = vsel %vm828_vm5, %v14337_v22, 0.0 }
 0x398   : > { %13682 = vpow2.f32 %v865_v23  ;;  %875 = vadd.xlane.f32.xlu0 %v874_v25  ;;  %v855_v40 = vsub.f32 %v14322_v43, %v846_v24 }
 0x39a   : > { %v14341_v26 = vpop.eup %13678  ;;  %v867_v44 = vmul.f32 1.442695, %v855_v40 }
 0x39b   : > { %v849_v29 = vpop.xlane.xlu1 %848  ;;  %v877_v30 = vsel %vm828_vm5, %v14341_v26, 0.0 }
 0x39c   : > { %878 = vadd.xlane.f32.xlu0 %v877_v30  ;;  %v856_v39 = vsub.f32 %v825_v47, %v849_v29 }
 0x39e   : > { %v14345_v31 = vpop.eup %13680  ;;  %v869_v42 = vmul.f32 1.442695, %v856_v39 }
 0x39f   : > { %v919_v32 = vpop.permute.xlu1 %918  ;;  %v880_v33 = vsel %vm828_vm5, %v14345_v31, 0.0 }
 0x3a0   : > { %881 = vadd.xlane.f32.xlu1 %v880_v33  ;;  %12258 = vmatpush3.msra.mxu0 %v919_v32  ;;  %13684 = vpow2.f32 %v869_v42 }
 0x3a1   : > { %12855 = vmatprep.subr.bf16.mxu0 %v18041_v17  ;;  %13686 = vpow2.f32 %v867_v44 }
 0x3a2   : > { %v14350_v34 = vpop.eup %13682 }
 0x3a3   : > { %v883_v38 = vsel %vm828_vm5, %v14350_v34, 0.0 }
 0x3a4   : > { %884 = vadd.xlane.f32.xlu0 %v883_v38 }
 0x3aa   : > { %v14363_v45 = vpop.eup %13684 }
 0x3ab   : > { %v889_v46 = vsel %vm828_vm5, %v14363_v45, 0.0  ;;  %v14367_v48 = vpop.eup %13686 }
 0x3ac   : > { %v886_v49 = vsel %vm828_vm5, %v14367_v48, 0.0 }
 0x3b1   : > { %13112 = vrot.lane.b32.xlu1 %v14220_v27, %s18035_s18 }
 0x3b5   : > { %13117 = vrot.lane.b32.xlu1 %v14230_v35, %s18035_s18 }
 0x3b9   : > { %1074 = vrot.lane.b32.xlu1 %v14234_v36, %s18035_s18 }
 0x3ba   : > { %13107 = vrot.lane.b32.xlu0 %v14222_v28, %s18035_s18  ;;  %s18068_s18 = smov 56  }
 0x3d9   : > { %890 = vadd.xlane.f32.xlu0 %v889_v46 }
 0x3dd   : > { %887 = vadd.xlane.f32.xlu1 %v886_v49 }
 0x3ee   : > { %13122 = vrot.lane.b32.xlu1 %v14222_v28, %s18031_s19 }
 0x3ef   : > { %1048 = vrot.lane.b32.xlu0 %v14261_v60, %s18033_s20 }
 0x3f2   : > { %1050 = vrot.lane.b32.xlu1 %v14269_v61, %s18033_s20 }
 0x3f3   : > { %13127 = vrot.lane.b32.xlu0 %v14220_v27, %s18031_s19 }
 0x3f6   : > { %1052 = vrot.lane.b32.xlu1 %v14276_v62, %s18033_s20 }
 0x3f7   : > { %1054 = vrot.lane.b32.xlu0 %v14283_v63, %s18033_s20 }
 0x3fa   : > { %13132 = vrot.lane.b32.xlu1 %v14230_v35, %s18031_s19 }
 0x3fb   : > { %1056 = vrot.lane.b32.xlu0 %v14289_v0, %s18033_s20 }
 0x3fe   : > { %1058 = vrot.lane.b32.xlu1 %v14295_v1, %s18033_s20 }
 0x3ff   : > { %1060 = vrot.lane.b32.xlu0 %v14302_v2, %s18033_s20  ;;  %s18063_s20 = smov 80  }
 0x402   : > { %1449 = vrot.lane.b32.xlu1 %v14234_v36, %s18031_s19  ;;  %s18062_s19 = smov 120  }
 0x403   : > { %13137 = vrot.lane.b32.xlu0 %v14222_v28, %s18029_s26 }
 0x406   : > { %1423 = vrot.lane.b32.xlu1 %v14261_v60, %s18021_s28 }
 0x407   : > { %1425 = vrot.lane.b32.xlu0 %v14269_v61, %s18021_s28 }
 0x40a   : > { %13142 = vrot.lane.b32.xlu1 %v14220_v27, %s18029_s26 }
 0x40b   : > { %1427 = vrot.lane.b32.xlu0 %v14276_v62, %s18021_s28 }
 0x40e   : > { %1429 = vrot.lane.b32.xlu1 %v14283_v63, %s18021_s28 }
 0x40f   : > { %13147 = vrot.lane.b32.xlu0 %v14230_v35, %s18029_s26 }
 0x412   : > { %1431 = vrot.lane.b32.xlu1 %v14289_v0, %s18021_s28 }
 0x413   : > { %1433 = vrot.lane.b32.xlu0 %v14295_v1, %s18021_s28 }
 0x416   : > { %1435 = vrot.lane.b32.xlu1 %v14302_v2, %s18021_s28  ;;  %s18023_s28 = smov 24  }
 0x417   : > { %1824 = vrot.lane.b32.xlu0 %v14234_v36, %s18029_s26  ;;  %s18060_s26 = smov 96  }
 0x41a   : > { %1798 = vrot.lane.b32.xlu1 %v14261_v60, %s18019_s29 }
 0x41b   : > { %1800 = vrot.lane.b32.xlu0 %v14269_v61, %s18019_s29 }
 0x41e   : > { %1802 = vrot.lane.b32.xlu1 %v14276_v62, %s18019_s29 }
 0x41f   : > { %1804 = vrot.lane.b32.xlu0 %v14283_v63, %s18019_s29 }
 0x421   : > { %v873_v43 = vpop.xlane.xlu1 %872 }
 0x422   : > { %13688 = vrcp.f32 %v873_v43  ;;  %1806 = vrot.lane.b32.xlu1 %v14289_v0, %s18019_s29 }
 0x423   : > { %1808 = vrot.lane.b32.xlu0 %v14295_v1, %s18019_s29 }
 0x425   : > { %v876_v47 = vpop.xlane.xlu0 %875 }
 0x426   : > { %13690 = vrcp.f32 %v876_v47  ;;  %1810 = vrot.lane.b32.xlu1 %v14302_v2, %s18019_s29  ;;  %s18065_s29 = smov 112  }
 0x427   : > { %13152 = vrot.lane.b32.xlu0 %v14222_v28, %s18011_s23 }
 0x429   : > { %v879_v60 = vpop.xlane.xlu0 %878 }
 0x42a   : > { %13692 = vrcp.f32 %v879_v60  ;;  %13157 = vrot.lane.b32.xlu1 %v14220_v27, %s18011_s23 }
 0x42b   : > { %1293 = vrot.lane.b32.xlu0 %v14234_v36, %s18011_s23 }
 0x42c   : > { %v13689_v61 = vpop.eup %13688 }
 0x42d   : > { %v899_v62 = vmul.f32 %v13689_v61, %v14333_v16  ;;  %v882_v63 = vpop.xlane.xlu1 %881 }
 0x42e   : > { %13694 = vrcp.f32 %v882_v63  ;;  %13162 = vrot.lane.b32.xlu1 %v14230_v35, %s18011_s23  ;;  %s18013_s23 = smov 40  }
 0x42f   : > { %12260 = vmatmul.mubr.msk.f32.vlgmr.msra.gmra.mrb[8].mxu0 %vm828_vm5, %v899_v62 }
 0x430   : > { %v13691_v0 = vpop.eup %13690  ;;  %12262 = vmatprep.mubr.msk.f32.mxu0 %vm14021_vm1, %v18043_v37 }
 0x431   : > { %v885_v1 = vpop.xlane.xlu0 %884  ;;  %v900_v2 = vmul.f32 %v13691_v0, %v14337_v22  ;;  %v13113_v57 = vpop.permute.xlu1 %13112 }
 0x432   : > { %13696 = vrcp.f32 %v885_v1  ;;  %13167 = vrot.lane.b32.xlu1 %v14222_v28, %s18015_s27  ;;  %v13115_v4 = vunpack.i.h.bf16 %v13113_v57  ;;  %v13114_v5 = vunpack.i.l.bf16 %v13113_v57 }
 0x433   : > { %12263 = vmatmul.mubr.msk.f32.gmra.mrb[10].mxu0 %vm828_vm5, %v900_v2 }
 0x434   : > { %v13693_v50 = vpop.eup %13692  ;;  %12265 = vmatprep.mubr.msk.f32.mxu0 %vm14021_vm1, %v18043_v37  ;;  %v12860_v14 = vpack.c.bf16 %v13115_v4, %v13114_v5 }
 0x435   : > { %v13108_v51 = vpop.permute.xlu0 %13107  ;;  %v901_v52 = vmul.f32 %v13693_v50, %v14341_v26  ;;  %v13118_v16 = vpop.permute.xlu1 %13117 }
 0x436   : > { %v13110_v53 = vunpack.i.h.bf16 %v13108_v51  ;;  %v13109_v54 = vunpack.i.l.bf16 %v13108_v51  ;;  %v13120_v18 = vunpack.i.h.bf16 %v13118_v16  ;;  %v13119_v19 = vunpack.i.l.bf16 %v13118_v16 }
 0x437   : > { %12266 = vmatmul.mubr.msk.f32.gmra.mrb[12].mxu0 %vm828_vm5, %v901_v52 }
 0x438   : > { %v13695_v55 = vpop.eup %13694  ;;  %v12856_v56 = vpack.c.bf16 %v13110_v53, %v13109_v54  ;;  %12268 = vmatprep.mubr.msk.f32.mxu0 %vm14021_vm1, %v18043_v37  ;;  %v12864_v20 = vpack.c.bf16 %v13120_v18, %v13119_v19 }
 0x439   : > { %v902_v58 = vmul.f32 %v13695_v55, %v14345_v31  ;;  %v1075_v21 = vpop.permute.xlu1 %1074 }
 0x43a   : > { %12858 = vmatpush3.bf16.xpose.msk.msra.mxu0 %vm14246_vm3, %v12856_v56 }
 0x43b   : > { %12269 = vmatmul.mubr.msk.f32.gmra.mrb[14].mxu0 %vm828_vm5, %v902_v58  ;;  %12859 = vmatprep.subr.bf16.mxu0 %v18041_v17 }
 0x43c   : > { %v13697_v59 = vpop.eup %13696  ;;  %12271 = vmatprep.mubr.msk.f32.mxu0 %vm14021_vm1, %v18043_v37 }
 0x43d   : > { %v903_v11 = vmul.f32 %v13697_v59, %v14350_v34 }
 0x43f   : > { %12272 = vmatmul.mubr.msk.f32.gmra.mrb[16].mxu0 %vm828_vm5, %v903_v11 }
 0x440   : > { %12274 = vmatprep.mubr.msk.f32.mxu0 %vm14021_vm1, %v18043_v37 }
 0x442   : > { %12862 = vmatpush3.bf16.xpose.msk.msra.mxu0 %vm14246_vm3, %v12860_v14 }
 0x443   : > { %12863 = vmatprep.subr.bf16.mxu0 %v18041_v17 }
 0x44a   : > { %12866 = vmatpush3.bf16.xpose.msk.msra.mxu0 %vm14246_vm3, %v12864_v20 }
 0x44b   : > { %12292 = vmatprep.subr.mxu0 %v18043_v37 }
 0x452   : > { %12293 = vmatpush3.xpose.msk.msra.mxu0 %vm692_vm2, %v1075_v21 }
 0x453   : > { %12876 = vmatprep.subr.bf16.mxu0 %v18041_v17 }
 0x466   : > { %v891_v22 = vpop.xlane.xlu0 %890 }
 0x46a   : > { %v888_v23 = vpop.xlane.xlu1 %887  ;;  %v1049_v24 = vpop.permute.xlu0 %1048 }
 0x46b   : > { %13698 = vrcp.f32 %v888_v23 }
 0x46c   : > { %13700 = vrcp.f32 %v891_v22 }
 0x46e   : > { %v13123_v25 = vpop.permute.xlu1 %13122  ;;  %v13128_v26 = vpop.permute.xlu0 %13127 }
 0x46f   : > { %v13125_v44 = vunpack.i.h.bf16 %v13123_v25  ;;  %v13124_v46 = vunpack.i.l.bf16 %v13123_v25  ;;  %v13130_v60 = vunpack.i.h.bf16 %v13128_v26  ;;  %v13129_v61 = vunpack.i.l.bf16 %v13128_v26 }
 0x471   : > { %v12881_v0 = vpack.c.bf16 %v13130_v60, %v13129_v61 }
 0x472   : > { %v1051_v29 = vpop.permute.xlu1 %1050  ;;  %v1055_v30 = vpop.permute.xlu0 %1054 }
 0x475   : > { %v13699_v31 = vpop.eup %13698 }
 0x476   : > { %v1053_v32 = vpop.permute.xlu1 %1052  ;;  %v1057_v33 = vpop.permute.xlu0 %1056  ;;  %v904_v34 = vmul.f32 %v13699_v31, %v14367_v48  ;;  %v12877_v48 = vpack.c.bf16 %v13125_v44, %v13124_v46 }
 0x477   : > { %v13701_v38 = vpop.eup %13700 }
 0x478   : > { %12275 = vmatmul.mubr.msk.f32.gmra.mrb[18].mxu0 %vm828_vm5, %v904_v34  ;;  %v905_v42 = vmul.f32 %v13701_v38, %v14363_v45 }
 0x479   : > { %12277 = vmatprep.mubr.msk.f32.mxu0 %vm14021_vm1, %v18043_v37 }
 0x47a   : > { %v13133_v39 = vpop.permute.xlu1 %13132  ;;  %v1061_v40 = vpop.permute.xlu0 %1060 }
 0x47b   : > { %v13135_v50 = vunpack.i.h.bf16 %v13133_v39  ;;  %v13134_v51 = vunpack.i.l.bf16 %v13133_v39 }
 0x47c   : > { %12278 = vmatmul.mubr.msk.f32.gmra.mrb[20].mxu0 %vm828_vm5, %v905_v42 }
 0x47d   : > { %12294 = vmatprep.mubr.msk.f32.mxu0 %vm14021_vm1, %v18043_v37  ;;  %v12885_v54 = vpack.c.bf16 %v13135_v50, %v13134_v51 }
 0x47e   : > { %v1059_v49 = vpop.permute.xlu1 %1058  ;;  %v13138_v43 = vpop.permute.xlu0 %13137 }
 0x47f   : > { %v13140_v59 = vunpack.i.h.bf16 %v13138_v43  ;;  %v13139_v4 = vunpack.i.l.bf16 %v13138_v43 }
 0x480   : > { %12295 = vmatmul.mubr.msk.f32.vlgmr.msra.gmra.mrb[22].mxu0 %vm692_vm2, %v1049_v24 }
 0x481   : > { %12879 = vmatpush3.bf16.xpose.msk.msra.mxu0 %vm14246_vm3, %v12877_v48  ;;  %12297 = vmatprep.mubr.msk.f32.mxu0 %vm14021_vm1, %v18043_v37  ;;  %v12898_v14 = vpack.c.bf16 %v13140_v59, %v13139_v4 }
 0x482   : > { %v1450_v47 = vpop.permute.xlu1 %1449  ;;  %v1426_v45 = vpop.permute.xlu0 %1425  ;;  %12880 = vmatprep.subr.bf16.mxu0 %v18041_v17 }
 0x484   : > { %12298 = vmatmul.mubr.msk.f32.gmra.mrb[24].mxu0 %vm692_vm2, %v1051_v29 }
 0x485   : > { %12300 = vmatprep.mubr.msk.f32.mxu0 %vm14021_vm1, %v18043_v37 }
 0x486   : > { %v1424_v62 = vpop.permute.xlu1 %1423  ;;  %v1428_v63 = vpop.permute.xlu0 %1427 }
 0x488   : > { %12301 = vmatmul.mubr.msk.f32.gmra.mrb[26].mxu0 %vm692_vm2, %v1053_v32 }
 0x489   : > { %12883 = vmatpush3.bf16.xpose.msk.msra.mxu0 %vm14246_vm3, %v12881_v0  ;;  %12303 = vmatprep.mubr.msk.f32.mxu0 %vm14021_vm1, %v18043_v37 }
 0x48a   : > { %v13143_v1 = vpop.permute.xlu1 %13142  ;;  %v13148_v2 = vpop.permute.xlu0 %13147  ;;  %12884 = vmatprep.subr.bf16.mxu0 %v18041_v17 }
 0x48b   : > { %v13145_v19 = vunpack.i.h.bf16 %v13143_v1  ;;  %v13144_v20 = vunpack.i.l.bf16 %v13143_v1  ;;  %v13149_v31 = vunpack.i.l.bf16 %v13148_v2 }
 0x48c   : > { %12304 = vmatmul.mubr.msk.f32.gmra.mrb[28].mxu0 %vm692_vm2, %v1055_v30  ;;  %v13150_v30 = vunpack.i.h.bf16 %v13148_v2 }
 0x48d   : > { %12306 = vmatprep.mubr.msk.f32.mxu0 %vm14021_vm1, %v18043_v37  ;;  %v12902_v23 = vpack.c.bf16 %v13145_v19, %v13144_v20 }
 0x48e   : > { %v1430_v52 = vpop.permute.xlu1 %1429  ;;  %v1434_v53 = vpop.permute.xlu0 %1433 }
 0x490   : > { %12307 = vmatmul.mubr.msk.f32.gmra.mrb[30].mxu0 %vm692_vm2, %v1057_v33  ;;  %v12906_v33 = vpack.c.bf16 %v13150_v30, %v13149_v31 }
 0x491   : > { %12887 = vmatpush3.bf16.xpose.msk.msra.mxu0 %vm14246_vm3, %v12885_v54  ;;  %12309 = vmatprep.mubr.msk.f32.mxu0 %vm14021_vm1, %v18043_v37 }
 0x492   : > { %v1432_v55 = vpop.permute.xlu1 %1431  ;;  %v1825_v56 = vpop.permute.xlu0 %1824  ;;  %12362 = vmatprep.subr.mxu0 %v18043_v37 }
 0x494   : > { %12310 = vmatmul.mubr.msk.f32.gmra.mrb[32].mxu0 %vm692_vm2, %v1059_v49 }
 0x495   : > { %12312 = vmatprep.mubr.msk.f32.mxu0 %vm14021_vm1, %v18043_v37 }
 0x496   : > { %v1436_v57 = vpop.permute.xlu1 %1435  ;;  %v14505_v58 = vpop.permute.xlu0 %1800 }
 0x498   : > { %12313 = vmatmul.mubr.msk.f32.gmra.mrb[34].mxu0 %vm692_vm2, %v1061_v40 }
 0x499   : > { %12363 = vmatpush3.xpose.msk.msra.mxu0 %vm692_vm2, %v1450_v47  ;;  %12364 = vmatprep.mubr.msk.f32.mxu0 %vm14021_vm1, %v18043_v37 }
 0x49a   : > { %v1799_v5 = vpop.permute.xlu1 %1798  ;;  %v1805_v11 = vpop.permute.xlu0 %1804  ;;  %12897 = vmatprep.subr.bf16.mxu0 %v18041_v17 }
 0x49c   : > { %12365 = vmatmul.mubr.msk.f32.vlgmr.msra.gmra.mrb[36].mxu0 %vm692_vm2, %v1424_v62 }
 0x49d   : > { %12900 = vmatpush3.bf16.xpose.msk.msra.mxu0 %vm14246_vm3, %v12898_v14  ;;  %12367 = vmatprep.mubr.msk.f32.mxu0 %vm14021_vm1, %v18043_v37 }
 0x49e   : > { %v1803_v16 = vpop.permute.xlu1 %1802  ;;  %v1809_v18 = vpop.permute.xlu0 %1808  ;;  %12901 = vmatprep.subr.bf16.mxu0 %v18041_v17 }
 0x4a0   : > { %12368 = vmatmul.mubr.msk.f32.gmra.mrb[38].mxu0 %vm692_vm2, %v1426_v45 }
 0x4a1   : > { %12370 = vmatprep.mubr.msk.f32.mxu0 %vm14021_vm1, %v18043_v37 }
 0x4a2   : > { %v1807_v21 = vpop.permute.xlu1 %1806  ;;  %v13153_v22 = vpop.permute.xlu0 %13152 }
 0x4a3   : > { %v13155_v24 = vunpack.i.h.bf16 %v13153_v22  ;;  %v13154_v25 = vunpack.i.l.bf16 %v13153_v22 }
 0x4a4   : > { %12371 = vmatmul.mubr.msk.f32.gmra.mrb[40].mxu0 %vm692_vm2, %v1428_v63 }
 0x4a5   : > { %v12868_v26 = vpack.c.bf16 %v13155_v24, %v13154_v25  ;;  %12904 = vmatpush3.bf16.xpose.msk.msra.mxu0 %vm14246_vm3, %v12902_v23  ;;  %12373 = vmatprep.mubr.msk.f32.mxu0 %vm14021_vm1, %v18043_v37 }
 0x4a6   : > { %v1811_v29 = vpop.permute.xlu1 %1810  ;;  %12905 = vmatprep.subr.bf16.mxu0 %v18041_v17  ;;  %v1294_v49 = vpop.permute.xlu0 %1293 }
 0x4a7   : > { %12869 = vmatpush3.bf16.msra.mxu1 %v12868_v26 }
 0x4a8   : > { %12374 = vmatmul.mubr.msk.f32.gmra.mrb[42].mxu0 %vm692_vm2, %v1430_v52  ;;  %12870 = vmatprep.subr.bf16.mxu1 %v18041_v17 }
 0x4a9   : > { %12376 = vmatprep.mubr.msk.f32.mxu0 %vm14021_vm1, %v18043_v37 }
 0x4aa   : > { %v13158_v32 = vpop.permute.xlu1 %13157 }
 0x4ab   : > { %v13160_v34 = vunpack.i.h.bf16 %v13158_v32  ;;  %v13159_v38 = vunpack.i.l.bf16 %v13158_v32 }
 0x4ac   : > { %12377 = vmatmul.mubr.msk.f32.gmra.mrb[44].mxu0 %vm692_vm2, %v1432_v55 }
 0x4ad   : > { %v12871_v39 = vpack.c.bf16 %v13160_v34, %v13159_v38  ;;  %12908 = vmatpush3.bf16.xpose.msk.msra.mxu0 %vm14246_vm3, %v12906_v33  ;;  %12379 = vmatprep.mubr.msk.f32.mxu0 %vm14021_vm1, %v18043_v37 }
 0x4ae   : > { %v13163_v40 = vpop.permute.xlu1 %13162  ;;  %12432 = vmatprep.subr.mxu0 %v18043_v37 }
 0x4af   : > { %v13165_v42 = vunpack.i.h.bf16 %v13163_v40  ;;  %v13164_v44 = vunpack.i.l.bf16 %v13163_v40  ;;  %12872 = vmatpush3.bf16.msra.mxu1 %v12871_v39 }
 0x4b0   : > { %12380 = vmatmul.mubr.msk.f32.gmra.mrb[46].mxu0 %vm692_vm2, %v1434_v53  ;;  %12873 = vmatprep.subr.bf16.mxu1 %v18041_v17 }
 0x4b1   : > { %v12874_v46 = vpack.c.bf16 %v13165_v42, %v13164_v44  ;;  %12382 = vmatprep.mubr.msk.f32.mxu0 %vm14021_vm1, %v18043_v37 }
 0x4b3   : > { %12875 = vmatpush3.bf16.msra.mxu1 %v12874_v46 }
 0x4b4   : > { %12383 = vmatmul.mubr.msk.f32.gmra.mrb[48].mxu0 %vm692_vm2, %v1436_v57  ;;  %12327 = vmatprep.subr.mxu1 %v18043_v37 }
 0x4b5   : > { %12433 = vmatpush3.xpose.msk.msra.mxu0 %vm692_vm2, %v1825_v56  ;;  %12434 = vmatprep.mubr.msk.f32.mxu0 %vm14021_vm1, %v18043_v37 }
 0x4b7   : > { %12328 = vmatpush3.msra.mxu1 %v1294_v49 }
 0x4b8   : > { %12435 = vmatmul.mubr.msk.f32.vlgmr.msra.gmra.mrb[50].mxu0 %vm692_vm2, %v1799_v5  ;;  %12888 = vmatprep.subr.bf16.mxu1 %v18041_v17 }
 0x4b9   : > { %12437 = vmatprep.mubr.msk.f32.mxu0 %vm14021_vm1, %v18043_v37 }
 0x4bc   : > { %12438 = vmatmul.mubr.msk.f32.gmra.mrb[52].mxu0 %vm692_vm2, %v14505_v58 }
 0x4bd   : > { %12440 = vmatprep.mubr.msk.f32.mxu0 %vm14021_vm1, %v18043_v37 }
 0x4c0   : > { %12441 = vmatmul.mubr.msk.f32.gmra.mrb[54].mxu0 %vm692_vm2, %v1803_v16 }
 0x4c1   : > { %12443 = vmatprep.mubr.msk.f32.mxu0 %vm14021_vm1, %v18043_v37 }
 0x4c4   : > { %12444 = vmatmul.mubr.msk.f32.gmra.mrb[56].mxu0 %vm692_vm2, %v1805_v11 }
 0x4c5   : > { %12446 = vmatprep.mubr.msk.f32.mxu0 %vm14021_vm1, %v18043_v37 }
 0x4c8   : > { %12447 = vmatmul.mubr.msk.f32.gmra.mrb[58].mxu0 %vm692_vm2, %v1807_v21 }
 0x4c9   : > { %12449 = vmatprep.mubr.msk.f32.mxu0 %vm14021_vm1, %v18043_v37 }
 0x4cc   : > { %12450 = vmatmul.mubr.msk.f32.gmra.mrb[60].mxu0 %vm692_vm2, %v1809_v18 }
 0x4cd   : > { %12452 = vmatprep.mubr.msk.f32.mxu0 %vm14021_vm1, %v18043_v37 }
 0x4d0   : > { %12453 = vmatmul.mubr.msk.f32.gmra.mrb[62].mxu0 %vm692_vm2, %v1811_v29 }
 0x502   : > { %v14567_v43 = vpop.f32.mrb[8].mxu0 }
 0x503   : > { %v12261_v48 = vpop.f32.mrb[9].mxu0 }
 0x506   : > { %v14569_v47 = vpop.f32.mrb[10].mxu0 }
 0x507   : > { %v12264_v45 = vpop.f32.mrb[11].mxu0 }
 0x50a   : > { %v14571_v60 = vpop.f32.mrb[12].mxu0 }
 0x50b   : > { %v12267_v61 = vpop.f32.mrb[13].mxu0 }
 0x50e   : > { %v14573_v62 = vpop.f32.mrb[14].mxu0 }
 0x50f   : > { %v12270_v63 = vpop.f32.mrb[15].mxu0 }
 0x512   : > { %v14575_v0 = vpop.f32.mrb[16].mxu0 }
 0x513   : > { %v12273_v1 = vpop.f32.mrb[17].mxu0 }
 0x54b   : > { %v14577_v2 = vpop.f32.mrb[18].mxu0 }
 0x54c   : > { %v12276_v50 = vpop.f32.mrb[19].mxu0 }
 0x54f   : > { %v14579_v51 = vpop.f32.mrb[20].mxu0 }
 0x550   : > { %v12279_v52 = vpop.f32.mrb[21].mxu0 }
 0x553   : > { %v1170_v53 = vpop.f32.mrb[22].mxu0 }
 0x554   : > { %v12296_v54 = vpop.f32.mrb[23].mxu0  ;;  %v14582_v55 = vadd.f32 %v1170_v53, %v14309_v8 }
 0x556   : > { %v1204_v56 = vsel %vm828_vm5, %v14582_v55, -inf }
 0x557   : > { %1205 = vmax.xlane.f32.xlu0 %v1204_v56  ;;  %v1175_v57 = vpop.f32.mrb[24].mxu0 }
 0x558   : > { %v12299_v58 = vpop.f32.mrb[25].mxu0  ;;  %v14587_v59 = vadd.f32 %v1175_v57, %v14309_v8 }
 0x55a   : > { %v1207_v4 = vsel %vm828_vm5, %v14587_v59, -inf }
 0x55b   : > { %1208 = vmax.xlane.f32.xlu1 %v1207_v4  ;;  %v1180_v5 = vpop.f32.mrb[26].mxu0 }
 0x55c   : > { %v12302_v11 = vpop.f32.mrb[27].mxu0  ;;  %v14592_v14 = vadd.f32 %v1180_v5, %v14309_v8 }
 0x55e   : > { %v1210_v16 = vsel %vm828_vm5, %v14592_v14, -inf }
 0x55f   : > { %1211 = vmax.xlane.f32.xlu0 %v1210_v16  ;;  %v1185_v18 = vpop.f32.mrb[28].mxu0 }
 0x560   : > { %v12305_v19 = vpop.f32.mrb[29].mxu0  ;;  %v14597_v20 = vadd.f32 %v1185_v18, %v14309_v8 }
 0x562   : > { %v1213_v21 = vsel %vm828_vm5, %v14597_v20, -inf }
 0x563   : > { %1214 = vmax.xlane.f32.xlu0 %v1213_v21  ;;  %v1190_v22 = vpop.f32.mrb[30].mxu0 }
 0x564   : > { %v12308_v23 = vpop.f32.mrb[31].mxu0  ;;  %v14602_v24 = vadd.f32 %v1190_v22, %v14309_v8 }
 0x566   : > { %v1216_v25 = vsel %vm828_vm5, %v14602_v24, -inf }
 0x567   : > { %1217 = vmax.xlane.f32.xlu1 %v1216_v25  ;;  %v1195_v26 = vpop.f32.mrb[32].mxu0 }
 0x568   : > { %v12311_v29 = vpop.f32.mrb[33].mxu0  ;;  %v14607_v30 = vadd.f32 %v1195_v26, %v14309_v8 }
 0x56a   : > { %v1219_v31 = vsel %vm828_vm5, %v14607_v30, -inf }
 0x56b   : > { %1220 = vmax.xlane.f32.xlu0 %v1219_v31  ;;  %v1200_v32 = vpop.f32.mrb[34].mxu0 }
 0x56c   : > { %v12314_v33 = vpop.f32.mrb[35].mxu0  ;;  %v14612_v34 = vadd.f32 %v1200_v32, %v14309_v8 }
 0x56e   : > { %v1222_v38 = vsel %vm828_vm5, %v14612_v34, -inf }
 0x56f   : > { %1223 = vmax.xlane.f32.xlu1 %v1222_v38  ;;  %v1545_v39 = vpop.f32.mrb[36].mxu0 }
 0x570   : > { %v12366_v40 = vpop.f32.mrb[37].mxu0  ;;  %v14617_v42 = vadd.f32 %v1545_v39, %v14309_v8 }
 0x572   : > { %v1579_v44 = vsel %vm828_vm5, %v14617_v42, -inf }
 0x573   : > { %1580 = vmax.xlane.f32.xlu0 %v1579_v44  ;;  %v1550_v46 = vpop.f32.mrb[38].mxu0 }
 0x574   : > { %v12369_v49 = vpop.f32.mrb[39].mxu0  ;;  %v14622_v48 = vadd.f32 %v1550_v46, %v14309_v8 }
 0x576   : > { %v1582_v45 = vsel %vm828_vm5, %v14622_v48, -inf }
 0x577   : > { %1583 = vmax.xlane.f32.xlu1 %v1582_v45  ;;  %v1555_v61 = vpop.f32.mrb[40].mxu0 }
 0x578   : > { %v12372_v63 = vpop.f32.mrb[41].mxu0  ;;  %v14627_v1 = vadd.f32 %v1555_v61, %v14309_v8 }
 0x57a   : > { %v1585_v50 = vsel %vm828_vm5, %v14627_v1, -inf }
 0x57b   : > { %1586 = vmax.xlane.f32.xlu0 %v1585_v50  ;;  %v1560_v52 = vpop.f32.mrb[42].mxu0 }
 0x57c   : > { %v12375_v53 = vpop.f32.mrb[43].mxu0  ;;  %v14632_v54 = vadd.f32 %v1560_v52, %v14309_v8 }
 0x57e   : > { %v1588_v56 = vsel %vm828_vm5, %v14632_v54, -inf }
 0x57f   : > { %1589 = vmax.xlane.f32.xlu1 %v1588_v56  ;;  %v1565_v57 = vpop.f32.mrb[44].mxu0 }
 0x580   : > { %v12378_v58 = vpop.f32.mrb[45].mxu0  ;;  %v14637_v4 = vadd.f32 %v1565_v57, %v14309_v8 }
 0x582   : > { %v1591_v5 = vsel %vm828_vm5, %v14637_v4, -inf }
 0x583   : > { %1592 = vmax.xlane.f32.xlu0 %v1591_v5  ;;  %v1570_v11 = vpop.f32.mrb[46].mxu0 }
 0x584   : > { %v12381_v16 = vpop.f32.mrb[47].mxu0  ;;  %v14642_v18 = vadd.f32 %v1570_v11, %v14309_v8 }
 0x586   : > { %v1594_v19 = vsel %vm828_vm5, %v14642_v18, -inf }
 0x587   : > { %1595 = vmax.xlane.f32.xlu1 %v1594_v19  ;;  %v1575_v21 = vpop.f32.mrb[48].mxu0 }
 0x588   : > { %v12384_v22 = vpop.f32.mrb[49].mxu0  ;;  %v14647_v23 = vadd.f32 %v1575_v21, %v14309_v8 }
 0x58a   : > { %v1597_v25 = vsel %vm828_vm5, %v14647_v23, -inf }
 0x58b   : > { %1598 = vmax.xlane.f32.xlu0 %v1597_v25  ;;  %v1920_v26 = vpop.f32.mrb[50].mxu0 }
 0x58c   : > { %v12436_v29 = vpop.f32.mrb[51].mxu0  ;;  %v14652_v31 = vadd.f32 %v1920_v26, %v14309_v8 }
 0x58d   : > { %v14690_v29 = vpop.permute.xlu1 %13167 }
 0x58e   : > { %v1954_v32 = vsel %vm828_vm5, %v14652_v31, -inf }
 0x58f   : > { %1955 = vmax.xlane.f32.xlu1 %v1954_v32  ;;  %v1925_v33 = vpop.f32.mrb[52].mxu0 }
 0x590   : > { %v12439_v38 = vpop.f32.mrb[53].mxu0  ;;  %v14657_v39 = vadd.f32 %v1925_v33, %v14309_v8 }
 0x592   : > { %v1957_v40 = vsel %vm828_vm5, %v14657_v39, -inf }
 0x593   : > { %1958 = vmax.xlane.f32.xlu0 %v1957_v40  ;;  %v1930_v44 = vpop.f32.mrb[54].mxu0 }
 0x594   : > { %v12442_v46 = vpop.f32.mrb[55].mxu0  ;;  %v14666_v57 = vadd.f32 %v1930_v44, %v14309_v8 }
 0x596   : > { %v1960_v58 = vsel %vm828_vm5, %v14666_v57, -inf }
 0x597   : > { %v1935_v49 = vpop.f32.mrb[56].mxu0 }
 0x598   : > { %v12445_v45 = vpop.f32.mrb[57].mxu0  ;;  %v14671_v5 = vadd.f32 %v1935_v49, %v14309_v8 }
 0x59a   : > { %v1963_v16 = vsel %vm828_vm5, %v14671_v5, -inf }
 0x59b   : > { %v1940_v61 = vpop.f32.mrb[58].mxu0 }
 0x59c   : > { %v12448_v63 = vpop.f32.mrb[59].mxu0  ;;  %v14674_v11 = vadd.f32 %v1940_v61, %v14309_v8 }
 0x59e   : > { %v1966_v19 = vsel %vm828_vm5, %v14674_v11, -inf }
 0x59f   : > { %v1945_v50 = vpop.f32.mrb[60].mxu0 }
 0x5a0   : > { %13177 = vrot.lane.b32.xlu1 %v14230_v35, %s18015_s27  ;;  %v12451_v52 = vpop.f32.mrb[61].mxu0  ;;  %v14681_v21 = vadd.f32 %v1945_v50, %v14309_v8 }
 0x5a2   : > { %v1969_v25 = vsel %vm828_vm5, %v14681_v21, -inf }
 0x5a3   : > { %v1950_v53 = vpop.f32.mrb[62].mxu0 }
 0x5a4   : > { %v12454_v56 = vpop.f32.mrb[63].mxu0  ;;  %v14684_v22 = vadd.f32 %v1950_v53, %v14309_v8 }
 0x5a6   : > { %v1972_v26 = vsel %vm828_vm5, %v14684_v22, -inf }
 0x5a9   : > { %13172 = vrot.lane.b32.xlu0 %v14220_v27, %s18015_s27 }
 0x5c4   : > { %1961 = vmax.xlane.f32.xlu1 %v1960_v58 }
 0x5c8   : > { %1964 = vmax.xlane.f32.xlu0 %v1963_v16  ;;  %1967 = vmax.xlane.f32.xlu1 %v1966_v19 }
 0x5cc   : > { %1970 = vmax.xlane.f32.xlu0 %v1969_v25  ;;  %1973 = vmax.xlane.f32.xlu1 %v1972_v26 }
 0x5e4   : > { %v1206_v32 = vpop.xlane.xlu0 %1205 }
 0x5e5   : > { %v1225_v33 = vsub.f32 %v14582_v55, %v1206_v32 }
 0x5e7   : > { %v1232_v38 = vmul.f32 1.442695, %v1225_v33 }
 0x5e8   : > { %v1209_v40 = vpop.xlane.xlu1 %1208 }
 0x5e9   : > { %13702 = vpow2.f32 %v1232_v38  ;;  %v1226_v44 = vsub.f32 %v14587_v59, %v1209_v40 }
 0x5eb   : > { %v1234_v46 = vmul.f32 1.442695, %v1226_v44 }
 0x5ec   : > { %v1212_v49 = vpop.xlane.xlu0 %1211 }
 0x5ed   : > { %13704 = vpow2.f32 %v1234_v46  ;;  %v1227_v45 = vsub.f32 %v14592_v14, %v1212_v49 }
 0x5ef   : > { %v1236_v61 = vmul.f32 1.442695, %v1227_v45 }
 0x5f0   : > { %v1215_v63 = vpop.xlane.xlu0 %1214 }
 0x5f1   : > { %13706 = vpow2.f32 %v1236_v61  ;;  %v1228_v50 = vsub.f32 %v14597_v20, %v1215_v63 }
 0x5f3   : > { %v14696_v52 = vpop.eup %13702  ;;  %v1238_v53 = vmul.f32 1.442695, %v1228_v50 }
 0x5f4   : > { %v1218_v56 = vpop.xlane.xlu1 %1217  ;;  %v1246_v55 = vsel %vm828_vm5, %v14696_v52, 0.0 }
 0x5f5   : > { %13708 = vpow2.f32 %v1238_v53  ;;  %v1229_v59 = vsub.f32 %v14602_v24, %v1218_v56  ;;  %1247 = vadd.xlane.f32.xlu0 %v1246_v55 }
 0x5f7   : > { %v14701_v58 = vpop.eup %13704  ;;  %v1240_v16 = vmul.f32 1.442695, %v1229_v59 }
 0x5f8   : > { %v1221_v14 = vpop.xlane.xlu0 %1220  ;;  %v1249_v19 = vsel %vm828_vm5, %v14701_v58, 0.0 }
 0x5f9   : > { %13710 = vpow2.f32 %v1240_v16  ;;  %v1230_v20 = vsub.f32 %v14607_v30, %v1221_v14  ;;  %1250 = vadd.xlane.f32.xlu1 %v1249_v19 }
 0x5fb   : > { %v14706_v25 = vpop.eup %13706  ;;  %v1242_v26 = vmul.f32 1.442695, %v1230_v20 }
 0x5fc   : > { %v1224_v32 = vpop.xlane.xlu1 %1223  ;;  %v1252_v33 = vsel %vm828_vm5, %v14706_v25, 0.0 }
 0x5fd   : > { %13712 = vpow2.f32 %v1242_v26  ;;  %v1231_v24 = vsub.f32 %v14612_v34, %v1224_v32  ;;  %1253 = vadd.xlane.f32.xlu0 %v1252_v33 }
 0x5ff   : > { %v14711_v38 = vpop.eup %13708  ;;  %v1244_v40 = vmul.f32 1.442695, %v1231_v24 }
 0x600   : > { %v1581_v44 = vpop.xlane.xlu0 %1580  ;;  %v1255_v46 = vsel %vm828_vm5, %v14711_v38, 0.0 }
 0x601   : > { %13714 = vpow2.f32 %v1244_v40  ;;  %v1600_v30 = vsub.f32 %v14617_v42, %v1581_v44  ;;  %1256 = vadd.xlane.f32.xlu1 %v1255_v46 }
 0x603   : > { %v14716_v49 = vpop.eup %13710  ;;  %v1607_v45 = vmul.f32 1.442695, %v1600_v30 }
 0x604   : > { %v1584_v61 = vpop.xlane.xlu1 %1583  ;;  %v1258_v63 = vsel %vm828_vm5, %v14716_v49, 0.0 }
 0x605   : > { %13716 = vpow2.f32 %v1607_v45  ;;  %v1601_v34 = vsub.f32 %v14622_v48, %v1584_v61  ;;  %1259 = vadd.xlane.f32.xlu1 %v1258_v63 }
 0x607   : > { %v14721_v50 = vpop.eup %13712  ;;  %v1609_v53 = vmul.f32 1.442695, %v1601_v34 }
 0x608   : > { %v1587_v56 = vpop.xlane.xlu0 %1586  ;;  %v1261_v55 = vsel %vm828_vm5, %v14721_v50, 0.0 }
 0x609   : > { %13718 = vpow2.f32 %v1609_v53  ;;  %v1602_v42 = vsub.f32 %v14627_v1, %v1587_v56  ;;  %1262 = vadd.xlane.f32.xlu0 %v1261_v55 }
 0x60b   : > { %v14726_v59 = vpop.eup %13714  ;;  %v1611_v16 = vmul.f32 1.442695, %v1602_v42 }
 0x60c   : > { %v1590_v14 = vpop.xlane.xlu1 %1589  ;;  %v1264_v19 = vsel %vm828_vm5, %v14726_v59, 0.0 }
 0x60d   : > { %13720 = vpow2.f32 %v1611_v16  ;;  %v1603_v48 = vsub.f32 %v14632_v54, %v1590_v14  ;;  %1265 = vadd.xlane.f32.xlu1 %v1264_v19 }
 0x60f   : > { %v14731_v20 = vpop.eup %13716  ;;  %v1613_v26 = vmul.f32 1.442695, %v1603_v48 }
 0x610   : > { %v1593_v32 = vpop.xlane.xlu0 %1592  ;;  %v1621_v33 = vsel %vm828_vm5, %v14731_v20, 0.0 }
 0x611   : > { %13722 = vpow2.f32 %v1613_v26  ;;  %v1604_v1 = vsub.f32 %v14637_v4, %v1593_v32  ;;  %1622 = vadd.xlane.f32.xlu1 %v1621_v33 }
 0x613   : > { %v14736_v24 = vpop.eup %13718  ;;  %v1615_v40 = vmul.f32 1.442695, %v1604_v1 }
 0x614   : > { %v1596_v44 = vpop.xlane.xlu1 %1595  ;;  %v1624_v46 = vsel %vm828_vm5, %v14736_v24, 0.0 }
 0x615   : > { %13724 = vpow2.f32 %v1615_v40  ;;  %v1605_v54 = vsub.f32 %v14642_v18, %v1596_v44  ;;  %1625 = vadd.xlane.f32.xlu1 %v1624_v46 }
 0x617   : > { %v14741_v30 = vpop.eup %13720  ;;  %v1617_v45 = vmul.f32 1.442695, %v1605_v54 }
 0x618   : > { %v1599_v61 = vpop.xlane.xlu0 %1598  ;;  %v1627_v63 = vsel %vm828_vm5, %v14741_v30, 0.0 }
 0x619   : > { %13726 = vpow2.f32 %v1617_v45  ;;  %v1606_v4 = vsub.f32 %v14647_v23, %v1599_v61  ;;  %1628 = vadd.xlane.f32.xlu1 %v1627_v63 }
 0x61b   : > { %v14746_v34 = vpop.eup %13722  ;;  %v1619_v53 = vmul.f32 1.442695, %v1606_v4 }
 0x61c   : > { %v1630_v56 = vsel %vm828_vm5, %v14746_v34, 0.0  ;;  %v1956_v19 = vpop.xlane.xlu1 %1955 }
 0x61d   : > { %13728 = vpow2.f32 %v1619_v53  ;;  %1631 = vadd.xlane.f32.xlu0 %v1630_v56  ;;  %v1975_v48 = vsub.f32 %v14652_v31, %v1956_v19 }
 0x61f   : > { %v14750_v18 = vpop.eup %13724  ;;  %v1982_v26 = vmul.f32 1.442695, %v1975_v48 }
 0x620   : > { %v1633_v55 = vsel %vm828_vm5, %v14750_v18, 0.0  ;;  %v1959_v32 = vpop.xlane.xlu0 %1958  ;;  %v14771_v33 = vpop.permute.xlu1 %13177 }
 0x621   : > { %1634 = vadd.xlane.f32.xlu1 %v1633_v55  ;;  %13730 = vpow2.f32 %v1982_v26  ;;  %v1976_v1 = vsub.f32 %v14657_v39, %v1959_v32 }
 0x623   : > { %v14754_v42 = vpop.eup %13726  ;;  %v1984_v44 = vmul.f32 1.442695, %v1976_v1 }
 0x624   : > { %v1636_v23 = vsel %vm828_vm5, %v14754_v42, 0.0 }
 0x625   : > { %1637 = vadd.xlane.f32.xlu0 %v1636_v23  ;;  %13732 = vpow2.f32 %v1984_v44 }
 0x627   : > { %v14758_v16 = vpop.eup %13728 }
 0x628   : > { %v1639_v14 = vsel %vm828_vm5, %v14758_v16, 0.0 }
 0x629   : > { %1640 = vadd.xlane.f32.xlu1 %v1639_v14 }
 0x62b   : > { %v14777_v45 = vpop.eup %13730 }
 0x62c   : > { %v1996_v39 = vsel %vm828_vm5, %v14777_v45, 0.0 }
 0x63a   : > { %13182 = vrot.lane.b32.xlu1 %v14222_v28, %s18013_s23  ;;  %v14774_v28 = vpop.permute.xlu0 %13172 }
 0x63b   : > { %1668 = vrot.lane.b32.xlu0 %v14234_v36, %s18015_s27  ;;  %s18025_s27 = smov 16  }
 0x63e   : > { %13187 = vrot.lane.b32.xlu1 %v14220_v27, %s18013_s23 }
 0x642   : > { %13192 = vrot.lane.b32.xlu1 %v14230_v35, %s18013_s23 }
 0x651   : > { %v1962_v40 = vpop.xlane.xlu1 %1961 }
 0x652   : > { %v1977_v46 = vsub.f32 %v14666_v57, %v1962_v40 }
 0x654   : > { %v1986_v31 = vmul.f32 1.442695, %v1977_v46 }
 0x655   : > { %v1965_v27 = vpop.xlane.xlu0 %1964  ;;  %v1968_v54 = vpop.xlane.xlu1 %1967 }
 0x656   : > { %v1979_v35 = vsub.f32 %v14674_v11, %v1968_v54  ;;  %v1978_v61 = vsub.f32 %v14671_v5, %v1965_v27  ;;  %v14785_v5 = vpop.eup %13732 }
 0x657   : > { %v1999_v19 = vsel %vm828_vm5, %v14785_v5, 0.0 }
 0x658   : > { %v1990_v63 = vmul.f32 1.442695, %v1979_v35  ;;  %v1988_v55 = vmul.f32 1.442695, %v1978_v61  ;;  %v13169_v61 = vunpack.i.l.bf16 %v14690_v29 }
 0x659   : > { %v1971_v4 = vpop.xlane.xlu0 %1970  ;;  %v1974_v53 = vpop.xlane.xlu1 %1973 }
 0x65a   : > { %v1980_v56 = vsub.f32 %v14681_v21, %v1971_v4  ;;  %v1981_v57 = vsub.f32 %v14684_v22, %v1974_v53  ;;  %1997 = vadd.xlane.f32.xlu0 %v1996_v39  ;;  %13734 = vpow2.f32 %v1990_v63 }
 0x65b   : > { %13736 = vpow2.f32 %v1986_v31  ;;  %v13170_v31 = vunpack.i.h.bf16 %v14690_v29 }
 0x65c   : > { %v1992_v23 = vmul.f32 1.442695, %v1980_v56  ;;  %v1994_v11 = vmul.f32 1.442695, %v1981_v57  ;;  %v13175_v56 = vunpack.i.h.bf16 %v14774_v28  ;;  %v13174_v57 = vunpack.i.l.bf16 %v14774_v28 }
 0x65d   : > { %v12889_v39 = vpack.c.bf16 %v13170_v31, %v13169_v61 }
 0x65e   : > { %13738 = vpow2.f32 %v1992_v23  ;;  %v13179_v23 = vunpack.i.l.bf16 %v14771_v33 }
 0x65f   : > { %13740 = vpow2.f32 %v1988_v55 }
 0x660   : > { %13742 = vpow2.f32 %v1994_v11  ;;  %v12892_v11 = vpack.c.bf16 %v13175_v56, %v13174_v57 }
 0x664   : > { %v14787_v14 = vpop.eup %13734 }
 0x665   : > { %v14791_v48 = vpop.eup %13736  ;;  %v2008_v21 = vsel %vm828_vm5, %v14787_v14, 0.0 }
 0x666   : > { %2000 = vadd.xlane.f32.xlu1 %v1999_v19  ;;  %2009 = vadd.xlane.f32.xlu0 %v2008_v21  ;;  %v2002_v32 = vsel %vm828_vm5, %v14791_v48, 0.0 }
 0x668   : > { %v14795_v22 = vpop.eup %13738 }
 0x669   : > { %v2011_v26 = vsel %vm828_vm5, %v14795_v22, 0.0  ;;  %v14801_v1 = vpop.eup %13740 }
 0x66a   : > { %2003 = vadd.xlane.f32.xlu1 %v2002_v32  ;;  %v14803_v40 = vpop.eup %13742  ;;  %2012 = vadd.xlane.f32.xlu0 %v2011_v26  ;;  %v2005_v44 = vsel %vm828_vm5, %v14801_v1, 0.0 }
 0x66b   : > { %v2014_v46 = vsel %vm828_vm5, %v14803_v40, 0.0 }
 0x66e   : > { %2006 = vadd.xlane.f32.xlu1 %v2005_v44  ;;  %2015 = vadd.xlane.f32.xlu0 %v2014_v46 }
 0x67f   : > { %2043 = vrot.lane.b32.xlu1 %v14234_v36, %s18013_s23  ;;  %s18027_s23 = smov 8  }
 0x682   : > { %v1248_v27 = vpop.xlane.xlu0 %1247 }
 0x683   : > { %13744 = vrcp.f32 %v1248_v27 }
 0x686   : > { %v1251_v54 = vpop.xlane.xlu1 %1250 }
 0x687   : > { %13746 = vrcp.f32 %v1251_v54 }
 0x68a   : > { %v1254_v35 = vpop.xlane.xlu0 %1253 }
 0x68b   : > { %13748 = vrcp.f32 %v1254_v35 }
 0x68d   : > { %v13745_v63 = vpop.eup %13744 }
 0x68e   : > { %v1274_v4 = vmul.f32 %v13745_v63, %v14696_v52  ;;  %v1257_v53 = vpop.xlane.xlu1 %1256  ;;  %v13180_v52 = vunpack.i.h.bf16 %v14771_v33 }
 0x68f   : > { %13750 = vrcp.f32 %v1257_v53 }
 0x690   : > { %12330 = vmatmul.mubr.msk.f32.vlgmr.msra.gmra.mrb[14].mxu1 %vm828_vm5, %v1274_v4  ;;  %v12895_v26 = vpack.c.bf16 %v13180_v52, %v13179_v23 }
 0x691   : > { %v13747_v36 = vpop.eup %13746  ;;  %12890 = vmatpush3.bf16.msra.mxu1 %v12889_v39  ;;  %12332 = vmatprep.mubr.msk.f32.mxu1 %vm14021_vm1, %v18043_v37 }
 0x692   : > { %v1260_v55 = vpop.xlane.xlu1 %1259  ;;  %12891 = vmatprep.subr.bf16.mxu1 %v18041_v17  ;;  %v1275_v29 = vmul.f32 %v13747_v36, %v14701_v58 }
 0x693   : > { %13752 = vrcp.f32 %v1260_v55 }
 0x694   : > { %12333 = vmatmul.mubr.msk.f32.gmra.mrb[16].mxu1 %vm828_vm5, %v1275_v29 }
 0x695   : > { %v13749_v28 = vpop.eup %13748  ;;  %12893 = vmatpush3.bf16.msra.mxu1 %v12892_v11  ;;  %12335 = vmatprep.mubr.msk.f32.mxu1 %vm14021_vm1, %v18043_v37 }
 0x696   : > { %v1263_v19 = vpop.xlane.xlu0 %1262  ;;  %12894 = vmatprep.subr.bf16.mxu1 %v18041_v17  ;;  %v1276_v21 = vmul.f32 %v13749_v28, %v14706_v25 }
 0x697   : > { %13754 = vrcp.f32 %v1263_v19 }
 0x698   : > { %12336 = vmatmul.mubr.msk.f32.gmra.mrb[18].mxu1 %vm828_vm5, %v1276_v21 }
 0x699   : > { %v13751_v58 = vpop.eup %13750  ;;  %12896 = vmatpush3.bf16.msra.mxu1 %v12895_v26  ;;  %12338 = vmatprep.mubr.msk.f32.mxu1 %vm14021_vm1, %v18043_v37 }
 0x69a   : > { %v1266_v33 = vpop.xlane.xlu1 %1265  ;;  %v1277_v32 = vmul.f32 %v13751_v58, %v14711_v38  ;;  %12397 = vmatprep.subr.mxu1 %v18043_v37 }
 0x69b   : > { %13756 = vrcp.f32 %v1266_v33 }
 0x69c   : > { %12339 = vmatmul.mubr.msk.f32.gmra.mrb[20].mxu1 %vm828_vm5, %v1277_v32 }
 0x69d   : > { %v13753_v44 = vpop.eup %13752  ;;  %12341 = vmatprep.mubr.msk.f32.mxu1 %vm14021_vm1, %v18043_v37 }
 0x69e   : > { %v1278_v25 = vmul.f32 %v13753_v44, %v14716_v49  ;;  %v1623_v27 = vpop.xlane.xlu1 %1622 }
 0x69f   : > { %13758 = vrcp.f32 %v1623_v27 }
 0x6a0   : > { %12342 = vmatmul.mubr.msk.f32.gmra.mrb[22].mxu1 %vm828_vm5, %v1278_v25 }
 0x6a1   : > { %v13755_v46 = vpop.eup %13754  ;;  %12344 = vmatprep.mubr.msk.f32.mxu1 %vm14021_vm1, %v18043_v37 }
 0x6a2   : > { %v1279_v38 = vmul.f32 %v13755_v46, %v14721_v50  ;;  %v1626_v31 = vpop.xlane.xlu1 %1625 }
 0x6a3   : > { %13760 = vrcp.f32 %v1626_v31 }
 0x6a4   : > { %12345 = vmatmul.mubr.msk.f32.gmra.mrb[24].mxu1 %vm828_vm5, %v1279_v38 }
 0x6a5   : > { %v13757_v54 = vpop.eup %13756  ;;  %12347 = vmatprep.mubr.msk.f32.mxu1 %vm14021_vm1, %v18043_v37 }
 0x6a6   : > { %v1280_v35 = vmul.f32 %v13757_v54, %v14726_v59  ;;  %v1629_v49 = vpop.xlane.xlu1 %1628 }
 0x6a7   : > { %13762 = vrcp.f32 %v1629_v49 }
 0x6a8   : > { %12348 = vmatmul.mubr.msk.f32.gmra.mrb[26].mxu1 %vm828_vm5, %v1280_v35 }
 0x6a9   : > { %12399 = vmatprep.mubr.msk.f32.mxu1 %vm14021_vm1, %v18043_v37  ;;  %v13759_v4 = vpop.eup %13758 }
 0x6aa   : > { %v1632_v61 = vpop.xlane.xlu0 %1631  ;;  %v1649_v53 = vmul.f32 %v13759_v4, %v14731_v20 }
 0x6ab   : > { %13764 = vrcp.f32 %v1632_v61 }
 0x6ad   : > { %v13761_v59 = vpop.eup %13760 }
 0x6ae   : > { %v1635_v50 = vpop.xlane.xlu1 %1634  ;;  %v1650_v36 = vmul.f32 %v13761_v59, %v14736_v24 }
 0x6af   : > { %13766 = vrcp.f32 %v1635_v50 }
 0x6b1   : > { %v13763_v55 = vpop.eup %13762 }
 0x6b2   : > { %v1638_v63 = vpop.xlane.xlu0 %1637  ;;  %v1651_v11 = vmul.f32 %v13763_v55, %v14741_v30 }
 0x6b3   : > { %13768 = vrcp.f32 %v1638_v63 }
 0x6b5   : > { %v13765_v28 = vpop.eup %13764 }
 0x6b6   : > { %v1669_v39 = vpop.permute.xlu0 %1668  ;;  %v1641_v56 = vpop.xlane.xlu1 %1640  ;;  %v1652_v58 = vmul.f32 %v13765_v28, %v14746_v34 }
 0x6b7   : > { %12398 = vmatpush3.msra.mxu1 %v1669_v39  ;;  %13770 = vrcp.f32 %v1641_v56 }
 0x6b8   : > { %12400 = vmatmul.mubr.msk.f32.vlgmr.msra.gmra.mrb[28].mxu1 %vm828_vm5, %v1649_v53  ;;  %12909 = vmatprep.subr.bf16.mxu1 %v18041_v17 }
 0x6b9   : > { %12402 = vmatprep.mubr.msk.f32.mxu1 %vm14021_vm1, %v18043_v37  ;;  %v13767_v33 = vpop.eup %13766 }
 0x6ba   : > { %v13183_v57 = vpop.permute.xlu1 %13182  ;;  %v1653_v25 = vmul.f32 %v13767_v33, %v14750_v18 }
 0x6bb   : > { %v13185_v29 = vunpack.i.h.bf16 %v13183_v57  ;;  %v13184_v52 = vunpack.i.l.bf16 %v13183_v57 }
 0x6bc   : > { %12403 = vmatmul.mubr.msk.f32.gmra.mrb[30].mxu1 %vm828_vm5, %v1650_v36 }
 0x6bd   : > { %v12910_v20 = vpack.c.bf16 %v13185_v29, %v13184_v52  ;;  %12405 = vmatprep.mubr.msk.f32.mxu1 %vm14021_vm1, %v18043_v37  ;;  %v13769_v46 = vpop.eup %13768 }
 0x6be   : > { %v13188_v23 = vpop.permute.xlu1 %13187  ;;  %v1654_v34 = vmul.f32 %v13769_v46, %v14754_v42 }
 0x6bf   : > { %v13190_v19 = vunpack.i.h.bf16 %v13188_v23  ;;  %v13189_v21 = vunpack.i.l.bf16 %v13188_v23  ;;  %12911 = vmatpush3.bf16.msra.mxu1 %v12910_v20 }
 0x6c0   : > { %12406 = vmatmul.mubr.msk.f32.gmra.mrb[32].mxu1 %vm828_vm5, %v1651_v11  ;;  %12912 = vmatprep.subr.bf16.mxu1 %v18041_v17 }
 0x6c1   : > { %v12913_v24 = vpack.c.bf16 %v13190_v19, %v13189_v21  ;;  %12408 = vmatprep.mubr.msk.f32.mxu1 %vm14021_vm1, %v18043_v37  ;;  %v13771_v27 = vpop.eup %13770 }
 0x6c2   : > { %v13193_v26 = vpop.permute.xlu1 %13192  ;;  %v1655_v38 = vmul.f32 %v13771_v27, %v14758_v16 }
 0x6c3   : > { %v13195_v32 = vunpack.i.h.bf16 %v13193_v26  ;;  %v13194_v44 = vunpack.i.l.bf16 %v13193_v26  ;;  %12914 = vmatpush3.bf16.msra.mxu1 %v12913_v24 }
 0x6c4   : > { %12409 = vmatmul.mubr.msk.f32.gmra.mrb[34].mxu1 %vm828_vm5, %v1652_v58  ;;  %12915 = vmatprep.subr.bf16.mxu1 %v18041_v17 }
 0x6c5   : > { %v12916_v30 = vpack.c.bf16 %v13195_v32, %v13194_v44  ;;  %12411 = vmatprep.mubr.msk.f32.mxu1 %vm14021_vm1, %v18043_v37 }
 0x6c7   : > { %12917 = vmatpush3.bf16.msra.mxu1 %v12916_v30 }
 0x6c8   : > { %12412 = vmatmul.mubr.msk.f32.gmra.mrb[36].mxu1 %vm828_vm5, %v1653_v25  ;;  %12467 = vmatprep.subr.mxu1 %v18043_v37 }
 0x6c9   : > { %12414 = vmatprep.mubr.msk.f32.mxu1 %vm14021_vm1, %v18043_v37 }
 0x6cc   : > { %12415 = vmatmul.mubr.msk.f32.gmra.mrb[38].mxu1 %vm828_vm5, %v1654_v34 }
 0x6cd   : > { %12417 = vmatprep.mubr.msk.f32.mxu1 %vm14021_vm1, %v18043_v37 }
 0x6d0   : > { %12418 = vmatmul.mubr.msk.f32.gmra.mrb[40].mxu1 %vm828_vm5, %v1655_v38 }
 0x6d1   : > { %12469 = vmatprep.mubr.msk.f32.mxu1 %vm14021_vm1, %v18043_v37 }
 0x6e7   : > { %v1998_v18 = vpop.xlane.xlu0 %1997 }
 0x6e8   : > { %13772 = vrcp.f32 %v1998_v18 }
 0x6f2   : > { %v13773_v49 = vpop.eup %13772 }
 0x6f3   : > { %v2001_v54 = vpop.xlane.xlu1 %2000  ;;  %v2010_v42 = vpop.xlane.xlu0 %2009  ;;  %v2024_v61 = vmul.f32 %v13773_v49, %v14777_v45 }
 0x6f4   : > { %13774 = vrcp.f32 %v2001_v54 }
 0x6f7   : > { %v2004_v35 = vpop.xlane.xlu1 %2003  ;;  %v2013_v16 = vpop.xlane.xlu0 %2012 }
 0x6f8   : > { %13776 = vrcp.f32 %v2004_v35  ;;  %v13408_v35 = vld [vmem:[%s17993_s3] sm:$0xff]  }
 0x6f9   : > { %12490 = vmatprep.subr.bf16.mxu0 %v13408_v35 }
 0x6fa   : > { %12491 = vmatpush3.bf16.msra.mxu0 %v13408_v35 }
 0x6fb   : > { %v2007_v31 = vpop.xlane.xlu1 %2006  ;;  %v2016_v45 = vpop.xlane.xlu0 %2015 }
 0x6fc   : > { %13778 = vrcp.f32 %v2007_v31 }
 0x6fd   : > { %13780 = vrcp.f32 %v2010_v42 }
 0x6fe   : > { %v13775_v63 = vpop.eup %13774  ;;  %13782 = vrcp.f32 %v2013_v16 }
 0x6ff   : > { %v2044_v50 = vpop.permute.xlu1 %2043  ;;  %v2025_v4 = vmul.f32 %v13775_v63, %v14785_v5  ;;  %13784 = vrcp.f32 %v2016_v45 }
 0x700   : > { %12468 = vmatpush3.msra.mxu1 %v2044_v50 }
 0x701   : > { %12470 = vmatmul.mubr.msk.f32.vlgmr.msra.gmra.mrb[42].mxu1 %vm828_vm5, %v2024_v61 }
 0x702   : > { %12472 = vmatprep.mubr.msk.f32.mxu1 %vm14021_vm1, %v18043_v37  ;;  %v13777_v53 = vpop.eup %13776 }
 0x703   : > { %v2026_v39 = vmul.f32 %v13777_v53, %v14791_v48 }
 0x705   : > { %12473 = vmatmul.mubr.msk.f32.gmra.mrb[44].mxu1 %vm828_vm5, %v2025_v4 }
 0x706   : > { %12475 = vmatprep.mubr.msk.f32.mxu1 %vm14021_vm1, %v18043_v37  ;;  %v13779_v56 = vpop.eup %13778 }
 0x707   : > { %v2027_v59 = vmul.f32 %v13779_v56, %v14801_v1  ;;  %v13781_v5 = vpop.eup %13780 }
 0x708   : > { %v2028_v57 = vmul.f32 %v13781_v5, %v14787_v14  ;;  %v13783_v36 = vpop.eup %13782 }
 0x709   : > { %12476 = vmatmul.mubr.msk.f32.gmra.mrb[46].mxu1 %vm828_vm5, %v2026_v39  ;;  %v2029_v48 = vmul.f32 %v13783_v36, %v14795_v22  ;;  %v13785_v55 = vpop.eup %13784 }
 0x70a   : > { %12478 = vmatprep.mubr.msk.f32.mxu1 %vm14021_vm1, %v18043_v37  ;;  %v2030_v1 = vmul.f32 %v13785_v55, %v14803_v40 }
 0x70d   : > { %12479 = vmatmul.mubr.msk.f32.gmra.mrb[48].mxu1 %vm828_vm5, %v2027_v59 }
 0x70e   : > { %12481 = vmatprep.mubr.msk.f32.mxu1 %vm14021_vm1, %v18043_v37 }
 0x711   : > { %12482 = vmatmul.mubr.msk.f32.gmra.mrb[50].mxu1 %vm828_vm5, %v2028_v57  ;;  %v13409_v57 = vld [vmem:[%s17993_s3 + $0x8] sm:$0xff]  }
 0x712   : > { %12484 = vmatprep.mubr.msk.f32.mxu1 %vm14021_vm1, %v18043_v37  ;;  %12492 = vmatprep.subr.bf16.mxu0 %v13409_v57 }
 0x713   : > { %12493 = vmatpush3.bf16.msra.mxu0 %v13409_v57 }
 0x715   : > { %12485 = vmatmul.mubr.msk.f32.gmra.mrb[52].mxu1 %vm828_vm5, %v2029_v48 }
 0x716   : > { %12487 = vmatprep.mubr.msk.f32.mxu1 %vm14021_vm1, %v18043_v37 }
 0x719   : > { %12488 = vmatmul.mubr.msk.f32.gmra.mrb[54].mxu1 %vm828_vm5, %v2030_v1 }
 0x763   : > { %v1389_v29 = vpop.f32.mrb[14].mxu1 }
 0x764   : > { %v12331_v14 = vpop.f32.mrb[15].mxu1 }
 0x767   : > { %v1394_v52 = vpop.f32.mrb[16].mxu1 }
 0x768   : > { %v13196_v20 = vpack.i.bf16 %v1394_v52, %v1389_v29  ;;  %v12334_v23 = vpop.f32.mrb[17].mxu1 }
 0x76a   : > { %13197 = vrot.lane.b32.xlu1 %v13196_v20, %s18027_s23 }
 0x76b   : > { %v1399_v11 = vpop.f32.mrb[18].mxu1 }
 0x76c   : > { %v12337_v22 = vpop.f32.mrb[19].mxu1 }
 0x76f   : > { %v1404_v28 = vpop.f32.mrb[20].mxu1 }
 0x770   : > { %v13201_v19 = vpack.i.bf16 %v1404_v28, %v1399_v11  ;;  %v12340_v21 = vpop.f32.mrb[21].mxu1 }
 0x772   : > { %13202 = vrot.lane.b32.xlu0 %v13201_v19, %s18027_s23 }
 0x773   : > { %v1409_v24 = vpop.f32.mrb[22].mxu1 }
 0x774   : > { %v12343_v26 = vpop.f32.mrb[23].mxu1 }
 0x777   : > { %v1414_v40 = vpop.f32.mrb[24].mxu1 }
 0x778   : > { %v13226_v58 = vpack.i.bf16 %v1414_v40, %v1409_v24  ;;  %v12346_v33 = vpop.f32.mrb[25].mxu1 }
 0x77b   : > { %v1419_v32 = vpop.f32.mrb[26].mxu1 }
 0x77c   : > { %2192 = vrot.lane.b32.xlu0 %v1419_v32, %s18027_s23  ;;  %v12349_v44 = vpop.f32.mrb[27].mxu1 }
 0x78b   : > { %v1764_v30 = vpop.f32.mrb[28].mxu1 }
 0x78c   : > { %v12401_v25 = vpop.f32.mrb[29].mxu1 }
 0x78f   : > { %v1769_v46 = vpop.f32.mrb[30].mxu1 }
 0x790   : > { %v13206_v34 = vpack.i.bf16 %v1769_v46, %v1764_v30  ;;  %v12404_v27 = vpop.f32.mrb[31].mxu1 }
 0x792   : > { %13207 = vrot.lane.b32.xlu1 %v13206_v34, %s18025_s27 }
 0x793   : > { %v1774_v38 = vpop.f32.mrb[32].mxu1 }
 0x794   : > { %v12407_v18 = vpop.f32.mrb[33].mxu1 }
 0x797   : > { %v1779_v54 = vpop.f32.mrb[34].mxu1 }
 0x798   : > { %v13211_v42 = vpack.i.bf16 %v1779_v54, %v1774_v38  ;;  %v12410_v31 = vpop.f32.mrb[35].mxu1 }
 0x79a   : > { %13212 = vrot.lane.b32.xlu1 %v13211_v42, %s18025_s27 }
 0x79b   : > { %v1784_v49 = vpop.f32.mrb[36].mxu1 }
 0x79c   : > { %v12413_v61 = vpop.f32.mrb[37].mxu1 }
 0x79f   : > { %v1789_v50 = vpop.f32.mrb[38].mxu1 }
 0x7a0   : > { %v13231_v63 = vpack.i.bf16 %v1789_v50, %v1784_v49  ;;  %v12416_v16 = vpop.f32.mrb[39].mxu1 }
 0x7a3   : > { %v1794_v4 = vpop.f32.mrb[40].mxu1 }
 0x7a4   : > { %2220 = vrot.lane.b32.xlu0 %v1794_v4, %s18025_s27  ;;  %v12419_v53 = vpop.f32.mrb[41].mxu1 }
 0x7d4   : > { %v2139_v45 = vpop.f32.mrb[42].mxu1 }
 0x7d5   : > { %v12471_v39 = vpop.f32.mrb[43].mxu1 }
 0x7d8   : > { %v2144_v56 = vpop.f32.mrb[44].mxu1 }
 0x7d9   : > { %v13216_v59 = vpack.i.bf16 %v2144_v56, %v2139_v45  ;;  %v12474_v5 = vpop.f32.mrb[45].mxu1 }
 0x7db   : > { %13217 = vrot.lane.b32.xlu1 %v13216_v59, %s18023_s28 }
 0x7dc   : > { %v2149_v36 = vpop.f32.mrb[46].mxu1  ;;  %v13198_v19 = vpop.permute.xlu1 %13197 }
 0x7dd   : > { %v12477_v48 = vpop.f32.mrb[47].mxu1  ;;  %v13200_v26 = vunpack.i.h.bf16 %v13198_v19  ;;  %v13199_v40 = vunpack.i.l.bf16 %v13198_v19 }
 0x7df   : > { %v2258_v44 = vsel %vm692_vm2, %v14569_v47, %v13200_v26  ;;  %v2257_v30 = vsel %vm692_vm2, %v14567_v43, %v13199_v40 }
 0x7e0   : > { %v2154_v55 = vpop.f32.mrb[48].mxu1 }
 0x7e1   : > { %v13221_v1 = vpack.i.bf16 %v2154_v55, %v2149_v36  ;;  %v12480_v29 = vpop.f32.mrb[49].mxu1 }
 0x7e3   : > { %13222 = vrot.lane.b32.xlu1 %v13221_v1, %s18023_s28 }
 0x7e4   : > { %v2159_v14 = vpop.f32.mrb[50].mxu1  ;;  %v13203_v34 = vpop.permute.xlu0 %13202 }
 0x7e5   : > { %v12483_v52 = vpop.f32.mrb[51].mxu1  ;;  %v13205_v42 = vunpack.i.h.bf16 %v13203_v34  ;;  %v13204_v31 = vunpack.i.l.bf16 %v13203_v34 }
 0x7e7   : > { %13227 = vrot.lane.b32.xlu1 %v13226_v58, %s18027_s23  ;;  %v2260_v43 = vsel %vm692_vm2, %v14573_v62, %v13205_v42  ;;  %v2259_v50 = vsel %vm692_vm2, %v14571_v60, %v13204_v31  ;;  %s18061_s23 = smov 88  }
 0x7e8   : > { %v2164_v20 = vpop.f32.mrb[52].mxu1 }
 0x7e9   : > { %v13236_v23 = vpack.i.bf16 %v2164_v20, %v2159_v14  ;;  %v12486_v11 = vpop.f32.mrb[53].mxu1 }
 0x7eb   : > { %13232 = vrot.lane.b32.xlu1 %v13231_v63, %s18025_s27  ;;  %s18069_s27 = smov 48  }
 0x7ec   : > { %v2169_v22 = vpop.f32.mrb[54].mxu1 }
 0x7ed   : > { %2248 = vrot.lane.b32.xlu0 %v2169_v22, %s18023_s28  ;;  %v12489_v28 = vpop.f32.mrb[55].mxu1 }
 0x7ee   : > { %v2193_v45 = vpop.permute.xlu0 %2192 }
 0x7ef   : > { %13237 = vrot.lane.b32.xlu1 %v13236_v23, %s18023_s28  ;;  %v2263_v1 = vsel %vm692_vm2, %v14579_v51, %v2193_v45  ;;  %s18067_s28 = smov 64  }
 0x804   : > { %v13208_v21 = vpop.permute.xlu1 %13207 }
 0x805   : > { %v13210_v33 = vunpack.i.h.bf16 %v13208_v21  ;;  %v13209_v32 = vunpack.i.l.bf16 %v13208_v21 }
 0x807   : > { %v2265_v27 = vsel %vm2264_vm6, %v2257_v30, %v13209_v32  ;;  %v2266_v38 = vsel %vm2264_vm6, %v2258_v44, %v13210_v33 }
 0x80c   : > { %v13213_v24 = vpop.permute.xlu1 %13212 }
 0x80d   : > { %v13215_v49 = vunpack.i.h.bf16 %v13213_v24  ;;  %v13214_v61 = vunpack.i.l.bf16 %v13213_v24 }
 0x80f   : > { %v2268_v4 = vsel %vm2264_vm6, %v2260_v43, %v13215_v49  ;;  %v2267_v53 = vsel %vm2264_vm6, %v2259_v50, %v13214_v61 }
 0x816   : > { %v2221_v57 = vpop.permute.xlu0 %2220 }
 0x817   : > { %v2271_v14 = vsel %vm2264_vm6, %v2263_v1, %v2221_v57 }
 0x84d   : > { %v13218_v58 = vpop.permute.xlu1 %13217 }
 0x84e   : > { %v13220_v25 = vunpack.i.h.bf16 %v13218_v58  ;;  %v13219_v46 = vunpack.i.l.bf16 %v13218_v58 }
 0x850   : > { %v2274_v18 = vsel %vm2272_vm7, %v2266_v38, %v13220_v25  ;;  %v2273_v54 = vsel %vm2272_vm7, %v2265_v27, %v13219_v46 }
 0x851   : > { %v2280_v35 = vpack.c.bf16 %v2274_v18, %v2273_v54 }
 0x853   : > { %12494 = vmatprep.mubr.msk.bf16.mxu0 %vm587_vm0, %v2280_v35 }
 0x855   : > { %v13223_v47 = vpop.permute.xlu1 %13222 }
 0x856   : > { %v13225_v63 = vunpack.i.h.bf16 %v13223_v47  ;;  %v13224_v16 = vunpack.i.l.bf16 %v13223_v47 }
 0x858   : > { %v2276_v39 = vsel %vm2272_vm7, %v2268_v4, %v13225_v63  ;;  %v2275_v56 = vsel %vm2272_vm7, %v2267_v53, %v13224_v16 }
 0x859   : > { %v2281_v59 = vpack.c.bf16 %v2276_v39, %v2275_v56  ;;  %v13228_v5 = vpop.permute.xlu1 %13227 }
 0x85a   : > { %v13230_v36 = vunpack.i.h.bf16 %v13228_v5  ;;  %v13229_v48 = vunpack.i.l.bf16 %v13228_v5 }
 0x85b   : > { %12495 = vmatmul.mubr.msk.bf16.vlgmr.msra.gmra.mrb[64].mxu0 %vm587_vm0, %v2281_v59 }
 0x85c   : > { %v2262_v20 = vsel %vm692_vm2, %v14577_v2, %v13230_v36  ;;  %v2261_v23 = vsel %vm692_vm2, %v14575_v0, %v13229_v48  ;;  %v10487_v0 = vld [vmem:[%s17994_s4] ss:$0 sm:$0xff] }
 0x85d   : > { %v13233_v62 = vpop.permute.xlu1 %13232 }
 0x85e   : > { %v13235_v60 = vunpack.i.h.bf16 %v13233_v62  ;;  %v13234_v55 = vunpack.i.l.bf16 %v13233_v62 }
 0x85f   : > { %v2249_v29 = vpop.permute.xlu0 %2248 }
 0x860   : > { %v2269_v28 = vsel %vm2264_vm6, %v2261_v23, %v13234_v55  ;;  %v2270_v19 = vsel %vm2264_vm6, %v2262_v20, %v13235_v60  ;;  %v2279_v21 = vsel %vm2272_vm7, %v2271_v14, %v2249_v29 }
 0x861   : > { %v13238_v52 = vpop.permute.xlu1 %13237  ;;  %v2283_v40 = vpack.c.bf16 %v2279_v21, %v2279_v21 }
 0x862   : > { %v13240_v11 = vunpack.i.h.bf16 %v13238_v52  ;;  %v13239_v22 = vunpack.i.l.bf16 %v13238_v52 }
 0x864   : > { %v2278_v51 = vsel %vm2272_vm7, %v2270_v19, %v13240_v11  ;;  %v2277_v24 = vsel %vm2272_vm7, %v2269_v28, %v13239_v22 }
 0x865   : > { %v2282_v26 = vpack.c.bf16 %v2278_v51, %v2277_v24 }
 0x867   : > { %12498 = vmatprep.mubr.msk.bf16.mxu0 %vm587_vm0, %v2282_v26 }
 0x868   : > { %12499 = vmatmul.mubr.msk.bf16.gmra.mrb[68].mxu0 %vm587_vm0, %v2283_v40 }
 0x92e   : > { %v12496_v2 = vpop.f32.mrb[64].mxu0 }
 0x92f   : > { %v2353_v33 = vpop.f32.mrb[65].mxu0  ;;  %v2362_v25 = vadd.f32 %v12496_v2, %v10487_v0 }
 0x930   : > { %v2354_v32 = vadd.f32 %v10487_v0, %v2353_v33  ;;  %v12497_v58 = vpop.f32.mrb[66].mxu0 }
 0x931   : > { %v2365_v44 = vadd.f32 %v12497_v58, %v10487_v0  ;;  %v2356_v30 = vpop.f32.mrb[67].mxu0  ;;  %v2385_v35 = vadd.f32 %v2362_v25, %v14190_v9  ;;  %v2522_v25 = vld [vmem:[%s17997_s7 + $0x40] sm:$0xff] }
 0x932   : > { %v2357_v46 = vadd.f32 %v10487_v0, %v2356_v30  ;;  %v2383_v34 = vadd.f32 %v2354_v32, %v14183_v6  ;;  %v2514_v30 = vld [vmem:[%s17997_s7] sm:$0xff] }
 0x933   : > { %v2386_v18 = vadd.f32 %v2365_v44, %v14192_v10  ;;  %v2398_v31 = vsel %vm587_vm0, %v2385_v35, 0.0 }
 0x934   : > { %v2392_v27 = vsel %vm587_vm0, %v2383_v34, 0.0  ;;  %v2384_v38 = vadd.f32 %v2357_v46, %v14185_v7  ;;  %v2515_v46 = vld [vmem:[%s17997_s7 + $0x8] sm:$0xff] }
 0x935   : > { %2393 = vadd.xlane.f32.xlu1 %v2392_v27  ;;  %v2401_v42 = vsel %vm587_vm0, %v2386_v18, 0.0  ;;  %v2523_v27 = vld [vmem:[%s17997_s7 + $0x48] sm:$0xff] }
 0x936   : > { %v2395_v54 = vsel %vm587_vm0, %v2384_v38, 0.0 }
 0x937   : > { %2396 = vadd.xlane.f32.xlu0 %v2395_v54  ;;  %v10499_v54 = vcombine.high %v2515_v46, %v2523_v27 }
 0x939   : > { %2402 = vadd.xlane.f32.xlu1 %v2401_v42  ;;  %2789 = vmatprep.subr.bf16.mxu0 %v10499_v54  ;;  %v2538_v42 = vld [vmem:[%s17997_s7 + $0xc0] sm:$0xff]  ;;  %v2533_v54 = vld [vmem:[%s17997_s7 + $0x98] sm:$0xff] }
 0x93b   : > { %v12500_v49 = vpop.f32.mrb[68].mxu0  ;;  %2399 = vadd.xlane.f32.xlu0 %v2398_v31  ;;  %v2531_v31 = vld [vmem:[%s17997_s7 + $0x88] sm:$0xff] }
 0x93c   : > { %v2369_v6 = vpop.f32.mrb[69].mxu0  ;;  %v2378_v61 = vadd.f32 %v12500_v49, %v10487_v0 }
 0x93d   : > { %v2370_v47 = vadd.f32 %v10487_v0, %v2369_v6  ;;  %v12501_v43 = vpop.f32.mrb[70].mxu0  ;;  %v2539_v6 = vld [vmem:[%s17997_s7 + $0xc8] sm:$0xff] }
 0x93e   : > { %v2372_v7 = vpop.f32.mrb[71].mxu0  ;;  %v2389_v16 = vadd.f32 %v2378_v61, %v14204_v15  ;;  %v10515_v43 = vcombine.high %v2531_v31, %v2539_v6 }
 0x93f   : > { %v2373_v50 = vadd.f32 %v10487_v0, %v2372_v7  ;;  %v2387_v10 = vadd.f32 %v2370_v47, %v14197_v12  ;;  %v10514_v47 = vcombine.low %v2531_v31, %v2539_v6  ;;  %v18039_v7 = vmov 0  }
 0x940   : > { %v2410_v53 = vsel %vm587_vm0, %v2389_v16, 0.0  ;;  %2750 = vmatprep.mubr.bf16.mxu1 %v18039_v7  ;;  %2821 = vmatprep.mubr.bf16.mxu0 %v18039_v7 }
 0x941   : > { %v2404_v63 = vsel %vm587_vm0, %v2387_v10, 0.0  ;;  %v2388_v9 = vadd.f32 %v2373_v50, %v14199_v13  ;;  %v15037_v50 = vld [vmem:[%s17997_s7 + $0x10] sm:$0xff] }
 0x942   : > { %2405 = vadd.xlane.f32.xlu0 %v2404_v63  ;;  %v15047_v63 = vld [vmem:[%s17997_s7 + $0x18] sm:$0xff] }
 0x943   : > { %v2407_v4 = vsel %vm587_vm0, %v2388_v9, 0.0 }
 0x944   : > { %2408 = vadd.xlane.f32.xlu1 %v2407_v4  ;;  %v15056_v4 = vld [vmem:[%s17997_s7 + $0x58] sm:$0xff] }
 0x946   : > { %2411 = vadd.xlane.f32.xlu0 %v2410_v53  ;;  %v10502_v53 = vcombine.low %v15047_v63, %v15056_v4 }
 0x9c2   : > { %v2394_v45 = vpop.xlane.xlu1 %2393 }
 0x9c3   : > { %v2414_v39 = vmul.f32 0.03125, %v2394_v45  ;;  %v10503_v45 = vcombine.high %v15047_v63, %v15056_v4 }
 0x9c4   : > { %v2397_v56 = vpop.xlane.xlu0 %2396 }
 0x9c5   : > { %v14973_v59 = vsub.f32 %v2383_v34, %v2414_v39  ;;  %v2415_v5 = vmul.f32 0.03125, %v2397_v56  ;;  %v10497_v34 = vcombine.high %v2514_v30, %v2522_v25 }
 0x9c6   : > { %v2403_v12 = vpop.xlane.xlu1 %2402 }
 0x9c7   : > { %v14975_v57 = vsub.f32 %v2384_v38, %v2415_v5  ;;  %v2417_v62 = vmul.f32 0.03125, %v2403_v12  ;;  %v2428_v13 = vmul.f32 %v14973_v59, %v14973_v59  ;;  %v10496_v38 = vcombine.low %v2514_v30, %v2522_v25  ;;  %2718 = vmatprep.subr.bf16.mxu1 %v10497_v34 }
 0x9c8   : > { %v2400_v15 = vpop.xlane.xlu0 %2399 }
 0x9c9   : > { %v14979_v36 = vsub.f32 %v2386_v18, %v2417_v62  ;;  %v2416_v48 = vmul.f32 0.03125, %v2400_v15  ;;  %v2435_v60 = vsel %vm587_vm0, %v2428_v13, 0.0  ;;  %v2429_v55 = vmul.f32 %v14975_v57, %v14975_v57  ;;  %2719 = vmatpush1.bf16.msra.mxu1 %v10496_v38 }
 0x9ca   : > { %2436 = vadd.xlane.f32.xlu1 %v2435_v60  ;;  %v10498_v18 = vcombine.low %v2515_v46, %v2523_v27  ;;  %v2532_v46 = vld [vmem:[%s17997_s7 + $0x90] sm:$0xff] }
 0x9cb   : > { %v14984_v1 = vsub.f32 %v2385_v35, %v2416_v48  ;;  %v2438_v29 = vsel %vm587_vm0, %v2429_v55, 0.0  ;;  %v2431_v14 = vmul.f32 %v14979_v36, %v14979_v36  ;;  %v2530_v35 = vld [vmem:[%s17997_s7 + $0x80] sm:$0xff] }
 0x9cc   : > { %2439 = vadd.xlane.f32.xlu0 %v2438_v29  ;;  %2790 = vmatpush1.bf16.msra.mxu0 %v10498_v18  ;;  %v10513_v49 = vcombine.high %v2530_v35, %v2538_v42  ;;  %v10512_v61 = vcombine.low %v2530_v35, %v2538_v42  ;;  %v2540_v18 = vld [vmem:[%s17997_s7 + $0xd0] sm:$0xff]  ;;  %v2541_v35 = vld [vmem:[%s17997_s7 + $0xd8] sm:$0xff] }
 0x9cd   : > { %v2430_v52 = vmul.f32 %v14984_v1, %v14984_v1  ;;  %v2444_v11 = vsel %vm587_vm0, %v2431_v14, 0.0  ;;  %2791 = vmatprep.subr.bf16.mxu0 %v10515_v43  ;;  %v10517_v6 = vcombine.high %v2532_v46, %v2540_v18  ;;  %v2519_v43 = vld [vmem:[%s17997_s7 + $0x28] sm:$0xff] }
 0x9ce   : > { %2720 = vmatprep.subr.bf16.mxu1 %v10513_v49 }
 0x9cf   : > { %v2406_v20 = vpop.xlane.xlu0 %2405  ;;  %v2441_v23 = vsel %vm587_vm0, %v2430_v52, 0.0  ;;  %2721 = vmatpush1.bf16.msra.mxu1 %v10512_v61  ;;  %v10519_v61 = vcombine.high %v2533_v54, %v2541_v35 }
 0x9d0   : > { %v2418_v22 = vmul.f32 0.03125, %v2406_v20  ;;  %2442 = vadd.xlane.f32.xlu1 %v2441_v23  ;;  %2445 = vadd.xlane.f32.xlu0 %v2444_v11  ;;  %v15065_v11 = vld [vmem:[%s17995_s5] ss:$0 sm:$0xff] }
 0x9d1   : > { %v2409_v28 = vpop.xlane.xlu1 %2408  ;;  %2792 = vmatpush1.bf16.msra.mxu0 %v10514_v47  ;;  %v15105_v47 = vld [vmem:[%s17997_s7 + $0x20] sm:$0xff] }
 0x9d2   : > { %v14993_v19 = vsub.f32 %v2387_v10, %v2418_v22  ;;  %v2419_v21 = vmul.f32 0.03125, %v2409_v28  ;;  %v15042_v10 = vld [vmem:[%s17997_s7 + $0x50] sm:$0xff]  ;;  %2931 = vmatprep.subr.bf16.mxu0 %v10503_v45  ;;  %v10516_v45 = vcombine.low %v2532_v46, %v2540_v18  ;;  %v2545_v46 = vld [vmem:[%s17997_s7 + $0xf8] sm:$0xff] }
 0x9d3   : > { %v2412_v51 = vpop.xlane.xlu0 %2411 }
 0x9d4   : > { %v14995_v24 = vsub.f32 %v2388_v9, %v2419_v21  ;;  %v2420_v26 = vmul.f32 0.03125, %v2412_v51  ;;  %v2432_v40 = vmul.f32 %v14993_v19, %v14993_v19  ;;  %v10500_v9 = vcombine.low %v15037_v50, %v15042_v10 }
 0x9d6   : > { %v14999_v0 = vsub.f32 %v2389_v16, %v2420_v26  ;;  %v2447_v2 = vsel %vm587_vm0, %v2432_v40, 0.0  ;;  %v2433_v33 = vmul.f32 %v14995_v24, %v14995_v24  ;;  %v10501_v16 = vcombine.high %v15037_v50, %v15042_v10 }
 0x9d7   : > { %2448 = vadd.xlane.f32.xlu1 %v2447_v2 }
 0x9d8   : > { %v2450_v32 = vsel %vm587_vm0, %v2433_v33, 0.0  ;;  %v2434_v58 = vmul.f32 %v14999_v0, %v14999_v0  ;;  %2860 = vmatprep.subr.bf16.mxu1 %v10501_v16  ;;  %v2527_v16 = vld [vmem:[%s17997_s7 + $0x68] sm:$0xff] }
 0x9d9   : > { %2451 = vadd.xlane.f32.xlu0 %v2450_v32 }
 0x9da   : > { %v2453_v44 = vsel %vm587_vm0, %v2434_v58, 0.0  ;;  %v15073_v58 = vld [vmem:[%s17996_s6] ss:$0 sm:$0xff] }
 0x9db   : > { %2454 = vadd.xlane.f32.xlu1 %v2453_v44 }
 0xa57   : > { %v2437_v39 = vpop.xlane.xlu1 %2436 }
 0xa58   : > { %v2456_v56 = vmul.f32 0.03125, %v2437_v39 }
 0xa59   : > { %v2440_v5 = vpop.xlane.xlu0 %2439 }
 0xa5a   : > { %v2463_v12 = vadd.f32 1e-05, %v2456_v56  ;;  %v2457_v62 = vmul.f32 0.03125, %v2440_v5 }
 0xa5c   : > { %13786 = vrsqrt.f32 %v2463_v12  ;;  %v2464_v13 = vadd.f32 1e-05, %v2457_v62  ;;  %v10518_v12 = vcombine.low %v2533_v54, %v2541_v35 }
 0xa5d   : > { %v2446_v15 = vpop.xlane.xlu0 %2445  ;;  %v2443_v48 = vpop.xlane.xlu1 %2442 }
 0xa5e   : > { %13788 = vrsqrt.f32 %v2464_v13  ;;  %v2459_v60 = vmul.f32 0.03125, %v2446_v15  ;;  %v2458_v55 = vmul.f32 0.03125, %v2443_v48  ;;  %v10507_v13 = vcombine.high %v2519_v43, %v2527_v16 }
 0xa60   : > { %v2466_v29 = vadd.f32 1e-05, %v2459_v60  ;;  %v2465_v14 = vadd.f32 1e-05, %v2458_v55 }
 0xa62   : > { %13790 = vrsqrt.f32 %v2466_v29 }
 0xa63   : > { %13792 = vrsqrt.f32 %v2465_v14  ;;  %v2534_v14 = vld [vmem:[%s17997_s7 + $0xa0] sm:$0xff] }
 0xa64   : > { %v2449_v52 = vpop.xlane.xlu1 %2448 }
 0xa65   : > { %v2460_v20 = vmul.f32 0.03125, %v2449_v52  ;;  %v2542_v52 = vld [vmem:[%s17997_s7 + $0xe0] sm:$0xff] }
 0xa66   : > { %v13787_v23 = vpop.eup %13786  ;;  %v2452_v22 = vpop.xlane.xlu0 %2451 }
 0xa67   : > { %v2477_v28 = vmul.f32 %v13787_v23, %v14973_v59  ;;  %v2467_v21 = vadd.f32 1e-05, %v2460_v20  ;;  %v2461_v51 = vmul.f32 0.03125, %v2452_v22  ;;  %v2535_v20 = vld [vmem:[%s17997_s7 + $0xa8] sm:$0xff]  ;;  %v10506_v22 = vcombine.low %v2519_v43, %v2527_v16 }
 0xa68   : > { %v13789_v26 = vpop.eup %13788  ;;  %v2455_v40 = vpop.xlane.xlu1 %2454  ;;  %v2543_v23 = vld [vmem:[%s17997_s7 + $0xe8] sm:$0xff] }
 0xa69   : > { %v2490_v2 = vmul.f32 %v15065_v11, %v2477_v28  ;;  %v2478_v33 = vmul.f32 %v13789_v26, %v14975_v57  ;;  %13794 = vrsqrt.f32 %v2467_v21  ;;  %v2468_v32 = vadd.f32 1e-05, %v2461_v51  ;;  %v2520_v51 = vld [vmem:[%s17997_s7 + $0x30] sm:$0xff]  ;;  %v13416_v43 = vld [vmem:[%s17999_s9 + $0x8] sm:$0xff]  }
 0xa6a   : > { %v2462_v44 = vmul.f32 0.03125, %v2455_v40  ;;  %v10521_v28 = vcombine.high %v2534_v14, %v2542_v52  ;;  %v10523_v21 = vcombine.high %v2535_v20, %v2543_v23  ;;  %v2528_v26 = vld [vmem:[%s17997_s7 + $0x70] sm:$0xff]  ;;  %v2521_v40 = vld [vmem:[%s17997_s7 + $0x38] sm:$0xff]  ;;  %v13417_v16 = vld [vmem:[%s17999_s9 + $0x88] sm:$0xff]  }
 0xa6b   : > { %v2491_v30 = vmul.f32 %v15065_v11, %v2478_v33  ;;  %13796 = vrsqrt.f32 %v2468_v32  ;;  %v15080_v57 = vadd.f32 %v15073_v58, %v2490_v2  ;;  %v2529_v2 = vld [vmem:[%s17997_s7 + $0x78] sm:$0xff]  ;;  %v10520_v33 = vcombine.low %v2534_v14, %v2542_v52  ;;  %v13433_v14 = vld [vmem:[%s17999_s9 + $0xa8] sm:$0xff]   ;;  %v13435_v52 = vld [vmem:[%s17999_s9 + $0xf0] sm:$0xff]  }
 0xa6c   : > { %v13791_v59 = vpop.eup %13790  ;;  %v2469_v25 = vadd.f32 1e-05, %v2462_v44  ;;  %v10522_v32 = vcombine.low %v2535_v20, %v2543_v23  ;;  %v10511_v44 = vcombine.high %v2521_v40, %v2529_v2  ;;  %v13436_v20 = vld [vmem:[%s17999_s9 + $0x30] sm:$0xff]  }
 0xa6d   : > { %v13793_v34 = vpop.eup %13792  ;;  %v15083_v27 = vadd.f32 %v15073_v58, %v2491_v30  ;;  %v2480_v38 = vmul.f32 %v13791_v59, %v14979_v36  ;;  %v2536_v30 = vld [vmem:[%s17997_s7 + $0xb0] sm:$0xff] }
 0xa6e   : > { %v2479_v42 = vmul.f32 %v13793_v34, %v14984_v1  ;;  %13798 = vrsqrt.f32 %v2469_v25  ;;  %v2526_v1 = vld [vmem:[%s17997_s7 + $0x60] sm:$0xff]  ;;  %v2544_v59 = vld [vmem:[%s17997_s7 + $0xf0] sm:$0xff]  ;;  %v2537_v25 = vld [vmem:[%s17997_s7 + $0xb8] sm:$0xff]  ;;  %v10508_v34 = vcombine.low %v2520_v51, %v2528_v26 }
 0xa6f   : > { %v15098_v31 = vpack.c.bf16 %v15083_v27, %v15080_v57  ;;  %v2493_v36 = vmul.f32 %v15065_v11, %v2480_v38  ;;  %v10505_v62 = vcombine.high %v15105_v47, %v2526_v1  ;;  %v10510_v38 = vcombine.low %v2521_v40, %v2529_v2  ;;  %v13437_v23 = vld [vmem:[%s17999_s9 + $0xb0] sm:$0xff]  }
 0xa70   : > { %v2492_v49 = vmul.f32 %v15065_v11, %v2479_v42  ;;  %v10525_v18 = vcombine.high %v2536_v30, %v2544_v59  ;;  %v10527_v54 = vcombine.high %v2537_v25, %v2545_v46  ;;  %v10524_v35 = vcombine.low %v2536_v30, %v2544_v59 }
 0xa71   : > { %10528 = vmatmul.mubr.msk.bf16.vlgmr.msra.gmra.mrb[56].mxu1 %vm587_vm0, %v15098_v31  ;;  %10532 = vmatmul.mubr.msk.bf16.vlgmr.msra.gmra.mrb[72].mxu0 %vm587_vm0, %v15098_v31  ;;  %v15123_v56 = vadd.f32 %v15073_v58, %v2493_v36  ;;  %v10526_v42 = vcombine.low %v2537_v25, %v2545_v46  ;;  %v13410_v36 = vld [vmem:[%s17999_s9 + $0x40] sm:$0xff]  }
 0xa72   : > { %2760 = vmatprep.mubr.bf16.mxu1 %v18039_v7  ;;  %2831 = vmatprep.mubr.bf16.mxu0 %v18039_v7  ;;  %v15126_v5 = vadd.f32 %v15073_v58, %v2492_v49  ;;  %v13411_v49 = vld [vmem:[%s17999_s9 + $0xc0] sm:$0xff]  }
 0xa73   : > { %v13795_v39 = vpop.eup %13794  ;;  %2861 = vmatpush1.bf16.msra.mxu1 %v10500_v9  ;;  %2932 = vmatpush1.bf16.msra.mxu0 %v10502_v53 }
 0xa74   : > { %2862 = vmatprep.subr.bf16.mxu1 %v10517_v6  ;;  %2933 = vmatprep.subr.bf16.mxu0 %v10519_v61  ;;  %v2481_v48 = vmul.f32 %v13795_v39, %v14993_v19  ;;  %v15139_v55 = vpack.c.bf16 %v15123_v56, %v15126_v5  ;;  %v13412_v6 = vld [vmem:[%s17999_s9] sm:$0xff]   ;;  %v13420_v39 = vld [vmem:[%s17999_s9 + $0x10] sm:$0xff]  }
 0xa75   : > { %v13797_v15 = vpop.eup %13796  ;;  %v13413_v61 = vld [vmem:[%s17999_s9 + $0x80] sm:$0xff]  }
 0xa76   : > { %v2482_v60 = vmul.f32 %v13797_v15, %v14995_v24  ;;  %v2494_v63 = vmul.f32 %v15065_v11, %v2481_v48  ;;  %v13424_v15 = vld [vmem:[%s17999_s9 + $0x18] sm:$0xff]  }
 0xa77   : > { %2863 = vmatpush1.bf16.msra.mxu1 %v10516_v45  ;;  %2934 = vmatpush1.bf16.msra.mxu0 %v10518_v12  ;;  %v13419_v45 = vld [vmem:[%s17999_s9 + $0xd0] sm:$0xff]   ;;  %v13425_v48 = vld [vmem:[%s17999_s9 + $0x98] sm:$0xff]  }
 0xa78   : > { %v13799_v50 = vpop.eup %13798  ;;  %v2495_v10 = vmul.f32 %v15065_v11, %v2482_v60  ;;  %3002 = vmatprep.subr.bf16.mxu1 %v10505_v62  ;;  %3073 = vmatprep.subr.bf16.mxu0 %v10507_v13  ;;  %v15154_v9 = vadd.f32 %v15073_v58, %v2494_v63  ;;  %v13421_v12 = vld [vmem:[%s17999_s9 + $0x90] sm:$0xff]   ;;  %v13422_v62 = vld [vmem:[%s17999_s9 + $0x58] sm:$0xff]   ;;  %v13426_v60 = vld [vmem:[%s17999_s9 + $0x60] sm:$0xff]  }
 0xa79   : > { %10529 = vmatmul.mubr.msk.bf16.gmra.mrb[60].mxu1 %vm587_vm0, %v15139_v55  ;;  %10533 = vmatmul.mubr.msk.bf16.gmra.mrb[76].mxu0 %vm587_vm0, %v15139_v55  ;;  %v2483_v24 = vmul.f32 %v13799_v50, %v14999_v0  ;;  %v13423_v13 = vld [vmem:[%s17999_s9 + $0xd8] sm:$0xff]   ;;  %v13428_v50 = vld [vmem:[%s17999_s9 + $0x20] sm:$0xff]   ;;  %v13430_v63 = vld [vmem:[%s17999_s9 + $0x68] sm:$0xff]  }
 0xa7a   : > { %2770 = vmatprep.mubr.bf16.mxu1 %v18039_v7  ;;  %2841 = vmatprep.mubr.bf16.mxu0 %v18039_v7  ;;  %v15150_v19 = vadd.f32 %v15073_v58, %v2495_v10  ;;  %v13429_v10 = vld [vmem:[%s17999_s9 + $0xa0] sm:$0xff]  }
 0xa7b   : > { %v2496_v53 = vmul.f32 %v15065_v11, %v2483_v24  ;;  %v10504_v11 = vcombine.low %v15105_v47, %v2526_v1  ;;  %v13414_v47 = vld [vmem:[%s17999_s9 + $0x48] sm:$0xff]  }
 0xa7c   : > { %v15158_v4 = vpack.c.bf16 %v15150_v19, %v15154_v9  ;;  %v13415_v1 = vld [vmem:[%s17999_s9 + $0xc8] sm:$0xff]  }
 0xa7d   : > { %v15168_v0 = vadd.f32 %v15073_v58, %v2496_v53  ;;  %v10509_v58 = vcombine.high %v2520_v51, %v2528_v26  ;;  %v13431_v24 = vld [vmem:[%s17999_s9 + $0xe8] sm:$0xff]   ;;  %v13442_v51 = vld [vmem:[%s17999_s9 + $0x140] sm:$0xff]   ;;  %v14037_v26 = vmov 1966171168  }
 0xa7e   : > { %v13432_v53 = vld [vmem:[%s17999_s9 + $0x28] sm:$0xff]   ;;  %v3356_v40 = vunpack.c.l.s4 %v14037_v26 }
 0xa7f   : > { %v15172_v29 = vpack.c.bf16 %v15168_v0, %v15168_v0 }
 0xa80   : > { %v3357_v2 = vunpack.c.0.s8 %v3356_v40 }
 0xa81   : > { %10530 = vmatmul.mubr.msk.bf16.gmra.mrb[64].mxu1 %vm587_vm0, %v15158_v4  ;;  %10534 = vmatmul.mubr.msk.bf16.gmra.mrb[80].mxu0 %vm587_vm0, %v15158_v4 }
 0xa82   : > { %2780 = vmatprep.mubr.bf16.mxu1 %v18039_v7  ;;  %2851 = vmatprep.mubr.bf16.mxu0 %v18039_v7 }
 0xa89   : > { %10531 = vmatmul.mubr.msk.bf16.gmra.mrb[68].mxu1 %vm587_vm0, %v15172_v29  ;;  %10535 = vmatmul.mubr.msk.bf16.gmra.mrb[84].mxu0 %vm587_vm0, %v15172_v29 }
 0xa8a   : > { %2892 = vmatprep.mubr.bf16.mxu1 %v18039_v7  ;;  %2963 = vmatprep.mubr.bf16.mxu0 %v18039_v7 }
 0xa91   : > { %10536 = vmatmul.mubr.msk.bf16.vlgmr.msra.gmra.mrb[72].mxu1 %vm587_vm0, %v15098_v31  ;;  %10540 = vmatmul.mubr.msk.bf16.vlgmr.msra.gmra.mrb[88].mxu0 %vm587_vm0, %v15098_v31 }
 0xa92   : > { %2902 = vmatprep.mubr.bf16.mxu1 %v18039_v7  ;;  %2973 = vmatprep.mubr.bf16.mxu0 %v18039_v7 }
 0xa93   : > { %3003 = vmatpush1.bf16.msra.mxu1 %v10504_v11  ;;  %3074 = vmatpush1.bf16.msra.mxu0 %v10506_v22  ;;  %v13438_v11 = vld [vmem:[%s17999_s9 + $0x78] sm:$0xff]  }
 0xa94   : > { %3004 = vmatprep.subr.bf16.mxu1 %v10521_v28  ;;  %3075 = vmatprep.subr.bf16.mxu0 %v10523_v21  ;;  %v13439_v22 = vld [vmem:[%s17999_s9 + $0xf8] sm:$0xff]  }
 0xa95   : > { %v13440_v28 = vld [vmem:[%s17999_s9 + $0x38] sm:$0xff]  }
 0xa96   : > { %v13441_v21 = vld [vmem:[%s17999_s9 + $0xb8] sm:$0xff]  }
 0xa97   : > { %3005 = vmatpush1.bf16.msra.mxu1 %v10520_v33  ;;  %3076 = vmatpush1.bf16.msra.mxu0 %v10522_v32  ;;  %v3359_v33 = vshrl.u32 %v556_v3, 7 }
 0xa98   : > { %3144 = vmatprep.subr.bf16.mxu1 %v10509_v58  ;;  %3215 = vmatprep.subr.bf16.mxu0 %v10511_v44  ;;  %v15395_v58 = vld [vmem:[%s17998_s8] sm:$0xff] }
 0xa99   : > { %10537 = vmatmul.mubr.msk.bf16.gmra.mrb[76].mxu1 %vm587_vm0, %v15139_v55  ;;  %10541 = vmatmul.mubr.msk.bf16.gmra.mrb[92].mxu0 %vm587_vm0, %v15139_v55  ;;  %v15390_v32 = vsub.s32 %v3357_v2, %v3359_v33 }
 0xa9a   : > { %2912 = vmatprep.mubr.bf16.mxu1 %v18039_v7  ;;  %2983 = vmatprep.mubr.bf16.mxu0 %v18039_v7 }
 0xa9b   : > { %v3361_v44 = vrot.slane %v15395_v58, %v15390_v32 }
 0xa9d   : > { %v3369_v30 = vcombine.high %v3361_v44, %v3361_v44  ;;  %v3377_v59 = vrot.slane %v3361_v44, %v15390_v32 }
 0xa9f   : > { %v3391_v25 = vrot.slane %v3369_v30, %v15390_v32  ;;  %v3399_v46 = vcombine.high %v3377_v59, %v3377_v59 }
 0xaa1   : > { %10538 = vmatmul.mubr.msk.bf16.gmra.mrb[80].mxu1 %vm587_vm0, %v15158_v4  ;;  %10542 = vmatmul.mubr.msk.bf16.gmra.mrb[96].mxu0 %vm587_vm0, %v15158_v4  ;;  %v3467_v3 = vpack.i.b16 %v3399_v46, %v3399_v46 }
 0xaa2   : > { %2922 = vmatprep.mubr.bf16.mxu1 %v18039_v7  ;;  %2993 = vmatprep.mubr.bf16.mxu0 %v18039_v7 }
 0xaa9   : > { %10539 = vmatmul.mubr.msk.bf16.gmra.mrb[84].mxu1 %vm587_vm0, %v15172_v29  ;;  %10543 = vmatmul.mubr.msk.bf16.gmra.mrb[100].mxu0 %vm587_vm0, %v15172_v29 }
 0xaaa   : > { %3034 = vmatprep.mubr.bf16.mxu1 %v18039_v7  ;;  %3105 = vmatprep.mubr.bf16.mxu0 %v18039_v7 }
 0xab1   : > { %10544 = vmatmul.mubr.msk.bf16.vlgmr.msra.gmra.mrb[88].mxu1 %vm587_vm0, %v15098_v31  ;;  %10548 = vmatmul.mubr.msk.bf16.vlgmr.msra.gmra.mrb[104].mxu0 %vm587_vm0, %v15098_v31 }
 0xab2   : > { %3044 = vmatprep.mubr.bf16.mxu1 %v18039_v7  ;;  %3115 = vmatprep.mubr.bf16.mxu0 %v18039_v7 }
 0xab3   : > { %3145 = vmatpush1.bf16.msra.mxu1 %v10508_v34  ;;  %3216 = vmatpush1.bf16.msra.mxu0 %v10510_v38  ;;  %v3401_v34 = vcombine.high %v3391_v25, %v3391_v25  ;;  %v3453_v38 = vpack.i.b16 %v3377_v59, %v3377_v59  ;;  %v13448_v59 = vld [vmem:[%s17999_s9 + $0x108] sm:$0xff]  }
 0xab4   : > { %3146 = vmatprep.subr.bf16.mxu1 %v10525_v18  ;;  %3217 = vmatprep.subr.bf16.mxu0 %v10527_v54  ;;  %v15401_v18 = vsub.s32 0, %v3359_v33  ;;  %v3460_v54 = vpack.i.b16 %v3391_v25, %v3391_v25  ;;  %v13449_v25 = vld [vmem:[%s17999_s9 + $0x188] sm:$0xff]  }
 0xab6   : > { %18059 = vst [vmem:[#allocation9_spill] sm:$0xff] %v15401_v18 }
 0xab7   : > { %3147 = vmatpush1.bf16.msra.mxu1 %v10524_v35  ;;  %3218 = vmatpush1.bf16.msra.mxu0 %v10526_v42  ;;  %v3474_v35 = vpack.i.b16 %v3401_v34, %v3401_v34  ;;  %v13450_v34 = vld [vmem:[%s17999_s9 + $0x150] sm:$0xff]  }
 0xab8   : > { %11421 = vmatprep.subr.bf16.mxu1 %v13410_v36  ;;  %11461 = vmatprep.subr.bf16.mxu0 %v13411_v49 }
 0xab9   : > { %10545 = vmatmul.mubr.msk.bf16.gmra.mrb[92].mxu1 %vm587_vm0, %v15139_v55  ;;  %10549 = vmatmul.mubr.msk.bf16.gmra.mrb[108].mxu0 %vm587_vm0, %v15139_v55 }
 0xaba   : > { %3054 = vmatprep.mubr.bf16.mxu1 %v18039_v7  ;;  %3125 = vmatprep.mubr.bf16.mxu0 %v18039_v7 }
 0xac1   : > { %10546 = vmatmul.mubr.msk.bf16.gmra.mrb[96].mxu1 %vm587_vm0, %v15158_v4  ;;  %10550 = vmatmul.mubr.msk.bf16.gmra.mrb[112].mxu0 %vm587_vm0, %v15158_v4 }
 0xac2   : > { %3064 = vmatprep.mubr.bf16.mxu1 %v18039_v7  ;;  %3135 = vmatprep.mubr.bf16.mxu0 %v18039_v7 }
 0xac9   : > { %10547 = vmatmul.mubr.msk.bf16.gmra.mrb[100].mxu1 %vm587_vm0, %v15172_v29  ;;  %10551 = vmatmul.mubr.msk.bf16.gmra.mrb[116].mxu0 %vm587_vm0, %v15172_v29 }
 0xaca   : > { %3176 = vmatprep.mubr.bf16.mxu1 %v18039_v7  ;;  %3247 = vmatprep.mubr.bf16.mxu0 %v18039_v7 }
 0xad1   : > { %10552 = vmatmul.mubr.msk.bf16.vlgmr.msra.gmra.mrb[104].mxu1 %vm587_vm0, %v15098_v31  ;;  %10556 = vmatmul.mubr.msk.bf16.vlgmr.msra.gmra.mrb[120].mxu0 %vm587_vm0, %v15098_v31  ;;  %v13418_v31 = vld [vmem:[%s17999_s9 + $0x50] sm:$0xff]  }
 0xad2   : > { %3186 = vmatprep.mubr.bf16.mxu1 %v18039_v7  ;;  %3257 = vmatprep.mubr.bf16.mxu0 %v18039_v7 }
 0xad3   : > { %11422 = vmatpush3.bf16.msra.mxu1 %v13412_v6  ;;  %11462 = vmatpush3.bf16.msra.mxu0 %v13413_v61  ;;  %v15404_v61 = vrot.slane %v3453_v38, %v15401_v18  ;;  %v13451_v38 = vld [vmem:[%s17999_s9 + $0x1d0] sm:$0xff]  }
 0xad4   : > { %11423 = vmatprep.subr.bf16.mxu1 %v13414_v47  ;;  %11463 = vmatprep.subr.bf16.mxu0 %v13415_v1  ;;  %v15407_v47 = vrot.slane %v3467_v3, %v15401_v18 }
 0xad7   : > { %11424 = vmatpush3.bf16.msra.mxu1 %v13416_v43  ;;  %11464 = vmatpush3.bf16.msra.mxu0 %v13417_v16  ;;  %v15410_v16 = vrot.slane %v3460_v54, %v15401_v18 }
 0xad8   : > { %11425 = vmatprep.subr.bf16.mxu1 %v13418_v31  ;;  %11465 = vmatprep.subr.bf16.mxu0 %v13419_v45  ;;  %v15413_v31 = vrot.slane %v3474_v35, %v15401_v18 }
 0xad9   : > { %10553 = vmatmul.mubr.msk.bf16.gmra.mrb[108].mxu1 %vm587_vm0, %v15139_v55  ;;  %10557 = vmatmul.mubr.msk.bf16.gmra.mrb[124].mxu0 %vm587_vm0, %v15139_v55  ;;  %v13427_v55 = vld [vmem:[%s17999_s9 + $0xe0] sm:$0xff]  }
 0xada   : > { %3196 = vmatprep.mubr.bf16.mxu1 %v18039_v7  ;;  %3267 = vmatprep.mubr.bf16.mxu0 %v18039_v7 }
 0xadb   : > { %11426 = vmatpush3.bf16.msra.mxu1 %v13420_v39  ;;  %11466 = vmatpush3.bf16.msra.mxu0 %v13421_v12 }
 0xadc   : > { %11427 = vmatprep.subr.bf16.mxu1 %v13422_v62  ;;  %11467 = vmatprep.subr.bf16.mxu0 %v13423_v13 }
 0xadf   : > { %11428 = vmatpush3.bf16.msra.mxu1 %v13424_v15  ;;  %11468 = vmatpush3.bf16.msra.mxu0 %v13425_v48 }
 0xae0   : > { %11429 = vmatprep.subr.bf16.mxu1 %v13426_v60  ;;  %11469 = vmatprep.subr.bf16.mxu0 %v13427_v55 }
 0xae1   : > { %10554 = vmatmul.mubr.msk.bf16.gmra.mrb[112].mxu1 %vm587_vm0, %v15158_v4  ;;  %10558 = vmatmul.mubr.msk.bf16.gmra.mrb[128].mxu0 %vm587_vm0, %v15158_v4  ;;  %v13434_v4 = vld [vmem:[%s17999_s9 + $0x70] sm:$0xff]  }
 0xae2   : > { %3206 = vmatprep.mubr.bf16.mxu1 %v18039_v7  ;;  %3277 = vmatprep.mubr.bf16.mxu0 %v18039_v7 }
 0xae3   : > { %11430 = vmatpush3.bf16.msra.mxu1 %v13428_v50  ;;  %11470 = vmatpush3.bf16.msra.mxu0 %v13429_v10 }
 0xae4   : > { %11431 = vmatprep.subr.bf16.mxu1 %v13430_v63  ;;  %11471 = vmatprep.subr.bf16.mxu0 %v13431_v24 }
 0xae7   : > { %11432 = vmatpush3.bf16.msra.mxu1 %v13432_v53  ;;  %11472 = vmatpush3.bf16.msra.mxu0 %v13433_v14  ;;  %v13444_v14 = vld [vmem:[%s17999_s9 + $0x100] sm:$0xff]  }
 0xae8   : > { %11433 = vmatprep.subr.bf16.mxu1 %v13434_v4  ;;  %11473 = vmatprep.subr.bf16.mxu0 %v13435_v52  ;;  %v13445_v4 = vld [vmem:[%s17999_s9 + $0x180] sm:$0xff]  }
 0xae9   : > { %10555 = vmatmul.mubr.msk.bf16.gmra.mrb[116].mxu1 %vm587_vm0, %v15172_v29  ;;  %10559 = vmatmul.mubr.msk.bf16.gmra.mrb[132].mxu0 %vm587_vm0, %v15172_v29  ;;  %v13443_v29 = vld [vmem:[%s17999_s9 + $0x1c0] sm:$0xff]  }
 0xaeb   : > { %11434 = vmatpush3.bf16.msra.mxu1 %v13436_v20  ;;  %11474 = vmatpush3.bf16.msra.mxu0 %v13437_v23 }
 0xaec   : > { %11435 = vmatprep.subr.bf16.mxu1 %v13438_v11  ;;  %11475 = vmatprep.subr.bf16.mxu0 %v13439_v22  ;;  %v13446_v22 = vld [vmem:[%s17999_s9 + $0x148] sm:$0xff]  }
 0xaef   : > { %11436 = vmatpush3.bf16.msra.mxu1 %v13440_v28  ;;  %11476 = vmatpush3.bf16.msra.mxu0 %v13441_v21  ;;  %v13447_v28 = vld [vmem:[%s17999_s9 + $0x1c8] sm:$0xff]  }
 0xaf0   : > { %11501 = vmatprep.subr.bf16.mxu1 %v13442_v51  ;;  %11541 = vmatprep.subr.bf16.mxu0 %v13443_v29  ;;  %v3354_v29 = vcombine.high %v15395_v58, %v15395_v58 }
 0xaf2   : > { %v3368_v35 = vrot.slane %v3354_v29, %v15390_v32 }
 0xb44   : > { %v2752_v42 = vpop.f32.mrb[56].mxu1  ;;  %v2823_v36 = vpop.f32.mrb[72].mxu0 }
 0xb45   : > { %v2754_v49 = vpop.f32.mrb[57].mxu1  ;;  %v2825_v6 = vpop.f32.mrb[73].mxu0 }
 0xb46   : > { %v2756_v1 = vpop.f32.mrb[58].mxu1  ;;  %v2827_v43 = vpop.f32.mrb[74].mxu0 }
 0xb47   : > { %v3286_v45 = vpack.c.bf16 %v2756_v1, %v2752_v42  ;;  %v3288_v39 = vpack.c.bf16 %v2827_v43, %v2823_v36  ;;  %v2758_v12 = vpop.f32.mrb[59].mxu1  ;;  %v2829_v62 = vpop.f32.mrb[75].mxu0  ;;  %v13452_v1 = vld [vmem:[%s17999_s9 + $0x110] sm:$0xff]  }
 0xb48   : > { %v3287_v13 = vpack.c.bf16 %v2758_v12, %v2754_v49  ;;  %v3289_v15 = vpack.c.bf16 %v2829_v62, %v2825_v6  ;;  %v13453_v43 = vld [vmem:[%s17999_s9 + $0x190] sm:$0xff]  }
 0xb49   : > { %v3564_v48 = vadd.bf16 %v15404_v61, %v3286_v45  ;;  %v3566_v60 = vadd.bf16 %v15407_v47, %v3288_v39 }
 0xb4a   : > { %v3565_v55 = vadd.bf16 %v15410_v16, %v3287_v13  ;;  %v3567_v50 = vadd.bf16 %v15413_v31, %v3289_v15  ;;  %v13454_v13 = vld [vmem:[%s17999_s9 + $0x158] sm:$0xff]  }
 0xb4b   : > { %v3628_v52 = vmax.bf16 %v18039_v7, %v3564_v48  ;;  %v3630_v20 = vmax.bf16 %v18039_v7, %v3566_v60  ;;  %v13455_v15 = vld [vmem:[%s17999_s9 + $0x1d8] sm:$0xff]  }
 0xb4c   : > { %v2762_v10 = vpop.f32.mrb[60].mxu1  ;;  %v2833_v63 = vpop.f32.mrb[76].mxu0  ;;  %v3629_v24 = vmax.bf16 %v18039_v7, %v3565_v55  ;;  %v3631_v53 = vmax.bf16 %v18039_v7, %v3567_v50  ;;  %v3370_v55 = vcombine.high %v3368_v35, %v3368_v35 }
 0xb4d   : > { %v2764_v23 = vpop.f32.mrb[61].mxu1  ;;  %v2835_v11 = vpop.f32.mrb[77].mxu0 }
 0xb4e   : > { %v2766_v21 = vpop.f32.mrb[62].mxu1  ;;  %v2837_v51 = vpop.f32.mrb[78].mxu0  ;;  %4755 = vmatprep.mubr.bf16.mxu1 %v3629_v24  ;;  %4819 = vmatprep.mubr.bf16.mxu0 %v3631_v53  ;;  %v15471_v53 = vrot.slane %v3368_v35, %v15390_v32  ;;  %v15490_v29 = vrot.slane %v3370_v55, %v15390_v32  ;;  %v13463_v35 = vld [vmem:[%s17999_s9 + $0x1e8] sm:$0xff]  }
 0xb4f   : > { %v3302_v26 = vpack.c.bf16 %v2766_v21, %v2762_v10  ;;  %v3304_v40 = vpack.c.bf16 %v2837_v51, %v2833_v63  ;;  %v2768_v2 = vpop.f32.mrb[63].mxu1  ;;  %v2839_v33 = vpop.f32.mrb[79].mxu0  ;;  %4756 = vmatmul.mubr.bf16.vlgmr.msra.gmra.mrb[120].mxu1 %v3628_v52  ;;  %4820 = vmatmul.mubr.bf16.vlgmr.msra.gmra.mrb[136].mxu0 %v3630_v20  ;;  %v13456_v52 = vld [vmem:[%s17999_s9 + $0x118] sm:$0xff]  }
 0xb50   : > { %v3303_v44 = vpack.c.bf16 %v2768_v2, %v2764_v23  ;;  %v3305_v30 = vpack.c.bf16 %v2839_v33, %v2835_v11  ;;  %11502 = vmatpush3.bf16.msra.mxu1 %v13444_v14  ;;  %11542 = vmatpush3.bf16.msra.mxu0 %v13445_v4  ;;  %v13457_v20 = vld [vmem:[%s17999_s9 + $0x198] sm:$0xff]  }
 0xb51   : > { %v3580_v58 = vadd.bf16 %v15404_v61, %v3302_v26  ;;  %v3582_v46 = vadd.bf16 %v15407_v47, %v3304_v40  ;;  %11503 = vmatprep.subr.bf16.mxu1 %v13446_v22  ;;  %11543 = vmatprep.subr.bf16.mxu0 %v13447_v28  ;;  %v13458_v22 = vld [vmem:[%s17999_s9 + $0x160] sm:$0xff]   ;;  %v15494_v26 = vcombine.high %v15471_v53, %v15471_v53 }
 0xb52   : > { %v3581_v3 = vadd.bf16 %v15410_v16, %v3303_v44  ;;  %v3583_v54 = vadd.bf16 %v15413_v31, %v3305_v30  ;;  %v13459_v28 = vld [vmem:[%s17999_s9 + $0x1e0] sm:$0xff]  }
 0xb53   : > { %v3644_v12 = vmax.bf16 %v18039_v7, %v3580_v58  ;;  %v3646_v62 = vmax.bf16 %v18039_v7, %v3582_v46 }
 0xb54   : > { %v2772_v42 = vpop.f32.mrb[64].mxu1  ;;  %v2843_v36 = vpop.f32.mrb[80].mxu0  ;;  %11504 = vmatpush3.bf16.msra.mxu1 %v13448_v59  ;;  %11544 = vmatpush3.bf16.msra.mxu0 %v13449_v25  ;;  %v3645_v49 = vmax.bf16 %v18039_v7, %v3581_v3  ;;  %v3647_v6 = vmax.bf16 %v18039_v7, %v3583_v54  ;;  %v13460_v59 = vld [vmem:[%s17999_s9 + $0x120] sm:$0xff]   ;;  %v13462_v54 = vld [vmem:[%s17999_s9 + $0x168] sm:$0xff]  }
 0xb55   : > { %v2774_v45 = vpop.f32.mrb[65].mxu1  ;;  %v2845_v39 = vpop.f32.mrb[81].mxu0  ;;  %11505 = vmatprep.subr.bf16.mxu1 %v13450_v34  ;;  %11545 = vmatprep.subr.bf16.mxu0 %v13451_v38  ;;  %v13461_v25 = vld [vmem:[%s17999_s9 + $0x1a0] sm:$0xff]  }
 0xb56   : > { %v2776_v48 = vpop.f32.mrb[66].mxu1  ;;  %v2847_v60 = vpop.f32.mrb[82].mxu0  ;;  %4763 = vmatprep.mubr.bf16.mxu1 %v3645_v49  ;;  %4827 = vmatprep.mubr.bf16.mxu0 %v3647_v6 }
 0xb57   : > { %v3318_v50 = vpack.c.bf16 %v2776_v48, %v2772_v42  ;;  %v3320_v10 = vpack.c.bf16 %v2847_v60, %v2843_v36  ;;  %v2778_v63 = vpop.f32.mrb[67].mxu1  ;;  %v2849_v24 = vpop.f32.mrb[83].mxu0  ;;  %4764 = vmatmul.mubr.bf16.gmra.mrb[124].mxu1 %v3644_v12  ;;  %4828 = vmatmul.mubr.bf16.gmra.mrb[140].mxu0 %v3646_v62  ;;  %v3481_v62 = vpack.i.b16 %v15471_v53, %v15471_v53  ;;  %v13464_v48 = vld [vmem:[%s17999_s9 + $0x128] sm:$0xff]  }
 0xb58   : > { %v3319_v14 = vpack.c.bf16 %v2778_v63, %v2774_v45  ;;  %v3321_v4 = vpack.c.bf16 %v2849_v24, %v2845_v39  ;;  %11506 = vmatpush3.bf16.msra.mxu1 %v13452_v1  ;;  %11546 = vmatpush3.bf16.msra.mxu0 %v13453_v43  ;;  %v3402_v1 = vcombine.high %v15490_v29, %v15490_v29 }
 0xb59   : > { %v3596_v23 = vadd.bf16 %v15404_v61, %v3318_v50  ;;  %v3598_v11 = vadd.bf16 %v15407_v47, %v3320_v10  ;;  %11507 = vmatprep.subr.bf16.mxu1 %v13454_v13  ;;  %11547 = vmatprep.subr.bf16.mxu0 %v13455_v15  ;;  %v13467_v50 = vld [vmem:[%s17999_s9 + $0x170] sm:$0xff]  }
 0xb5a   : > { %v3597_v21 = vadd.bf16 %v15410_v16, %v3319_v14  ;;  %v3599_v51 = vadd.bf16 %v15413_v31, %v3321_v4  ;;  %v13468_v10 = vld [vmem:[%s17999_s9 + $0x1f0] sm:$0xff]   ;;  %v15539_v4 = vrot.slane %v3481_v62, %v15401_v18  ;;  %v15591_v62 = vld [vmem:[%s17998_s8 + $0x8] sm:$0xff] }
 0xb5b   : > { %v3660_v30 = vmax.bf16 %v18039_v7, %v3596_v23  ;;  %v3662_v3 = vmax.bf16 %v18039_v7, %v3598_v11  ;;  %v13469_v23 = vld [vmem:[%s17999_s9 + $0x130] sm:$0xff]  }
 0xb5c   : > { %v2782_v40 = vpop.f32.mrb[68].mxu1  ;;  %v2853_v2 = vpop.f32.mrb[84].mxu0  ;;  %11508 = vmatpush3.bf16.msra.mxu1 %v13456_v52  ;;  %11548 = vmatpush3.bf16.msra.mxu0 %v13457_v20  ;;  %v3661_v33 = vmax.bf16 %v18039_v7, %v3597_v21  ;;  %v3663_v44 = vmax.bf16 %v18039_v7, %v3599_v51  ;;  %v13470_v11 = vld [vmem:[%s17999_s9 + $0x1b0] sm:$0xff]  }
 0xb5d   : > { %v3334_v58 = vpack.c.bf16 %v2782_v40, %v2782_v40  ;;  %v3336_v46 = vpack.c.bf16 %v2853_v2, %v2853_v2  ;;  %v2784_v34 = vpop.f32.mrb[69].mxu1  ;;  %v2855_v38 = vpop.f32.mrb[85].mxu0  ;;  %11509 = vmatprep.subr.bf16.mxu1 %v13458_v22  ;;  %11549 = vmatprep.subr.bf16.mxu0 %v13459_v28  ;;  %v13472_v40 = vld [vmem:[%s17999_s9 + $0x1f8] sm:$0xff]  }
 0xb5e   : > { %v3335_v42 = vpack.c.bf16 %v2784_v34, %v2784_v34  ;;  %v3337_v36 = vpack.c.bf16 %v2855_v38, %v2855_v38  ;;  %v2786_v49 = vpop.f32.mrb[70].mxu1  ;;  %v2857_v6 = vpop.f32.mrb[86].mxu0  ;;  %4771 = vmatprep.mubr.bf16.mxu1 %v3661_v33  ;;  %4835 = vmatprep.mubr.bf16.mxu0 %v3663_v44  ;;  %v13474_v34 = vld [vmem:[%s17999_s9 + $0x1b8] sm:$0xff]  }
 0xb5f   : > { %v2787_v43 = vpop.f32.mrb[71].mxu1  ;;  %v2858_v45 = vpop.f32.mrb[87].mxu0  ;;  %4772 = vmatmul.mubr.bf16.gmra.mrb[128].mxu1 %v3660_v30  ;;  %4836 = vmatmul.mubr.bf16.gmra.mrb[144].mxu0 %v3662_v3  ;;  %v3612_v13 = vadd.bf16 %v15404_v61, %v3334_v58  ;;  %v3614_v15 = vadd.bf16 %v15407_v47, %v3336_v46  ;;  %v3488_v61 = vpack.i.b16 %v15490_v29, %v15490_v29  ;;  %v13473_v46 = vld [vmem:[%s17999_s9 + $0x138] sm:$0xff]  }
 0xb60   : > { %v3613_v39 = vadd.bf16 %v15410_v16, %v3335_v42  ;;  %v3615_v12 = vadd.bf16 %v15413_v31, %v3337_v36  ;;  %11510 = vmatpush3.bf16.msra.mxu1 %v13460_v59  ;;  %11550 = vmatpush3.bf16.msra.mxu0 %v13461_v25  ;;  %v13465_v16 = vld [vmem:[%s17999_s9 + $0x1a8] sm:$0xff]   ;;  %v3495_v31 = vpack.i.b16 %v15494_v26, %v15494_v26  ;;  %v13471_v26 = vld [vmem:[%s17999_s9 + $0x178] sm:$0xff]   ;;  %v13476_v42 = vld [vmem:[%s17999_s9 + $0x2c0] sm:$0xff]  }
 0xb61   : > { %11511 = vmatprep.subr.bf16.mxu1 %v13462_v54  ;;  %11551 = vmatprep.subr.bf16.mxu0 %v13463_v35  ;;  %v3502_v47 = vpack.i.b16 %v3402_v1, %v3402_v1  ;;  %v3676_v52 = vmax.bf16 %v18039_v7, %v3612_v13  ;;  %v3678_v20 = vmax.bf16 %v18039_v7, %v3614_v15  ;;  %v13475_v35 = vld [vmem:[%s17999_s9 + $0x240] sm:$0xff]  }
 0xb62   : > { %v3677_v60 = vmax.bf16 %v18039_v7, %v3613_v39  ;;  %v3679_v55 = vmax.bf16 %v18039_v7, %v3615_v12  ;;  %v15550_v21 = vrot.slane %v3495_v31, %v15401_v18  ;;  %v15553_v51 = vrot.slane %v3488_v61, %v15401_v18  ;;  %v13477_v39 = vld [vmem:[%s17999_s9 + $0x200] sm:$0xff]   ;;  %v13479_v31 = vld [vmem:[%s17999_s9 + $0x248] sm:$0xff]  }
 0xb63   : > { %v15556_v29 = vrot.slane %v3502_v47, %v15401_v18  ;;  %v13478_v12 = vld [vmem:[%s17999_s9 + $0x280] sm:$0xff]  }
 0xb64   : > { %v2894_v63 = vpop.f32.mrb[72].mxu1  ;;  %v2965_v24 = vpop.f32.mrb[88].mxu0  ;;  %4779 = vmatprep.mubr.bf16.mxu1 %v3677_v60  ;;  %4843 = vmatprep.mubr.bf16.mxu0 %v3679_v55  ;;  %v13480_v60 = vld [vmem:[%s17999_s9 + $0x2c8] sm:$0xff]  }
 0xb65   : > { %11512 = vmatpush3.bf16.msra.mxu1 %v13464_v48  ;;  %11552 = vmatpush3.bf16.msra.mxu0 %v13465_v16  ;;  %v2896_v53 = vpop.f32.mrb[73].mxu1  ;;  %v2967_v14 = vpop.f32.mrb[89].mxu0 }
 0xb66   : > { %v2898_v22 = vpop.f32.mrb[74].mxu1  ;;  %v2969_v28 = vpop.f32.mrb[90].mxu0  ;;  %11513 = vmatprep.subr.bf16.mxu1 %v13467_v50  ;;  %11553 = vmatprep.subr.bf16.mxu0 %v13468_v10 }
 0xb67   : > { %v3290_v2 = vpack.c.bf16 %v2898_v22, %v2894_v63  ;;  %v3292_v33 = vpack.c.bf16 %v2969_v28, %v2965_v24  ;;  %v2900_v44 = vpop.f32.mrb[75].mxu1  ;;  %v2971_v30 = vpop.f32.mrb[91].mxu0  ;;  %4780 = vmatmul.mubr.bf16.gmra.mrb[132].mxu1 %v3676_v52  ;;  %4844 = vmatmul.mubr.bf16.gmra.mrb[148].mxu0 %v3678_v20  ;;  %v3410_v24 = vrot.slane %v15591_v62, %v15390_v32  ;;  %v13482_v52 = vld [vmem:[%s17999_s9 + $0x288] sm:$0xff]   ;;  %v13483_v22 = vld [vmem:[%s17999_s9 + $0x250] sm:$0xff]  }
 0xb68   : > { %v3291_v59 = vpack.c.bf16 %v2900_v44, %v2896_v53  ;;  %v3293_v25 = vpack.c.bf16 %v2971_v30, %v2967_v14  ;;  %v13481_v14 = vld [vmem:[%s17999_s9 + $0x208] sm:$0xff]   ;;  %v13484_v28 = vld [vmem:[%s17999_s9 + $0x2d0] sm:$0xff]  }
 0xb69   : > { %v3568_v58 = vadd.bf16 %v15539_v4, %v3290_v2  ;;  %11514 = vmatpush3.bf16.msra.mxu1 %v13469_v23  ;;  %11554 = vmatpush3.bf16.msra.mxu0 %v13470_v11  ;;  %v3570_v38 = vadd.bf16 %v15550_v21, %v3292_v33  ;;  %v3418_v44 = vcombine.high %v3410_v24, %v3410_v24 }
 0xb6a   : > { %v3569_v3 = vadd.bf16 %v15553_v51, %v3291_v59  ;;  %v3571_v54 = vadd.bf16 %v15556_v29, %v3293_v25  ;;  %11515 = vmatprep.subr.bf16.mxu1 %v13471_v26  ;;  %11555 = vmatprep.subr.bf16.mxu0 %v13472_v40  ;;  %v13485_v25 = vld [vmem:[%s17999_s9 + $0x210] sm:$0xff]  }
 0xb6b   : > { %v3632_v13 = vmax.bf16 %v18039_v7, %v3568_v58  ;;  %v3634_v15 = vmax.bf16 %v18039_v7, %v3570_v38  ;;  %v13486_v58 = vld [vmem:[%s17999_s9 + $0x290] sm:$0xff]  }
 0xb6c   : > { %v2904_v36 = vpop.f32.mrb[76].mxu1  ;;  %v2975_v49 = vpop.f32.mrb[92].mxu0  ;;  %v3633_v6 = vmax.bf16 %v18039_v7, %v3569_v3  ;;  %v3635_v1 = vmax.bf16 %v18039_v7, %v3571_v54  ;;  %v13487_v54 = vld [vmem:[%s17999_s9 + $0x258] sm:$0xff]  }
 0xb6d   : > { %11516 = vmatpush3.bf16.msra.mxu1 %v13473_v46  ;;  %11556 = vmatpush3.bf16.msra.mxu0 %v13474_v34  ;;  %v2906_v43 = vpop.f32.mrb[77].mxu1  ;;  %v2977_v45 = vpop.f32.mrb[93].mxu0 }
 0xb6e   : > { %v2908_v48 = vpop.f32.mrb[78].mxu1  ;;  %v2979_v16 = vpop.f32.mrb[94].mxu0  ;;  %4883 = vmatprep.mubr.bf16.mxu1 %v3633_v6  ;;  %4947 = vmatprep.mubr.bf16.mxu0 %v3635_v1  ;;  %v15636_v1 = vrot.slane %v3410_v24, %v15390_v32 }
 0xb6f   : > { %v3306_v55 = vpack.c.bf16 %v2908_v48, %v2904_v36  ;;  %v3308_v61 = vpack.c.bf16 %v2979_v16, %v2975_v49  ;;  %v2910_v47 = vpop.f32.mrb[79].mxu1  ;;  %v2981_v50 = vpop.f32.mrb[95].mxu0  ;;  %11581 = vmatprep.subr.bf16.mxu1 %v13475_v35  ;;  %11621 = vmatprep.subr.bf16.mxu0 %v13476_v42  ;;  %v13488_v35 = vld [vmem:[%s17999_s9 + $0x2d8] sm:$0xff]  }
 0xb70   : > { %v3307_v10 = vpack.c.bf16 %v2910_v47, %v2906_v43  ;;  %v3309_v63 = vpack.c.bf16 %v2981_v50, %v2977_v45  ;;  %4884 = vmatmul.mubr.bf16.vlgmr.msra.gmra.mrb[136].mxu1 %v3632_v13  ;;  %4948 = vmatmul.mubr.bf16.vlgmr.msra.gmra.mrb[152].mxu0 %v3634_v15  ;;  %v13489_v15 = vld [vmem:[%s17999_s9 + $0x218] sm:$0xff]  }
 0xb71   : > { %v3584_v53 = vadd.bf16 %v15539_v4, %v3306_v55  ;;  %11582 = vmatpush3.bf16.msra.mxu1 %v13477_v39  ;;  %11622 = vmatpush3.bf16.msra.mxu0 %v13478_v12  ;;  %v3586_v20 = vadd.bf16 %v15550_v21, %v3308_v61  ;;  %v15639_v39 = vrot.slane %v3418_v44, %v15390_v32  ;;  %v13490_v48 = vld [vmem:[%s17999_s9 + $0x298] sm:$0xff]   ;;  %v13492_v55 = vld [vmem:[%s17999_s9 + $0x2e0] sm:$0xff]   ;;  %v13495_v44 = vld [vmem:[%s17999_s9 + $0x268] sm:$0xff]  }
 0xb72   : > { %v3585_v23 = vadd.bf16 %v15553_v51, %v3307_v10  ;;  %v3587_v11 = vadd.bf16 %v15556_v29, %v3309_v63  ;;  %11583 = vmatprep.subr.bf16.mxu1 %v13479_v31  ;;  %11623 = vmatprep.subr.bf16.mxu0 %v13480_v60  ;;  %v13491_v60 = vld [vmem:[%s17999_s9 + $0x260] sm:$0xff]   ;;  %v3448_v63 = vcombine.high %v15636_v1, %v15636_v1 }
 0xb73   : > { %v3648_v38 = vmax.bf16 %v18039_v7, %v3584_v53  ;;  %v3650_v3 = vmax.bf16 %v18039_v7, %v3586_v20  ;;  %v3450_v24 = vcombine.high %v15639_v39, %v15639_v39 }
 0xb74   : > { %v2914_v26 = vpop.f32.mrb[80].mxu1  ;;  %v2985_v40 = vpop.f32.mrb[96].mxu0  ;;  %v3649_v2 = vmax.bf16 %v18039_v7, %v3585_v23  ;;  %v3651_v33 = vmax.bf16 %v18039_v7, %v3587_v11  ;;  %v13493_v11 = vld [vmem:[%s17999_s9 + $0x220] sm:$0xff]  }
 0xb75   : > { %11584 = vmatpush3.bf16.msra.mxu1 %v13481_v14  ;;  %11624 = vmatpush3.bf16.msra.mxu0 %v13482_v52  ;;  %v2916_v30 = vpop.f32.mrb[81].mxu1  ;;  %v2987_v59 = vpop.f32.mrb[97].mxu0 }
 0xb76   : > { %v2918_v46 = vpop.f32.mrb[82].mxu1  ;;  %v2989_v34 = vpop.f32.mrb[98].mxu0  ;;  %4891 = vmatprep.mubr.bf16.mxu1 %v3649_v2  ;;  %4955 = vmatprep.mubr.bf16.mxu0 %v3651_v33 }
 0xb77   : > { %v3322_v42 = vpack.c.bf16 %v2918_v46, %v2914_v26  ;;  %v3324_v36 = vpack.c.bf16 %v2989_v34, %v2985_v40  ;;  %v2920_v49 = vpop.f32.mrb[83].mxu1  ;;  %v2991_v6 = vpop.f32.mrb[99].mxu0  ;;  %11585 = vmatprep.subr.bf16.mxu1 %v13483_v22  ;;  %11625 = vmatprep.subr.bf16.mxu0 %v13484_v28  ;;  %v13494_v22 = vld [vmem:[%s17999_s9 + $0x2a0] sm:$0xff]  }
 0xb78   : > { %v3323_v43 = vpack.c.bf16 %v2920_v49, %v2916_v30  ;;  %v3325_v45 = vpack.c.bf16 %v2991_v6, %v2987_v59  ;;  %4892 = vmatmul.mubr.bf16.gmra.mrb[140].mxu1 %v3648_v38  ;;  %4956 = vmatmul.mubr.bf16.gmra.mrb[156].mxu0 %v3650_v3  ;;  %v13496_v30 = vld [vmem:[%s17999_s9 + $0x2e8] sm:$0xff]   ;;  %v3523_v38 = vpack.i.b16 %v3448_v63, %v3448_v63  ;;  %v13499_v49 = vld [vmem:[%s17999_s9 + $0x270] sm:$0xff]  }
 0xb79   : > { %v3600_v12 = vadd.bf16 %v15539_v4, %v3322_v42  ;;  %v3602_v13 = vadd.bf16 %v15550_v21, %v3324_v36  ;;  %11586 = vmatpush3.bf16.msra.mxu1 %v13485_v25  ;;  %11626 = vmatpush3.bf16.msra.mxu0 %v13486_v58  ;;  %v3509_v58 = vpack.i.b16 %v15636_v1, %v15636_v1  ;;  %v13500_v6 = vld [vmem:[%s17999_s9 + $0x2f0] sm:$0xff]  }
 0xb7a   : > { %v3601_v16 = vadd.bf16 %v15553_v51, %v3323_v43  ;;  %v3603_v31 = vadd.bf16 %v15556_v29, %v3325_v45  ;;  %11587 = vmatprep.subr.bf16.mxu1 %v13487_v54  ;;  %11627 = vmatprep.subr.bf16.mxu0 %v13488_v35  ;;  %v13497_v54 = vld [vmem:[%s17999_s9 + $0x228] sm:$0xff]   ;;  %v3530_v42 = vpack.i.b16 %v3450_v24, %v3450_v24 }
 0xb7b   : > { %v3664_v20 = vmax.bf16 %v18039_v7, %v3600_v12  ;;  %v3666_v23 = vmax.bf16 %v18039_v7, %v3602_v13  ;;  %v13498_v35 = vld [vmem:[%s17999_s9 + $0x2a8] sm:$0xff]   ;;  %v15703_v12 = vrot.slane %v3523_v38, %v15401_v18  ;;  %v13510_v38 = vld [vmem:[%s17999_s9 + $0x380] sm:$0xff]  }
 0xb7c   : > { %v2924_v61 = vpop.f32.mrb[84].mxu1  ;;  %v2995_v47 = vpop.f32.mrb[100].mxu0  ;;  %v3665_v50 = vmax.bf16 %v18039_v7, %v3601_v16  ;;  %v3667_v10 = vmax.bf16 %v18039_v7, %v3603_v31 }
 0xb7d   : > { %v3338_v53 = vpack.c.bf16 %v2924_v61, %v2924_v61  ;;  %11588 = vmatpush3.bf16.msra.mxu1 %v13489_v15  ;;  %11628 = vmatpush3.bf16.msra.mxu0 %v13490_v48  ;;  %v2926_v14 = vpop.f32.mrb[85].mxu1  ;;  %v2997_v52 = vpop.f32.mrb[101].mxu0  ;;  %v3340_v28 = vpack.c.bf16 %v2995_v47, %v2995_v47  ;;  %v13501_v15 = vld [vmem:[%s17999_s9 + $0x230] sm:$0xff]   ;;  %v13503_v47 = vld [vmem:[%s17999_s9 + $0x278] sm:$0xff]  }
 0xb7e   : > { %v3339_v26 = vpack.c.bf16 %v2926_v14, %v2926_v14  ;;  %v3341_v40 = vpack.c.bf16 %v2997_v52, %v2997_v52  ;;  %v2928_v2 = vpop.f32.mrb[86].mxu1  ;;  %v2999_v33 = vpop.f32.mrb[102].mxu0  ;;  %4899 = vmatprep.mubr.bf16.mxu1 %v3665_v50  ;;  %4963 = vmatprep.mubr.bf16.mxu0 %v3667_v10  ;;  %v13502_v48 = vld [vmem:[%s17999_s9 + $0x2b0] sm:$0xff]   ;;  %v13504_v50 = vld [vmem:[%s17999_s9 + $0x2f8] sm:$0xff]  }
 0xb7f   : > { %v2929_v59 = vpop.f32.mrb[87].mxu1  ;;  %v3000_v25 = vpop.f32.mrb[103].mxu0  ;;  %11589 = vmatprep.subr.bf16.mxu1 %v13491_v60  ;;  %11629 = vmatprep.subr.bf16.mxu0 %v13492_v55  ;;  %v3616_v3 = vadd.bf16 %v15539_v4, %v3338_v53  ;;  %v15715_v60 = vrot.slane %v3530_v42, %v15401_v18  ;;  %v13508_v2 = vld [vmem:[%s17999_s9 + $0x3c0] sm:$0xff]   ;;  %v13512_v42 = vld [vmem:[%s17999_s9 + $0x3c8] sm:$0xff]  }
 0xb80   : > { %v3617_v46 = vadd.bf16 %v15553_v51, %v3339_v26  ;;  %v3619_v34 = vadd.bf16 %v15556_v29, %v3341_v40  ;;  %4900 = vmatmul.mubr.bf16.gmra.mrb[144].mxu1 %v3664_v20  ;;  %4964 = vmatmul.mubr.bf16.gmra.mrb[160].mxu0 %v3666_v23  ;;  %v3516_v51 = vpack.i.b16 %v15639_v39, %v15639_v39  ;;  %v13505_v23 = vld [vmem:[%s17999_s9 + $0x238] sm:$0xff]   ;;  %v13507_v40 = vld [vmem:[%s17999_s9 + $0x340] sm:$0xff]  }
 0xb81   : > { %11590 = vmatpush3.bf16.msra.mxu1 %v13493_v11  ;;  %11630 = vmatpush3.bf16.msra.mxu0 %v13494_v22  ;;  %v3618_v29 = vadd.bf16 %v15550_v21, %v3340_v28  ;;  %v15700_v39 = vrot.slane %v3509_v58, %v15401_v18  ;;  %v3680_v55 = vmax.bf16 %v18039_v7, %v3616_v3  ;;  %v13506_v11 = vld [vmem:[%s17999_s9 + $0x2b8] sm:$0xff]  }
 0xb82   : > { %11591 = vmatprep.subr.bf16.mxu1 %v13495_v44  ;;  %11631 = vmatprep.subr.bf16.mxu0 %v13496_v30  ;;  %v3681_v4 = vmax.bf16 %v18039_v7, %v3617_v46  ;;  %v3683_v36 = vmax.bf16 %v18039_v7, %v3619_v34  ;;  %v15706_v13 = vrot.slane %v3516_v51, %v15401_v18  ;;  %v13509_v34 = vld [vmem:[%s17999_s9 + $0x300] sm:$0xff]  }
 0xb83   : > { %v3682_v61 = vmax.bf16 %v18039_v7, %v3618_v29  ;;  %v3403_v25 = vcombine.high %v15591_v62, %v15591_v62  ;;  %v13511_v62 = vld [vmem:[%s17999_s9 + $0x348] sm:$0xff]  }
 0xb84   : > { %v3036_v1 = vpop.f32.mrb[88].mxu1  ;;  %v3107_v43 = vpop.f32.mrb[104].mxu0  ;;  %4907 = vmatprep.mubr.bf16.mxu1 %v3681_v4  ;;  %4971 = vmatprep.mubr.bf16.mxu0 %v3683_v36 }
 0xb85   : > { %11592 = vmatpush3.bf16.msra.mxu1 %v13497_v54  ;;  %11632 = vmatpush3.bf16.msra.mxu0 %v13498_v35  ;;  %v3038_v21 = vpop.f32.mrb[89].mxu1  ;;  %v3109_v45 = vpop.f32.mrb[105].mxu0 }
 0xb86   : > { %v3040_v16 = vpop.f32.mrb[90].mxu1  ;;  %v3111_v31 = vpop.f32.mrb[106].mxu0  ;;  %11593 = vmatprep.subr.bf16.mxu1 %v13499_v49  ;;  %11633 = vmatprep.subr.bf16.mxu0 %v13500_v6 }
 0xb87   : > { %v3294_v10 = vpack.c.bf16 %v3040_v16, %v3036_v1  ;;  %v3296_v63 = vpack.c.bf16 %v3111_v31, %v3107_v43  ;;  %v3042_v24 = vpop.f32.mrb[91].mxu1  ;;  %v3113_v53 = vpop.f32.mrb[107].mxu0  ;;  %v3417_v43 = vrot.slane %v3403_v25, %v15390_v32 }
 0xb88   : > { %v3295_v14 = vpack.c.bf16 %v3042_v24, %v3038_v21  ;;  %v3297_v52 = vpack.c.bf16 %v3113_v53, %v3109_v45  ;;  %4908 = vmatmul.mubr.bf16.gmra.mrb[148].mxu1 %v3680_v55  ;;  %4972 = vmatmul.mubr.bf16.gmra.mrb[164].mxu0 %v3682_v61  ;;  %v13513_v45 = vld [vmem:[%s17999_s9 + $0x308] sm:$0xff]   ;;  %v13515_v55 = vld [vmem:[%s17999_s9 + $0x350] sm:$0xff]  }
 0xb89   : > { %v3572_v20 = vadd.bf16 %v15700_v39, %v3294_v10  ;;  %11594 = vmatpush3.bf16.msra.mxu1 %v13501_v15  ;;  %11634 = vmatpush3.bf16.msra.mxu0 %v13502_v48  ;;  %v3574_v22 = vadd.bf16 %v15703_v12, %v3296_v63  ;;  %v13514_v15 = vld [vmem:[%s17999_s9 + $0x388] sm:$0xff]   ;;  %v13516_v61 = vld [vmem:[%s17999_s9 + $0x3d0] sm:$0xff]   ;;  %v3419_v24 = vcombine.high %v3417_v43, %v3417_v43 }
 0xb8a   : > { %v3573_v28 = vadd.bf16 %v15706_v13, %v3295_v14  ;;  %v3575_v26 = vadd.bf16 %v15715_v60, %v3297_v52  ;;  %11595 = vmatprep.subr.bf16.mxu1 %v13503_v47  ;;  %11635 = vmatprep.subr.bf16.mxu0 %v13504_v50  ;;  %v13517_v52 = vld [vmem:[%s17999_s9 + $0x310] sm:$0xff]  }
 0xb8b   : > { %v3636_v3 = vmax.bf16 %v18039_v7, %v3572_v20  ;;  %v3638_v54 = vmax.bf16 %v18039_v7, %v3574_v22  ;;  %v13518_v20 = vld [vmem:[%s17999_s9 + $0x390] sm:$0xff]  }
 0xb8c   : > { %v3046_v33 = vpop.f32.mrb[92].mxu1  ;;  %v3117_v44 = vpop.f32.mrb[108].mxu0  ;;  %v3637_v30 = vmax.bf16 %v18039_v7, %v3573_v28  ;;  %v3639_v59 = vmax.bf16 %v18039_v7, %v3575_v26  ;;  %v13519_v26 = vld [vmem:[%s17999_s9 + $0x358] sm:$0xff]  }
 0xb8d   : > { %11596 = vmatpush3.bf16.msra.mxu1 %v13505_v23  ;;  %11636 = vmatpush3.bf16.msra.mxu0 %v13506_v11  ;;  %v3048_v58 = vpop.f32.mrb[93].mxu1  ;;  %v3119_v46 = vpop.f32.mrb[109].mxu0 }
 0xb8e   : > { %v3050_v35 = vpop.f32.mrb[94].mxu1  ;;  %v3121_v51 = vpop.f32.mrb[110].mxu0  ;;  %5011 = vmatprep.mubr.bf16.mxu1 %v3637_v30  ;;  %5075 = vmatprep.mubr.bf16.mxu0 %v3639_v59  ;;  %v15793_v59 = vrot.slane %v3417_v43, %v15390_v32 }
 0xb8f   : > { %v3310_v29 = vpack.c.bf16 %v3050_v35, %v3046_v33  ;;  %v3312_v4 = vpack.c.bf16 %v3121_v51, %v3117_v44  ;;  %v3052_v36 = vpop.f32.mrb[95].mxu1  ;;  %v3123_v49 = vpop.f32.mrb[111].mxu0  ;;  %11661 = vmatprep.subr.bf16.mxu1 %v13507_v40  ;;  %11701 = vmatprep.subr.bf16.mxu0 %v13508_v2  ;;  %v13520_v40 = vld [vmem:[%s17999_s9 + $0x3d8] sm:$0xff]  }
 0xb90   : > { %v3311_v6 = vpack.c.bf16 %v3052_v36, %v3048_v58  ;;  %v3313_v1 = vpack.c.bf16 %v3123_v49, %v3119_v46  ;;  %5012 = vmatmul.mubr.bf16.vlgmr.msra.gmra.mrb[152].mxu1 %v3636_v3  ;;  %5076 = vmatmul.mubr.bf16.vlgmr.msra.gmra.mrb[168].mxu0 %v3638_v54  ;;  %v15796_v46 = vrot.slane %v3419_v24, %v15390_v32  ;;  %v13521_v3 = vld [vmem:[%s17999_s9 + $0x318] sm:$0xff]   ;;  %v13528_v24 = vld [vmem:[%s17999_s9 + $0x3e8] sm:$0xff]  }
 0xb91   : > { %v3588_v21 = vadd.bf16 %v15700_v39, %v3310_v29  ;;  %11662 = vmatpush3.bf16.msra.mxu1 %v13509_v34  ;;  %11702 = vmatpush3.bf16.msra.mxu0 %v13510_v38  ;;  %v3590_v48 = vadd.bf16 %v15703_v12, %v3312_v4  ;;  %v13522_v54 = vld [vmem:[%s17999_s9 + $0x398] sm:$0xff]  }
 0xb92   : > { %v3589_v16 = vadd.bf16 %v15706_v13, %v3311_v6  ;;  %v3591_v31 = vadd.bf16 %v15715_v60, %v3313_v1  ;;  %11663 = vmatprep.subr.bf16.mxu1 %v13511_v62  ;;  %11703 = vmatprep.subr.bf16.mxu0 %v13512_v42  ;;  %v13523_v62 = vld [vmem:[%s17999_s9 + $0x360] sm:$0xff]   ;;  %v3449_v6 = vcombine.high %v15793_v59, %v15793_v59 }
 0xb93   : > { %v3652_v22 = vmax.bf16 %v18039_v7, %v3588_v21  ;;  %v3654_v28 = vmax.bf16 %v18039_v7, %v3590_v48  ;;  %v13524_v42 = vld [vmem:[%s17999_s9 + $0x3e0] sm:$0xff]   ;;  %v3451_v1 = vcombine.high %v15796_v46, %v15796_v46 }
 0xb94   : > { %v3056_v47 = vpop.f32.mrb[96].mxu1  ;;  %v3127_v50 = vpop.f32.mrb[112].mxu0  ;;  %v3653_v10 = vmax.bf16 %v18039_v7, %v3589_v16  ;;  %v3655_v63 = vmax.bf16 %v18039_v7, %v3591_v31  ;;  %v13525_v16 = vld [vmem:[%s17999_s9 + $0x320] sm:$0xff]  }
 0xb95   : > { %11664 = vmatpush3.bf16.msra.mxu1 %v13513_v45  ;;  %11704 = vmatpush3.bf16.msra.mxu0 %v13514_v15  ;;  %v3058_v53 = vpop.f32.mrb[97].mxu1  ;;  %v3129_v14 = vpop.f32.mrb[113].mxu0  ;;  %v13526_v31 = vld [vmem:[%s17999_s9 + $0x3a0] sm:$0xff]  }
 0xb96   : > { %v3060_v23 = vpop.f32.mrb[98].mxu1  ;;  %v3131_v11 = vpop.f32.mrb[114].mxu0  ;;  %5019 = vmatprep.mubr.bf16.mxu1 %v3653_v10  ;;  %5083 = vmatprep.mubr.bf16.mxu0 %v3655_v63  ;;  %v13527_v63 = vld [vmem:[%s17999_s9 + $0x368] sm:$0xff]  }
 0xb97   : > { %v3326_v2 = vpack.c.bf16 %v3060_v23, %v3056_v47  ;;  %v3328_v33 = vpack.c.bf16 %v3131_v11, %v3127_v50  ;;  %v3062_v44 = vpop.f32.mrb[99].mxu1  ;;  %v3133_v30 = vpop.f32.mrb[115].mxu0  ;;  %11665 = vmatprep.subr.bf16.mxu1 %v13515_v55  ;;  %11705 = vmatprep.subr.bf16.mxu0 %v13516_v61  ;;  %v3551_v11 = vpack.i.b16 %v3449_v6, %v3449_v6 }
 0xb98   : > { %v3327_v25 = vpack.c.bf16 %v3062_v44, %v3058_v53  ;;  %v3329_v58 = vpack.c.bf16 %v3133_v30, %v3129_v14  ;;  %5020 = vmatmul.mubr.bf16.gmra.mrb[156].mxu1 %v3652_v22  ;;  %5084 = vmatmul.mubr.bf16.gmra.mrb[172].mxu0 %v3654_v28  ;;  %v13529_v28 = vld [vmem:[%s17999_s9 + $0x328] sm:$0xff]   ;;  %v13533_v44 = vld [vmem:[%s17999_s9 + $0x3f0] sm:$0xff]  }
 0xb99   : > { %v3604_v34 = vadd.bf16 %v15700_v39, %v3326_v2  ;;  %v3606_v38 = vadd.bf16 %v15703_v12, %v3328_v33  ;;  %11666 = vmatpush3.bf16.msra.mxu1 %v13517_v52  ;;  %11706 = vmatpush3.bf16.msra.mxu0 %v13518_v20  ;;  %v3537_v52 = vpack.i.b16 %v15793_v59, %v15793_v59  ;;  %v13532_v33 = vld [vmem:[%s17999_s9 + $0x370] sm:$0xff]  }
 0xb9a   : > { %v3605_v35 = vadd.bf16 %v15706_v13, %v3327_v25  ;;  %v3607_v51 = vadd.bf16 %v15715_v60, %v3329_v58  ;;  %11667 = vmatprep.subr.bf16.mxu1 %v13519_v26  ;;  %11707 = vmatprep.subr.bf16.mxu0 %v13520_v40  ;;  %v13530_v26 = vld [vmem:[%s17999_s9 + $0x3a8] sm:$0xff]   ;;  %v3558_v40 = vpack.i.b16 %v3451_v1, %v3451_v1 }
 0xb9b   : > { %v3668_v15 = vmax.bf16 %v18039_v7, %v3604_v34  ;;  %v3670_v48 = vmax.bf16 %v18039_v7, %v3606_v38  ;;  %v15857_v58 = vrot.slane %v3537_v52, %v15401_v18  ;;  %v13534_v38 = vld [vmem:[%s17999_s9 + $0x330] sm:$0xff]  }
 0xb9c   : > { %v3066_v29 = vpop.f32.mrb[100].mxu1  ;;  %v3137_v4 = vpop.f32.mrb[116].mxu0  ;;  %v3669_v36 = vmax.bf16 %v18039_v7, %v3605_v35  ;;  %v3671_v49 = vmax.bf16 %v18039_v7, %v3607_v51  ;;  %v15872_v51 = vrot.slane %v3558_v40, %v15401_v18 }
 0xb9d   : > { %v3342_v43 = vpack.c.bf16 %v3066_v29, %v3066_v29  ;;  %11668 = vmatpush3.bf16.msra.mxu1 %v13521_v3  ;;  %11708 = vmatpush3.bf16.msra.mxu0 %v13522_v54  ;;  %v3068_v21 = vpop.f32.mrb[101].mxu1  ;;  %v3139_v45 = vpop.f32.mrb[117].mxu0  ;;  %v3344_v55 = vpack.c.bf16 %v3137_v4, %v3137_v4  ;;  %v13535_v3 = vld [vmem:[%s17999_s9 + $0x3b0] sm:$0xff]   ;;  %v13536_v29 = vld [vmem:[%s17999_s9 + $0x378] sm:$0xff]  }
 0xb9e   : > { %v3343_v61 = vpack.c.bf16 %v3068_v21, %v3068_v21  ;;  %v3345_v47 = vpack.c.bf16 %v3139_v45, %v3139_v45  ;;  %v3070_v50 = vpop.f32.mrb[102].mxu1  ;;  %v3141_v10 = vpop.f32.mrb[118].mxu0  ;;  %5027 = vmatprep.mubr.bf16.mxu1 %v3669_v36  ;;  %5091 = vmatprep.mubr.bf16.mxu0 %v3671_v49  ;;  %v13537_v4 = vld [vmem:[%s17999_s9 + $0x3f8] sm:$0xff]  }
 0xb9f   : > { %v3071_v53 = vpop.f32.mrb[103].mxu1  ;;  %v3142_v14 = vpop.f32.mrb[119].mxu0  ;;  %11669 = vmatprep.subr.bf16.mxu1 %v13523_v62  ;;  %11709 = vmatprep.subr.bf16.mxu0 %v13524_v42  ;;  %v3620_v22 = vadd.bf16 %v15700_v39, %v3342_v43 }
 0xba0   : > { %v3621_v20 = vadd.bf16 %v15706_v13, %v3343_v61  ;;  %v3623_v23 = vadd.bf16 %v15715_v60, %v3345_v47  ;;  %5028 = vmatmul.mubr.bf16.gmra.mrb[160].mxu1 %v3668_v15  ;;  %5092 = vmatmul.mubr.bf16.gmra.mrb[176].mxu0 %v3670_v48  ;;  %v3544_v13 = vpack.i.b16 %v15796_v46, %v15796_v46  ;;  %v13538_v15 = vld [vmem:[%s17999_s9 + $0x338] sm:$0xff]  }
 0xba1   : > { %11670 = vmatpush3.bf16.msra.mxu1 %v13525_v16  ;;  %11710 = vmatpush3.bf16.msra.mxu0 %v13526_v31  ;;  %v3622_v60 = vadd.bf16 %v15703_v12, %v3344_v55  ;;  %v15860_v46 = vrot.slane %v3551_v11, %v15401_v18  ;;  %v3684_v62 = vmax.bf16 %v18039_v7, %v3620_v22  ;;  %v13539_v48 = vld [vmem:[%s17999_s9 + $0x3b8] sm:$0xff]  }
 0xba2   : > { %11671 = vmatprep.subr.bf16.mxu1 %v13527_v63  ;;  %11711 = vmatprep.subr.bf16.mxu0 %v13528_v24  ;;  %v3685_v39 = vmax.bf16 %v18039_v7, %v3621_v20  ;;  %v3687_v2 = vmax.bf16 %v18039_v7, %v3623_v23  ;;  %v15863_v34 = vrot.slane %v3544_v13, %v15401_v18 }
 0xba3   : > { %v3686_v42 = vmax.bf16 %v18039_v7, %v3622_v60 }
 0xba4   : > { %v3178_v30 = vpop.f32.mrb[104].mxu1  ;;  %v3249_v59 = vpop.f32.mrb[120].mxu0  ;;  %5035 = vmatprep.mubr.bf16.mxu1 %v3685_v39  ;;  %5099 = vmatprep.mubr.bf16.mxu0 %v3687_v2 }
 0xba5   : > { %11672 = vmatpush3.bf16.msra.mxu1 %v13529_v28  ;;  %11712 = vmatpush3.bf16.msra.mxu0 %v13530_v26  ;;  %v3180_v12 = vpop.f32.mrb[105].mxu1  ;;  %v3251_v25 = vpop.f32.mrb[121].mxu0 }
 0xba6   : > { %v3182_v54 = vpop.f32.mrb[106].mxu1  ;;  %v3253_v35 = vpop.f32.mrb[122].mxu0  ;;  %11673 = vmatprep.subr.bf16.mxu1 %v13532_v33  ;;  %11713 = vmatprep.subr.bf16.mxu0 %v13533_v44 }
 0xba7   : > { %v3298_v36 = vpack.c.bf16 %v3182_v54, %v3178_v30  ;;  %v3300_v49 = vpack.c.bf16 %v3253_v35, %v3249_v59  ;;  %v3184_v6 = vpop.f32.mrb[107].mxu1  ;;  %v3255_v1 = vpop.f32.mrb[123].mxu0 }
 0xba8   : > { %v3299_v43 = vpack.c.bf16 %v3184_v6, %v3180_v12  ;;  %v3301_v21 = vpack.c.bf16 %v3255_v1, %v3251_v25  ;;  %5036 = vmatmul.mubr.bf16.gmra.mrb[164].mxu1 %v3684_v62  ;;  %5100 = vmatmul.mubr.bf16.gmra.mrb[180].mxu0 %v3686_v42 }
 0xba9   : > { %v3576_v45 = vadd.bf16 %v15857_v58, %v3298_v36  ;;  %11674 = vmatpush3.bf16.msra.mxu1 %v13534_v38  ;;  %11714 = vmatpush3.bf16.msra.mxu0 %v13535_v3  ;;  %v3578_v16 = vadd.bf16 %v15860_v46, %v3300_v49 }
 0xbaa   : > { %v3577_v31 = vadd.bf16 %v15863_v34, %v3299_v43  ;;  %v3579_v55 = vadd.bf16 %v15872_v51, %v3301_v21  ;;  %11675 = vmatprep.subr.bf16.mxu1 %v13536_v29  ;;  %11715 = vmatprep.subr.bf16.mxu0 %v13537_v4 }
 0xbab   : > { %v3640_v53 = vmax.bf16 %v18039_v7, %v3576_v45  ;;  %v3642_v14 = vmax.bf16 %v18039_v7, %v3578_v16 }
 0xbac   : > { %v3188_v61 = vpop.f32.mrb[108].mxu1  ;;  %v3259_v47 = vpop.f32.mrb[124].mxu0  ;;  %v3641_v50 = vmax.bf16 %v18039_v7, %v3577_v31  ;;  %v3643_v10 = vmax.bf16 %v18039_v7, %v3579_v55 }
 0xbad   : > { %11676 = vmatpush3.bf16.msra.mxu1 %v13538_v15  ;;  %11716 = vmatpush3.bf16.msra.mxu0 %v13539_v48  ;;  %v3190_v63 = vpop.f32.mrb[109].mxu1  ;;  %v3261_v24 = vpop.f32.mrb[125].mxu0 }
 0xbae   : > { %v3192_v52 = vpop.f32.mrb[110].mxu1  ;;  %v3263_v20 = vpop.f32.mrb[126].mxu0  ;;  %5139 = vmatprep.mubr.bf16.mxu1 %v3641_v50  ;;  %5203 = vmatprep.mubr.bf16.mxu0 %v3643_v10 }
 0xbaf   : > { %v3314_v23 = vpack.c.bf16 %v3192_v52, %v3188_v61  ;;  %v3316_v11 = vpack.c.bf16 %v3263_v20, %v3259_v47  ;;  %v3194_v22 = vpop.f32.mrb[111].mxu1  ;;  %v3265_v28 = vpop.f32.mrb[127].mxu0  ;;  %12918 = vmatprep.subr.bf16.mxu0 %v18041_v17 }
 0xbb0   : > { %v3315_v26 = vpack.c.bf16 %v3194_v22, %v3190_v63  ;;  %v3317_v13 = vpack.c.bf16 %v3265_v28, %v3261_v24  ;;  %5140 = vmatmul.mubr.bf16.vlgmr.msra.gmra.mrb[168].mxu1 %v3640_v53  ;;  %5204 = vmatmul.mubr.bf16.vlgmr.msra.gmra.mrb[184].mxu0 %v3642_v14 }
 0xbb1   : > { %v3592_v40 = vadd.bf16 %v15857_v58, %v3314_v23  ;;  %v3594_v60 = vadd.bf16 %v15860_v46, %v3316_v11 }
 0xbb2   : > { %v3593_v39 = vadd.bf16 %v15863_v34, %v3315_v26  ;;  %v3595_v2 = vadd.bf16 %v15872_v51, %v3317_v13 }
 0xbb3   : > { %v3656_v54 = vmax.bf16 %v18039_v7, %v3592_v40  ;;  %v3658_v35 = vmax.bf16 %v18039_v7, %v3594_v60 }
 0xbb4   : > { %v3198_v33 = vpop.f32.mrb[112].mxu1  ;;  %v3269_v44 = vpop.f32.mrb[128].mxu0  ;;  %v3657_v30 = vmax.bf16 %v18039_v7, %v3593_v39  ;;  %v3659_v59 = vmax.bf16 %v18039_v7, %v3595_v2 }
 0xbb5   : > { %v3200_v12 = vpop.f32.mrb[113].mxu1  ;;  %v3271_v25 = vpop.f32.mrb[129].mxu0 }
 0xbb6   : > { %v3202_v38 = vpop.f32.mrb[114].mxu1  ;;  %v3273_v3 = vpop.f32.mrb[130].mxu0  ;;  %5147 = vmatprep.mubr.bf16.mxu1 %v3657_v30  ;;  %5211 = vmatprep.mubr.bf16.mxu0 %v3659_v59 }
 0xbb7   : > { %v3330_v62 = vpack.c.bf16 %v3202_v38, %v3198_v33  ;;  %v3332_v42 = vpack.c.bf16 %v3273_v3, %v3269_v44  ;;  %v3204_v29 = vpop.f32.mrb[115].mxu1  ;;  %v3275_v4 = vpop.f32.mrb[131].mxu0 }
 0xbb8   : > { %v3331_v36 = vpack.c.bf16 %v3204_v29, %v3200_v12  ;;  %v3333_v49 = vpack.c.bf16 %v3275_v4, %v3271_v25  ;;  %5148 = vmatmul.mubr.bf16.gmra.mrb[172].mxu1 %v3656_v54  ;;  %5212 = vmatmul.mubr.bf16.gmra.mrb[188].mxu0 %v3658_v35 }
 0xbb9   : > { %v3608_v6 = vadd.bf16 %v15857_v58, %v3330_v62  ;;  %v3610_v1 = vadd.bf16 %v15860_v46, %v3332_v42 }
 0xbba   : > { %v3609_v43 = vadd.bf16 %v15863_v34, %v3331_v36  ;;  %v3611_v21 = vadd.bf16 %v15872_v51, %v3333_v49 }
 0xbbb   : > { %v3672_v47 = vmax.bf16 %v18039_v7, %v3608_v6  ;;  %v3674_v50 = vmax.bf16 %v18039_v7, %v3610_v1 }
 0xbbc   : > { %v3208_v45 = vpop.f32.mrb[116].mxu1  ;;  %v3279_v15 = vpop.f32.mrb[132].mxu0  ;;  %v3673_v48 = vmax.bf16 %v18039_v7, %v3609_v43  ;;  %v3675_v16 = vmax.bf16 %v18039_v7, %v3611_v21 }
 0xbbd   : > { %v3346_v31 = vpack.c.bf16 %v3208_v45, %v3208_v45  ;;  %v3210_v55 = vpop.f32.mrb[117].mxu1  ;;  %v3281_v61 = vpop.f32.mrb[133].mxu0  ;;  %v3348_v10 = vpack.c.bf16 %v3279_v15, %v3279_v15 }
 0xbbe   : > { %v3347_v63 = vpack.c.bf16 %v3210_v55, %v3210_v55  ;;  %v3349_v24 = vpack.c.bf16 %v3281_v61, %v3281_v61  ;;  %v3212_v53 = vpop.f32.mrb[118].mxu1  ;;  %v3283_v14 = vpop.f32.mrb[134].mxu0  ;;  %5155 = vmatprep.mubr.bf16.mxu1 %v3673_v48  ;;  %5219 = vmatprep.mubr.bf16.mxu0 %v3675_v16 }
 0xbbf   : > { %v3213_v52 = vpop.f32.mrb[119].mxu1  ;;  %v3284_v20 = vpop.f32.mrb[135].mxu0  ;;  %v3624_v22 = vadd.bf16 %v15857_v58, %v3346_v31  ;;  %v3626_v28 = vadd.bf16 %v15860_v46, %v3348_v10  ;;  %v10560_v46 = vld [vmem:[%s18000_s10] ss:$0 sm:$0xff] }
 0xbc0   : > { %v3625_v23 = vadd.bf16 %v15863_v34, %v3347_v63  ;;  %v3627_v11 = vadd.bf16 %v15872_v51, %v3349_v24  ;;  %5156 = vmatmul.mubr.bf16.gmra.mrb[176].mxu1 %v3672_v47  ;;  %5220 = vmatmul.mubr.bf16.gmra.mrb[192].mxu0 %v3674_v50 }
 0xbc1   : > { %v3688_v40 = vmax.bf16 %v18039_v7, %v3624_v22  ;;  %v3690_v60 = vmax.bf16 %v18039_v7, %v3626_v28 }
 0xbc2   : > { %v3689_v26 = vmax.bf16 %v18039_v7, %v3625_v23  ;;  %v3691_v13 = vmax.bf16 %v18039_v7, %v3627_v11 }
 0xbc4   : > { %5163 = vmatprep.mubr.bf16.mxu1 %v3689_v26  ;;  %5227 = vmatprep.mubr.bf16.mxu0 %v3691_v13 }
 0xbc8   : > { %5164 = vmatmul.mubr.bf16.gmra.mrb[180].mxu1 %v3688_v40  ;;  %5228 = vmatmul.mubr.bf16.gmra.mrb[196].mxu0 %v3690_v60 }
 0xbc9   : > { %12528 = vmatprep.mubr.msk.f32.mxu0 %vm14021_vm1, %v18043_v37 }
 0xc22   : > { %v11437_v34 = vpop.f32.mrb[120].mxu1  ;;  %v11477_v51 = vpop.f32.mrb[136].mxu0 }
 0xc23   : > { %v11438_v58 = vpop.f32.mrb[121].mxu1  ;;  %v11478_v39 = vpop.f32.mrb[137].mxu0 }
 0xc24   : > { %v11439_v2 = vadd.f32 %v11438_v58, %v11437_v34  ;;  %v11479_v33 = vadd.f32 %v11478_v39, %v11477_v51  ;;  %v11440_v44 = vpop.f32.mrb[122].mxu1  ;;  %v11480_v30 = vpop.f32.mrb[138].mxu0 }
 0xc25   : > { %v11441_v59 = vpop.f32.mrb[123].mxu1  ;;  %v11481_v12 = vpop.f32.mrb[139].mxu0 }
 0xc26   : > { %v4758_v25 = vadd.f32 %v11439_v2, %v10560_v46  ;;  %v11442_v38 = vadd.f32 %v11441_v59, %v11440_v44  ;;  %v11482_v3 = vadd.f32 %v11481_v12, %v11480_v30 }
 0xc28   : > { %v4822_v54 = vadd.f32 %v11479_v33, %v4758_v25  ;;  %v4761_v35 = vadd.f32 %v11442_v38, %v10560_v46 }
 0xc2a   : > { %v4825_v62 = vadd.f32 %v11482_v3, %v4761_v35  ;;  %v11443_v42 = vpop.f32.mrb[124].mxu1  ;;  %v11483_v29 = vpop.f32.mrb[140].mxu0 }
 0xc2b   : > { %v11444_v4 = vpop.f32.mrb[125].mxu1  ;;  %v11484_v36 = vpop.f32.mrb[141].mxu0 }
 0xc2c   : > { %v11445_v49 = vadd.f32 %v11444_v4, %v11443_v42  ;;  %v11485_v6 = vadd.f32 %v11484_v36, %v11483_v29  ;;  %v11446_v1 = vpop.f32.mrb[126].mxu1  ;;  %v11486_v43 = vpop.f32.mrb[142].mxu0 }
 0xc2d   : > { %v11447_v21 = vpop.f32.mrb[127].mxu1  ;;  %v11487_v45 = vpop.f32.mrb[143].mxu0 }
 0xc2e   : > { %v4766_v15 = vadd.f32 %v11445_v49, %v10560_v46  ;;  %v11448_v48 = vadd.f32 %v11447_v21, %v11446_v1  ;;  %v11488_v16 = vadd.f32 %v11487_v45, %v11486_v43 }
 0xc30   : > { %v4830_v31 = vadd.f32 %v11485_v6, %v4766_v15  ;;  %v4769_v55 = vadd.f32 %v11448_v48, %v10560_v46 }
 0xc32   : > { %v4833_v61 = vadd.f32 %v11488_v16, %v4769_v55  ;;  %v11449_v47 = vpop.f32.mrb[128].mxu1  ;;  %v11489_v50 = vpop.f32.mrb[144].mxu0 }
 0xc33   : > { %v11450_v10 = vpop.f32.mrb[129].mxu1  ;;  %v11490_v63 = vpop.f32.mrb[145].mxu0 }
 0xc34   : > { %v11451_v24 = vadd.f32 %v11450_v10, %v11449_v47  ;;  %v11491_v53 = vadd.f32 %v11490_v63, %v11489_v50  ;;  %v11452_v14 = vpop.f32.mrb[130].mxu1  ;;  %v11492_v52 = vpop.f32.mrb[146].mxu0 }
 0xc35   : > { %v11453_v20 = vpop.f32.mrb[131].mxu1  ;;  %v11493_v23 = vpop.f32.mrb[147].mxu0 }
 0xc36   : > { %v4774_v11 = vadd.f32 %v11451_v24, %v10560_v46  ;;  %v11454_v22 = vadd.f32 %v11453_v20, %v11452_v14  ;;  %v11494_v28 = vadd.f32 %v11493_v23, %v11492_v52 }
 0xc38   : > { %v4838_v26 = vadd.f32 %v11491_v53, %v4774_v11  ;;  %v4777_v13 = vadd.f32 %v11454_v22, %v10560_v46 }
 0xc3a   : > { %v4841_v40 = vadd.f32 %v11494_v28, %v4777_v13  ;;  %v11455_v60 = vpop.f32.mrb[132].mxu1  ;;  %v11495_v34 = vpop.f32.mrb[148].mxu0 }
 0xc3b   : > { %v11456_v51 = vpop.f32.mrb[133].mxu1  ;;  %v11496_v58 = vpop.f32.mrb[149].mxu0 }
 0xc3c   : > { %v11457_v39 = vadd.f32 %v11456_v51, %v11455_v60  ;;  %v11497_v2 = vadd.f32 %v11496_v58, %v11495_v34  ;;  %v11458_v33 = vpop.f32.mrb[134].mxu1  ;;  %v11498_v44 = vpop.f32.mrb[150].mxu0 }
 0xc3d   : > { %v11459_v30 = vpop.f32.mrb[135].mxu1  ;;  %v11499_v59 = vpop.f32.mrb[151].mxu0 }
 0xc3e   : > { %v4782_v12 = vadd.f32 %v11457_v39, %v10560_v46 }
 0xc40   : > { %v4846_v25 = vadd.f32 %v11497_v2, %v4782_v12 }
 0xc43   : > { %v11517_v38 = vpop.f32.mrb[136].mxu1  ;;  %v11557_v3 = vpop.f32.mrb[152].mxu0 }
 0xc44   : > { %v11518_v35 = vpop.f32.mrb[137].mxu1  ;;  %v11558_v42 = vpop.f32.mrb[153].mxu0 }
 0xc45   : > { %v11519_v29 = vadd.f32 %v11518_v35, %v11517_v38  ;;  %v11559_v4 = vadd.f32 %v11558_v42, %v11557_v3  ;;  %v11520_v36 = vpop.f32.mrb[138].mxu1  ;;  %v11560_v49 = vpop.f32.mrb[154].mxu0 }
 0xc46   : > { %v11521_v6 = vpop.f32.mrb[139].mxu1  ;;  %v11561_v1 = vpop.f32.mrb[155].mxu0 }
 0xc47   : > { %v4886_v43 = vadd.f32 %v11519_v29, %v4822_v54  ;;  %v11522_v21 = vadd.f32 %v11521_v6, %v11520_v36  ;;  %v11562_v45 = vadd.f32 %v11561_v1, %v11560_v49 }
 0xc49   : > { %v4950_v15 = vadd.f32 %v11559_v4, %v4886_v43  ;;  %v4889_v48 = vadd.f32 %v11522_v21, %v4825_v62 }
 0xc4b   : > { %v4953_v16 = vadd.f32 %v11562_v45, %v4889_v48  ;;  %v11523_v55 = vpop.f32.mrb[140].mxu1  ;;  %v11563_v47 = vpop.f32.mrb[156].mxu0 }
 0xc4c   : > { %v11524_v46 = vpop.f32.mrb[141].mxu1  ;;  %v11564_v50 = vpop.f32.mrb[157].mxu0 }
 0xc4d   : > { %v11525_v10 = vadd.f32 %v11524_v46, %v11523_v55  ;;  %v11565_v63 = vadd.f32 %v11564_v50, %v11563_v47  ;;  %v11526_v24 = vpop.f32.mrb[142].mxu1  ;;  %v11566_v53 = vpop.f32.mrb[158].mxu0 }
 0xc4e   : > { %v11527_v14 = vpop.f32.mrb[143].mxu1  ;;  %v11567_v52 = vpop.f32.mrb[159].mxu0 }
 0xc4f   : > { %v4894_v20 = vadd.f32 %v11525_v10, %v4830_v31  ;;  %v11528_v23 = vadd.f32 %v11527_v14, %v11526_v24  ;;  %v11568_v11 = vadd.f32 %v11567_v52, %v11566_v53 }
 0xc51   : > { %v4958_v22 = vadd.f32 %v11565_v63, %v4894_v20  ;;  %v4897_v54 = vadd.f32 %v11528_v23, %v4833_v61 }
 0xc53   : > { %v4961_v28 = vadd.f32 %v11568_v11, %v4897_v54  ;;  %v11529_v13 = vpop.f32.mrb[144].mxu1  ;;  %v11569_v60 = vpop.f32.mrb[160].mxu0 }
 0xc54   : > { %v11530_v62 = vpop.f32.mrb[145].mxu1  ;;  %v11570_v34 = vpop.f32.mrb[161].mxu0 }
 0xc55   : > { %v11531_v51 = vadd.f32 %v11530_v62, %v11529_v13  ;;  %v11571_v58 = vadd.f32 %v11570_v34, %v11569_v60  ;;  %v11532_v39 = vpop.f32.mrb[146].mxu1  ;;  %v11572_v2 = vpop.f32.mrb[162].mxu0 }
 0xc56   : > { %v11533_v33 = vpop.f32.mrb[147].mxu1  ;;  %v11573_v44 = vpop.f32.mrb[163].mxu0 }
 0xc57   : > { %v4902_v30 = vadd.f32 %v11531_v51, %v4838_v26  ;;  %v11534_v59 = vadd.f32 %v11533_v33, %v11532_v39  ;;  %v11574_v12 = vadd.f32 %v11573_v44, %v11572_v2 }
 0xc59   : > { %v4966_v38 = vadd.f32 %v11571_v58, %v4902_v30  ;;  %v4905_v31 = vadd.f32 %v11534_v59, %v4841_v40 }
 0xc5b   : > { %v4969_v3 = vadd.f32 %v11574_v12, %v4905_v31  ;;  %v11535_v35 = vpop.f32.mrb[148].mxu1  ;;  %v11575_v42 = vpop.f32.mrb[164].mxu0 }
 0xc5c   : > { %v11536_v61 = vpop.f32.mrb[149].mxu1  ;;  %v11576_v29 = vpop.f32.mrb[165].mxu0 }
 0xc5d   : > { %v11537_v4 = vadd.f32 %v11536_v61, %v11535_v35  ;;  %v11577_v36 = vadd.f32 %v11576_v29, %v11575_v42  ;;  %v11538_v49 = vpop.f32.mrb[150].mxu1  ;;  %v11578_v6 = vpop.f32.mrb[166].mxu0 }
 0xc5e   : > { %v11539_v1 = vpop.f32.mrb[151].mxu1  ;;  %v11579_v43 = vpop.f32.mrb[167].mxu0 }
 0xc5f   : > { %v4910_v21 = vadd.f32 %v11537_v4, %v4846_v25 }
 0xc61   : > { %v4974_v45 = vadd.f32 %v11577_v36, %v4910_v21 }
 0xc63   : > { %v11597_v48 = vpop.f32.mrb[152].mxu1  ;;  %v11637_v55 = vpop.f32.mrb[168].mxu0 }
 0xc64   : > { %v11598_v26 = vpop.f32.mrb[153].mxu1  ;;  %v11638_v47 = vpop.f32.mrb[169].mxu0 }
 0xc65   : > { %v11599_v46 = vadd.f32 %v11598_v26, %v11597_v48  ;;  %v11639_v50 = vadd.f32 %v11638_v47, %v11637_v55  ;;  %v11600_v40 = vpop.f32.mrb[154].mxu1  ;;  %v11640_v10 = vpop.f32.mrb[170].mxu0 }
 0xc66   : > { %v11601_v63 = vpop.f32.mrb[155].mxu1  ;;  %v11641_v24 = vpop.f32.mrb[171].mxu0 }
 0xc67   : > { %v5014_v53 = vadd.f32 %v11599_v46, %v4950_v15  ;;  %v11602_v14 = vadd.f32 %v11601_v63, %v11600_v40  ;;  %v11642_v52 = vadd.f32 %v11641_v24, %v11640_v10 }
 0xc69   : > { %v5078_v20 = vadd.f32 %v11639_v50, %v5014_v53  ;;  %v5017_v23 = vadd.f32 %v11602_v14, %v4953_v16 }
 0xc6b   : > { %v5081_v11 = vadd.f32 %v11642_v52, %v5017_v23  ;;  %v11603_v54 = vpop.f32.mrb[156].mxu1  ;;  %v11643_v13 = vpop.f32.mrb[172].mxu0 }
 0xc6c   : > { %v11604_v25 = vpop.f32.mrb[157].mxu1  ;;  %v11644_v60 = vpop.f32.mrb[173].mxu0 }
 0xc6d   : > { %v11605_v62 = vadd.f32 %v11604_v25, %v11603_v54  ;;  %v11645_v34 = vadd.f32 %v11644_v60, %v11643_v13  ;;  %v11606_v51 = vpop.f32.mrb[158].mxu1  ;;  %v11646_v58 = vpop.f32.mrb[174].mxu0 }
 0xc6e   : > { %v11607_v39 = vpop.f32.mrb[159].mxu1  ;;  %v11647_v2 = vpop.f32.mrb[175].mxu0 }
 0xc6f   : > { %v5022_v33 = vadd.f32 %v11605_v62, %v4958_v22  ;;  %v11608_v44 = vadd.f32 %v11607_v39, %v11606_v51  ;;  %v11648_v30 = vadd.f32 %v11647_v2, %v11646_v58 }
 0xc71   : > { %v5086_v59 = vadd.f32 %v11645_v34, %v5022_v33  ;;  %v5025_v15 = vadd.f32 %v11608_v44, %v4961_v28 }
 0xc73   : > { %v15926_v12 = vadd.f32 %v11648_v30, %v5025_v15  ;;  %v11609_v31 = vpop.f32.mrb[160].mxu1  ;;  %v11649_v16 = vpop.f32.mrb[176].mxu0 }
 0xc74   : > { %v11610_v35 = vpop.f32.mrb[161].mxu1  ;;  %v11650_v42 = vpop.f32.mrb[177].mxu0 }
 0xc75   : > { %v11611_v61 = vadd.f32 %v11610_v35, %v11609_v31  ;;  %v11651_v29 = vadd.f32 %v11650_v42, %v11649_v16  ;;  %v11612_v4 = vpop.f32.mrb[162].mxu1  ;;  %v11652_v36 = vpop.f32.mrb[178].mxu0 }
 0xc76   : > { %v11613_v49 = vpop.f32.mrb[163].mxu1  ;;  %v11653_v6 = vpop.f32.mrb[179].mxu0 }
 0xc77   : > { %v5030_v1 = vadd.f32 %v11611_v61, %v4966_v38  ;;  %v11614_v43 = vadd.f32 %v11613_v49, %v11612_v4  ;;  %v11654_v21 = vadd.f32 %v11653_v6, %v11652_v36 }
 0xc79   : > { %v15928_v22 = vadd.f32 %v11651_v29, %v5030_v1  ;;  %v5033_v48 = vadd.f32 %v11614_v43, %v4969_v3 }
 0xc7b   : > { %v15930_v55 = vadd.f32 %v11654_v21, %v5033_v48  ;;  %v11615_v28 = vpop.f32.mrb[164].mxu1  ;;  %v11655_v26 = vpop.f32.mrb[180].mxu0 }
 0xc7c   : > { %v11616_v47 = vpop.f32.mrb[165].mxu1  ;;  %v11656_v46 = vpop.f32.mrb[181].mxu0 }
 0xc7d   : > { %v11617_v50 = vadd.f32 %v11616_v47, %v11615_v28  ;;  %v11657_v40 = vadd.f32 %v11656_v46, %v11655_v26  ;;  %v11618_v10 = vpop.f32.mrb[166].mxu1  ;;  %v11658_v63 = vpop.f32.mrb[182].mxu0 }
 0xc7e   : > { %v11619_v24 = vpop.f32.mrb[167].mxu1  ;;  %v11659_v53 = vpop.f32.mrb[183].mxu0 }
 0xc7f   : > { %v5038_v14 = vadd.f32 %v11617_v50, %v4974_v45 }
 0xc81   : > { %v15932_v52 = vadd.f32 %v11657_v40, %v5038_v14 }
 0xc83   : > { %v11677_v38 = vpop.f32.mrb[168].mxu1  ;;  %v11717_v23 = vpop.f32.mrb[184].mxu0 }
 0xc84   : > { %v11678_v54 = vpop.f32.mrb[169].mxu1  ;;  %v11718_v13 = vpop.f32.mrb[185].mxu0 }
 0xc85   : > { %v11679_v3 = vadd.f32 %v11678_v54, %v11677_v38  ;;  %v11719_v25 = vadd.f32 %v11718_v13, %v11717_v23  ;;  %v11680_v60 = vpop.f32.mrb[170].mxu1  ;;  %v11720_v62 = vpop.f32.mrb[186].mxu0 }
 0xc86   : > { %v11681_v34 = vpop.f32.mrb[171].mxu1  ;;  %v11721_v51 = vpop.f32.mrb[187].mxu0 }
 0xc87   : > { %v5142_v58 = vadd.f32 %v11679_v3, %v5078_v20  ;;  %v11682_v39 = vadd.f32 %v11681_v34, %v11680_v60  ;;  %v11722_v2 = vadd.f32 %v11721_v51, %v11720_v62 }
 0xc89   : > { %v5206_v33 = vadd.f32 %v11719_v25, %v5142_v58  ;;  %v5145_v44 = vadd.f32 %v11682_v39, %v5081_v11 }
 0xc8b   : > { %v5209_v30 = vadd.f32 %v11722_v2, %v5145_v44  ;;  %v11683_v15 = vpop.f32.mrb[172].mxu1  ;;  %v11723_v45 = vpop.f32.mrb[188].mxu0  ;;  %v15935_v31 = vadd.f32 %v5206_v33, %v15080_v57 }
 0xc8c   : > { %v11684_v16 = vpop.f32.mrb[173].mxu1  ;;  %v11724_v35 = vpop.f32.mrb[189].mxu0 }
 0xc8d   : > { %v11685_v42 = vadd.f32 %v11684_v16, %v11683_v15  ;;  %v11725_v61 = vadd.f32 %v11724_v35, %v11723_v45  ;;  %v11686_v29 = vpop.f32.mrb[174].mxu1  ;;  %v11726_v4 = vpop.f32.mrb[190].mxu0  ;;  %v5244_v36 = vsel %vm587_vm0, %v15935_v31, 0.0  ;;  %v5236_v20 = vadd.f32 %v5209_v30, %v15083_v27 }
 0xc8e   : > { %v11687_v49 = vpop.f32.mrb[175].mxu1  ;;  %v11727_v6 = vpop.f32.mrb[191].mxu0  ;;  %5245 = vadd.xlane.f32.xlu0 %v5244_v36 }
 0xc8f   : > { %v5150_v11 = vadd.f32 %v11685_v42, %v5086_v59  ;;  %v11688_v1 = vadd.f32 %v11687_v49, %v11686_v29  ;;  %v11728_v43 = vadd.f32 %v11727_v6, %v11726_v4  ;;  %v5247_v57 = vsel %vm587_vm0, %v5236_v20, 0.0 }
 0xc90   : > { %5248 = vadd.xlane.f32.xlu1 %v5247_v57 }
 0xc91   : > { %v5214_v21 = vadd.f32 %v11725_v61, %v5150_v11  ;;  %v5153_v48 = vadd.f32 %v11688_v1, %v15926_v12 }
 0xc93   : > { %v5217_v28 = vadd.f32 %v11728_v43, %v5153_v48  ;;  %v11689_v26 = vpop.f32.mrb[176].mxu1  ;;  %v11729_v47 = vpop.f32.mrb[192].mxu0  ;;  %v5237_v46 = vadd.f32 %v5214_v21, %v15126_v5 }
 0xc94   : > { %v11690_v50 = vpop.f32.mrb[177].mxu1  ;;  %v11730_v40 = vpop.f32.mrb[193].mxu0 }
 0xc95   : > { %v11691_v27 = vadd.f32 %v11690_v50, %v11689_v26  ;;  %v11731_v10 = vadd.f32 %v11730_v40, %v11729_v47  ;;  %v11692_v63 = vpop.f32.mrb[178].mxu1  ;;  %v11732_v24 = vpop.f32.mrb[194].mxu0  ;;  %v5250_v59 = vsel %vm587_vm0, %v5237_v46, 0.0  ;;  %v5238_v53 = vadd.f32 %v5217_v28, %v15123_v56 }
 0xc96   : > { %v11693_v14 = vpop.f32.mrb[179].mxu1  ;;  %v11733_v38 = vpop.f32.mrb[195].mxu0  ;;  %5251 = vadd.xlane.f32.xlu0 %v5250_v59 }
 0xc97   : > { %v5158_v12 = vadd.f32 %v11691_v27, %v15928_v22  ;;  %v11694_v23 = vadd.f32 %v11693_v14, %v11692_v63  ;;  %v11734_v54 = vadd.f32 %v11733_v38, %v11732_v24  ;;  %v5253_v13 = vsel %vm587_vm0, %v5238_v53, 0.0 }
 0xc98   : > { %5254 = vadd.xlane.f32.xlu1 %v5253_v13  ;;  %v13540_v13 = vld [vmem:[%s18056_s1 + $0x10] sm:$0xff]  }
 0xc99   : > { %v5222_v5 = vadd.f32 %v11731_v10, %v5158_v12  ;;  %v5161_v3 = vadd.f32 %v11694_v23, %v15930_v55  ;;  %12502 = vmatprep.subr.bf16.mxu1 %v13540_v13 }
 0xc9a   : > { %12503 = vmatpush3.bf16.msra.mxu1 %v13540_v13 }
 0xc9b   : > { %v5225_v25 = vadd.f32 %v11734_v54, %v5161_v3  ;;  %v11695_v60 = vpop.f32.mrb[180].mxu1  ;;  %v11735_v62 = vpop.f32.mrb[196].mxu0  ;;  %v5239_v34 = vadd.f32 %v5222_v5, %v15154_v9  ;;  %v13541_v5 = vld [vmem:[%s18056_s1 + $0x18] sm:$0xff]  }
 0xc9c   : > { %v11696_v51 = vpop.f32.mrb[181].mxu1  ;;  %v11736_v56 = vpop.f32.mrb[197].mxu0  ;;  %12504 = vmatprep.subr.bf16.mxu1 %v13541_v5 }
 0xc9d   : > { %v11697_v58 = vadd.f32 %v11696_v51, %v11695_v60  ;;  %v11737_v39 = vadd.f32 %v11736_v56, %v11735_v62  ;;  %v11698_v2 = vpop.f32.mrb[182].mxu1  ;;  %v11738_v33 = vpop.f32.mrb[198].mxu0  ;;  %v5256_v22 = vsel %vm587_vm0, %v5239_v34, 0.0  ;;  %v5240_v44 = vadd.f32 %v5225_v25, %v15150_v19 }
 0xc9e   : > { %v11699_v30 = vpop.f32.mrb[183].mxu1  ;;  %v11739_v15 = vpop.f32.mrb[199].mxu0  ;;  %5257 = vadd.xlane.f32.xlu0 %v5256_v22  ;;  %12505 = vmatpush3.bf16.msra.mxu1 %v13541_v5 }
 0xc9f   : > { %v5166_v55 = vadd.f32 %v11697_v58, %v15932_v52  ;;  %v5259_v45 = vsel %vm587_vm0, %v5240_v44, 0.0  ;;  %12930 = vmatprep.subr.bf16.mxu1 %v18041_v17  ;;  %v10689_v30 = vld [vmem:[%s18001_s11] ss:$0 sm:$0xff] }
 0xca0   : > { %5260 = vadd.xlane.f32.xlu1 %v5259_v45 }
 0xca1   : > { %v5230_v16 = vadd.f32 %v11737_v39, %v5166_v55 }
 0xca3   : > { %v5241_v9 = vadd.f32 %v5230_v16, %v15168_v0 }
 0xca5   : > { %v5262_v35 = vsel %vm587_vm0, %v5241_v9, 0.0 }
 0xca6   : > { %5263 = vadd.xlane.f32.xlu0 %v5262_v35 }
 0xd1b   : > { %v5246_v42 = vpop.xlane.xlu0 %5245 }
 0xd1c   : > { %v5265_v61 = vmul.f32 0.03125, %v5246_v42 }
 0xd1d   : > { %v5249_v29 = vpop.xlane.xlu1 %5248 }
 0xd1e   : > { %v15956_v4 = vsub.f32 %v15935_v31, %v5265_v61  ;;  %v5266_v19 = vmul.f32 0.03125, %v5249_v29  ;;  %v10690_v61 = vld [vmem:[%s18002_s12] ss:$0 sm:$0xff] }
 0xd20   : > { %v15958_v36 = vsub.f32 %v5236_v20, %v5266_v19  ;;  %v5279_v52 = vmul.f32 %v15956_v4, %v15956_v4 }
 0xd22   : > { %v5286_v49 = vsel %vm587_vm0, %v5279_v52, 0.0  ;;  %v5280_v0 = vmul.f32 %v15958_v36, %v15958_v36 }
 0xd23   : > { %5287 = vadd.xlane.f32.xlu1 %v5286_v49  ;;  %v5252_v6 = vpop.xlane.xlu0 %5251 }
 0xd24   : > { %v5267_v11 = vmul.f32 0.03125, %v5252_v6  ;;  %v5289_v1 = vsel %vm587_vm0, %v5280_v0, 0.0 }
 0xd25   : > { %v5255_v43 = vpop.xlane.xlu1 %5254  ;;  %5290 = vadd.xlane.f32.xlu0 %v5289_v1 }
 0xd26   : > { %v15966_v31 = vsub.f32 %v5237_v46, %v5267_v11  ;;  %v5268_v57 = vmul.f32 0.03125, %v5255_v43 }
 0xd28   : > { %v15968_v20 = vsub.f32 %v5238_v53, %v5268_v57  ;;  %v5281_v21 = vmul.f32 %v15966_v31, %v15966_v31 }
 0xd2a   : > { %v5292_v48 = vsel %vm587_vm0, %v5281_v21, 0.0  ;;  %v5282_v28 = vmul.f32 %v15968_v20, %v15968_v20 }
 0xd2b   : > { %5293 = vadd.xlane.f32.xlu1 %v5292_v48  ;;  %v5258_v26 = vpop.xlane.xlu0 %5257 }
 0xd2c   : > { %v5269_v47 = vmul.f32 0.03125, %v5258_v26  ;;  %v5295_v50 = vsel %vm587_vm0, %v5282_v28, 0.0 }
 0xd2d   : > { %v5261_v40 = vpop.xlane.xlu1 %5260  ;;  %5296 = vadd.xlane.f32.xlu0 %v5295_v50 }
 0xd2e   : > { %v15976_v46 = vsub.f32 %v5239_v34, %v5269_v47  ;;  %v5270_v27 = vmul.f32 0.03125, %v5261_v40 }
 0xd30   : > { %v15978_v10 = vsub.f32 %v5240_v44, %v5270_v27  ;;  %v5283_v63 = vmul.f32 %v15976_v46, %v15976_v46 }
 0xd32   : > { %v5298_v24 = vsel %vm587_vm0, %v5283_v63, 0.0  ;;  %v5284_v59 = vmul.f32 %v15978_v10, %v15978_v10 }
 0xd33   : > { %5299 = vadd.xlane.f32.xlu1 %v5298_v24  ;;  %v5264_v53 = vpop.xlane.xlu0 %5263 }
 0xd34   : > { %v5271_v14 = vmul.f32 0.03125, %v5264_v53  ;;  %v5301_v38 = vsel %vm587_vm0, %v5284_v59, 0.0 }
 0xd35   : > { %5302 = vadd.xlane.f32.xlu0 %v5301_v38 }
 0xd36   : > { %v15986_v12 = vsub.f32 %v5241_v9, %v5271_v14 }
 0xd38   : > { %v5285_v23 = vmul.f32 %v15986_v12, %v15986_v12 }
 0xd3a   : > { %v5304_v54 = vsel %vm587_vm0, %v5285_v23, 0.0 }
 0xd3b   : > { %5305 = vadd.xlane.f32.xlu1 %v5304_v54 }
 0xdb0   : > { %v5288_v3 = vpop.xlane.xlu1 %5287 }
 0xdb1   : > { %v5307_v25 = vmul.f32 0.03125, %v5288_v3  ;;  %v10696_v3 = vld [vmem:[%s17992_s2 + $0x1] ss:$0 sm:$0xff] }
 0xdb2   : > { %v5291_v60 = vpop.xlane.xlu0 %5290 }
 0xdb3   : > { %v5314_v62 = vadd.f32 1e-05, %v5307_v25  ;;  %v5308_v34 = vmul.f32 0.03125, %v5291_v60 }
 0xdb5   : > { %13800 = vrsqrt.f32 %v5314_v62  ;;  %v5315_v51 = vadd.f32 1e-05, %v5308_v34 }
 0xdb7   : > { %13802 = vrsqrt.f32 %v5315_v51 }
 0xdb8   : > { %v5294_v56 = vpop.xlane.xlu1 %5293 }
 0xdb9   : > { %v5309_v58 = vmul.f32 0.03125, %v5294_v56 }
 0xdba   : > { %v5297_v39 = vpop.xlane.xlu0 %5296 }
 0xdbb   : > { %v5316_v2 = vadd.f32 1e-05, %v5309_v58  ;;  %v5310_v33 = vmul.f32 0.03125, %v5297_v39 }
 0xdbd   : > { %13804 = vrsqrt.f32 %v5316_v2  ;;  %v5317_v22 = vadd.f32 1e-05, %v5310_v33 }
 0xdbf   : > { %v13801_v44 = vpop.eup %13800  ;;  %13806 = vrsqrt.f32 %v5317_v22 }
 0xdc0   : > { %v5300_v15 = vpop.xlane.xlu1 %5299  ;;  %v5328_v55 = vmul.f32 %v13801_v44, %v15956_v4 }
 0xdc1   : > { %v13803_v45 = vpop.eup %13802  ;;  %v5311_v16 = vmul.f32 0.03125, %v5300_v15 }
 0xdc2   : > { %v5303_v9 = vpop.xlane.xlu0 %5302  ;;  %v5329_v35 = vmul.f32 %v13803_v45, %v15958_v36  ;;  %v5341_v42 = vmul.f32 %v10689_v30, %v5328_v55 }
 0xdc3   : > { %v5318_v29 = vadd.f32 1e-05, %v5311_v16  ;;  %v5312_v19 = vmul.f32 0.03125, %v5303_v9 }
 0xdc4   : > { %v5342_v52 = vmul.f32 %v10689_v30, %v5329_v35  ;;  %v16006_v0 = vadd.f32 %v10690_v61, %v5341_v42 }
 0xdc5   : > { %13808 = vrsqrt.f32 %v5318_v29  ;;  %v5319_v49 = vadd.f32 1e-05, %v5312_v19 }
 0xdc6   : > { %v16008_v6 = vadd.f32 %v10690_v61, %v5342_v52 }
 0xdc7   : > { %v13805_v4 = vpop.eup %13804  ;;  %13810 = vrsqrt.f32 %v5319_v49 }
 0xdc8   : > { %v5330_v11 = vmul.f32 %v13805_v4, %v15966_v31  ;;  %v5306_v1 = vpop.xlane.xlu1 %5305  ;;  %v5361_v36 = vpack.c.bf16 %v16008_v6, %v16006_v0 }
 0xdc9   : > { %v13807_v43 = vpop.eup %13806  ;;  %v5313_v57 = vmul.f32 0.03125, %v5306_v1 }
 0xdca   : > { %v5343_v21 = vmul.f32 %v10689_v30, %v5330_v11  ;;  %v5331_v48 = vmul.f32 %v13807_v43, %v15968_v20  ;;  %12506 = vmatprep.mubr.msk.bf16.mxu1 %vm587_vm0, %v5361_v36 }
 0xdcb   : > { %v5320_v28 = vadd.f32 1e-05, %v5313_v57 }
 0xdcc   : > { %v5344_v26 = vmul.f32 %v10689_v30, %v5331_v48  ;;  %v16015_v47 = vadd.f32 %v10690_v61, %v5343_v21 }
 0xdcd   : > { %13812 = vrsqrt.f32 %v5320_v28 }
 0xdce   : > { %v16017_v50 = vadd.f32 %v10690_v61, %v5344_v26 }
 0xdcf   : > { %v13809_v40 = vpop.eup %13808 }
 0xdd0   : > { %v5362_v31 = vpack.c.bf16 %v16017_v50, %v16015_v47  ;;  %v5332_v27 = vmul.f32 %v13809_v40, %v15976_v46 }
 0xdd1   : > { %v13811_v63 = vpop.eup %13810 }
 0xdd2   : > { %12507 = vmatmul.mubr.msk.bf16.vlgmr.msra.gmra.mrb[184].mxu1 %vm587_vm0, %v5362_v31  ;;  %v5333_v20 = vmul.f32 %v13811_v63, %v15978_v10  ;;  %v5345_v24 = vmul.f32 %v10689_v30, %v5332_v27 }
 0xdd4   : > { %v5346_v59 = vmul.f32 %v10689_v30, %v5333_v20  ;;  %v16024_v53 = vadd.f32 %v10690_v61, %v5345_v24 }
 0xdd6   : > { %v16026_v14 = vadd.f32 %v10690_v61, %v5346_v59 }
 0xdd7   : > { %v13813_v38 = vpop.eup %13812 }
 0xdd8   : > { %v5363_v23 = vpack.c.bf16 %v16026_v14, %v16024_v53  ;;  %v5334_v54 = vmul.f32 %v13813_v38, %v15986_v12 }
 0xdda   : > { %12510 = vmatprep.mubr.msk.bf16.mxu1 %vm587_vm0, %v5363_v23  ;;  %v5347_v46 = vmul.f32 %v10689_v30, %v5334_v54 }
 0xddc   : > { %v16032_v13 = vadd.f32 %v10690_v61, %v5347_v46 }
 0xdde   : > { %v5364_v10 = vpack.c.bf16 %v16032_v13, %v16032_v13 }
 0xde0   : > { %12511 = vmatmul.mubr.msk.bf16.gmra.mrb[188].mxu1 %vm587_vm0, %v5364_v10 }
 0xde1   : > { %12563 = vmatprep.mubr.msk.f32.mxu1 %vm14021_vm1, %v18043_v37 }
 0xea5   : > { %v12508_v5 = vpop.f32.mrb[184].mxu1 }
 0xea6   : > { %v5436_v25 = vpop.f32.mrb[185].mxu1  ;;  %v5445_v60 = vadd.f32 %v12508_v5, %v10696_v3 }
 0xea7   : > { %v12509_v12 = vpop.f32.mrb[186].mxu1  ;;  %v5437_v51 = vadd.f32 %v10696_v3, %v5436_v25 }
 0xea8   : > { %v5448_v62 = vadd.f32 %v12509_v12, %v10696_v3  ;;  %v5439_v34 = vpop.f32.mrb[187].mxu1  ;;  %v16084_v61 = vmul.f32 0.35355338, %v5445_v60 }
 0xea9   : > { %v5440_v56 = vadd.f32 %v10696_v3, %v5439_v34  ;;  %v16064_v16 = vmul.f32 0.35355338, %v5437_v51 }
 0xeaa   : > { %v16042_v58 = vpack.i.bf16 %v5448_v62, %v5445_v60  ;;  %v16074_v9 = vmul.f32 0.35355338, %v5448_v62 }
 0xeab   : > { %v16044_v39 = vpack.i.bf16 %v5440_v56, %v5437_v51  ;;  %v16076_v35 = vmul.f32 0.35355338, %v5440_v56 }
 0xeac   : > { %13247 = vrot.lane.b32.xlu1 %v16042_v58, %s18060_s26 }
 0xead   : > { %13242 = vrot.lane.b32.xlu0 %v16044_v39, %s18060_s26 }
 0xeb3   : > { %v12512_v2 = vpop.f32.mrb[188].mxu1 }
 0xeb4   : > { %v16050_v33 = vadd.f32 %v12512_v2, %v10696_v3  ;;  %v5452_v22 = vpop.f32.mrb[189].mxu1 }
 0xeb5   : > { %v12513_v44 = vpop.f32.mrb[190].mxu1  ;;  %v5453_v15 = vadd.f32 %v10696_v3, %v5452_v22 }
 0xeb6   : > { %5492 = vrot.lane.b32.xlu0 %v16050_v33, %s18060_s26  ;;  %v5455_v30 = vpop.f32.mrb[191].mxu1  ;;  %v16091_v29 = vmul.f32 0.35355338, %v16050_v33 }
 0xeb7   : > { %v5456_v55 = vadd.f32 %v10696_v3, %v5455_v30  ;;  %v16082_v42 = vmul.f32 0.35355338, %v5453_v15 }
 0xeb9   : > { %v16054_v45 = vpack.i.bf16 %v5456_v55, %v5453_v15  ;;  %v16097_v19 = vmul.f32 0.35355338, %v5456_v55 }
 0xeba   : > { %13262 = vrot.lane.b32.xlu0 %v16042_v58, %s18061_s23 }
 0xebb   : > { %13252 = vrot.lane.b32.xlu1 %v16054_v45, %s18060_s26  ;;  %s18070_s26 = smov 40  }
 0xebe   : > { %5874 = vrot.lane.b32.xlu0 %v16050_v33, %s18061_s23 }
 0xebf   : > { %13257 = vrot.lane.b32.xlu1 %v16044_v39, %s18061_s23 }
 0xec2   : > { %5848 = vrot.lane.b32.xlu0 %v16064_v16, %s18062_s19 }
 0xec3   : > { %13267 = vrot.lane.b32.xlu1 %v16054_v45, %s18061_s23  ;;  %s18074_s23 = smov 8  }
 0xec6   : > { %13277 = vrot.lane.b32.xlu0 %v16042_v58, %s18063_s20 }
 0xec7   : > { %13272 = vrot.lane.b32.xlu1 %v16044_v39, %s18063_s20 }
 0xeca   : > { %5854 = vrot.lane.b32.xlu0 %v16074_v9, %s18062_s19 }
 0xecb   : > { %5850 = vrot.lane.b32.xlu1 %v16076_v35, %s18062_s19 }
 0xece   : > { %5856 = vrot.lane.b32.xlu0 %v16082_v42, %s18062_s19 }
 0xecf   : > { %5852 = vrot.lane.b32.xlu1 %v16084_v61, %s18062_s19 }
 0xed2   : > { %5860 = vrot.lane.b32.xlu0 %v16091_v29, %s18062_s19 }
 0xed3   : > { %13282 = vrot.lane.b32.xlu1 %v16054_v45, %s18063_s20 }
 0xed6   : > { %13287 = vrot.lane.b32.xlu0 %v16044_v39, %s18064_s30 }
 0xed7   : > { %5858 = vrot.lane.b32.xlu1 %v16097_v19, %s18062_s19  ;;  %s18075_s19 = smov 16  }
 0xeda   : > { %6225 = vrot.lane.b32.xlu0 %v16076_v35, %s18065_s29 }
 0xedb   : > { %6249 = vrot.lane.b32.xlu1 %v16050_v33, %s18063_s20 }
 0xede   : > { %6227 = vrot.lane.b32.xlu0 %v16084_v61, %s18065_s29 }
 0xedf   : > { %6223 = vrot.lane.b32.xlu1 %v16064_v16, %s18065_s29 }
 0xee2   : > { %13297 = vrot.lane.b32.xlu0 %v16054_v45, %s18064_s30 }
 0xee3   : > { %13292 = vrot.lane.b32.xlu1 %v16042_v58, %s18064_s30 }
 0xee6   : > { %6233 = vrot.lane.b32.xlu0 %v16097_v19, %s18065_s29 }
 0xee7   : > { %6229 = vrot.lane.b32.xlu1 %v16074_v9, %s18065_s29 }
 0xeea   : > { %6624 = vrot.lane.b32.xlu0 %v16050_v33, %s18064_s30  ;;  %s512_s30 = sand.u32 1, %s14008_s22  }
 0xeeb   : > { %6231 = vrot.lane.b32.xlu1 %v16082_v42, %s18065_s29  ;;  %s10323_s20 = scalar_lea.sflag [#allocation3], %s512_s30 }
 0xeee   : > { %6600 = vrot.lane.b32.xlu0 %v16076_v35, %s18066_s17 }
 0xeef   : > { %6235 = vrot.lane.b32.xlu1 %v16091_v29, %s18065_s29 }
 0xef2   : > { %6604 = vrot.lane.b32.xlu0 %v16074_v9, %s18066_s17 }
 0xef3   : > { %6598 = vrot.lane.b32.xlu1 %v16064_v16, %s18066_s17 }
 0xef6   : > { %6608 = vrot.lane.b32.xlu0 %v16097_v19, %s18066_s17 }
 0xef7   : > { %6602 = vrot.lane.b32.xlu1 %v16084_v61, %s18066_s17 }
 0xefa   : > { %13302 = vrot.lane.b32.xlu0 %v16044_v39, %s18067_s28 }
 0xefb   : > { %6606 = vrot.lane.b32.xlu1 %v16082_v42, %s18066_s17 }
 0xefe   : > { %13312 = vrot.lane.b32.xlu0 %v16054_v45, %s18067_s28 }
 0xeff   : > { %6610 = vrot.lane.b32.xlu1 %v16091_v29, %s18066_s17 }
 0xf02   : > { %13317 = vrot.lane.b32.xlu0 %v16044_v39, %s18068_s18 }
 0xf03   : > { %13307 = vrot.lane.b32.xlu1 %v16042_v58, %s18067_s28 }
 0xf06   : > { %6093 = vrot.lane.b32.xlu0 %v16050_v33, %s18068_s18 }
 0xf07   : > { %5718 = vrot.lane.b32.xlu1 %v16050_v33, %s18067_s28  ;;  %s18076_s28 = smov 24  }
 0xf0a   : > { %13337 = vrot.lane.b32.xlu0 %v16042_v58, %s18069_s27 }
 0xf0b   : > { %13322 = vrot.lane.b32.xlu1 %v16042_v58, %s18068_s18 }
 0xf0f   : > { %13327 = vrot.lane.b32.xlu1 %v16054_v45, %s18068_s18  ;;  %s513_s18 = scalar_lea.vmem [#allocation2], %s512_s30 }
 0xf13   : > { %13332 = vrot.lane.b32.xlu1 %v16044_v39, %s18069_s27 }
 0xf17   : > { %13342 = vrot.lane.b32.xlu1 %v16054_v45, %s18069_s27 }
 0xf1e   : > { %v13248_v1 = vpop.permute.xlu1 %13247 }
 0xf1f   : > { %v13243_v52 = vpop.permute.xlu0 %13242  ;;  %v13250_v36 = vunpack.i.h.bf16 %v13248_v1  ;;  %v13249_v43 = vunpack.i.l.bf16 %v13248_v1 }
 0xf20   : > { %v13245_v49 = vunpack.i.h.bf16 %v13243_v52  ;;  %v13244_v4 = vunpack.i.l.bf16 %v13243_v52 }
 0xf21   : > { %v12923_v21 = vpack.c.bf16 %v13250_v36, %v13249_v43 }
 0xf22   : > { %v12919_v11 = vpack.c.bf16 %v13245_v49, %v13244_v4 }
 0xf24   : > { %12921 = vmatpush3.bf16.xpose.msk.msra.mxu0 %vm14246_vm3, %v12919_v11 }
 0xf25   : > { %12922 = vmatprep.subr.bf16.mxu0 %v18041_v17 }
 0xf28   : > { %v5493_v57 = vpop.permute.xlu0 %5492 }
 0xf2c   : > { %v13263_v48 = vpop.permute.xlu0 %13262  ;;  %12925 = vmatpush3.bf16.xpose.msk.msra.mxu0 %vm14246_vm3, %v12923_v21 }
 0xf2d   : > { %v13253_v28 = vpop.permute.xlu1 %13252  ;;  %12926 = vmatprep.subr.bf16.mxu0 %v18041_v17  ;;  %v13265_v12 = vunpack.i.h.bf16 %v13263_v48  ;;  %v13264_v60 = vunpack.i.l.bf16 %v13263_v48 }
 0xf2e   : > { %v13255_v26 = vunpack.i.h.bf16 %v13253_v28  ;;  %v13254_v40 = vunpack.i.l.bf16 %v13253_v28 }
 0xf2f   : > { %v12944_v51 = vpack.c.bf16 %v13265_v12, %v13264_v60 }
 0xf30   : > { %v5875_v31 = vpop.permute.xlu0 %5874  ;;  %v12927_v63 = vpack.c.bf16 %v13255_v26, %v13254_v40 }
 0xf31   : > { %v13258_v27 = vpop.permute.xlu1 %13257 }
 0xf32   : > { %v13260_v23 = vunpack.i.h.bf16 %v13258_v27  ;;  %v13259_v54 = vunpack.i.l.bf16 %v13258_v27 }
 0xf34   : > { %v5849_v20 = vpop.permute.xlu0 %5848  ;;  %12929 = vmatpush3.bf16.xpose.msk.msra.mxu0 %vm14246_vm3, %v12927_v63  ;;  %v12940_v5 = vpack.c.bf16 %v13260_v23, %v13259_v54 }
 0xf35   : > { %v13268_v24 = vpop.permute.xlu1 %13267  ;;  %12526 = vmatprep.subr.mxu0 %v18043_v37 }
 0xf36   : > { %v13270_v22 = vunpack.i.h.bf16 %v13268_v24  ;;  %v13269_v44 = vunpack.i.l.bf16 %v13268_v24 }
 0xf38   : > { %v16170_v59 = vpop.permute.xlu0 %13277  ;;  %v12948_v55 = vpack.c.bf16 %v13270_v22, %v13269_v44 }
 0xf39   : > { %v13273_v38 = vpop.permute.xlu1 %13272  ;;  %v13280_v1 = vunpack.i.h.bf16 %v16170_v59  ;;  %v13279_v36 = vunpack.i.l.bf16 %v16170_v59 }
 0xf3a   : > { %v13274_v52 = vunpack.i.l.bf16 %v13273_v38 }
 0xf3b   : > { %v12965_v21 = vpack.c.bf16 %v13280_v1, %v13279_v36 }
 0xf3c   : > { %v16172_v46 = vpop.permute.xlu0 %5854  ;;  %12527 = vmatpush3.xpose.msk.msra.mxu0 %vm692_vm2, %v5493_v57 }
 0xf3d   : > { %v5851_v10 = vpop.permute.xlu1 %5850  ;;  %12939 = vmatprep.subr.bf16.mxu0 %v18041_v17 }
 0xf3f   : > { %12529 = vmatmul.mubr.msk.f32.vlgmr.msra.gmra.mrb[200].mxu0 %vm692_vm2, %v16064_v16 }
 0xf40   : > { %v16178_v3 = vpop.permute.xlu0 %5856  ;;  %12942 = vmatpush3.bf16.xpose.msk.msra.mxu0 %vm14246_vm3, %v12940_v5  ;;  %12531 = vmatprep.mubr.msk.f32.mxu0 %vm14021_vm1, %v18043_v37 }
 0xf41   : > { %v5853_v25 = vpop.permute.xlu1 %5852  ;;  %12943 = vmatprep.subr.bf16.mxu0 %v18041_v17 }
 0xf43   : > { %12532 = vmatmul.mubr.msk.f32.gmra.mrb[202].mxu0 %vm692_vm2, %v16076_v35 }
 0xf44   : > { %v16187_v62 = vpop.permute.xlu0 %5860  ;;  %12534 = vmatprep.mubr.msk.f32.mxu0 %vm14021_vm1, %v18043_v37 }
 0xf45   : > { %v13283_v34 = vpop.permute.xlu1 %13282 }
 0xf46   : > { %v13285_v26 = vunpack.i.h.bf16 %v13283_v34  ;;  %v13284_v40 = vunpack.i.l.bf16 %v13283_v34 }
 0xf47   : > { %12535 = vmatmul.mubr.msk.f32.gmra.mrb[204].mxu0 %vm692_vm2, %v16084_v61  ;;  %v13275_v61 = vunpack.i.h.bf16 %v13273_v38 }
 0xf48   : > { %v16193_v56 = vpop.permute.xlu0 %13287  ;;  %12946 = vmatpush3.bf16.xpose.msk.msra.mxu0 %vm14246_vm3, %v12944_v51  ;;  %12537 = vmatprep.mubr.msk.f32.mxu0 %vm14021_vm1, %v18043_v37  ;;  %v12969_v63 = vpack.c.bf16 %v13285_v26, %v13284_v40 }
 0xf49   : > { %v16199_v2 = vpop.permute.xlu1 %5858  ;;  %12947 = vmatprep.subr.bf16.mxu0 %v18041_v17  ;;  %v12961_v4 = vpack.c.bf16 %v13275_v61, %v13274_v52 }
 0xf4b   : > { %12538 = vmatmul.mubr.msk.f32.gmra.mrb[206].mxu0 %vm692_vm2, %v16074_v9 }
 0xf4c   : > { %v16204_v30 = vpop.permute.xlu0 %6225  ;;  %12540 = vmatprep.mubr.msk.f32.mxu0 %vm14021_vm1, %v18043_v37 }
 0xf4d   : > { %v16208_v15 = vpop.permute.xlu1 %6249 }
 0xf4f   : > { %12541 = vmatmul.mubr.msk.f32.gmra.mrb[208].mxu0 %vm692_vm2, %v16082_v42 }
 0xf50   : > { %v16212_v16 = vpop.permute.xlu0 %6227  ;;  %12950 = vmatpush3.bf16.xpose.msk.msra.mxu0 %vm14246_vm3, %v12948_v55  ;;  %12543 = vmatprep.mubr.msk.f32.mxu0 %vm14021_vm1, %v18043_v37 }
 0xf51   : > { %v16218_v9 = vpop.permute.xlu1 %6223  ;;  %12596 = vmatprep.subr.mxu0 %v18043_v37 }
 0xf53   : > { %12544 = vmatmul.mubr.msk.f32.gmra.mrb[210].mxu0 %vm692_vm2, %v16097_v19 }
 0xf54   : > { %v16223_v35 = vpop.permute.xlu0 %13297  ;;  %12546 = vmatprep.mubr.msk.f32.mxu0 %vm14021_vm1, %v18043_v37 }
 0xf55   : > { %v16227_v42 = vpop.permute.xlu1 %13292  ;;  %v13299_v55 = vunpack.i.l.bf16 %v16223_v35 }
 0xf57   : > { %12547 = vmatmul.mubr.msk.f32.gmra.mrb[212].mxu0 %vm692_vm2, %v16091_v29 }
 0xf58   : > { %v16231_v49 = vpop.permute.xlu0 %6233  ;;  %12597 = vmatpush3.xpose.msk.msra.mxu0 %vm692_vm2, %v5875_v31  ;;  %12598 = vmatprep.mubr.msk.f32.mxu0 %vm14021_vm1, %v18043_v37 }
 0xf59   : > { %v16236_v19 = vpop.permute.xlu1 %6229  ;;  %12960 = vmatprep.subr.bf16.mxu0 %v18041_v17 }
 0xf5b   : > { %12599 = vmatmul.mubr.msk.f32.vlgmr.msra.gmra.mrb[214].mxu0 %vm692_vm2, %v5849_v20 }
 0xf5c   : > { %v16240_v11 = vpop.permute.xlu0 %6624  ;;  %12963 = vmatpush3.bf16.xpose.msk.msra.mxu0 %vm14246_vm3, %v12961_v4  ;;  %12601 = vmatprep.mubr.msk.f32.mxu0 %vm14021_vm1, %v18043_v37 }
 0xf5d   : > { %v16246_v29 = vpop.permute.xlu1 %6231  ;;  %12964 = vmatprep.subr.bf16.mxu0 %v18041_v17 }
 0xf5f   : > { %12602 = vmatmul.mubr.msk.f32.gmra.mrb[216].mxu0 %vm692_vm2, %v5851_v10  ;;  %v13289_v10 = vunpack.i.l.bf16 %v16193_v56 }
 0xf60   : > { %v16252_v43 = vpop.permute.xlu0 %6600  ;;  %12604 = vmatprep.mubr.msk.f32.mxu0 %vm14021_vm1, %v18043_v37 }
 0xf61   : > { %v16256_v57 = vpop.permute.xlu1 %6235 }
 0xf63   : > { %12605 = vmatmul.mubr.msk.f32.gmra.mrb[218].mxu0 %vm692_vm2, %v5853_v25 }
 0xf64   : > { %v16259_v48 = vpop.permute.xlu0 %6604  ;;  %12967 = vmatpush3.bf16.xpose.msk.msra.mxu0 %vm14246_vm3, %v12965_v21  ;;  %12607 = vmatprep.mubr.msk.f32.mxu0 %vm14021_vm1, %v18043_v37 }
 0xf65   : > { %v16265_v28 = vpop.permute.xlu1 %6598  ;;  %12968 = vmatprep.subr.bf16.mxu0 %v18041_v17 }
 0xf67   : > { %12608 = vmatmul.mubr.msk.f32.gmra.mrb[220].mxu0 %vm692_vm2, %v16172_v46  ;;  %v13290_v46 = vunpack.i.h.bf16 %v16193_v56 }
 0xf68   : > { %v16270_v31 = vpop.permute.xlu0 %6608  ;;  %12610 = vmatprep.mubr.msk.f32.mxu0 %vm14021_vm1, %v18043_v37 }
 0xf69   : > { %v16274_v27 = vpop.permute.xlu1 %6602  ;;  %v12982_v25 = vpack.c.bf16 %v13290_v46, %v13289_v10 }
 0xf6b   : > { %12611 = vmatmul.mubr.msk.f32.gmra.mrb[222].mxu0 %vm692_vm2, %v16178_v3 }
 0xf6c   : > { %v13303_v20 = vpop.permute.xlu0 %13302  ;;  %12971 = vmatpush3.bf16.xpose.msk.msra.mxu0 %vm14246_vm3, %v12969_v63  ;;  %12613 = vmatprep.mubr.msk.f32.mxu0 %vm14021_vm1, %v18043_v37 }
 0xf6d   : > { %v13305_v24 = vunpack.i.h.bf16 %v13303_v20  ;;  %v13304_v59 = vunpack.i.l.bf16 %v13303_v20  ;;  %v16282_v38 = vpop.permute.xlu1 %6606  ;;  %12666 = vmatprep.subr.mxu0 %v18043_v37 }
 0xf6f   : > { %v12931_v23 = vpack.c.bf16 %v13305_v24, %v13304_v59  ;;  %12614 = vmatmul.mubr.msk.f32.gmra.mrb[224].mxu0 %vm692_vm2, %v16199_v2  ;;  %v13294_v2 = vunpack.i.l.bf16 %v16227_v42 }
 0xf70   : > { %12616 = vmatprep.mubr.msk.f32.mxu0 %vm14021_vm1, %v18043_v37  ;;  %v13313_v5 = vpop.permute.xlu0 %13312 }
 0xf71   : > { %v16289_v54 = vpop.permute.xlu1 %6610  ;;  %12932 = vmatpush3.bf16.msra.mxu1 %v12931_v23  ;;  %v13315_v34 = vunpack.i.h.bf16 %v13313_v5  ;;  %v13314_v51 = vunpack.i.l.bf16 %v13313_v5 }
 0xf72   : > { %12933 = vmatprep.subr.bf16.mxu1 %v18041_v17 }
 0xf73   : > { %12617 = vmatmul.mubr.msk.f32.gmra.mrb[226].mxu0 %vm692_vm2, %v16187_v62  ;;  %v13295_v62 = vunpack.i.h.bf16 %v16227_v42  ;;  %v12937_v22 = vpack.c.bf16 %v13315_v34, %v13314_v51 }
 0xf74   : > { %12667 = vmatpush3.xpose.msk.msra.mxu0 %vm692_vm2, %v16208_v15  ;;  %12668 = vmatprep.mubr.msk.f32.mxu0 %vm14021_vm1, %v18043_v37  ;;  %v13300_v15 = vunpack.i.h.bf16 %v16223_v35 }
 0xf75   : > { %v13308_v3 = vpop.permute.xlu1 %13307  ;;  %12981 = vmatprep.subr.bf16.mxu0 %v18041_v17  ;;  %v12986_v44 = vpack.c.bf16 %v13295_v62, %v13294_v2 }
 0xf76   : > { %v13310_v12 = vunpack.i.h.bf16 %v13308_v3  ;;  %v13309_v60 = vunpack.i.l.bf16 %v13308_v3 }
 0xf77   : > { %12669 = vmatmul.mubr.msk.f32.vlgmr.msra.gmra.mrb[228].mxu0 %vm692_vm2, %v16218_v9 }
 0xf78   : > { %v12934_v56 = vpack.c.bf16 %v13310_v12, %v13309_v60  ;;  %12984 = vmatpush3.bf16.xpose.msk.msra.mxu0 %vm14246_vm3, %v12982_v25  ;;  %12671 = vmatprep.mubr.msk.f32.mxu0 %vm14021_vm1, %v18043_v37 }
 0xf79   : > { %12985 = vmatprep.subr.bf16.mxu0 %v18041_v17 }
 0xf7a   : > { %12935 = vmatpush3.bf16.msra.mxu1 %v12934_v56 }
 0xf7b   : > { %12672 = vmatmul.mubr.msk.f32.gmra.mrb[230].mxu0 %vm692_vm2, %v16204_v30  ;;  %12936 = vmatprep.subr.bf16.mxu1 %v18041_v17  ;;  %v5719_v30 = vpop.permute.xlu1 %5718 }
 0xf7c   : > { %12674 = vmatprep.mubr.msk.f32.mxu0 %vm14021_vm1, %v18043_v37 }
 0xf7e   : > { %12938 = vmatpush3.bf16.msra.mxu1 %v12937_v22 }
 0xf7f   : > { %12675 = vmatmul.mubr.msk.f32.gmra.mrb[232].mxu0 %vm692_vm2, %v16212_v16  ;;  %12561 = vmatprep.subr.mxu1 %v18043_v37  ;;  %v12990_v16 = vpack.c.bf16 %v13300_v15, %v13299_v55 }
 0xf80   : > { %12988 = vmatpush3.bf16.xpose.msk.msra.mxu0 %vm14246_vm3, %v12986_v44  ;;  %12677 = vmatprep.mubr.msk.f32.mxu0 %vm14021_vm1, %v18043_v37 }
 0xf81   : > { %12989 = vmatprep.subr.bf16.mxu0 %v18041_v17 }
 0xf82   : > { %12562 = vmatpush3.msra.mxu1 %v5719_v30 }
 0xf83   : > { %12678 = vmatmul.mubr.msk.f32.gmra.mrb[234].mxu0 %vm692_vm2, %v16236_v19  ;;  %12951 = vmatprep.subr.bf16.mxu1 %v18041_v17 }
 0xf84   : > { %12680 = vmatprep.mubr.msk.f32.mxu0 %vm14021_vm1, %v18043_v37 }
 0xf87   : > { %12681 = vmatmul.mubr.msk.f32.gmra.mrb[236].mxu0 %vm692_vm2, %v16246_v29 }
 0xf88   : > { %12992 = vmatpush3.bf16.xpose.msk.msra.mxu0 %vm14246_vm3, %v12990_v16  ;;  %12683 = vmatprep.mubr.msk.f32.mxu0 %vm14021_vm1, %v18043_v37 }
 0xf89   : > { %12736 = vmatprep.subr.mxu0 %v18043_v37 }
 0xf8b   : > { %12684 = vmatmul.mubr.msk.f32.gmra.mrb[238].mxu0 %vm692_vm2, %v16231_v49 }
 0xf8c   : > { %12686 = vmatprep.mubr.msk.f32.mxu0 %vm14021_vm1, %v18043_v37 }
 0xf8f   : > { %12687 = vmatmul.mubr.msk.f32.gmra.mrb[240].mxu0 %vm692_vm2, %v16256_v57 }
 0xf90   : > { %12737 = vmatpush3.xpose.msk.msra.mxu0 %vm692_vm2, %v16240_v11  ;;  %12738 = vmatprep.mubr.msk.f32.mxu0 %vm14021_vm1, %v18043_v37 }
 0xf93   : > { %12739 = vmatmul.mubr.msk.f32.vlgmr.msra.gmra.mrb[242].mxu0 %vm692_vm2, %v16265_v28 }
 0xf94   : > { %12741 = vmatprep.mubr.msk.f32.mxu0 %vm14021_vm1, %v18043_v37 }
 0xf97   : > { %12742 = vmatmul.mubr.msk.f32.gmra.mrb[244].mxu0 %vm692_vm2, %v16252_v43 }
 0xf98   : > { %12744 = vmatprep.mubr.msk.f32.mxu0 %vm14021_vm1, %v18043_v37 }
 0xf9b   : > { %12745 = vmatmul.mubr.msk.f32.gmra.mrb[246].mxu0 %vm692_vm2, %v16274_v27 }
 0xf9c   : > { %12747 = vmatprep.mubr.msk.f32.mxu0 %vm14021_vm1, %v18043_v37 }
 0xf9f   : > { %12748 = vmatmul.mubr.msk.f32.gmra.mrb[248].mxu0 %vm692_vm2, %v16259_v48 }
 0xfa0   : > { %12750 = vmatprep.mubr.msk.f32.mxu0 %vm14021_vm1, %v18043_v37 }
 0xfa3   : > { %12751 = vmatmul.mubr.msk.f32.gmra.mrb[250].mxu0 %vm692_vm2, %v16282_v38 }
 0xfa4   : > { %12753 = vmatprep.mubr.msk.f32.mxu0 %vm14021_vm1, %v18043_v37 }
 0xfa7   : > { %12754 = vmatmul.mubr.msk.f32.gmra.mrb[252].mxu0 %vm692_vm2, %v16270_v31 }
 0xfa8   : > { %12756 = vmatprep.mubr.msk.f32.mxu0 %vm14021_vm1, %v18043_v37 }
 0xfab   : > { %12757 = vmatmul.mubr.msk.f32.gmra.mrb[254].mxu0 %vm692_vm2, %v16289_v54 }
0x1012   : > { %v5595_v41 = vpop.f32.mrb[200].mxu0 }
0x1013   : > { %v16374_v9 = vadd.f32 %v5595_v41, %v14309_v8  ;;  %v12530_v35 = vpop.f32.mrb[201].mxu0 }
0x1015   : > { %v5629_v42 = vsel %vm828_vm5, %v16374_v9, -inf }
0x1016   : > { %5630 = vmax.xlane.f32.xlu0 %v5629_v42  ;;  %v5600_v61 = vpop.f32.mrb[202].mxu0 }
0x1017   : > { %v16379_v52 = vadd.f32 %v5600_v61, %v14309_v8  ;;  %v12533_v49 = vpop.f32.mrb[203].mxu0 }
0x1019   : > { %v5632_v19 = vsel %vm828_vm5, %v16379_v52, -inf }
0x101a   : > { %5633 = vmax.xlane.f32.xlu1 %v5632_v19  ;;  %v5605_v4 = vpop.f32.mrb[204].mxu0 }
0x101b   : > { %v16384_v11 = vadd.f32 %v5605_v4, %v14309_v8  ;;  %v12536_v29 = vpop.f32.mrb[205].mxu0 }
0x101d   : > { %v5635_v1 = vsel %vm828_vm5, %v16384_v11, -inf }
0x101e   : > { %5636 = vmax.xlane.f32.xlu0 %v5635_v1  ;;  %v5610_v36 = vpop.f32.mrb[206].mxu0 }
0x101f   : > { %v16389_v43 = vadd.f32 %v5610_v36, %v14309_v8  ;;  %v12539_v57 = vpop.f32.mrb[207].mxu0 }
0x1021   : > { %v5638_v21 = vsel %vm828_vm5, %v16389_v43, -inf }
0x1022   : > { %5639 = vmax.xlane.f32.xlu0 %v5638_v21  ;;  %v5615_v48 = vpop.f32.mrb[208].mxu0 }
0x1023   : > { %v16394_v28 = vadd.f32 %v5615_v48, %v14309_v8  ;;  %v12542_v26 = vpop.f32.mrb[209].mxu0 }
0x1025   : > { %v5641_v40 = vsel %vm828_vm5, %v16394_v28, -inf }
0x1026   : > { %5642 = vmax.xlane.f32.xlu1 %v5641_v40  ;;  %v5620_v31 = vpop.f32.mrb[210].mxu0 }
0x1027   : > { %v12545_v27 = vpop.f32.mrb[211].mxu0  ;;  %v16426_v19 = vadd.f32 %v5620_v31, %v14309_v8 }
0x1029   : > { %v5644_v48 = vsel %vm828_vm5, %v16426_v19, -inf }
0x102a   : > { %v5625_v63 = vpop.f32.mrb[212].mxu0 }
0x102b   : > { %v16399_v20 = vadd.f32 %v5625_v63, %v14309_v8  ;;  %v12548_v24 = vpop.f32.mrb[213].mxu0 }
0x102d   : > { %v5647_v59 = vsel %vm828_vm5, %v16399_v20, -inf }
0x102e   : > { %5648 = vmax.xlane.f32.xlu1 %v5647_v59  ;;  %v5970_v38 = vpop.f32.mrb[214].mxu0 }
0x102f   : > { %v12600_v23 = vpop.f32.mrb[215].mxu0  ;;  %v16434_v57 = vadd.f32 %v5970_v38, %v14309_v8 }
0x1031   : > { %v6004_v27 = vsel %vm828_vm5, %v16434_v57, -inf }
0x1032   : > { %v5975_v54 = vpop.f32.mrb[216].mxu0 }
0x1033   : > { %v16404_v46 = vadd.f32 %v5975_v54, %v14309_v8  ;;  %v12603_v10 = vpop.f32.mrb[217].mxu0 }
0x1035   : > { %v6007_v5 = vsel %vm828_vm5, %v16404_v46, -inf }
0x1036   : > { %6008 = vmax.xlane.f32.xlu1 %v6007_v5  ;;  %v5980_v3 = vpop.f32.mrb[218].mxu0 }
0x1037   : > { %v12606_v25 = vpop.f32.mrb[219].mxu0  ;;  %v16439_v40 = vadd.f32 %v5980_v3, %v14309_v8 }
0x1038   : > { %6468 = vrot.lane.b32.xlu0 %v16050_v33, %s18069_s27  ;;  %s10335_s27 = sshll.u32 %s513_s18, 4  ;;  %s17950_s27 = int_to_ptr.vmem [resolvable:$true] %s10335_s27 }
0x1039   : > { %v6010_v54 = vsel %vm828_vm5, %v16439_v40, -inf  ;;  %s13954_s29 = scalar_lea.vmem %s17950_s27, 16 }
0x103a   : > { %v5985_v12 = vpop.f32.mrb[220].mxu0  ;;  %p13955_p11 = scmp.ne.s32.totalorder %s17950_s27, %s13954_s29 }
0x103b   : > { %v16411_v60 = vadd.f32 %v5985_v12, %v14309_v8  ;;  %v12609_v34 = vpop.f32.mrb[221].mxu0 }
0x103c   : > { %p13956_p12 = pnand %p13955_p11, %p14162_p5 }
0x103d   : > { %v6013_v51 = vsel %vm828_vm5, %v16411_v60, -inf }
0x103e   : > { %6014 = vmax.xlane.f32.xlu1 %v6013_v51  ;;  %v5990_v56 = vpop.f32.mrb[222].mxu0  ;;  %p13957_p13 = pneg %p13956_p12 }
0x103f   : > { %v12612_v62 = vpop.f32.mrb[223].mxu0  ;;  %v16449_v38 = vadd.f32 %v5990_v56, %v14309_v8 }
0x1041   : > { %v6016_v25 = vsel %vm828_vm5, %v16449_v38, -inf }
0x1042   : > { %v5995_v2 = vpop.f32.mrb[224].mxu0 }
0x1043   : > { %v16416_v22 = vadd.f32 %v5995_v2, %v14309_v8  ;;  %v12615_v44 = vpop.f32.mrb[225].mxu0 }
0x1045   : > { %v6019_v30 = vsel %vm828_vm5, %v16416_v22, -inf }
0x1046   : > { %6020 = vmax.xlane.f32.xlu1 %v6019_v30  ;;  %v6000_v15 = vpop.f32.mrb[226].mxu0 }
0x1047   : > { %v12618_v55 = vpop.f32.mrb[227].mxu0  ;;  %v16454_v5 = vadd.f32 %v6000_v15, %v14309_v8 }
0x1049   : > { %v6022_v2 = vsel %vm828_vm5, %v16454_v5, -inf }
0x104a   : > { %v6345_v16 = vpop.f32.mrb[228].mxu0 }
0x104b   : > { %v16421_v41 = vadd.f32 %v6345_v16, %v14309_v8  ;;  %v12670_v35 = vpop.f32.mrb[229].mxu0 }
0x104d   : > { %v6379_v42 = vsel %vm828_vm5, %v16421_v41, -inf }
0x104e   : > { %6380 = vmax.xlane.f32.xlu1 %v6379_v42  ;;  %v6350_v61 = vpop.f32.mrb[230].mxu0 }
0x104f   : > { %v12673_v49 = vpop.f32.mrb[231].mxu0  ;;  %v16464_v56 = vadd.f32 %v6350_v61, %v14309_v8 }
0x1051   : > { %v6382_v55 = vsel %vm828_vm5, %v16464_v56, -inf }
0x1052   : > { %v6355_v4 = vpop.f32.mrb[232].mxu0 }
0x1053   : > { %v16429_v29 = vadd.f32 %v6355_v4, %v14309_v8  ;;  %v12676_v1 = vpop.f32.mrb[233].mxu0 }
0x1055   : > { %v6385_v36 = vsel %vm828_vm5, %v16429_v29, -inf }
0x1056   : > { %6386 = vmax.xlane.f32.xlu1 %v6385_v36  ;;  %v6360_v21 = vpop.f32.mrb[234].mxu0 }
0x1057   : > { %5645 = vmax.xlane.f32.xlu0 %v5644_v48  ;;  %v12679_v26 = vpop.f32.mrb[235].mxu0  ;;  %v16469_v30 = vadd.f32 %v6360_v21, %v14309_v8 }
0x1059   : > { %v6388_v61 = vsel %vm828_vm5, %v16469_v30, -inf }
0x105a   : > { %v6365_v31 = vpop.f32.mrb[236].mxu0 }
0x105b   : > { %v16444_v63 = vadd.f32 %v6365_v31, %v14309_v8  ;;  %6005 = vmax.xlane.f32.xlu0 %v6004_v27  ;;  %v12682_v24 = vpop.f32.mrb[237].mxu0 }
0x105d   : > { %v6391_v59 = vsel %vm828_vm5, %v16444_v63, -inf }
0x105e   : > { %6392 = vmax.xlane.f32.xlu1 %v6391_v59  ;;  %v6370_v23 = vpop.f32.mrb[238].mxu0 }
0x105f   : > { %6011 = vmax.xlane.f32.xlu0 %v6010_v54  ;;  %v12685_v10 = vpop.f32.mrb[239].mxu0  ;;  %v16474_v35 = vadd.f32 %v6370_v23, %v14309_v8 }
0x1061   : > { %v6394_v36 = vsel %vm828_vm5, %v16474_v35, -inf }
0x1062   : > { %v6375_v3 = vpop.f32.mrb[240].mxu0 }
0x1063   : > { %v16459_v12 = vadd.f32 %v6375_v3, %v14309_v8  ;;  %6017 = vmax.xlane.f32.xlu0 %v6016_v25  ;;  %v12688_v34 = vpop.f32.mrb[241].mxu0 }
0x1065   : > { %v6397_v51 = vsel %vm828_vm5, %v16459_v12, -inf }
0x1066   : > { %6398 = vmax.xlane.f32.xlu1 %v6397_v51  ;;  %v6720_v62 = vpop.f32.mrb[242].mxu0 }
0x1067   : > { %6023 = vmax.xlane.f32.xlu0 %v6022_v2  ;;  %v12740_v44 = vpop.f32.mrb[243].mxu0  ;;  %v16479_v4 = vadd.f32 %v6720_v62, %v14309_v8 }
0x1069   : > { %v6754_v31 = vsel %vm828_vm5, %v16479_v4, -inf }
0x106a   : > { %v6725_v15 = vpop.f32.mrb[244].mxu0 }
0x106b   : > { %6383 = vmax.xlane.f32.xlu0 %v6382_v55  ;;  %v12743_v16 = vpop.f32.mrb[245].mxu0  ;;  %v16484_v48 = vadd.f32 %v6725_v15, %v14309_v8 }
0x106d   : > { %v6757_v23 = vsel %vm828_vm5, %v16484_v48, -inf }
0x106e   : > { %v6730_v42 = vpop.f32.mrb[246].mxu0 }
0x106f   : > { %6389 = vmax.xlane.f32.xlu0 %v6388_v61  ;;  %v12746_v49 = vpop.f32.mrb[247].mxu0  ;;  %v16489_v24 = vadd.f32 %v6730_v42, %v14309_v8  ;;  %v16515_v42 = vpop.permute.xlu1 %13322 }
0x1070   : > { %v16517_v61 = vpop.permute.xlu0 %13317 }
0x1071   : > { %v6760_v51 = vsel %vm828_vm5, %v16489_v24, -inf }
0x1072   : > { %v6735_v1 = vpop.f32.mrb[248].mxu0 }
0x1073   : > { %6395 = vmax.xlane.f32.xlu0 %v6394_v36  ;;  %v12749_v21 = vpop.f32.mrb[249].mxu0  ;;  %v16499_v25 = vadd.f32 %v6735_v1, %v14309_v8  ;;  %v16519_v49 = vpop.permute.xlu1 %13327 }
0x1074   : > { %v16521_v1 = vpop.permute.xlu0 %6093 }
0x1075   : > { %v6763_v55 = vsel %vm828_vm5, %v16499_v25, -inf }
0x1076   : > { %v6740_v26 = vpop.f32.mrb[250].mxu0 }
0x1077   : > { %6755 = vmax.xlane.f32.xlu0 %v6754_v31  ;;  %v12752_v27 = vpop.f32.mrb[251].mxu0  ;;  %v16509_v15 = vadd.f32 %v6740_v26, %v14309_v8  ;;  %v16523_v36 = vpop.permute.xlu1 %13332 }
0x1079   : > { %v6766_v16 = vsel %vm828_vm5, %v16509_v15, -inf }
0x107a   : > { %v6745_v59 = vpop.f32.mrb[252].mxu0 }
0x107b   : > { %v16494_v54 = vadd.f32 %v6745_v59, %v14309_v8  ;;  %6758 = vmax.xlane.f32.xlu0 %v6757_v23  ;;  %v12755_v10 = vpop.f32.mrb[253].mxu0  ;;  %v16527_v21 = vpop.permute.xlu1 %13342 }
0x107d   : > { %v6769_v3 = vsel %vm828_vm5, %v16494_v54, -inf }
0x107e   : > { %6770 = vmax.xlane.f32.xlu1 %v6769_v3  ;;  %v6750_v34 = vpop.f32.mrb[254].mxu0 }
0x107f   : > { %v16504_v62 = vadd.f32 %v6750_v34, %v14309_v8  ;;  %6761 = vmax.xlane.f32.xlu0 %v6760_v51  ;;  %v12758_v2 = vpop.f32.mrb[255].mxu0  ;;  %v16525_v8 = vpop.permute.xlu0 %13337 }
0x1081   : > { %v6772_v44 = vsel %vm828_vm5, %v16504_v62, -inf }
0x1082   : > { %6773 = vmax.xlane.f32.xlu1 %v6772_v44 }
0x1083   : > { %6764 = vmax.xlane.f32.xlu0 %v6763_v55 }
0x1087   : > { %6767 = vmax.xlane.f32.xlu0 %v6766_v16 }
0x10a3   : > { %v5631_v26 = vpop.xlane.xlu0 %5630 }
0x10a4   : > { %v5650_v31 = vsub.f32 %v16374_v9, %v5631_v26 }
0x10a6   : > { %v5657_v27 = vmul.f32 1.442695, %v5650_v31 }
0x10a7   : > { %v5634_v59 = vpop.xlane.xlu1 %5633 }
0x10a8   : > { %13814 = vpow2.f32 %v5657_v27  ;;  %v5651_v23 = vsub.f32 %v16379_v52, %v5634_v59 }
0x10aa   : > { %v5659_v10 = vmul.f32 1.442695, %v5651_v23 }
0x10ab   : > { %v5637_v3 = vpop.xlane.xlu0 %5636 }
0x10ac   : > { %13816 = vpow2.f32 %v5659_v10  ;;  %v5652_v34 = vsub.f32 %v16384_v11, %v5637_v3 }
0x10ae   : > { %v5661_v51 = vmul.f32 1.442695, %v5652_v34 }
0x10af   : > { %v5640_v2 = vpop.xlane.xlu0 %5639 }
0x10b0   : > { %13818 = vpow2.f32 %v5661_v51  ;;  %v5653_v44 = vsub.f32 %v16389_v43, %v5640_v2 }
0x10b2   : > { %v16533_v55 = vpop.eup %13814  ;;  %v5663_v16 = vmul.f32 1.442695, %v5653_v44 }
0x10b3   : > { %v5643_v7 = vpop.xlane.xlu1 %5642  ;;  %v5671_v9 = vsel %vm828_vm5, %v16533_v55, 0.0  ;;  %v16554_v10 = vpop.permute.xlu0 %6468 }
0x10b4   : > { %13820 = vpow2.f32 %v5663_v16  ;;  %v5654_v52 = vsub.f32 %v16394_v28, %v5643_v7  ;;  %5672 = vadd.xlane.f32.xlu1 %v5671_v9 }
0x10b6   : > { %v16538_v26 = vpop.eup %13816  ;;  %v5665_v31 = vmul.f32 1.442695, %v5654_v52 }
0x10b7   : > { %v5674_v11 = vsel %vm828_vm5, %v16538_v26, 0.0 }
0x10b8   : > { %13822 = vpow2.f32 %v5665_v31  ;;  %5675 = vadd.xlane.f32.xlu1 %v5674_v11 }
0x10ba   : > { %v16542_v43 = vpop.eup %13818 }
0x10bb   : > { %v5677_v27 = vsel %vm828_vm5, %v16542_v43, 0.0  ;;  %v5649_v3 = vpop.xlane.xlu1 %5648 }
0x10bc   : > { %5678 = vadd.xlane.f32.xlu1 %v5677_v27  ;;  %v5656_v34 = vsub.f32 %v16399_v20, %v5649_v3 }
0x10be   : > { %v16546_v59 = vpop.eup %13820  ;;  %v5669_v44 = vmul.f32 1.442695, %v5656_v34 }
0x10bf   : > { %v5680_v7 = vsel %vm828_vm5, %v16546_v59, 0.0 }
0x10c0   : > { %5681 = vadd.xlane.f32.xlu1 %v5680_v7 }
0x10c2   : > { %v16550_v28 = vpop.eup %13822 }
0x10c3   : > { %v5683_v23 = vsel %vm828_vm5, %v16550_v28, 0.0 }
0x10c4   : > { %5684 = vadd.xlane.f32.xlu1 %v5683_v23 }
0x10e4   : > { %v5646_v51 = vpop.xlane.xlu0 %5645 }
0x10e5   : > { %v5655_v2 = vsub.f32 %v16426_v19, %v5646_v51  ;;  %v6009_v51 = vpop.xlane.xlu1 %6008 }
0x10e7   : > { %v5667_v16 = vmul.f32 1.442695, %v5655_v2  ;;  %v6026_v2 = vsub.f32 %v16404_v46, %v6009_v51 }
0x10e8   : > { %v6006_v9 = vpop.xlane.xlu0 %6005 }
0x10e9   : > { %13824 = vpow2.f32 %v5667_v16  ;;  %v6025_v52 = vsub.f32 %v16434_v57, %v6006_v9  ;;  %v6015_v16 = vpop.xlane.xlu1 %6014 }
0x10ea   : > { %13826 = vpow2.f32 %v5669_v44 }
0x10eb   : > { %v6032_v31 = vmul.f32 1.442695, %v6025_v52  ;;  %v6034_v52 = vmul.f32 1.442695, %v6026_v2 }
0x10ec   : > { %v6012_v57 = vpop.xlane.xlu0 %6011 }
0x10ed   : > { %13828 = vpow2.f32 %v6032_v31  ;;  %v6027_v9 = vsub.f32 %v16439_v40, %v6012_v57  ;;  %v6028_v31 = vsub.f32 %v16411_v60, %v6015_v16 }
0x10ee   : > { %13830 = vpow2.f32 %v6034_v52 }
0x10ef   : > { %v6038_v17 = vmul.f32 1.442695, %v6028_v31 }
0x10f0   : > { %v6018_v3 = vpop.xlane.xlu0 %6017 }
0x10f3   : > { %v16559_v11 = vpop.eup %13824 }
0x10f4   : > { %v5686_v27 = vsel %vm828_vm5, %v16559_v11, 0.0  ;;  %v16563_v7 = vpop.eup %13826  ;;  %v6024_v34 = vpop.xlane.xlu0 %6023 }
0x10f5   : > { %5687 = vadd.xlane.f32.xlu1 %v5686_v27  ;;  %v5689_v23 = vsel %vm828_vm5, %v16563_v7, 0.0  ;;  %v6021_v27 = vpop.xlane.xlu1 %6020  ;;  %v6031_v46 = vsub.f32 %v16454_v5, %v6024_v34 }
0x10f7   : > { %v16565_v20 = vpop.eup %13828  ;;  %v6044_v2 = vmul.f32 1.442695, %v6031_v46 }
0x10f8   : > { %v6046_v19 = vsel %vm828_vm5, %v16565_v20, 0.0  ;;  %v6384_v44 = vpop.xlane.xlu0 %6383  ;;  %v16585_v52 = vpop.eup %13830 }
0x10f9   : > { %6047 = vadd.xlane.f32.xlu0 %v6046_v19  ;;  %5690 = vadd.xlane.f32.xlu1 %v5689_v23  ;;  %v6036_v19 = vmul.f32 1.442695, %v6027_v9  ;;  %v6029_v23 = vsub.f32 %v16449_v38, %v6018_v3  ;;  %v6381_v37 = vpop.xlane.xlu1 %6380  ;;  %v6401_v38 = vsub.f32 %v16464_v56, %v6384_v44 }
0x10fa   : > { %v6400_v40 = vsub.f32 %v16421_v41, %v6381_v37 }
0x10fb   : > { %13832 = vpow2.f32 %v6036_v19  ;;  %v6040_v18 = vmul.f32 1.442695, %v6029_v23 }
0x10fc   : > { %13834 = vpow2.f32 %v6038_v17  ;;  %v6407_v3 = vmul.f32 1.442695, %v6400_v40 }
0x10fd   : > { %v6387_v60 = vpop.xlane.xlu1 %6386  ;;  %13836 = vpow2.f32 %v6040_v18 }
0x10fe   : > { %v6402_v16 = vsub.f32 %v16429_v29, %v6387_v60 }
0x1100   : > { %v6411_v37 = vmul.f32 1.442695, %v6402_v16 }
0x1101   : > { %v6393_v29 = vpop.xlane.xlu1 %6392 }
0x1102   : > { %v6404_v19 = vsub.f32 %v16444_v63, %v6393_v29 }
0x1104   : > { %v6415_v40 = vmul.f32 1.442695, %v6404_v19 }
0x1105   : > { %v16587_v5 = vpop.eup %13832 }
0x1106   : > { %v16591_v34 = vpop.eup %13834  ;;  %v6052_v44 = vsel %vm828_vm5, %v16587_v5, 0.0 }
0x1107   : > { %v16597_v31 = vpop.eup %13836 }
0x1108   : > { %v6058_v46 = vsel %vm828_vm5, %v16597_v31, 0.0 }
0x110a   : > { %13347 = vrot.lane.b32.xlu1 %v16044_v39, %s18070_s26  ;;  %v6390_v39 = vpop.xlane.xlu0 %6389 }
0x110b   : > { %v6403_v18 = vsub.f32 %v16469_v30, %v6390_v39  ;;  %v6399_v39 = vpop.xlane.xlu1 %6398 }
0x110e   : > { %v6396_v57 = vpop.xlane.xlu0 %6395 }
0x110f   : > { %13352 = vrot.lane.b32.xlu0 %v16042_v58, %s18070_s26  ;;  %v6030_v58 = vsub.f32 %v16416_v22, %v6021_v27  ;;  %v6409_v22 = vmul.f32 1.442695, %v6401_v38  ;;  %v6405_v9 = vsub.f32 %v16474_v35, %v6396_v57  ;;  %v6049_v35 = vsel %vm828_vm5, %v16585_v52, 0.0  ;;  %v16617_v16 = vpop.xlane.xlu1 %6770 }
0x1110   : > { %v6413_v27 = vmul.f32 1.442695, %v6403_v18  ;;  %v6406_v57 = vsub.f32 %v16459_v12, %v6399_v39 }
0x1111   : > { %v6042_v51 = vmul.f32 1.442695, %v6030_v58  ;;  %v6417_v41 = vmul.f32 1.442695, %v6405_v9  ;;  %v6055_v58 = vsel %vm828_vm5, %v16591_v34, 0.0 }
0x1112   : > { %v6756_v17 = vpop.xlane.xlu0 %6755 }
0x1113   : > { %13838 = vpow2.f32 %v6042_v51  ;;  %v6775_v56 = vsub.f32 %v16479_v4, %v6756_v17 }
0x1114   : > { %13840 = vpow2.f32 %v6044_v2 }
0x1115   : > { %13842 = vpow2.f32 %v6407_v3  ;;  %v6782_v4 = vmul.f32 1.442695, %v6775_v56 }
0x1116   : > { %13844 = vpow2.f32 %v6409_v22  ;;  %v6759_v30 = vpop.xlane.xlu0 %6758  ;;  %v6419_v22 = vmul.f32 1.442695, %v6406_v57 }
0x1117   : > { %13846 = vpow2.f32 %v6411_v37  ;;  %v6776_v12 = vsub.f32 %v16484_v48, %v6759_v30  ;;  %v16631_v48 = vpop.xlane.xlu1 %6773 }
0x1118   : > { %13848 = vpow2.f32 %v6417_v41 }
0x1119   : > { %13850 = vpow2.f32 %v6413_v27  ;;  %v6784_v56 = vmul.f32 1.442695, %v6776_v12 }
0x111a   : > { %13852 = vpow2.f32 %v6782_v4  ;;  %v6762_v60 = vpop.xlane.xlu0 %6761 }
0x111b   : > { %13854 = vpow2.f32 %v6415_v40  ;;  %v6777_v29 = vsub.f32 %v16489_v24, %v6762_v60 }
0x111c   : > { %13856 = vpow2.f32 %v6419_v22 }
0x111d   : > { %v16600_v23 = vpop.eup %13838  ;;  %13858 = vpow2.f32 %v6784_v56  ;;  %v6786_v19 = vmul.f32 1.442695, %v6777_v29 }
0x111e   : > { %v16606_v51 = vpop.eup %13840  ;;  %v6061_v2 = vsel %vm828_vm5, %v16600_v23, 0.0  ;;  %v6765_v41 = vpop.xlane.xlu0 %6764 }
0x111f   : > { %v16609_v63 = vpop.eup %13842  ;;  %v6064_v38 = vsel %vm828_vm5, %v16606_v51, 0.0  ;;  %v6778_v4 = vsub.f32 %v16499_v25, %v6765_v41  ;;  %v13320_v41 = vunpack.i.h.bf16 %v16517_v61 }
0x1120   : > { %v16615_v3 = vpop.eup %13844  ;;  %v6421_v37 = vsel %vm828_vm5, %v16609_v63, 0.0 }
0x1121   : > { %v16620_v9 = vpop.eup %13846  ;;  %v6424_v17 = vsel %vm828_vm5, %v16615_v3, 0.0  ;;  %v6788_v57 = vmul.f32 1.442695, %v6778_v4 }
0x1122   : > { %v16626_v18 = vpop.eup %13848  ;;  %v6427_v27 = vsel %vm828_vm5, %v16620_v9, 0.0  ;;  %v6768_v39 = vpop.xlane.xlu0 %6767 }
0x1123   : > { %v6779_v60 = vsub.f32 %v16509_v15, %v6768_v39  ;;  %v13319_v15 = vunpack.i.l.bf16 %v16517_v61  ;;  %v13325_v39 = vunpack.i.h.bf16 %v16515_v42 }
0x1125   : > { %v6790_v22 = vmul.f32 1.442695, %v6779_v60  ;;  %v12952_v4 = vpack.c.bf16 %v13320_v41, %v13319_v15 }
0x112e   : > { %6053 = vadd.xlane.f32.xlu0 %v6052_v44  ;;  %6050 = vadd.xlane.f32.xlu1 %v6049_v35  ;;  %v16629_v44 = vpop.eup %13850  ;;  %v6436_v35 = vsel %vm828_vm5, %v16626_v18, 0.0 }
0x112f   : > { %v16637_v30 = vpop.eup %13852 }
0x1130   : > { %v16644_v40 = vpop.eup %13854 }
0x1131   : > { %v6433_v25 = vsel %vm828_vm5, %v16644_v40, 0.0 }
0x1132   : > { %6056 = vadd.xlane.f32.xlu0 %v6055_v58  ;;  %6059 = vadd.xlane.f32.xlu1 %v6058_v46  ;;  %v6796_v58 = vsel %vm828_vm5, %v16637_v30, 0.0  ;;  %v6430_v46 = vsel %vm828_vm5, %v16629_v44, 0.0 }
0x1136   : > { %6062 = vadd.xlane.f32.xlu0 %v6061_v2  ;;  %6065 = vadd.xlane.f32.xlu1 %v6064_v38  ;;  %v16649_v38 = vpop.eup %13856 }
0x113a   : > { %6425 = vadd.xlane.f32.xlu0 %v6424_v17  ;;  %6422 = vadd.xlane.f32.xlu1 %v6421_v37  ;;  %v6439_v17 = vsel %vm828_vm5, %v16649_v38, 0.0  ;;  %v16653_v37 = vpop.eup %13858 }
0x113e   : > { %6437 = vadd.xlane.f32.xlu0 %v6436_v35  ;;  %6428 = vadd.xlane.f32.xlu1 %v6427_v27  ;;  %v6799_v27 = vsel %vm828_vm5, %v16653_v37, 0.0 }
0x1141   : > { %v5673_v24 = vpop.xlane.xlu1 %5672 }
0x1142   : > { %13860 = vrcp.f32 %v5673_v24  ;;  %6797 = vadd.xlane.f32.xlu0 %v6796_v58  ;;  %6431 = vadd.xlane.f32.xlu1 %v6430_v46  ;;  %v13324_v24 = vunpack.i.l.bf16 %v16515_v42  ;;  %v18071_v58 = vmov 0.0  }
0x1143   : > { %13862 = vpow2.f32 %v6786_v19 }
0x1144   : > { %v12955_v42 = vpack.c.bf16 %v13325_v39, %v13324_v24 }
0x1145   : > { %v5676_v2 = vpop.xlane.xlu1 %5675 }
0x1146   : > { %13864 = vrcp.f32 %v5676_v2  ;;  %6434 = vadd.xlane.f32.xlu1 %v6433_v25  ;;  %v13330_v25 = vunpack.i.h.bf16 %v16519_v49 }
0x1147   : > { %13866 = vpow2.f32 %v6788_v57  ;;  %v18072_v57 = vmov 0.0|0.0  }
0x1149   : > { %v5679_v12 = vpop.xlane.xlu1 %5678 }
0x114a   : > { %13868 = vrcp.f32 %v5679_v12  ;;  %6440 = vadd.xlane.f32.xlu1 %v6439_v17 }
0x114b   : > { %13870 = vpow2.f32 %v6790_v22  ;;  %v13329_v22 = vunpack.i.l.bf16 %v16519_v49 }
0x114c   : > { %v13861_v56 = vpop.eup %13860 }
0x114d   : > { %v5699_v29 = vmul.f32 %v13861_v56, %v16533_v55  ;;  %v5682_v35 = vpop.xlane.xlu1 %5681  ;;  %v16660_v19 = vpop.eup %13862  ;;  %v12958_v15 = vpack.c.bf16 %v13330_v25, %v13329_v22  ;;  %v13340_v25 = vunpack.i.h.bf16 %v16525_v8  ;;  %v13339_v22 = vunpack.i.l.bf16 %v16525_v8 }
0x114e   : > { %13872 = vrcp.f32 %v5682_v35  ;;  %6800 = vadd.xlane.f32.xlu1 %v6799_v27  ;;  %v6802_v46 = vsel %vm828_vm5, %v16660_v19, 0.0  ;;  %v6781_v27 = vsub.f32 %v16504_v62, %v16631_v48 }
0x114f   : > { %12564 = vmatmul.mubr.msk.f32.vlgmr.msra.gmra.mrb[192].mxu1 %vm828_vm5, %v5699_v29 }
0x1150   : > { %v13865_v61 = vpop.eup %13864  ;;  %12953 = vmatpush3.bf16.msra.mxu1 %v12952_v4  ;;  %12566 = vmatprep.mubr.msk.f32.mxu1 %vm14021_vm1, %v18071_v58 }
0x1151   : > { %v5685_v55 = vpop.xlane.xlu1 %5684  ;;  %12954 = vmatprep.subr.bf16.mxu1 %v18072_v57  ;;  %v5700_v60 = vmul.f32 %v13865_v61, %v16538_v26  ;;  %v16671_v2 = vpop.eup %13866 }
0x1152   : > { %13874 = vrcp.f32 %v5685_v55  ;;  %6803 = vadd.xlane.f32.xlu1 %v6802_v46  ;;  %v6805_v17 = vsel %vm828_vm5, %v16671_v2, 0.0 }
0x1153   : > { %12567 = vmatmul.mubr.msk.f32.gmra.mrb[194].mxu1 %vm828_vm5, %v5700_v60  ;;  %v13335_v60 = vunpack.i.h.bf16 %v16523_v36 }
0x1154   : > { %v13869_v12 = vpop.eup %13868  ;;  %12956 = vmatpush3.bf16.msra.mxu1 %v12955_v42  ;;  %12569 = vmatprep.mubr.msk.f32.mxu1 %vm14021_vm1, %v18071_v58  ;;  %v13334_v42 = vunpack.i.l.bf16 %v16523_v36  ;;  %v12976_v36 = vpack.c.bf16 %v13340_v25, %v13339_v22 }
0x1155   : > { %12957 = vmatprep.subr.bf16.mxu1 %v18072_v57  ;;  %v5701_v26 = vmul.f32 %v13869_v12, %v16542_v43  ;;  %v16682_v41 = vpop.eup %13870 }
0x1156   : > { %6806 = vadd.xlane.f32.xlu1 %v6805_v17  ;;  %v6808_v56 = vsel %vm828_vm5, %v16682_v41, 0.0  ;;  %v12973_v12 = vpack.c.bf16 %v13335_v60, %v13334_v42  ;;  %v13344_v17 = vunpack.i.l.bf16 %v16527_v21 }
0x1157   : > { %12570 = vmatmul.mubr.msk.f32.gmra.mrb[196].mxu1 %vm828_vm5, %v5701_v26 }
0x1158   : > { %v13873_v49 = vpop.eup %13872  ;;  %12959 = vmatpush3.bf16.msra.mxu1 %v12958_v15  ;;  %13357 = vrot.lane.b32.xlu0 %v16054_v45, %s18070_s26 }
0x1159   : > { %12572 = vmatprep.mubr.msk.f32.mxu1 %vm14021_vm1, %v18071_v58  ;;  %12631 = vmatprep.subr.mxu1 %v18071_v58  ;;  %v5702_v43 = vmul.f32 %v13873_v49, %v16546_v59  ;;  %v6780_v59 = vsub.f32 %v16494_v54, %v16617_v16 }
0x115a   : > { %6809 = vadd.xlane.f32.xlu1 %v6808_v56 }
0x115b   : > { %12573 = vmatmul.mubr.msk.f32.gmra.mrb[198].mxu1 %vm828_vm5, %v5702_v43  ;;  %v6792_v35 = vmul.f32 1.442695, %v6780_v59 }
0x115c   : > { %v13875_v29 = vpop.eup %13874  ;;  %12632 = vmatpush3.msra.mxu1 %v16521_v1  ;;  %12575 = vmatprep.mubr.msk.f32.mxu1 %vm14021_vm1, %v18071_v58  ;;  %v6794_v1 = vmul.f32 1.442695, %v6781_v27 }
0x115d   : > { %v5703_v45 = vmul.f32 %v13875_v29, %v16550_v28  ;;  %12972 = vmatprep.subr.bf16.mxu1 %v18072_v57  ;;  %13876 = vpow2.f32 %v6792_v35 }
0x115e   : > { %13878 = vpow2.f32 %v6794_v1 }
0x115f   : > { %12576 = vmatmul.mubr.msk.f32.gmra.mrb[200].mxu1 %vm828_vm5, %v5703_v45 }
0x1160   : > { %12578 = vmatprep.mubr.msk.f32.mxu1 %vm14021_vm1, %v18071_v58 }
0x1167   : > { %v16708_v28 = vpop.eup %13876 }
0x1168   : > { %v6811_v4 = vsel %vm828_vm5, %v16708_v28, 0.0  ;;  %v16712_v39 = vpop.eup %13878 }
0x1169   : > { %v6814_v54 = vsel %vm828_vm5, %v16712_v39, 0.0 }
0x116b   : > { %6843 = vrot.lane.b32.xlu1 %v16050_v33, %s18070_s26 }
0x1177   : > { %6812 = vadd.xlane.f32.xlu0 %v6811_v4 }
0x117b   : > { %6815 = vadd.xlane.f32.xlu0 %v6814_v54 }
0x1182   : > { %v5688_v16 = vpop.xlane.xlu1 %5687 }
0x1183   : > { %13880 = vrcp.f32 %v5688_v16 }
0x1186   : > { %v5691_v62 = vpop.xlane.xlu1 %5690  ;;  %v6048_v48 = vpop.xlane.xlu0 %6047 }
0x1187   : > { %13882 = vrcp.f32 %v5691_v62 }
0x1188   : > { %13884 = vrcp.f32 %v6048_v48 }
0x118a   : > { %v16739_v8 = vpop.permute.xlu0 %13352  ;;  %v13348_v26 = vpop.permute.xlu1 %13347 }
0x118b   : > { %v13349_v25 = vunpack.i.l.bf16 %v13348_v26 }
0x118d   : > { %v13881_v33 = vpop.eup %13880 }
0x118e   : > { %v5704_v24 = vmul.f32 %v13881_v33, %v16559_v11 }
0x1190   : > { %12579 = vmatmul.mubr.msk.f32.gmra.mrb[202].mxu1 %vm828_vm5, %v5704_v24 }
0x1191   : > { %12581 = vmatprep.mubr.msk.f32.mxu1 %vm14021_vm1, %v18071_v58  ;;  %v13883_v61 = vpop.eup %13882 }
0x1192   : > { %v5705_v55 = vmul.f32 %v13883_v61, %v16563_v7  ;;  %v13885_v46 = vpop.eup %13884  ;;  %v13345_v7 = vunpack.i.h.bf16 %v16527_v21 }
0x1193   : > { %v6074_v11 = vmul.f32 %v13885_v46, %v16565_v20 }
0x1194   : > { %12582 = vmatmul.mubr.msk.f32.gmra.mrb[204].mxu1 %vm828_vm5, %v5705_v55  ;;  %v12979_v20 = vpack.c.bf16 %v13345_v7, %v13344_v17  ;;  %v13354_v7 = vunpack.i.l.bf16 %v16739_v8 }
0x1195   : > { %12633 = vmatprep.mubr.msk.f32.mxu1 %vm14021_vm1, %v18071_v58 }
0x1198   : > { %12634 = vmatmul.mubr.msk.f32.vlgmr.msra.gmra.mrb[206].mxu1 %vm828_vm5, %v6074_v11  ;;  %v13350_v11 = vunpack.i.h.bf16 %v13348_v26 }
0x1199   : > { %12974 = vmatpush3.bf16.msra.mxu1 %v12973_v12  ;;  %12636 = vmatprep.mubr.msk.f32.mxu1 %vm14021_vm1, %v18071_v58 }
0x119a   : > { %12975 = vmatprep.subr.bf16.mxu1 %v18072_v57  ;;  %v12994_v17 = vpack.c.bf16 %v13350_v11, %v13349_v25 }
0x119d   : > { %12977 = vmatpush3.bf16.msra.mxu1 %v12976_v36  ;;  %v13355_v36 = vunpack.i.h.bf16 %v16739_v8 }
0x119e   : > { %12978 = vmatprep.subr.bf16.mxu1 %v18072_v57 }
0x11a1   : > { %12980 = vmatpush3.bf16.msra.mxu1 %v12979_v20 }
0x11a2   : > { %12701 = vmatprep.subr.mxu1 %v18071_v58 }
0x11a5   : > { %12702 = vmatpush3.msra.mxu1 %v16554_v10 }
0x11a6   : > { %12993 = vmatprep.subr.bf16.mxu1 %v18072_v57 }
0x11bb   : > { %v6054_v15 = vpop.xlane.xlu0 %6053  ;;  %v6051_v49 = vpop.xlane.xlu1 %6050 }
0x11bc   : > { %13886 = vrcp.f32 %v6051_v49 }
0x11bd   : > { %13888 = vrcp.f32 %v6054_v15  ;;  %v12997_v15 = vpack.c.bf16 %v13355_v36, %v13354_v7 }
0x11bf   : > { %v6060_v56 = vpop.xlane.xlu1 %6059  ;;  %v6057_v21 = vpop.xlane.xlu0 %6056 }
0x11c0   : > { %13890 = vrcp.f32 %v6057_v21 }
0x11c1   : > { %13892 = vrcp.f32 %v6060_v56 }
0x11c3   : > { %v6066_v43 = vpop.xlane.xlu1 %6065  ;;  %v6063_v59 = vpop.xlane.xlu0 %6062 }
0x11c4   : > { %13894 = vrcp.f32 %v6063_v59 }
0x11c5   : > { %13896 = vrcp.f32 %v6066_v43 }
0x11c6   : > { %v13887_v29 = vpop.eup %13886 }
0x11c7   : > { %v6423_v45 = vpop.xlane.xlu1 %6422  ;;  %v6075_v35 = vmul.f32 %v13887_v29, %v16585_v52  ;;  %v13889_v10 = vpop.eup %13888 }
0x11c8   : > { %v6076_v1 = vmul.f32 %v13889_v10, %v16587_v5  ;;  %v6426_v16 = vpop.xlane.xlu0 %6425  ;;  %13898 = vrcp.f32 %v6423_v45 }
0x11c9   : > { %12637 = vmatmul.mubr.msk.f32.gmra.mrb[208].mxu1 %vm828_vm5, %v6075_v35  ;;  %13900 = vrcp.f32 %v6426_v16 }
0x11ca   : > { %12639 = vmatprep.mubr.msk.f32.mxu1 %vm14021_vm1, %v18071_v58  ;;  %v13891_v4 = vpop.eup %13890 }
0x11cb   : > { %v6429_v27 = vpop.xlane.xlu1 %6428  ;;  %v6077_v52 = vmul.f32 %v13891_v4, %v16591_v34  ;;  %v13893_v62 = vpop.eup %13892 }
0x11cc   : > { %v6078_v5 = vmul.f32 %v13893_v62, %v16597_v31  ;;  %v6438_v24 = vpop.xlane.xlu0 %6437  ;;  %13902 = vrcp.f32 %v6429_v27 }
0x11cd   : > { %12640 = vmatmul.mubr.msk.f32.gmra.mrb[210].mxu1 %vm828_vm5, %v6076_v1 }
0x11ce   : > { %12642 = vmatprep.mubr.msk.f32.mxu1 %vm14021_vm1, %v18071_v58  ;;  %v13895_v33 = vpop.eup %13894 }
0x11cf   : > { %v6432_v54 = vpop.xlane.xlu1 %6431  ;;  %v6079_v34 = vmul.f32 %v13895_v33, %v16600_v23  ;;  %v13897_v55 = vpop.eup %13896 }
0x11d0   : > { %v6798_v31 = vpop.xlane.xlu0 %6797  ;;  %v6080_v60 = vmul.f32 %v13897_v55, %v16606_v51  ;;  %13904 = vrcp.f32 %v6432_v54 }
0x11d1   : > { %12643 = vmatmul.mubr.msk.f32.gmra.mrb[212].mxu1 %vm828_vm5, %v6077_v52 }
0x11d2   : > { %12645 = vmatprep.mubr.msk.f32.mxu1 %vm14021_vm1, %v18071_v58  ;;  %v13899_v42 = vpop.eup %13898 }
0x11d3   : > { %v6435_v48 = vpop.xlane.xlu1 %6434  ;;  %v6449_v23 = vmul.f32 %v13899_v42, %v16609_v63  ;;  %v13901_v12 = vpop.eup %13900 }
0x11d4   : > { %v13358_v20 = vpop.permute.xlu0 %13357  ;;  %13906 = vrcp.f32 %v6435_v48  ;;  %v6450_v26 = vmul.f32 %v13901_v12, %v16615_v3 }
0x11d5   : > { %12646 = vmatmul.mubr.msk.f32.gmra.mrb[214].mxu1 %vm828_vm5, %v6078_v5  ;;  %v13360_v49 = vunpack.i.h.bf16 %v13358_v20  ;;  %v13359_v56 = vunpack.i.l.bf16 %v13358_v20  ;;  %13908 = vrcp.f32 %v6438_v24  ;;  %v18073_v24 = vmov 0  }
0x11d6   : > { %12648 = vmatprep.mubr.msk.f32.mxu1 %vm14021_vm1, %v18071_v58  ;;  %v13903_v63 = vpop.eup %13902 }
0x11d7   : > { %v6441_v61 = vpop.xlane.xlu1 %6440  ;;  %v6451_v21 = vmul.f32 %v13903_v63, %v16620_v9  ;;  %v13000_v29 = vpack.c.bf16 %v13360_v49, %v13359_v56 }
0x11d8   : > { %13910 = vrcp.f32 %v6441_v61 }
0x11d9   : > { %12649 = vmatmul.mubr.msk.f32.gmra.mrb[216].mxu1 %vm828_vm5, %v6079_v34  ;;  %13912 = vrcp.f32 %v6798_v31 }
0x11da   : > { %12651 = vmatprep.mubr.msk.f32.mxu1 %vm14021_vm1, %v18071_v58  ;;  %v13905_v43 = vpop.eup %13904 }
0x11db   : > { %v6801_v46 = vpop.xlane.xlu1 %6800  ;;  %v6452_v45 = vmul.f32 %v13905_v43, %v16629_v44 }
0x11dc   : > { %13914 = vrcp.f32 %v6801_v46 }
0x11dd   : > { %12652 = vmatmul.mubr.msk.f32.gmra.mrb[218].mxu1 %vm828_vm5, %v6080_v60 }
0x11de   : > { %12703 = vmatprep.mubr.msk.f32.mxu1 %vm14021_vm1, %v18071_v58  ;;  %v13907_v59 = vpop.eup %13906 }
0x11df   : > { %v6804_v22 = vpop.xlane.xlu1 %6803  ;;  %v6453_v9 = vmul.f32 %v13907_v59, %v16644_v40  ;;  %v13909_v35 = vpop.eup %13908 }
0x11e0   : > { %v6454_v10 = vmul.f32 %v13909_v35, %v16626_v18  ;;  %13916 = vrcp.f32 %v6804_v22 }
0x11e1   : > { %12704 = vmatmul.mubr.msk.f32.vlgmr.msra.gmra.mrb[220].mxu1 %vm828_vm5, %v6449_v23 }
0x11e2   : > { %12995 = vmatpush3.bf16.msra.mxu1 %v12994_v17  ;;  %12706 = vmatprep.mubr.msk.f32.mxu1 %vm14021_vm1, %v18071_v58  ;;  %v13911_v44 = vpop.eup %13910 }
0x11e3   : > { %v6807_v51 = vpop.xlane.xlu1 %6806  ;;  %12996 = vmatprep.subr.bf16.mxu1 %v18072_v57  ;;  %v6455_v27 = vmul.f32 %v13911_v44, %v16649_v38  ;;  %v13913_v1 = vpop.eup %13912 }
0x11e4   : > { %13918 = vrcp.f32 %v6807_v51  ;;  %v6824_v40 = vmul.f32 %v13913_v1, %v16637_v30 }
0x11e5   : > { %12707 = vmatmul.mubr.msk.f32.gmra.mrb[222].mxu1 %vm828_vm5, %v6450_v26 }
0x11e6   : > { %12998 = vmatpush3.bf16.msra.mxu1 %v12997_v15  ;;  %12709 = vmatprep.mubr.msk.f32.mxu1 %vm14021_vm1, %v18071_v58  ;;  %v13915_v4 = vpop.eup %13914 }
0x11e7   : > { %v6810_v8 = vpop.xlane.xlu1 %6809  ;;  %12999 = vmatprep.subr.bf16.mxu1 %v18072_v57  ;;  %v6825_v18 = vmul.f32 %v13915_v4, %v16653_v37  ;;  %v13542_v4 = vld [vmem:[%s17993_s3 + $0x10] sm:$0xff]  }
0x11e8   : > { %13920 = vrcp.f32 %v6810_v8  ;;  %12794 = vmatprep.subr.bf16.mxu0 %v13542_v4 }
0x11e9   : > { %12710 = vmatmul.mubr.msk.f32.gmra.mrb[224].mxu1 %vm828_vm5, %v6451_v21  ;;  %12795 = vmatpush3.bf16.msra.mxu0 %v13542_v4 }
0x11ea   : > { %13001 = vmatpush3.bf16.msra.mxu1 %v13000_v29  ;;  %12712 = vmatprep.mubr.msk.f32.mxu1 %vm14021_vm1, %v18071_v58  ;;  %v13917_v54 = vpop.eup %13916 }
0x11eb   : > { %v6844_v3 = vpop.permute.xlu1 %6843  ;;  %12771 = vmatprep.subr.mxu1 %v18071_v58  ;;  %v6826_v16 = vmul.f32 %v13917_v54, %v16660_v19 }
0x11ed   : > { %12713 = vmatmul.mubr.msk.f32.gmra.mrb[226].mxu1 %vm828_vm5, %v6452_v45 }
0x11ee   : > { %12772 = vmatpush3.msra.mxu1 %v6844_v3  ;;  %12715 = vmatprep.mubr.msk.f32.mxu1 %vm14021_vm1, %v18071_v58  ;;  %v13919_v52 = vpop.eup %13918 }
0x11ef   : > { %v6827_v62 = vmul.f32 %v13919_v52, %v16671_v2 }
0x11f1   : > { %12716 = vmatmul.mubr.msk.f32.gmra.mrb[228].mxu1 %vm828_vm5, %v6453_v9 }
0x11f2   : > { %12718 = vmatprep.mubr.msk.f32.mxu1 %vm14021_vm1, %v18071_v58  ;;  %v13921_v37 = vpop.eup %13920 }
0x11f3   : > { %v6828_v48 = vmul.f32 %v13921_v37, %v16682_v41 }
0x11f5   : > { %12719 = vmatmul.mubr.msk.f32.gmra.mrb[230].mxu1 %vm828_vm5, %v6454_v10 }
0x11f6   : > { %12721 = vmatprep.mubr.msk.f32.mxu1 %vm14021_vm1, %v18071_v58 }
0x11f9   : > { %12722 = vmatmul.mubr.msk.f32.gmra.mrb[232].mxu1 %vm828_vm5, %v6455_v27 }
0x11fa   : > { %12773 = vmatprep.mubr.msk.f32.mxu1 %vm14021_vm1, %v18071_v58 }
0x11fd   : > { %12774 = vmatmul.mubr.msk.f32.vlgmr.msra.gmra.mrb[234].mxu1 %vm828_vm5, %v6824_v40 }
0x11fe   : > { %12776 = vmatprep.mubr.msk.f32.mxu1 %vm14021_vm1, %v18071_v58 }
0x1201   : > { %12777 = vmatmul.mubr.msk.f32.gmra.mrb[236].mxu1 %vm828_vm5, %v6825_v18 }
0x1202   : > { %12779 = vmatprep.mubr.msk.f32.mxu1 %vm14021_vm1, %v18071_v58 }
0x1204   : > { %v6813_v38 = vpop.xlane.xlu0 %6812 }
0x1205   : > { %13922 = vrcp.f32 %v6813_v38  ;;  %12780 = vmatmul.mubr.msk.f32.gmra.mrb[238].mxu1 %vm828_vm5, %v6826_v16 }
0x1206   : > { %12782 = vmatprep.mubr.msk.f32.mxu1 %vm14021_vm1, %v18071_v58 }
0x1208   : > { %v6816_v30 = vpop.xlane.xlu0 %6815 }
0x1209   : > { %13924 = vrcp.f32 %v6816_v30  ;;  %12783 = vmatmul.mubr.msk.f32.gmra.mrb[240].mxu1 %vm828_vm5, %v6827_v62 }
0x120a   : > { %12785 = vmatprep.mubr.msk.f32.mxu1 %vm14021_vm1, %v18071_v58 }
0x120d   : > { %12786 = vmatmul.mubr.msk.f32.gmra.mrb[242].mxu1 %vm828_vm5, %v6828_v48 }
0x120e   : > { %12788 = vmatprep.mubr.msk.f32.mxu1 %vm14021_vm1, %v18071_v58 }
0x120f   : > { %v13923_v19 = vpop.eup %13922 }
0x1210   : > { %v6829_v5 = vmul.f32 %v13923_v19, %v16708_v28 }
0x1212   : > { %12789 = vmatmul.mubr.msk.f32.gmra.mrb[244].mxu1 %vm828_vm5, %v6829_v5 }
0x1213   : > { %v13925_v2 = vpop.eup %13924  ;;  %12791 = vmatprep.mubr.msk.f32.mxu1 %vm14021_vm1, %v18071_v58 }
0x1214   : > { %v6830_v33 = vmul.f32 %v13925_v2, %v16712_v39 }
0x1216   : > { %12792 = vmatmul.mubr.msk.f32.gmra.mrb[246].mxu1 %vm828_vm5, %v6830_v33  ;;  %v13543_v33 = vld [vmem:[%s17993_s3 + $0x18] sm:$0xff]  }
0x1217   : > { %7552 = vmatprep.mubr.bf16.mxu1 %v18073_v24  ;;  %12796 = vmatprep.subr.bf16.mxu0 %v13543_v33 }
0x1218   : > { %12797 = vmatpush3.bf16.msra.mxu0 %v13543_v33 }
0x1222   : > { %v16825_v41 = vpop.f32.mrb[192].mxu1 }
0x1223   : > { %v12565_v61 = vpop.f32.mrb[193].mxu1 }
0x1226   : > { %v16827_v34 = vpop.f32.mrb[194].mxu1 }
0x1227   : > { %v12568_v55 = vpop.f32.mrb[195].mxu1 }
0x122a   : > { %v16829_v46 = vpop.f32.mrb[196].mxu1 }
0x122b   : > { %v12571_v28 = vpop.f32.mrb[197].mxu1 }
0x122e   : > { %v16831_v31 = vpop.f32.mrb[198].mxu1 }
0x122f   : > { %v12574_v60 = vpop.f32.mrb[199].mxu1 }
0x1232   : > { %v16833_v42 = vpop.f32.mrb[200].mxu1 }
0x1233   : > { %v12577_v11 = vpop.f32.mrb[201].mxu1 }
0x1263   : > { %v16835_v39 = vpop.f32.mrb[202].mxu1 }
0x1264   : > { %v12580_v25 = vpop.f32.mrb[203].mxu1 }
0x1267   : > { %v16837_v22 = vpop.f32.mrb[204].mxu1 }
0x1268   : > { %v12583_v23 = vpop.f32.mrb[205].mxu1 }
0x126b   : > { %v6189_v12 = vpop.f32.mrb[206].mxu1 }
0x126c   : > { %v12635_v36 = vpop.f32.mrb[207].mxu1 }
0x129c   : > { %v6194_v7 = vpop.f32.mrb[208].mxu1 }
0x129d   : > { %v13361_v17 = vpack.i.bf16 %v6194_v7, %v6189_v12  ;;  %v12638_v20 = vpop.f32.mrb[209].mxu1 }
0x129f   : > { %13362 = vrot.lane.b32.xlu1 %v13361_v17, %s18074_s23 }
0x12a0   : > { %v6199_v51 = vpop.f32.mrb[210].mxu1 }
0x12a1   : > { %v12641_v26 = vpop.f32.mrb[211].mxu1 }
0x12a4   : > { %v6204_v63 = vpop.f32.mrb[212].mxu1 }
0x12a5   : > { %v13366_v15 = vpack.i.bf16 %v6204_v63, %v6199_v51  ;;  %v12644_v49 = vpop.f32.mrb[213].mxu1 }
0x12a7   : > { %13367 = vrot.lane.b32.xlu0 %v13366_v15, %s18074_s23 }
0x12a8   : > { %v6209_v56 = vpop.f32.mrb[214].mxu1 }
0x12a9   : > { %v12647_v8 = vpop.f32.mrb[215].mxu1 }
0x12ac   : > { %v6214_v21 = vpop.f32.mrb[216].mxu1 }
0x12ad   : > { %v13391_v43 = vpack.i.bf16 %v6214_v21, %v6209_v56  ;;  %v12650_v29 = vpop.f32.mrb[217].mxu1 }
0x12b0   : > { %v6219_v3 = vpop.f32.mrb[218].mxu1 }
0x12b1   : > { %6992 = vrot.lane.b32.xlu0 %v6219_v3, %s18074_s23  ;;  %v12653_v45 = vpop.f32.mrb[219].mxu1 }
0x12b4   : > { %v6564_v59 = vpop.f32.mrb[220].mxu1 }
0x12b5   : > { %v12705_v9 = vpop.f32.mrb[221].mxu1 }
0x12b8   : > { %v6569_v35 = vpop.f32.mrb[222].mxu1 }
0x12b9   : > { %v13371_v10 = vpack.i.bf16 %v6569_v35, %v6564_v59  ;;  %v12708_v44 = vpop.f32.mrb[223].mxu1 }
0x12bb   : > { %13372 = vrot.lane.b32.xlu1 %v13371_v10, %s18075_s19 }
0x12bc   : > { %v6574_v27 = vpop.f32.mrb[224].mxu1 }
0x12bd   : > { %v12711_v1 = vpop.f32.mrb[225].mxu1 }
0x12c0   : > { %v6579_v40 = vpop.f32.mrb[226].mxu1 }
0x12c1   : > { %v13376_v18 = vpack.i.bf16 %v6579_v40, %v6574_v27  ;;  %v12714_v54 = vpop.f32.mrb[227].mxu1 }
0x12c3   : > { %13377 = vrot.lane.b32.xlu1 %v13376_v18, %s18075_s19 }
0x12c4   : > { %v6584_v38 = vpop.f32.mrb[228].mxu1 }
0x12c5   : > { %v12717_v16 = vpop.f32.mrb[229].mxu1 }
0x12c8   : > { %v6589_v52 = vpop.f32.mrb[230].mxu1 }
0x12c9   : > { %v13396_v30 = vpack.i.bf16 %v6589_v52, %v6584_v38  ;;  %v12720_v62 = vpop.f32.mrb[231].mxu1 }
0x12cc   : > { %v6594_v37 = vpop.f32.mrb[232].mxu1 }
0x12cd   : > { %7020 = vrot.lane.b32.xlu0 %v6594_v37, %s18075_s19  ;;  %v12723_v48 = vpop.f32.mrb[233].mxu1 }
0x12d0   : > { %v6939_v19 = vpop.f32.mrb[234].mxu1 }
0x12d1   : > { %v12775_v5 = vpop.f32.mrb[235].mxu1 }
0x12d4   : > { %v6944_v2 = vpop.f32.mrb[236].mxu1 }
0x12d5   : > { %v13381_v61 = vpack.i.bf16 %v6944_v2, %v6939_v19  ;;  %v12778_v55 = vpop.f32.mrb[237].mxu1 }
0x12d7   : > { %13382 = vrot.lane.b32.xlu1 %v13381_v61, %s18076_s28 }
0x12d8   : > { %v6949_v28 = vpop.f32.mrb[238].mxu1 }
0x12d9   : > { %v12781_v60 = vpop.f32.mrb[239].mxu1 }
0x12dc   : > { %v6954_v11 = vpop.f32.mrb[240].mxu1 }
0x12dd   : > { %v13386_v25 = vpack.i.bf16 %v6954_v11, %v6949_v28  ;;  %v12784_v23 = vpop.f32.mrb[241].mxu1 }
0x12df   : > { %13387 = vrot.lane.b32.xlu1 %v13386_v25, %s18076_s28 }
0x12e0   : > { %v6959_v12 = vpop.f32.mrb[242].mxu1 }
0x12e1   : > { %v12787_v36 = vpop.f32.mrb[243].mxu1 }
0x12e3   : > { %13392 = vrot.lane.b32.xlu1 %v13391_v43, %s18074_s23 }
0x12e5   : > { %v6964_v7 = vpop.f32.mrb[244].mxu1 }
0x12e6   : > { %v13401_v17 = vpack.i.bf16 %v6964_v7, %v6959_v12  ;;  %v12790_v20 = vpop.f32.mrb[245].mxu1 }
0x12e7   : > { %13397 = vrot.lane.b32.xlu1 %v13396_v30, %s18075_s19 }
0x12e9   : > { %v6969_v51 = vpop.f32.mrb[246].mxu1 }
0x12ea   : > { %7048 = vrot.lane.b32.xlu0 %v6969_v51, %s18076_s28  ;;  %v12793_v26 = vpop.f32.mrb[247].mxu1 }
0x12eb   : > { %13402 = vrot.lane.b32.xlu1 %v13401_v17, %s18076_s28  ;;  %s11293_s28 = sshll.u32 %s14145_s25, 4  ;;  %s14038_s25 = smov [#allocation2]  }
0x12ec   : > { %s17948_s19 = scalar_lea.hbm %s18006_s16, %s11293_s28  ;;  %s13958_s17 = sshll.u32 %s14038_s25, 4  ;;  %s13959_s17 = int_to_ptr.vmem [resolvable:$false] %s13958_s17 }
0x12ed   : > { %s13960_s1 = scalar_lea.vmem %s13959_s17, 32  ;;  %p13961_p0 = scmp.lt.s32.totalorder %s17950_s27, %s13959_s17 }
0x12ee   : > { %p13962_p1 = scmp.lt.s32.totalorder %s13960_s1, %s13954_s29 }
0x12f0   : > { %p13963_p2 = por %p13962_p1, %p13961_p0 }
0x12f2   : > { %p13964_p3 = pnand %p13963_p2, %p13957_p13 }
0x1311   : > { %v13363_v63 = vpop.permute.xlu1 %13362 }
0x1312   : > { %v13365_v56 = vunpack.i.h.bf16 %v13363_v63  ;;  %v13364_v8 = vunpack.i.l.bf16 %v13363_v63 }
0x1314   : > { %v7058_v43 = vsel %vm692_vm2, %v16827_v34, %v13365_v56  ;;  %v7057_v45 = vsel %vm692_vm2, %v16825_v41, %v13364_v8 }
0x1319   : > { %v13368_v35 = vpop.permute.xlu0 %13367 }
0x131a   : > { %v13370_v4 = vunpack.i.h.bf16 %v13368_v35  ;;  %v13369_v18 = vunpack.i.l.bf16 %v13368_v35 }
0x131c   : > { %v7060_v41 = vsel %vm692_vm2, %v16831_v31, %v13370_v4  ;;  %v7059_v16 = vsel %vm692_vm2, %v16829_v46, %v13369_v18 }
0x1323   : > { %v6993_v48 = vpop.permute.xlu0 %6992 }
0x1324   : > { %v7063_v11 = vsel %vm692_vm2, %v16837_v22, %v6993_v48 }
0x132d   : > { %v13373_v15 = vpop.permute.xlu1 %13372 }
0x132e   : > { %v13375_v21 = vunpack.i.h.bf16 %v13373_v15  ;;  %v13374_v29 = vunpack.i.l.bf16 %v13373_v15 }
0x1330   : > { %v7064_v10 = vsel %vm2264_vm6, %v7057_v45, %v13374_v29  ;;  %v7065_v44 = vsel %vm2264_vm6, %v7058_v43, %v13375_v21 }
0x1335   : > { %v13378_v49 = vpop.permute.xlu1 %13377 }
0x1336   : > { %v13380_v54 = vunpack.i.h.bf16 %v13378_v49  ;;  %v13379_v38 = vunpack.i.l.bf16 %v13378_v49 }
0x1338   : > { %v7067_v62 = vsel %vm2264_vm6, %v7060_v41, %v13380_v54  ;;  %v7066_v37 = vsel %vm2264_vm6, %v7059_v16, %v13379_v38 }
0x133f   : > { %v7021_v61 = vpop.permute.xlu0 %7020 }
0x1340   : > { %v7070_v23 = vsel %vm2264_vm6, %v7063_v11, %v7021_v61 }
0x1349   : > { %v13383_v3 = vpop.permute.xlu1 %13382 }
0x134a   : > { %v13385_v59 = vunpack.i.h.bf16 %v13383_v3  ;;  %v13384_v9 = vunpack.i.l.bf16 %v13383_v3 }
0x134c   : > { %v7072_v27 = vsel %vm2272_vm7, %v7065_v44, %v13385_v59  ;;  %v7071_v1 = vsel %vm2272_vm7, %v7064_v10, %v13384_v9 }
0x134d   : > { %v7078_v40 = vpack.c.bf16 %v7072_v27, %v7071_v1 }
0x134f   : > { %12798 = vmatprep.mubr.msk.bf16.mxu0 %vm587_vm0, %v7078_v40 }
0x1351   : > { %v13388_v34 = vpop.permute.xlu1 %13387 }
0x1352   : > { %v13390_v52 = vunpack.i.h.bf16 %v13388_v34  ;;  %v13389_v30 = vunpack.i.l.bf16 %v13388_v34 }
0x1354   : > { %v7074_v19 = vsel %vm2272_vm7, %v7067_v62, %v13390_v52  ;;  %v7073_v5 = vsel %vm2272_vm7, %v7066_v37, %v13389_v30 }
0x1355   : > { %v7079_v2 = vpack.c.bf16 %v7074_v19, %v7073_v5  ;;  %v13393_v33 = vpop.permute.xlu1 %13392 }
0x1356   : > { %v13395_v55 = vunpack.i.h.bf16 %v13393_v33  ;;  %v13394_v28 = vunpack.i.l.bf16 %v13393_v33 }
0x1357   : > { %12799 = vmatmul.mubr.msk.bf16.vlgmr.msra.gmra.mrb[0].mxu0 %vm587_vm0, %v7079_v2 }
0x1358   : > { %v7062_v36 = vsel %vm692_vm2, %v16835_v39, %v13395_v55  ;;  %v7061_v7 = vsel %vm692_vm2, %v16833_v42, %v13394_v28  ;;  %v10792_v42 = vld [vmem:[%s17994_s4 + $0x1] ss:$0 sm:$0xff] }
0x1359   : > { %v13398_v31 = vpop.permute.xlu1 %13397 }
0x135a   : > { %v13400_v46 = vunpack.i.h.bf16 %v13398_v31  ;;  %v13399_v60 = vunpack.i.l.bf16 %v13398_v31 }
0x135c   : > { %v7049_v25 = vpop.permute.xlu0 %7048  ;;  %v7068_v51 = vsel %vm2264_vm6, %v7061_v7, %v13399_v60  ;;  %v7069_v26 = vsel %vm2264_vm6, %v7062_v36, %v13400_v46 }
0x135d   : > { %v13403_v12 = vpop.permute.xlu1 %13402  ;;  %v7077_v63 = vsel %vm2272_vm7, %v7070_v23, %v7049_v25 }
0x135e   : > { %v13405_v17 = vunpack.i.h.bf16 %v13403_v12  ;;  %v13404_v20 = vunpack.i.l.bf16 %v13403_v12  ;;  %v7081_v56 = vpack.c.bf16 %v7077_v63, %v7077_v63 }
0x1360   : > { %v7076_v22 = vsel %vm2272_vm7, %v7069_v26, %v13405_v17  ;;  %v7075_v15 = vsel %vm2272_vm7, %v7068_v51, %v13404_v20 }
0x1361   : > { %v7080_v49 = vpack.c.bf16 %v7076_v22, %v7075_v15 }
0x1363   : > { %12802 = vmatprep.mubr.msk.bf16.mxu0 %vm587_vm0, %v7080_v49 }
0x1364   : > { %12803 = vmatmul.mubr.msk.bf16.gmra.mrb[4].mxu0 %vm587_vm0, %v7081_v56 }
0x1365   : > { %7623 = vmatprep.mubr.bf16.mxu0 %v18073_v24 }
0x142a   : > { %v12800_v39 = vpop.f32.mrb[0].mxu0 }
0x142b   : > { %v7153_v8 = vpop.f32.mrb[1].mxu0  ;;  %v7162_v45 = vadd.f32 %v12800_v39, %v10792_v42 }
0x142c   : > { %v7154_v21 = vadd.f32 %v10792_v42, %v7153_v8  ;;  %v12801_v29 = vpop.f32.mrb[2].mxu0 }
0x142d   : > { %v7165_v3 = vadd.f32 %v12801_v29, %v10792_v42  ;;  %v7156_v43 = vpop.f32.mrb[3].mxu0  ;;  %v7185_v27 = vadd.f32 %v7162_v45, %v16015_v47  ;;  %v10804_v45 = vld [vmem:[%s17997_s7 + $0x108] sm:$0xff] }
0x142e   : > { %v7183_v59 = vadd.f32 %v7154_v21, %v16006_v0  ;;  %v7157_v9 = vadd.f32 %v10792_v42, %v7156_v43  ;;  %v10811_v43 = vld [vmem:[%s17997_s7 + $0x140] sm:$0xff] }
0x142f   : > { %v7186_v35 = vadd.f32 %v7165_v3, %v16017_v50  ;;  %v7200_v4 = vsel %vm587_vm0, %v7185_v27, 0.0  ;;  %v10803_v3 = vld [vmem:[%s17997_s7 + $0x100] sm:$0xff] }
0x1430   : > { %v7184_v10 = vadd.f32 %v7157_v9, %v16008_v6  ;;  %v7194_v44 = vsel %vm587_vm0, %v7183_v59, 0.0  ;;  %v10812_v9 = vld [vmem:[%s17997_s7 + $0x148] sm:$0xff] }
0x1431   : > { %7195 = vadd.xlane.f32.xlu1 %v7194_v44  ;;  %v7203_v40 = vsel %vm587_vm0, %v7186_v35, 0.0  ;;  %v10838_v44 = vcombine.high %v10804_v45, %v10812_v9 }
0x1432   : > { %v7197_v1 = vsel %vm587_vm0, %v7184_v10, 0.0 }
0x1433   : > { %7198 = vadd.xlane.f32.xlu0 %v7197_v1  ;;  %7591 = vmatprep.subr.bf16.mxu0 %v10838_v44  ;;  %v10827_v1 = vld [vmem:[%s17997_s7 + $0x1c0] sm:$0xff] }
0x1435   : > { %7204 = vadd.xlane.f32.xlu1 %v7203_v40  ;;  %v10820_v40 = vld [vmem:[%s17997_s7 + $0x188] sm:$0xff] }
0x1437   : > { %v12804_v18 = vpop.f32.mrb[4].mxu0  ;;  %7201 = vadd.xlane.f32.xlu0 %v7200_v4 }
0x1438   : > { %v7169_v0 = vpop.f32.mrb[5].mxu0  ;;  %v7178_v54 = vadd.f32 %v12804_v18, %v10792_v42  ;;  %v10828_v18 = vld [vmem:[%s17997_s7 + $0x1c8] sm:$0xff] }
0x1439   : > { %v7170_v50 = vadd.f32 %v10792_v42, %v7169_v0  ;;  %v12805_v38 = vpop.f32.mrb[6].mxu0 }
0x143a   : > { %v7172_v6 = vpop.f32.mrb[7].mxu0  ;;  %v7189_v47 = vadd.f32 %v7178_v54, %v16032_v13  ;;  %v10853_v54 = vcombine.low %v10820_v40, %v10828_v18  ;;  %v16969_v38 = vld [vmem:[%s17997_s7 + $0x110] sm:$0xff] }
0x143b   : > { %v7187_v34 = vadd.f32 %v7170_v50, %v16024_v53  ;;  %v7173_v41 = vadd.f32 %v10792_v42, %v7172_v6  ;;  %v10854_v50 = vcombine.high %v10820_v40, %v10828_v18  ;;  %v16974_v6 = vld [vmem:[%s17997_s7 + $0x150] sm:$0xff]  ;;  %v17037_v18 = vld [vmem:[%s17997_s7 + $0x120] sm:$0xff] }
0x143c   : > { %v7212_v62 = vsel %vm587_vm0, %v7189_v47, 0.0 }
0x143d   : > { %v7188_v16 = vadd.f32 %v7173_v41, %v16026_v14  ;;  %v7206_v52 = vsel %vm587_vm0, %v7187_v34, 0.0  ;;  %v10839_v41 = vcombine.low %v16969_v38, %v16974_v6 }
0x143e   : > { %7207 = vadd.xlane.f32.xlu0 %v7206_v52 }
0x143f   : > { %v7209_v30 = vsel %vm587_vm0, %v7188_v16, 0.0 }
0x1440   : > { %7210 = vadd.xlane.f32.xlu1 %v7209_v30 }
0x1442   : > { %7213 = vadd.xlane.f32.xlu0 %v7212_v62 }
0x14be   : > { %v7196_v37 = vpop.xlane.xlu1 %7195 }
0x14bf   : > { %v7215_v48 = vmul.f32 0.03125, %v7196_v37 }
0x14c0   : > { %v7199_v19 = vpop.xlane.xlu0 %7198 }
0x14c1   : > { %v16907_v5 = vsub.f32 %v7183_v59, %v7215_v48  ;;  %v7216_v53 = vmul.f32 0.03125, %v7199_v19  ;;  %v10836_v59 = vcombine.high %v10803_v3, %v10811_v43 }
0x14c2   : > { %v7205_v2 = vpop.xlane.xlu1 %7204 }
0x14c3   : > { %v16909_v33 = vsub.f32 %v7184_v10, %v7216_v53  ;;  %v7218_v13 = vmul.f32 0.03125, %v7205_v2  ;;  %v7229_v14 = vmul.f32 %v16907_v5, %v16907_v5  ;;  %v10837_v10 = vcombine.low %v10804_v45, %v10812_v9  ;;  %7520 = vmatprep.subr.bf16.mxu1 %v10836_v59  ;;  %v10829_v9 = vld [vmem:[%s17997_s7 + $0x1d0] sm:$0xff] }
0x14c4   : > { %v7202_v61 = vpop.xlane.xlu0 %7201 }
0x14c5   : > { %v16913_v31 = vsub.f32 %v7186_v35, %v7218_v13  ;;  %v7217_v55 = vmul.f32 0.03125, %v7202_v61  ;;  %v7236_v28 = vsel %vm587_vm0, %v7229_v14, 0.0  ;;  %v7230_v46 = vmul.f32 %v16909_v33, %v16909_v33  ;;  %7592 = vmatpush1.bf16.msra.mxu0 %v10837_v10  ;;  %v10830_v10 = vld [vmem:[%s17997_s7 + $0x1d8] sm:$0xff] }
0x14c6   : > { %7237 = vadd.xlane.f32.xlu1 %v7236_v28  ;;  %v10835_v35 = vcombine.low %v10803_v3, %v10811_v43  ;;  %7593 = vmatprep.subr.bf16.mxu0 %v10854_v50  ;;  %v10821_v3 = vld [vmem:[%s17997_s7 + $0x190] sm:$0xff] }
0x14c7   : > { %v16918_v60 = vsub.f32 %v7185_v27, %v7217_v55  ;;  %v7239_v11 = vsel %vm587_vm0, %v7230_v46, 0.0  ;;  %v7232_v25 = vmul.f32 %v16913_v31, %v16913_v31  ;;  %v10819_v27 = vld [vmem:[%s17997_s7 + $0x180] sm:$0xff]  ;;  %v10856_v40 = vcombine.high %v10821_v3, %v10829_v9 }
0x14c8   : > { %7240 = vadd.xlane.f32.xlu0 %v7239_v11  ;;  %7521 = vmatpush1.bf16.msra.mxu1 %v10835_v35  ;;  %v10852_v4 = vcombine.high %v10819_v27, %v10827_v1  ;;  %v10851_v0 = vcombine.low %v10819_v27, %v10827_v1  ;;  %v10822_v35 = vld [vmem:[%s17997_s7 + $0x198] sm:$0xff]  ;;  %v10855_v50 = vcombine.low %v10821_v3, %v10829_v9 }
0x14c9   : > { %v7231_v23 = vmul.f32 %v16918_v60, %v16918_v60  ;;  %v7245_v7 = vsel %vm587_vm0, %v7232_v25, 0.0  ;;  %7594 = vmatpush1.bf16.msra.mxu0 %v10853_v54  ;;  %v10816_v54 = vld [vmem:[%s17997_s7 + $0x168] sm:$0xff] }
0x14ca   : > { %7522 = vmatprep.subr.bf16.mxu1 %v10852_v4  ;;  %v10858_v4 = vcombine.high %v10822_v35, %v10830_v10 }
0x14cb   : > { %v7208_v12 = vpop.xlane.xlu0 %7207  ;;  %v7242_v36 = vsel %vm587_vm0, %v7231_v23, 0.0 }
0x14cc   : > { %v7219_v17 = vmul.f32 0.03125, %v7208_v12  ;;  %7243 = vadd.xlane.f32.xlu1 %v7242_v36  ;;  %7246 = vadd.xlane.f32.xlu0 %v7245_v7  ;;  %v16997_v12 = vld [vmem:[%s17995_s5 + $0x1] ss:$0 sm:$0xff] }
0x14cd   : > { %v7211_v20 = vpop.xlane.xlu1 %7210  ;;  %7523 = vmatpush1.bf16.msra.mxu1 %v10851_v0  ;;  %v10808_v0 = vld [vmem:[%s17997_s7 + $0x128] sm:$0xff] }
0x14ce   : > { %v16927_v51 = vsub.f32 %v7187_v34, %v7219_v17  ;;  %v7220_v26 = vmul.f32 0.03125, %v7211_v20  ;;  %v16979_v34 = vld [vmem:[%s17997_s7 + $0x118] sm:$0xff] }
0x14cf   : > { %v7214_v63 = vpop.xlane.xlu0 %7213 }
0x14d0   : > { %v16929_v22 = vsub.f32 %v7188_v16, %v7220_v26  ;;  %v7221_v15 = vmul.f32 0.03125, %v7214_v63  ;;  %v7233_v49 = vmul.f32 %v16927_v51, %v16927_v51  ;;  %v16988_v16 = vld [vmem:[%s17997_s7 + $0x158] sm:$0xff] }
0x14d1   : > { %v10841_v52 = vcombine.low %v16979_v34, %v16988_v16  ;;  %v10842_v30 = vcombine.high %v16979_v34, %v16988_v16 }
0x14d2   : > { %v16933_v56 = vsub.f32 %v7189_v47, %v7221_v15  ;;  %v7248_v42 = vsel %vm587_vm0, %v7233_v49, 0.0  ;;  %v7234_v39 = vmul.f32 %v16929_v22, %v16929_v22  ;;  %v10840_v47 = vcombine.high %v16969_v38, %v16974_v6 }
0x14d3   : > { %7249 = vadd.xlane.f32.xlu1 %v7248_v42  ;;  %7733 = vmatprep.subr.bf16.mxu0 %v10842_v30 }
0x14d4   : > { %v7251_v8 = vsel %vm587_vm0, %v7234_v39, 0.0  ;;  %v7235_v21 = vmul.f32 %v16933_v56, %v16933_v56  ;;  %7662 = vmatprep.subr.bf16.mxu1 %v10840_v47  ;;  %v17005_v39 = vld [vmem:[%s17996_s6 + $0x1] ss:$0 sm:$0xff] }
0x14d5   : > { %7252 = vadd.xlane.f32.xlu0 %v7251_v8 }
0x14d6   : > { %v7254_v29 = vsel %vm587_vm0, %v7235_v21, 0.0 }
0x14d7   : > { %7255 = vadd.xlane.f32.xlu1 %v7254_v29 }
0x1553   : > { %v7238_v62 = vpop.xlane.xlu1 %7237 }
0x1554   : > { %v7257_v37 = vmul.f32 0.03125, %v7238_v62 }
0x1555   : > { %v7241_v48 = vpop.xlane.xlu0 %7240 }
0x1556   : > { %v7264_v19 = vadd.f32 1e-05, %v7257_v37  ;;  %v7258_v53 = vmul.f32 0.03125, %v7241_v48  ;;  %v10857_v37 = vcombine.low %v10822_v35, %v10830_v10  ;;  %v13544_v10 = vld [vmem:[%s17999_s9 + $0x440] sm:$0xff]  }
0x1558   : > { %13926 = vrsqrt.f32 %v7264_v19  ;;  %v7265_v2 = vadd.f32 1e-05, %v7258_v53  ;;  %v10846_v19 = vcombine.high %v10808_v0, %v10816_v54 }
0x1559   : > { %v7247_v13 = vpop.xlane.xlu0 %7246  ;;  %v7244_v14 = vpop.xlane.xlu1 %7243 }
0x155a   : > { %13928 = vrsqrt.f32 %v7265_v2  ;;  %v7260_v61 = vmul.f32 0.03125, %v7247_v13  ;;  %v7259_v55 = vmul.f32 0.03125, %v7244_v14 }
0x155c   : > { %v7267_v28 = vadd.f32 1e-05, %v7260_v61  ;;  %v7266_v46 = vadd.f32 1e-05, %v7259_v55  ;;  %v10823_v55 = vld [vmem:[%s17997_s7 + $0x1a0] sm:$0xff] }
0x155e   : > { %13930 = vrsqrt.f32 %v7267_v28  ;;  %v10831_v28 = vld [vmem:[%s17997_s7 + $0x1e0] sm:$0xff] }
0x155f   : > { %13932 = vrsqrt.f32 %v7266_v46  ;;  %v10824_v46 = vld [vmem:[%s17997_s7 + $0x1a8] sm:$0xff] }
0x1560   : > { %v7250_v11 = vpop.xlane.xlu1 %7249 }
0x1561   : > { %v7261_v25 = vmul.f32 0.03125, %v7250_v11  ;;  %v10832_v11 = vld [vmem:[%s17997_s7 + $0x1e8] sm:$0xff] }
0x1562   : > { %v13927_v23 = vpop.eup %13926  ;;  %v7253_v36 = vpop.xlane.xlu0 %7252 }
0x1563   : > { %v7278_v7 = vmul.f32 %v13927_v23, %v16907_v5  ;;  %v7268_v17 = vadd.f32 1e-05, %v7261_v25  ;;  %v7262_v20 = vmul.f32 0.03125, %v7253_v36  ;;  %v10845_v23 = vcombine.low %v10808_v0, %v10816_v54  ;;  %v13553_v0 = vld [vmem:[%s17999_s9 + $0x4d0] sm:$0xff]  }
0x1564   : > { %v13929_v26 = vpop.eup %13928  ;;  %v7256_v63 = vpop.xlane.xlu1 %7255  ;;  %v10862_v36 = vcombine.high %v10824_v46, %v10832_v11  ;;  %v13554_v54 = vld [vmem:[%s17999_s9 + $0x410] sm:$0xff]  }
0x1565   : > { %v7291_v15 = vmul.f32 %v16997_v12, %v7278_v7  ;;  %v7279_v49 = vmul.f32 %v13929_v26, %v16909_v33  ;;  %13934 = vrsqrt.f32 %v7268_v17  ;;  %v7269_v42 = vadd.f32 1e-05, %v7262_v20  ;;  %v10809_v7 = vld [vmem:[%s17997_s7 + $0x130] sm:$0xff]  ;;  %v10810_v20 = vld [vmem:[%s17997_s7 + $0x138] sm:$0xff] }
0x1566   : > { %v7263_v8 = vmul.f32 0.03125, %v7256_v63  ;;  %v10817_v17 = vld [vmem:[%s17997_s7 + $0x170] sm:$0xff]  ;;  %v10818_v26 = vld [vmem:[%s17997_s7 + $0x178] sm:$0xff]  ;;  %v10859_v63 = vcombine.low %v10823_v55, %v10831_v28 }
0x1567   : > { %v7292_v21 = vmul.f32 %v16997_v12, %v7279_v49  ;;  %13936 = vrsqrt.f32 %v7269_v42  ;;  %v17012_v33 = vadd.f32 %v17005_v39, %v7291_v15  ;;  %v10861_v15 = vcombine.low %v10824_v46, %v10832_v11  ;;  %v13572_v46 = vld [vmem:[%s17999_s9 + $0x478] sm:$0xff]  }
0x1568   : > { %v13931_v5 = vpop.eup %13930  ;;  %v7270_v29 = vadd.f32 1e-05, %v7263_v8  ;;  %v10848_v49 = vcombine.high %v10809_v7, %v10817_v17  ;;  %v10850_v42 = vcombine.high %v10810_v20, %v10818_v26  ;;  %v10833_v8 = vld [vmem:[%s17997_s7 + $0x1f0] sm:$0xff]  ;;  %v10849_v3 = vcombine.low %v10810_v20, %v10818_v26  ;;  %v13573_v11 = vld [vmem:[%s17999_s9 + $0x4f8] sm:$0xff]  }
0x1569   : > { %v13933_v43 = vpop.eup %13932  ;;  %v17015_v45 = vadd.f32 %v17005_v39, %v7292_v21  ;;  %v7281_v59 = vmul.f32 %v13931_v5, %v16913_v31  ;;  %v10826_v21 = vld [vmem:[%s17997_s7 + $0x1b8] sm:$0xff] }
0x156a   : > { %v7280_v44 = vmul.f32 %v13933_v43, %v16918_v60  ;;  %13938 = vrsqrt.f32 %v7270_v29  ;;  %v10815_v60 = vld [vmem:[%s17997_s7 + $0x160] sm:$0xff]  ;;  %v10834_v5 = vld [vmem:[%s17997_s7 + $0x1f8] sm:$0xff]  ;;  %v10847_v29 = vcombine.low %v10809_v7, %v10817_v17 }
0x156b   : > { %v17030_v27 = vpack.c.bf16 %v17015_v45, %v17012_v33  ;;  %v7294_v31 = vmul.f32 %v16997_v12, %v7281_v59  ;;  %v10844_v48 = vcombine.high %v17037_v18, %v10815_v60  ;;  %v10843_v25 = vcombine.low %v17037_v18, %v10815_v60  ;;  %v13550_v18 = vld [vmem:[%s17999_s9 + $0x408] sm:$0xff]  }
0x156c   : > { %v7293_v1 = vmul.f32 %v16997_v12, %v7280_v44  ;;  %v10866_v59 = vcombine.high %v10826_v21, %v10834_v5  ;;  %v10865_v35 = vcombine.low %v10826_v21, %v10834_v5  ;;  %v13545_v44 = vld [vmem:[%s17999_s9 + $0x4c0] sm:$0xff]   ;;  %v13551_v60 = vld [vmem:[%s17999_s9 + $0x488] sm:$0xff]  }
0x156d   : > { %10867 = vmatmul.mubr.msk.bf16.vlgmr.msra.gmra.mrb[248].mxu1 %vm587_vm0, %v17030_v27  ;;  %10871 = vmatmul.mubr.msk.bf16.vlgmr.msra.gmra.mrb[8].mxu0 %vm587_vm0, %v17030_v27  ;;  %v17055_v30 = vadd.f32 %v17005_v39, %v7294_v31  ;;  %v13546_v31 = vld [vmem:[%s17999_s9 + $0x400] sm:$0xff]  }
0x156e   : > { %7562 = vmatprep.mubr.bf16.mxu1 %v18073_v24  ;;  %7633 = vmatprep.mubr.bf16.mxu0 %v18073_v24  ;;  %v17058_v62 = vadd.f32 %v17005_v39, %v7293_v1  ;;  %v13547_v1 = vld [vmem:[%s17999_s9 + $0x480] sm:$0xff]  }
0x156f   : > { %v13935_v47 = vpop.eup %13934  ;;  %7663 = vmatpush1.bf16.msra.mxu1 %v10839_v41  ;;  %7734 = vmatpush1.bf16.msra.mxu0 %v10841_v52 }
0x1570   : > { %7664 = vmatprep.subr.bf16.mxu1 %v10856_v40  ;;  %7735 = vmatprep.subr.bf16.mxu0 %v10858_v4  ;;  %v7282_v2 = vmul.f32 %v13935_v47, %v16927_v51  ;;  %v17071_v14 = vpack.c.bf16 %v17055_v30, %v17058_v62  ;;  %v13548_v40 = vld [vmem:[%s17999_s9 + $0x448] sm:$0xff]   ;;  %v13556_v47 = vld [vmem:[%s17999_s9 + $0x458] sm:$0xff]  }
0x1571   : > { %v13937_v53 = vpop.eup %13936  ;;  %v13549_v4 = vld [vmem:[%s17999_s9 + $0x4c8] sm:$0xff]  }
0x1572   : > { %v7283_v13 = vmul.f32 %v13937_v53, %v16929_v22  ;;  %v7295_v34 = vmul.f32 %v16997_v12, %v7282_v2  ;;  %v13560_v53 = vld [vmem:[%s17999_s9 + $0x460] sm:$0xff]  }
0x1573   : > { %7665 = vmatpush1.bf16.msra.mxu1 %v10855_v50  ;;  %7736 = vmatpush1.bf16.msra.mxu0 %v10857_v37  ;;  %v13555_v50 = vld [vmem:[%s17999_s9 + $0x490] sm:$0xff]   ;;  %v13557_v37 = vld [vmem:[%s17999_s9 + $0x4d8] sm:$0xff]   ;;  %v13561_v2 = vld [vmem:[%s17999_s9 + $0x4e0] sm:$0xff]  }
0x1574   : > { %v13939_v38 = vpop.eup %13938  ;;  %v7296_v6 = vmul.f32 %v16997_v12, %v7283_v13  ;;  %7804 = vmatprep.subr.bf16.mxu1 %v10844_v48  ;;  %7875 = vmatprep.subr.bf16.mxu0 %v10846_v19  ;;  %v17086_v41 = vadd.f32 %v17005_v39, %v7295_v34  ;;  %v13558_v48 = vld [vmem:[%s17999_s9 + $0x418] sm:$0xff]   ;;  %v13562_v13 = vld [vmem:[%s17999_s9 + $0x420] sm:$0xff]   ;;  %v13566_v34 = vld [vmem:[%s17999_s9 + $0x428] sm:$0xff]  }
0x1575   : > { %10868 = vmatmul.mubr.msk.bf16.gmra.mrb[252].mxu1 %vm587_vm0, %v17071_v14  ;;  %10872 = vmatmul.mubr.msk.bf16.gmra.mrb[12].mxu0 %vm587_vm0, %v17071_v14  ;;  %v7284_v22 = vmul.f32 %v13939_v38, %v16933_v56  ;;  %v13559_v19 = vld [vmem:[%s17999_s9 + $0x498] sm:$0xff]   ;;  %v13564_v38 = vld [vmem:[%s17999_s9 + $0x468] sm:$0xff]  }
0x1576   : > { %7572 = vmatprep.mubr.bf16.mxu1 %v18073_v24  ;;  %7643 = vmatprep.mubr.bf16.mxu0 %v18073_v24  ;;  %v17082_v51 = vadd.f32 %v17005_v39, %v7296_v6  ;;  %v13565_v6 = vld [vmem:[%s17999_s9 + $0x4e8] sm:$0xff]  }
0x1577   : > { %v7297_v52 = vmul.f32 %v16997_v12, %v7284_v22  ;;  %v10860_v12 = vcombine.high %v10823_v55, %v10831_v28  ;;  %v13567_v22 = vld [vmem:[%s17999_s9 + $0x4a8] sm:$0xff]   ;;  %v13570_v55 = vld [vmem:[%s17999_s9 + $0x430] sm:$0xff]  }
0x1578   : > { %v17090_v16 = vpack.c.bf16 %v17082_v51, %v17086_v41  ;;  %v13571_v28 = vld [vmem:[%s17999_s9 + $0x4b0] sm:$0xff]  }
0x1579   : > { %v17100_v56 = vadd.f32 %v17005_v39, %v7297_v52  ;;  %v10825_v39 = vld [vmem:[%s17997_s7 + $0x1b0] sm:$0xff] }
0x157a   : > { %v10864_v43 = vcombine.high %v10825_v39, %v10833_v8  ;;  %v10863_v9 = vcombine.low %v10825_v39, %v10833_v8  ;;  %v13569_v52 = vld [vmem:[%s17999_s9 + $0x4f0] sm:$0xff]  }
0x157b   : > { %v17104_v61 = vpack.c.bf16 %v17100_v56, %v17100_v56 }
0x157d   : > { %10869 = vmatmul.mubr.msk.bf16.gmra.mrb[0].mxu1 %vm587_vm0, %v17090_v16  ;;  %10873 = vmatmul.mubr.msk.bf16.gmra.mrb[16].mxu0 %vm587_vm0, %v17090_v16 }
0x157e   : > { %7582 = vmatprep.mubr.bf16.mxu1 %v18073_v24  ;;  %7653 = vmatprep.mubr.bf16.mxu0 %v18073_v24 }
0x1585   : > { %10870 = vmatmul.mubr.msk.bf16.gmra.mrb[4].mxu1 %vm587_vm0, %v17104_v61  ;;  %10874 = vmatmul.mubr.msk.bf16.gmra.mrb[20].mxu0 %vm587_vm0, %v17104_v61 }
0x1586   : > { %7694 = vmatprep.mubr.bf16.mxu1 %v18073_v24  ;;  %7765 = vmatprep.mubr.bf16.mxu0 %v18073_v24 }
0x158d   : > { %10875 = vmatmul.mubr.msk.bf16.vlgmr.msra.gmra.mrb[8].mxu1 %vm587_vm0, %v17030_v27  ;;  %10879 = vmatmul.mubr.msk.bf16.vlgmr.msra.gmra.mrb[24].mxu0 %vm587_vm0, %v17030_v27 }
0x158e   : > { %7704 = vmatprep.mubr.bf16.mxu1 %v18073_v24  ;;  %7775 = vmatprep.mubr.bf16.mxu0 %v18073_v24 }
0x158f   : > { %7805 = vmatpush1.bf16.msra.mxu1 %v10843_v25  ;;  %7876 = vmatpush1.bf16.msra.mxu0 %v10845_v23  ;;  %v13574_v25 = vld [vmem:[%s17999_s9 + $0x438] sm:$0xff]  }
0x1590   : > { %7806 = vmatprep.subr.bf16.mxu1 %v10860_v12  ;;  %7877 = vmatprep.subr.bf16.mxu0 %v10862_v36  ;;  %v13575_v23 = vld [vmem:[%s17999_s9 + $0x4b8] sm:$0xff]   ;;  %v13576_v12 = vld [vmem:[%s17999_s9 + $0x540] sm:$0xff]   ;;  %v17324_v36 = vld [vmem:[%s17998_s8 + $0x10] sm:$0xff] }
0x1591   : > { %v8164_v7 = vrot.slane %v17324_v36, %v15390_v32 }
0x1593   : > { %7807 = vmatpush1.bf16.msra.mxu1 %v10859_v63  ;;  %7878 = vmatpush1.bf16.msra.mxu0 %v10861_v15  ;;  %v8172_v17 = vcombine.high %v8164_v7, %v8164_v7  ;;  %v8180_v20 = vrot.slane %v8164_v7, %v15390_v32  ;;  %v13582_v7 = vld [vmem:[%s17999_s9 + $0x508] sm:$0xff]  }
0x1594   : > { %7946 = vmatprep.subr.bf16.mxu1 %v10848_v49  ;;  %8017 = vmatprep.subr.bf16.mxu0 %v10850_v42 }
0x1595   : > { %10876 = vmatmul.mubr.msk.bf16.gmra.mrb[12].mxu1 %vm587_vm0, %v17071_v14  ;;  %10880 = vmatmul.mubr.msk.bf16.gmra.mrb[28].mxu0 %vm587_vm0, %v17071_v14  ;;  %v8194_v26 = vrot.slane %v8172_v17, %v15390_v32  ;;  %v8202_v63 = vcombine.high %v8180_v20, %v8180_v20  ;;  %v8256_v49 = vpack.i.b16 %v8180_v20, %v8180_v20  ;;  %v13583_v17 = vld [vmem:[%s17999_s9 + $0x588] sm:$0xff]  }
0x1596   : > { %7714 = vmatprep.mubr.bf16.mxu1 %v18073_v24  ;;  %7785 = vmatprep.mubr.bf16.mxu0 %v18073_v24 }
0x1597   : > { %v8204_v15 = vcombine.high %v8194_v26, %v8194_v26  ;;  %v8270_v42 = vpack.i.b16 %v8202_v63, %v8202_v63  ;;  %v8263_v39 = vpack.i.b16 %v8194_v26, %v8194_v26  ;;  %v13584_v26 = vld [vmem:[%s17999_s9 + $0x550] sm:$0xff]  }
0x1598   : > { %v13585_v63 = vld [vmem:[%s17999_s9 + $0x5d0] sm:$0xff]  }
0x1599   : > { %v8277_v8 = vpack.i.b16 %v8204_v15, %v8204_v15 }
0x159d   : > { %10877 = vmatmul.mubr.msk.bf16.gmra.mrb[16].mxu1 %vm587_vm0, %v17090_v16  ;;  %10881 = vmatmul.mubr.msk.bf16.gmra.mrb[32].mxu0 %vm587_vm0, %v17090_v16 }
0x159e   : > { %7724 = vmatprep.mubr.bf16.mxu1 %v18073_v24  ;;  %7795 = vmatprep.mubr.bf16.mxu0 %v18073_v24 }
0x15a5   : > { %10878 = vmatmul.mubr.msk.bf16.gmra.mrb[20].mxu1 %vm587_vm0, %v17104_v61  ;;  %10882 = vmatmul.mubr.msk.bf16.gmra.mrb[36].mxu0 %vm587_vm0, %v17104_v61 }
0x15a6   : > { %7836 = vmatprep.mubr.bf16.mxu1 %v18073_v24  ;;  %7907 = vmatprep.mubr.bf16.mxu0 %v18073_v24 }
0x15ad   : > { %10883 = vmatmul.mubr.msk.bf16.vlgmr.msra.gmra.mrb[24].mxu1 %vm587_vm0, %v17030_v27  ;;  %10887 = vmatmul.mubr.msk.bf16.vlgmr.msra.gmra.mrb[40].mxu0 %vm587_vm0, %v17030_v27 }
0x15ae   : > { %7846 = vmatprep.mubr.bf16.mxu1 %v18073_v24  ;;  %7917 = vmatprep.mubr.bf16.mxu0 %v18073_v24 }
0x15af   : > { %7947 = vmatpush1.bf16.msra.mxu1 %v10847_v29  ;;  %8018 = vmatpush1.bf16.msra.mxu0 %v10849_v3 }
0x15b0   : > { %7948 = vmatprep.subr.bf16.mxu1 %v10864_v43  ;;  %8019 = vmatprep.subr.bf16.mxu0 %v10866_v59  ;;  %v18077_v43 = vld [vmem:[#allocation9_spill] sm:$0xff] }
0x15b1   : > { %v17331_v59 = vrot.slane %v8256_v49, %v18077_v43 }
0x15b3   : > { %7949 = vmatpush1.bf16.msra.mxu1 %v10863_v9  ;;  %8020 = vmatpush1.bf16.msra.mxu0 %v10865_v35  ;;  %v17334_v9 = vrot.slane %v8270_v42, %v18077_v43 }
0x15b4   : > { %11865 = vmatprep.subr.bf16.mxu1 %v13544_v10  ;;  %11905 = vmatprep.subr.bf16.mxu0 %v13545_v44  ;;  %v17337_v44 = vrot.slane %v8263_v39, %v18077_v43 }
0x15b5   : > { %10884 = vmatmul.mubr.msk.bf16.gmra.mrb[28].mxu1 %vm587_vm0, %v17071_v14  ;;  %10888 = vmatmul.mubr.msk.bf16.gmra.mrb[44].mxu0 %vm587_vm0, %v17071_v14 }
0x15b6   : > { %7856 = vmatprep.mubr.bf16.mxu1 %v18073_v24  ;;  %7927 = vmatprep.mubr.bf16.mxu0 %v18073_v24 }
0x15bd   : > { %10885 = vmatmul.mubr.msk.bf16.gmra.mrb[32].mxu1 %vm587_vm0, %v17090_v16  ;;  %10889 = vmatmul.mubr.msk.bf16.gmra.mrb[48].mxu0 %vm587_vm0, %v17090_v16 }
0x15be   : > { %7866 = vmatprep.mubr.bf16.mxu1 %v18073_v24  ;;  %7937 = vmatprep.mubr.bf16.mxu0 %v18073_v24 }
0x15c5   : > { %10886 = vmatmul.mubr.msk.bf16.gmra.mrb[36].mxu1 %vm587_vm0, %v17104_v61  ;;  %10890 = vmatmul.mubr.msk.bf16.gmra.mrb[52].mxu0 %vm587_vm0, %v17104_v61 }
0x15c6   : > { %7978 = vmatprep.mubr.bf16.mxu1 %v18073_v24  ;;  %8049 = vmatprep.mubr.bf16.mxu0 %v18073_v24 }
0x15cd   : > { %10891 = vmatmul.mubr.msk.bf16.vlgmr.msra.gmra.mrb[40].mxu1 %vm587_vm0, %v17030_v27  ;;  %10895 = vmatmul.mubr.msk.bf16.vlgmr.msra.gmra.mrb[56].mxu0 %vm587_vm0, %v17030_v27  ;;  %v13552_v27 = vld [vmem:[%s17999_s9 + $0x450] sm:$0xff]  }
0x15ce   : > { %7988 = vmatprep.mubr.bf16.mxu1 %v18073_v24  ;;  %8059 = vmatprep.mubr.bf16.mxu0 %v18073_v24 }
0x15cf   : > { %11866 = vmatpush3.bf16.msra.mxu1 %v13546_v31  ;;  %11906 = vmatpush3.bf16.msra.mxu0 %v13547_v1  ;;  %v17340_v31 = vrot.slane %v8277_v8, %v18077_v43 }
0x15d0   : > { %11867 = vmatprep.subr.bf16.mxu1 %v13548_v40  ;;  %11907 = vmatprep.subr.bf16.mxu0 %v13549_v4 }
0x15d3   : > { %11868 = vmatpush3.bf16.msra.mxu1 %v13550_v18  ;;  %11908 = vmatpush3.bf16.msra.mxu0 %v13551_v60 }
0x15d4   : > { %11869 = vmatprep.subr.bf16.mxu1 %v13552_v27  ;;  %11909 = vmatprep.subr.bf16.mxu0 %v13553_v0 }
0x15d5   : > { %10892 = vmatmul.mubr.msk.bf16.gmra.mrb[44].mxu1 %vm587_vm0, %v17071_v14  ;;  %10896 = vmatmul.mubr.msk.bf16.gmra.mrb[60].mxu0 %vm587_vm0, %v17071_v14  ;;  %v13563_v14 = vld [vmem:[%s17999_s9 + $0x4a0] sm:$0xff]  }
0x15d6   : > { %7998 = vmatprep.mubr.bf16.mxu1 %v18073_v24  ;;  %8069 = vmatprep.mubr.bf16.mxu0 %v18073_v24 }
0x15d7   : > { %11870 = vmatpush3.bf16.msra.mxu1 %v13554_v54  ;;  %11910 = vmatpush3.bf16.msra.mxu0 %v13555_v50 }
0x15d8   : > { %11871 = vmatprep.subr.bf16.mxu1 %v13556_v47  ;;  %11911 = vmatprep.subr.bf16.mxu0 %v13557_v37 }
0x15db   : > { %11872 = vmatpush3.bf16.msra.mxu1 %v13558_v48  ;;  %11912 = vmatpush3.bf16.msra.mxu0 %v13559_v19 }
0x15dc   : > { %11873 = vmatprep.subr.bf16.mxu1 %v13560_v53  ;;  %11913 = vmatprep.subr.bf16.mxu0 %v13561_v2  ;;  %v13578_v2 = vld [vmem:[%s17999_s9 + $0x500] sm:$0xff]  }
0x15dd   : > { %10893 = vmatmul.mubr.msk.bf16.gmra.mrb[48].mxu1 %vm587_vm0, %v17090_v16  ;;  %10897 = vmatmul.mubr.msk.bf16.gmra.mrb[64].mxu0 %vm587_vm0, %v17090_v16  ;;  %v13568_v16 = vld [vmem:[%s17999_s9 + $0x470] sm:$0xff]  }
0x15de   : > { %8008 = vmatprep.mubr.bf16.mxu1 %v18073_v24  ;;  %8079 = vmatprep.mubr.bf16.mxu0 %v18073_v24 }
0x15df   : > { %11874 = vmatpush3.bf16.msra.mxu1 %v13562_v13  ;;  %11914 = vmatpush3.bf16.msra.mxu0 %v13563_v14  ;;  %v13579_v13 = vld [vmem:[%s17999_s9 + $0x580] sm:$0xff]  }
0x15e0   : > { %11875 = vmatprep.subr.bf16.mxu1 %v13564_v38  ;;  %11915 = vmatprep.subr.bf16.mxu0 %v13565_v6 }
0x15e3   : > { %11876 = vmatpush3.bf16.msra.mxu1 %v13566_v34  ;;  %11916 = vmatpush3.bf16.msra.mxu0 %v13567_v22  ;;  %v13580_v22 = vld [vmem:[%s17999_s9 + $0x548] sm:$0xff]  }
0x15e4   : > { %11877 = vmatprep.subr.bf16.mxu1 %v13568_v16  ;;  %11917 = vmatprep.subr.bf16.mxu0 %v13569_v52  ;;  %v13581_v16 = vld [vmem:[%s17999_s9 + $0x5c8] sm:$0xff]  }
0x15e5   : > { %10894 = vmatmul.mubr.msk.bf16.gmra.mrb[52].mxu1 %vm587_vm0, %v17104_v61  ;;  %10898 = vmatmul.mubr.msk.bf16.gmra.mrb[68].mxu0 %vm587_vm0, %v17104_v61  ;;  %v13577_v61 = vld [vmem:[%s17999_s9 + $0x5c0] sm:$0xff]  }
0x15e7   : > { %11878 = vmatpush3.bf16.msra.mxu1 %v13570_v55  ;;  %11918 = vmatpush3.bf16.msra.mxu0 %v13571_v28  ;;  %v8157_v28 = vcombine.high %v17324_v36, %v17324_v36 }
0x15e8   : > { %11879 = vmatprep.subr.bf16.mxu1 %v13572_v46  ;;  %11919 = vmatprep.subr.bf16.mxu0 %v13573_v11 }
0x15e9   : > { %v8171_v42 = vrot.slane %v8157_v28, %v15390_v32 }
0x15eb   : > { %11880 = vmatpush3.bf16.msra.mxu1 %v13574_v25  ;;  %11920 = vmatpush3.bf16.msra.mxu0 %v13575_v23 }
0x15ec   : > { %11945 = vmatprep.subr.bf16.mxu1 %v13576_v12  ;;  %11985 = vmatprep.subr.bf16.mxu0 %v13577_v61 }
0x1640   : > { %v7554_v21 = vpop.f32.mrb[248].mxu1  ;;  %v7625_v5 = vpop.f32.mrb[8].mxu0 }
0x1641   : > { %v7556_v29 = vpop.f32.mrb[249].mxu1  ;;  %v7627_v3 = vpop.f32.mrb[9].mxu0 }
0x1642   : > { %v7558_v35 = vpop.f32.mrb[250].mxu1  ;;  %v7629_v10 = vpop.f32.mrb[10].mxu0 }
0x1643   : > { %v8088_v1 = vpack.c.bf16 %v7558_v35, %v7554_v21  ;;  %v8090_v40 = vpack.c.bf16 %v7629_v10, %v7625_v5  ;;  %v7560_v4 = vpop.f32.mrb[251].mxu1  ;;  %v7631_v18 = vpop.f32.mrb[11].mxu0 }
0x1644   : > { %v8089_v60 = vpack.c.bf16 %v7560_v4, %v7556_v29  ;;  %v8091_v27 = vpack.c.bf16 %v7631_v18, %v7627_v3  ;;  %v13586_v29 = vld [vmem:[%s17999_s9 + $0x510] sm:$0xff]   ;;  %v13588_v4 = vld [vmem:[%s17999_s9 + $0x558] sm:$0xff]  }
0x1645   : > { %v8367_v0 = vadd.bf16 %v17331_v59, %v8088_v1  ;;  %v8369_v54 = vadd.bf16 %v17334_v9, %v8090_v40  ;;  %v13587_v3 = vld [vmem:[%s17999_s9 + $0x590] sm:$0xff]   ;;  %v13589_v18 = vld [vmem:[%s17999_s9 + $0x5d8] sm:$0xff]  }
0x1646   : > { %v8368_v50 = vadd.bf16 %v17337_v44, %v8089_v60  ;;  %v8370_v47 = vadd.bf16 %v17340_v31, %v8091_v27 }
0x1647   : > { %v8431_v14 = vmax.bf16 %v18073_v24, %v8367_v0  ;;  %v8433_v38 = vmax.bf16 %v18073_v24, %v8369_v54  ;;  %v8173_v0 = vcombine.high %v8171_v42, %v8171_v42 }
0x1648   : > { %v7564_v37 = vpop.f32.mrb[252].mxu1  ;;  %v7635_v48 = vpop.f32.mrb[12].mxu0  ;;  %v8432_v19 = vmax.bf16 %v18073_v24, %v8368_v50  ;;  %v8434_v53 = vmax.bf16 %v18073_v24, %v8370_v47 }
0x1649   : > { %v7566_v6 = vpop.f32.mrb[253].mxu1  ;;  %v7637_v34 = vpop.f32.mrb[13].mxu0 }
0x164a   : > { %v7568_v52 = vpop.f32.mrb[254].mxu1  ;;  %v7639_v55 = vpop.f32.mrb[14].mxu0  ;;  %9560 = vmatprep.mubr.bf16.mxu1 %v8432_v19  ;;  %9624 = vmatprep.mubr.bf16.mxu0 %v8434_v53 }
0x164b   : > { %v8104_v46 = vpack.c.bf16 %v7568_v52, %v7564_v37  ;;  %v8106_v11 = vpack.c.bf16 %v7639_v55, %v7635_v48  ;;  %v7570_v25 = vpop.f32.mrb[255].mxu1  ;;  %v7641_v23 = vpop.f32.mrb[15].mxu0  ;;  %9561 = vmatmul.mubr.bf16.vlgmr.msra.gmra.mrb[56].mxu1 %v8431_v14  ;;  %9625 = vmatmul.mubr.bf16.vlgmr.msra.gmra.mrb[72].mxu0 %v8433_v38  ;;  %v17398_v48 = vrot.slane %v8171_v42, %v15390_v32 }
0x164c   : > { %v8105_v12 = vpack.c.bf16 %v7570_v25, %v7566_v6  ;;  %v8107_v61 = vpack.c.bf16 %v7641_v23, %v7637_v34  ;;  %11946 = vmatpush3.bf16.msra.mxu1 %v13578_v2  ;;  %11986 = vmatpush3.bf16.msra.mxu0 %v13579_v13  ;;  %v13590_v2 = vld [vmem:[%s17999_s9 + $0x518] sm:$0xff]   ;;  %v13592_v6 = vld [vmem:[%s17999_s9 + $0x560] sm:$0xff]   ;;  %v17417_v52 = vrot.slane %v8173_v0, %v15390_v32  ;;  %v13602_v0 = vld [vmem:[%s17999_s9 + $0x5f0] sm:$0xff]  }
0x164d   : > { %v8383_v36 = vadd.bf16 %v17331_v59, %v8104_v46  ;;  %v8385_v20 = vadd.bf16 %v17334_v9, %v8106_v11  ;;  %11947 = vmatprep.subr.bf16.mxu1 %v13580_v22  ;;  %11987 = vmatprep.subr.bf16.mxu0 %v13581_v16  ;;  %v13591_v13 = vld [vmem:[%s17999_s9 + $0x598] sm:$0xff]   ;;  %v13593_v34 = vld [vmem:[%s17999_s9 + $0x5e0] sm:$0xff]   ;;  %v17421_v55 = vcombine.high %v17398_v48, %v17398_v48 }
0x164e   : > { %v8384_v15 = vadd.bf16 %v17337_v44, %v8105_v12  ;;  %v8386_v49 = vadd.bf16 %v17340_v31, %v8107_v61  ;;  %v13594_v12 = vld [vmem:[%s17999_s9 + $0x520] sm:$0xff]  }
0x164f   : > { %v8447_v35 = vmax.bf16 %v18073_v24, %v8383_v36  ;;  %v8449_v10 = vmax.bf16 %v18073_v24, %v8385_v20  ;;  %v13595_v61 = vld [vmem:[%s17999_s9 + $0x5a0] sm:$0xff]  }
0x1650   : > { %v7574_v39 = vpop.f32.mrb[0].mxu1  ;;  %v7645_v8 = vpop.f32.mrb[16].mxu0  ;;  %11948 = vmatpush3.bf16.msra.mxu1 %v13582_v7  ;;  %11988 = vmatpush3.bf16.msra.mxu0 %v13583_v17  ;;  %v8448_v21 = vmax.bf16 %v18073_v24, %v8384_v15  ;;  %v8450_v5 = vmax.bf16 %v18073_v24, %v8386_v49  ;;  %v13597_v15 = vld [vmem:[%s17999_s9 + $0x5e8] sm:$0xff]  }
0x1651   : > { %v7576_v1 = vpop.f32.mrb[1].mxu1  ;;  %v7647_v40 = vpop.f32.mrb[17].mxu0  ;;  %11949 = vmatprep.subr.bf16.mxu1 %v13584_v26  ;;  %11989 = vmatprep.subr.bf16.mxu0 %v13585_v63  ;;  %v13596_v63 = vld [vmem:[%s17999_s9 + $0x568] sm:$0xff]  }
0x1652   : > { %v7578_v60 = vpop.f32.mrb[2].mxu1  ;;  %v7649_v27 = vpop.f32.mrb[18].mxu0  ;;  %9568 = vmatprep.mubr.bf16.mxu1 %v8448_v21  ;;  %9632 = vmatprep.mubr.bf16.mxu0 %v8450_v5  ;;  %v8205_v21 = vcombine.high %v17417_v52, %v17417_v52 }
0x1653   : > { %v8120_v54 = vpack.c.bf16 %v7578_v60, %v7574_v39  ;;  %v8122_v50 = vpack.c.bf16 %v7649_v27, %v7645_v8  ;;  %v7580_v47 = vpop.f32.mrb[3].mxu1  ;;  %v7651_v37 = vpop.f32.mrb[19].mxu0  ;;  %9569 = vmatmul.mubr.bf16.gmra.mrb[60].mxu1 %v8447_v35  ;;  %9633 = vmatmul.mubr.bf16.gmra.mrb[76].mxu0 %v8449_v10  ;;  %v8284_v10 = vpack.i.b16 %v17398_v48, %v17398_v48  ;;  %v13601_v27 = vld [vmem:[%s17999_s9 + $0x570] sm:$0xff]  }
0x1654   : > { %v8121_v19 = vpack.c.bf16 %v7580_v47, %v7576_v1  ;;  %v8123_v53 = vpack.c.bf16 %v7651_v37, %v7647_v40  ;;  %11950 = vmatpush3.bf16.msra.mxu1 %v13586_v29  ;;  %11990 = vmatpush3.bf16.msra.mxu0 %v13587_v3 }
0x1655   : > { %v8399_v14 = vadd.bf16 %v17331_v59, %v8120_v54  ;;  %v8401_v38 = vadd.bf16 %v17334_v9, %v8122_v50  ;;  %11951 = vmatprep.subr.bf16.mxu1 %v13588_v4  ;;  %11991 = vmatprep.subr.bf16.mxu0 %v13589_v18  ;;  %v13598_v4 = vld [vmem:[%s17999_s9 + $0x528] sm:$0xff]  }
0x1656   : > { %v8400_v22 = vadd.bf16 %v17337_v44, %v8121_v19  ;;  %v8402_v16 = vadd.bf16 %v17340_v31, %v8123_v53  ;;  %v17468_v53 = vrot.slane %v8284_v10, %v18077_v43 }
0x1657   : > { %v8463_v28 = vmax.bf16 %v18073_v24, %v8399_v14  ;;  %v8465_v7 = vmax.bf16 %v18073_v24, %v8401_v38 }
0x1658   : > { %v7584_v46 = vpop.f32.mrb[4].mxu1  ;;  %v7655_v11 = vpop.f32.mrb[20].mxu0  ;;  %11952 = vmatpush3.bf16.msra.mxu1 %v13590_v2  ;;  %11992 = vmatpush3.bf16.msra.mxu0 %v13591_v13  ;;  %v8464_v25 = vmax.bf16 %v18073_v24, %v8400_v22  ;;  %v8466_v23 = vmax.bf16 %v18073_v24, %v8402_v16  ;;  %v13603_v2 = vld [vmem:[%s17999_s9 + $0x530] sm:$0xff]   ;;  %v13605_v16 = vld [vmem:[%s17999_s9 + $0x578] sm:$0xff]  }
0x1659   : > { %v8136_v17 = vpack.c.bf16 %v7584_v46, %v7584_v46  ;;  %v8138_v36 = vpack.c.bf16 %v7655_v11, %v7655_v11  ;;  %v7586_v20 = vpop.f32.mrb[5].mxu1  ;;  %v7657_v26 = vpop.f32.mrb[21].mxu0  ;;  %11953 = vmatprep.subr.bf16.mxu1 %v13592_v6  ;;  %11993 = vmatprep.subr.bf16.mxu0 %v13593_v34  ;;  %v13604_v13 = vld [vmem:[%s17999_s9 + $0x5b0] sm:$0xff]  }
0x165a   : > { %v8137_v49 = vpack.c.bf16 %v7586_v20, %v7586_v20  ;;  %v8139_v42 = vpack.c.bf16 %v7657_v26, %v7657_v26  ;;  %v7588_v39 = vpop.f32.mrb[6].mxu1  ;;  %v7659_v8 = vpop.f32.mrb[22].mxu0  ;;  %9576 = vmatprep.mubr.bf16.mxu1 %v8464_v25  ;;  %9640 = vmatprep.mubr.bf16.mxu0 %v8466_v23  ;;  %v13609_v26 = vld [vmem:[%s17999_s9 + $0x640] sm:$0xff]  }
0x165b   : > { %v7589_v5 = vpop.f32.mrb[7].mxu1  ;;  %v7660_v29 = vpop.f32.mrb[23].mxu0  ;;  %9577 = vmatmul.mubr.bf16.gmra.mrb[64].mxu1 %v8463_v28  ;;  %9641 = vmatmul.mubr.bf16.gmra.mrb[80].mxu0 %v8465_v7  ;;  %v8415_v1 = vadd.bf16 %v17331_v59, %v8136_v17  ;;  %v8417_v40 = vadd.bf16 %v17334_v9, %v8138_v36  ;;  %v8291_v59 = vpack.i.b16 %v17417_v52, %v17417_v52  ;;  %v13606_v52 = vld [vmem:[%s17999_s9 + $0x5f8] sm:$0xff]  }
0x165c   : > { %v8416_v3 = vadd.bf16 %v17337_v44, %v8137_v49  ;;  %v8418_v35 = vadd.bf16 %v17340_v31, %v8139_v42  ;;  %11954 = vmatpush3.bf16.msra.mxu1 %v13594_v12  ;;  %11994 = vmatpush3.bf16.msra.mxu0 %v13595_v61  ;;  %v13599_v44 = vld [vmem:[%s17999_s9 + $0x5a8] sm:$0xff]   ;;  %v8298_v31 = vpack.i.b16 %v17421_v55, %v17421_v55  ;;  %v13607_v61 = vld [vmem:[%s17999_s9 + $0x538] sm:$0xff]   ;;  %v13611_v5 = vld [vmem:[%s17999_s9 + $0x600] sm:$0xff]  }
0x165d   : > { %11955 = vmatprep.subr.bf16.mxu1 %v13596_v63  ;;  %11995 = vmatprep.subr.bf16.mxu0 %v13597_v15  ;;  %v8305_v9 = vpack.i.b16 %v8205_v21, %v8205_v21  ;;  %v8479_v47 = vmax.bf16 %v18073_v24, %v8415_v1  ;;  %v8481_v37 = vmax.bf16 %v18073_v24, %v8417_v40  ;;  %v13608_v7 = vld [vmem:[%s17999_s9 + $0x5b8] sm:$0xff]   ;;  %v13610_v63 = vld [vmem:[%s17999_s9 + $0x6c0] sm:$0xff]  }
0x165e   : > { %v8480_v18 = vmax.bf16 %v18073_v24, %v8416_v3  ;;  %v8482_v60 = vmax.bf16 %v18073_v24, %v8418_v35  ;;  %v17477_v6 = vrot.slane %v8298_v31, %v18077_v43  ;;  %v17480_v34 = vrot.slane %v8291_v59, %v18077_v43  ;;  %v13612_v29 = vld [vmem:[%s17999_s9 + $0x680] sm:$0xff]   ;;  %v17518_v3 = vld [vmem:[%s17998_s8 + $0x18] sm:$0xff] }
0x165f   : > { %v17483_v22 = vrot.slane %v8305_v9, %v18077_v43 }
0x1660   : > { %v7696_v54 = vpop.f32.mrb[8].mxu1  ;;  %v7767_v50 = vpop.f32.mrb[24].mxu0  ;;  %9584 = vmatprep.mubr.bf16.mxu1 %v8480_v18  ;;  %9648 = vmatprep.mubr.bf16.mxu0 %v8482_v60 }
0x1661   : > { %11956 = vmatpush3.bf16.msra.mxu1 %v13598_v4  ;;  %11996 = vmatpush3.bf16.msra.mxu0 %v13599_v44  ;;  %v7698_v48 = vpop.f32.mrb[9].mxu1  ;;  %v7769_v19 = vpop.f32.mrb[25].mxu0  ;;  %v13613_v4 = vld [vmem:[%s17999_s9 + $0x648] sm:$0xff]  }
0x1662   : > { %v7700_v14 = vpop.f32.mrb[10].mxu1  ;;  %v7771_v38 = vpop.f32.mrb[26].mxu0  ;;  %11957 = vmatprep.subr.bf16.mxu1 %v13601_v27  ;;  %11997 = vmatprep.subr.bf16.mxu0 %v13602_v0  ;;  %v13614_v44 = vld [vmem:[%s17999_s9 + $0x6c8] sm:$0xff]   ;;  %v8213_v0 = vrot.slane %v17518_v3, %v15390_v32 }
0x1663   : > { %v8092_v55 = vpack.c.bf16 %v7700_v14, %v7696_v54  ;;  %v8094_v28 = vpack.c.bf16 %v7771_v38, %v7767_v50  ;;  %v7702_v46 = vpop.f32.mrb[11].mxu1  ;;  %v7773_v11 = vpop.f32.mrb[27].mxu0  ;;  %9585 = vmatmul.mubr.bf16.gmra.mrb[68].mxu1 %v8479_v47  ;;  %9649 = vmatmul.mubr.bf16.gmra.mrb[84].mxu0 %v8481_v37  ;;  %v13615_v50 = vld [vmem:[%s17999_s9 + $0x608] sm:$0xff]  }
0x1664   : > { %v8093_v25 = vpack.c.bf16 %v7702_v46, %v7698_v48  ;;  %v8095_v23 = vpack.c.bf16 %v7773_v11, %v7769_v19  ;;  %v13616_v47 = vld [vmem:[%s17999_s9 + $0x688] sm:$0xff]   ;;  %v13619_v11 = vld [vmem:[%s17999_s9 + $0x610] sm:$0xff]  }
0x1665   : > { %v8371_v12 = vadd.bf16 %v17468_v53, %v8092_v55  ;;  %11958 = vmatpush3.bf16.msra.mxu1 %v13603_v2  ;;  %11998 = vmatpush3.bf16.msra.mxu0 %v13604_v13  ;;  %v8373_v17 = vadd.bf16 %v17477_v6, %v8094_v28  ;;  %v13617_v2 = vld [vmem:[%s17999_s9 + $0x650] sm:$0xff]   ;;  %v8221_v55 = vcombine.high %v8213_v0, %v8213_v0 }
0x1666   : > { %v8372_v36 = vadd.bf16 %v17480_v34, %v8093_v25  ;;  %v8374_v20 = vadd.bf16 %v17483_v22, %v8095_v23  ;;  %11959 = vmatprep.subr.bf16.mxu1 %v13605_v16  ;;  %11999 = vmatprep.subr.bf16.mxu0 %v13606_v52  ;;  %v13618_v13 = vld [vmem:[%s17999_s9 + $0x6d0] sm:$0xff]  }
0x1667   : > { %v8435_v35 = vmax.bf16 %v18073_v24, %v8371_v12  ;;  %v8437_v10 = vmax.bf16 %v18073_v24, %v8373_v17  ;;  %v13620_v25 = vld [vmem:[%s17999_s9 + $0x690] sm:$0xff]   ;;  %v13621_v17 = vld [vmem:[%s17999_s9 + $0x658] sm:$0xff]  }
0x1668   : > { %v7706_v15 = vpop.f32.mrb[12].mxu1  ;;  %v7777_v49 = vpop.f32.mrb[28].mxu0  ;;  %v8436_v42 = vmax.bf16 %v18073_v24, %v8372_v36  ;;  %v8438_v39 = vmax.bf16 %v18073_v24, %v8374_v20  ;;  %v13622_v36 = vld [vmem:[%s17999_s9 + $0x6d8] sm:$0xff]  }
0x1669   : > { %11960 = vmatpush3.bf16.msra.mxu1 %v13607_v61  ;;  %12000 = vmatpush3.bf16.msra.mxu0 %v13608_v7  ;;  %v7708_v8 = vpop.f32.mrb[13].mxu1  ;;  %v7779_v21 = vpop.f32.mrb[29].mxu0 }
0x166a   : > { %v7710_v1 = vpop.f32.mrb[14].mxu1  ;;  %v7781_v40 = vpop.f32.mrb[30].mxu0  ;;  %9688 = vmatprep.mubr.bf16.mxu1 %v8436_v42  ;;  %9752 = vmatprep.mubr.bf16.mxu0 %v8438_v39 }
0x166b   : > { %v8108_v31 = vpack.c.bf16 %v7710_v1, %v7706_v15  ;;  %v8110_v18 = vpack.c.bf16 %v7781_v40, %v7777_v49  ;;  %v7712_v60 = vpop.f32.mrb[15].mxu1  ;;  %v7783_v59 = vpop.f32.mrb[31].mxu0  ;;  %12025 = vmatprep.subr.bf16.mxu1 %v13609_v26  ;;  %12065 = vmatprep.subr.bf16.mxu0 %v13610_v63  ;;  %v17563_v49 = vrot.slane %v8213_v0, %v15390_v32  ;;  %v13625_v40 = vld [vmem:[%s17999_s9 + $0x660] sm:$0xff]  }
0x166c   : > { %v8109_v9 = vpack.c.bf16 %v7712_v60, %v7708_v8  ;;  %v8111_v27 = vpack.c.bf16 %v7783_v59, %v7779_v21  ;;  %9689 = vmatmul.mubr.bf16.vlgmr.msra.gmra.mrb[72].mxu1 %v8435_v35  ;;  %9753 = vmatmul.mubr.bf16.vlgmr.msra.gmra.mrb[88].mxu0 %v8437_v10  ;;  %v17566_v8 = vrot.slane %v8221_v55, %v15390_v32  ;;  %v13624_v35 = vld [vmem:[%s17999_s9 + $0x698] sm:$0xff]  }
0x166d   : > { %v8387_v54 = vadd.bf16 %v17468_v53, %v8108_v31  ;;  %12026 = vmatpush3.bf16.msra.mxu1 %v13611_v5  ;;  %12066 = vmatpush3.bf16.msra.mxu0 %v13612_v29  ;;  %v8389_v37 = vadd.bf16 %v17477_v6, %v8110_v18  ;;  %v13623_v29 = vld [vmem:[%s17999_s9 + $0x618] sm:$0xff]   ;;  %v8251_v59 = vcombine.high %v17563_v49, %v17563_v49 }
0x166e   : > { %v8388_v48 = vadd.bf16 %v17480_v34, %v8109_v9  ;;  %v8390_v19 = vadd.bf16 %v17483_v22, %v8111_v27  ;;  %12027 = vmatprep.subr.bf16.mxu1 %v13613_v4  ;;  %12067 = vmatprep.subr.bf16.mxu0 %v13614_v44  ;;  %v13626_v4 = vld [vmem:[%s17999_s9 + $0x6e0] sm:$0xff]   ;;  %v8253_v9 = vcombine.high %v17566_v8, %v17566_v8 }
0x166f   : > { %v8451_v23 = vmax.bf16 %v18073_v24, %v8387_v54  ;;  %v8453_v12 = vmax.bf16 %v18073_v24, %v8389_v37  ;;  %v13627_v37 = vld [vmem:[%s17999_s9 + $0x620] sm:$0xff]  }
0x1670   : > { %v7716_v14 = vpop.f32.mrb[16].mxu1  ;;  %v7787_v38 = vpop.f32.mrb[32].mxu0  ;;  %v8452_v16 = vmax.bf16 %v18073_v24, %v8388_v48  ;;  %v8454_v52 = vmax.bf16 %v18073_v24, %v8390_v19  ;;  %v13628_v48 = vld [vmem:[%s17999_s9 + $0x6a0] sm:$0xff]  }
0x1671   : > { %12028 = vmatpush3.bf16.msra.mxu1 %v13615_v50  ;;  %12068 = vmatpush3.bf16.msra.mxu0 %v13616_v47  ;;  %v7718_v28 = vpop.f32.mrb[17].mxu1  ;;  %v7789_v46 = vpop.f32.mrb[33].mxu0 }
0x1672   : > { %v7720_v61 = vpop.f32.mrb[18].mxu1  ;;  %v7791_v7 = vpop.f32.mrb[34].mxu0  ;;  %9696 = vmatprep.mubr.bf16.mxu1 %v8452_v16  ;;  %9760 = vmatprep.mubr.bf16.mxu0 %v8454_v52  ;;  %v13629_v16 = vld [vmem:[%s17999_s9 + $0x668] sm:$0xff]  }
0x1673   : > { %v8124_v20 = vpack.c.bf16 %v7720_v61, %v7716_v14  ;;  %v8126_v26 = vpack.c.bf16 %v7791_v7, %v7787_v38  ;;  %v7722_v63 = vpop.f32.mrb[19].mxu1  ;;  %v7793_v15 = vpop.f32.mrb[35].mxu0  ;;  %12029 = vmatprep.subr.bf16.mxu1 %v13617_v2  ;;  %12069 = vmatprep.subr.bf16.mxu0 %v13618_v13  ;;  %v13630_v52 = vld [vmem:[%s17999_s9 + $0x6e8] sm:$0xff]  }
0x1674   : > { %v8125_v42 = vpack.c.bf16 %v7722_v63, %v7718_v28  ;;  %v8127_v39 = vpack.c.bf16 %v7793_v15, %v7789_v46  ;;  %9697 = vmatmul.mubr.bf16.gmra.mrb[76].mxu1 %v8451_v23  ;;  %9761 = vmatmul.mubr.bf16.gmra.mrb[92].mxu0 %v8453_v12  ;;  %v8312_v46 = vpack.i.b16 %v17563_v49, %v17563_v49  ;;  %v13631_v61 = vld [vmem:[%s17999_s9 + $0x628] sm:$0xff]  }
0x1675   : > { %v8403_v21 = vadd.bf16 %v17468_v53, %v8124_v20  ;;  %v8405_v5 = vadd.bf16 %v17477_v6, %v8126_v26  ;;  %12030 = vmatpush3.bf16.msra.mxu1 %v13619_v11  ;;  %12070 = vmatpush3.bf16.msra.mxu0 %v13620_v25  ;;  %v8326_v23 = vpack.i.b16 %v8251_v59, %v8251_v59  ;;  %v13632_v7 = vld [vmem:[%s17999_s9 + $0x6a8] sm:$0xff]   ;;  %v13633_v20 = vld [vmem:[%s17999_s9 + $0x670] sm:$0xff]  }
0x1676   : > { %v8404_v10 = vadd.bf16 %v17480_v34, %v8125_v42  ;;  %v8406_v1 = vadd.bf16 %v17483_v22, %v8127_v39  ;;  %12031 = vmatprep.subr.bf16.mxu1 %v13621_v17  ;;  %12071 = vmatprep.subr.bf16.mxu0 %v13622_v36  ;;  %v8333_v17 = vpack.i.b16 %v8253_v9, %v8253_v9  ;;  %v13634_v26 = vld [vmem:[%s17999_s9 + $0x6f0] sm:$0xff]  }
0x1677   : > { %v8467_v27 = vmax.bf16 %v18073_v24, %v8403_v21  ;;  %v8469_v0 = vmax.bf16 %v18073_v24, %v8405_v5  ;;  %v17627_v42 = vrot.slane %v8312_v46, %v18077_v43  ;;  %v17630_v39 = vrot.slane %v8326_v23, %v18077_v43  ;;  %v13635_v21 = vld [vmem:[%s17999_s9 + $0x630] sm:$0xff]   ;;  %v13643_v46 = vld [vmem:[%s17999_s9 + $0x700] sm:$0xff]  }
0x1678   : > { %v7726_v44 = vpop.f32.mrb[20].mxu1  ;;  %v7797_v31 = vpop.f32.mrb[36].mxu0  ;;  %v8468_v18 = vmax.bf16 %v18073_v24, %v8404_v10  ;;  %v8470_v60 = vmax.bf16 %v18073_v24, %v8406_v1  ;;  %v13636_v5 = vld [vmem:[%s17999_s9 + $0x6b0] sm:$0xff]  }
0x1679   : > { %v8140_v54 = vpack.c.bf16 %v7726_v44, %v7726_v44  ;;  %12032 = vmatpush3.bf16.msra.mxu1 %v13623_v29  ;;  %12072 = vmatpush3.bf16.msra.mxu0 %v13624_v35  ;;  %v7728_v50 = vpop.f32.mrb[21].mxu1  ;;  %v7799_v47 = vpop.f32.mrb[37].mxu0  ;;  %v8142_v19 = vpack.c.bf16 %v7797_v31, %v7797_v31  ;;  %v13638_v44 = vld [vmem:[%s17999_s9 + $0x6f8] sm:$0xff]  }
0x167a   : > { %v8141_v2 = vpack.c.bf16 %v7728_v50, %v7728_v50  ;;  %v8143_v13 = vpack.c.bf16 %v7799_v47, %v7799_v47  ;;  %v7730_v14 = vpop.f32.mrb[22].mxu1  ;;  %v7801_v38 = vpop.f32.mrb[38].mxu0  ;;  %9704 = vmatprep.mubr.bf16.mxu1 %v8468_v18  ;;  %9768 = vmatprep.mubr.bf16.mxu0 %v8470_v60  ;;  %v13640_v50 = vld [vmem:[%s17999_s9 + $0x6b8] sm:$0xff]  }
0x167b   : > { %v7731_v55 = vpop.f32.mrb[23].mxu1  ;;  %v7802_v28 = vpop.f32.mrb[39].mxu0  ;;  %12033 = vmatprep.subr.bf16.mxu1 %v13625_v40  ;;  %12073 = vmatprep.subr.bf16.mxu0 %v13626_v4  ;;  %v8419_v12 = vadd.bf16 %v17468_v53, %v8140_v54  ;;  %v17644_v40 = vrot.slane %v8333_v17, %v18077_v43  ;;  %v13637_v4 = vld [vmem:[%s17999_s9 + $0x678] sm:$0xff]  }
0x167c   : > { %v8420_v11 = vadd.bf16 %v17480_v34, %v8141_v2  ;;  %v8422_v25 = vadd.bf16 %v17483_v22, %v8143_v13  ;;  %9705 = vmatmul.mubr.bf16.gmra.mrb[80].mxu1 %v8467_v27  ;;  %9769 = vmatmul.mubr.bf16.gmra.mrb[96].mxu0 %v8469_v0  ;;  %v8319_v34 = vpack.i.b16 %v17566_v8, %v17566_v8  ;;  %v13639_v54 = vld [vmem:[%s17999_s9 + $0x638] sm:$0xff]   ;;  %v13642_v2 = vld [vmem:[%s17999_s9 + $0x7c0] sm:$0xff]  }
0x167d   : > { %12034 = vmatpush3.bf16.msra.mxu1 %v13627_v37  ;;  %12074 = vmatpush3.bf16.msra.mxu0 %v13628_v48  ;;  %v8421_v22 = vadd.bf16 %v17477_v6, %v8142_v19  ;;  %v8483_v29 = vmax.bf16 %v18073_v24, %v8419_v12  ;;  %v13641_v19 = vld [vmem:[%s17999_s9 + $0x740] sm:$0xff]  }
0x167e   : > { %12035 = vmatprep.subr.bf16.mxu1 %v13629_v16  ;;  %12075 = vmatprep.subr.bf16.mxu0 %v13630_v52  ;;  %v8484_v53 = vmax.bf16 %v18073_v24, %v8420_v11  ;;  %v8486_v36 = vmax.bf16 %v18073_v24, %v8422_v25  ;;  %v17633_v8 = vrot.slane %v8319_v34, %v18077_v43  ;;  %v13644_v11 = vld [vmem:[%s17999_s9 + $0x780] sm:$0xff]  }
0x167f   : > { %v8485_v35 = vmax.bf16 %v18073_v24, %v8421_v22  ;;  %v8206_v52 = vcombine.high %v17518_v3, %v17518_v3  ;;  %v13645_v3 = vld [vmem:[%s17999_s9 + $0x748] sm:$0xff]  }
0x1680   : > { %v7838_v63 = vpop.f32.mrb[24].mxu1  ;;  %v7909_v15 = vpop.f32.mrb[40].mxu0  ;;  %9712 = vmatprep.mubr.bf16.mxu1 %v8484_v53  ;;  %9776 = vmatprep.mubr.bf16.mxu0 %v8486_v36 }
0x1681   : > { %12036 = vmatpush3.bf16.msra.mxu1 %v13631_v61  ;;  %12076 = vmatpush3.bf16.msra.mxu0 %v13632_v7  ;;  %v7840_v6 = vpop.f32.mrb[25].mxu1  ;;  %v7911_v49 = vpop.f32.mrb[41].mxu0  ;;  %v13646_v7 = vld [vmem:[%s17999_s9 + $0x7c8] sm:$0xff]  }
0x1682   : > { %v7842_v10 = vpop.f32.mrb[26].mxu1  ;;  %v7913_v1 = vpop.f32.mrb[42].mxu0  ;;  %12037 = vmatprep.subr.bf16.mxu1 %v13633_v20  ;;  %12077 = vmatprep.subr.bf16.mxu0 %v13634_v26  ;;  %v8220_v26 = vrot.slane %v8206_v52, %v15390_v32 }
0x1683   : > { %v8096_v31 = vpack.c.bf16 %v7842_v10, %v7838_v63  ;;  %v8098_v18 = vpack.c.bf16 %v7913_v1, %v7909_v15  ;;  %v7844_v60 = vpop.f32.mrb[27].mxu1  ;;  %v7915_v59 = vpop.f32.mrb[43].mxu0  ;;  %v13647_v15 = vld [vmem:[%s17999_s9 + $0x708] sm:$0xff]  }
0x1684   : > { %v8097_v9 = vpack.c.bf16 %v7844_v60, %v7840_v6  ;;  %v8099_v27 = vpack.c.bf16 %v7915_v59, %v7911_v49  ;;  %9713 = vmatmul.mubr.bf16.gmra.mrb[84].mxu1 %v8483_v29  ;;  %9777 = vmatmul.mubr.bf16.gmra.mrb[100].mxu0 %v8485_v35  ;;  %v13648_v6 = vld [vmem:[%s17999_s9 + $0x788] sm:$0xff]   ;;  %v13649_v29 = vld [vmem:[%s17999_s9 + $0x750] sm:$0xff]  }
0x1685   : > { %v8375_v0 = vadd.bf16 %v17627_v42, %v8096_v31  ;;  %12038 = vmatpush3.bf16.msra.mxu1 %v13635_v21  ;;  %12078 = vmatpush3.bf16.msra.mxu0 %v13636_v5  ;;  %v8377_v47 = vadd.bf16 %v17630_v39, %v8098_v18  ;;  %v13650_v35 = vld [vmem:[%s17999_s9 + $0x7d0] sm:$0xff]   ;;  %v8222_v31 = vcombine.high %v8220_v26, %v8220_v26 }
0x1686   : > { %v8376_v37 = vadd.bf16 %v17633_v8, %v8097_v9  ;;  %v8378_v48 = vadd.bf16 %v17644_v40, %v8099_v27  ;;  %12039 = vmatprep.subr.bf16.mxu1 %v13637_v4  ;;  %12079 = vmatprep.subr.bf16.mxu0 %v13638_v44  ;;  %v13651_v59 = vld [vmem:[%s17999_s9 + $0x710] sm:$0xff]  }
0x1687   : > { %v8439_v25 = vmax.bf16 %v18073_v24, %v8375_v0  ;;  %v8441_v23 = vmax.bf16 %v18073_v24, %v8377_v47  ;;  %v13652_v9 = vld [vmem:[%s17999_s9 + $0x790] sm:$0xff]   ;;  %v13653_v47 = vld [vmem:[%s17999_s9 + $0x758] sm:$0xff]   ;;  %v17723_v52 = vrot.slane %v8222_v31, %v15390_v32 }
0x1688   : > { %v7848_v13 = vpop.f32.mrb[28].mxu1  ;;  %v7919_v14 = vpop.f32.mrb[44].mxu0  ;;  %v8440_v38 = vmax.bf16 %v18073_v24, %v8376_v37  ;;  %v8442_v16 = vmax.bf16 %v18073_v24, %v8378_v48  ;;  %v13654_v37 = vld [vmem:[%s17999_s9 + $0x7d8] sm:$0xff]  }
0x1689   : > { %12040 = vmatpush3.bf16.msra.mxu1 %v13639_v54  ;;  %12080 = vmatpush3.bf16.msra.mxu0 %v13640_v50  ;;  %v7850_v55 = vpop.f32.mrb[29].mxu1  ;;  %v7921_v28 = vpop.f32.mrb[45].mxu0 }
0x168a   : > { %v7852_v12 = vpop.f32.mrb[30].mxu1  ;;  %v7923_v61 = vpop.f32.mrb[46].mxu0  ;;  %9816 = vmatprep.mubr.bf16.mxu1 %v8440_v38  ;;  %9880 = vmatprep.mubr.bf16.mxu0 %v8442_v16 }
0x168b   : > { %v8112_v34 = vpack.c.bf16 %v7852_v12, %v7848_v13  ;;  %v8114_v17 = vpack.c.bf16 %v7923_v61, %v7919_v14  ;;  %v7854_v22 = vpop.f32.mrb[31].mxu1  ;;  %v7925_v53 = vpop.f32.mrb[47].mxu0  ;;  %12105 = vmatprep.subr.bf16.mxu1 %v13641_v19  ;;  %12145 = vmatprep.subr.bf16.mxu0 %v13642_v2  ;;  %v17720_v14 = vrot.slane %v8220_v26, %v15390_v32  ;;  %v13657_v32 = vld [vmem:[%s17999_s9 + $0x760] sm:$0xff]  }
0x168c   : > { %v8113_v36 = vpack.c.bf16 %v7854_v22, %v7850_v55  ;;  %v8115_v20 = vpack.c.bf16 %v7925_v53, %v7921_v28  ;;  %9817 = vmatmul.mubr.bf16.vlgmr.msra.gmra.mrb[88].mxu1 %v8439_v25  ;;  %9881 = vmatmul.mubr.bf16.vlgmr.msra.gmra.mrb[104].mxu0 %v8441_v23  ;;  %v13658_v12 = vld [vmem:[%s17999_s9 + $0x7e0] sm:$0xff]   ;;  %v8254_v22 = vcombine.high %v17723_v52, %v17723_v52 }
0x168d   : > { %v8391_v63 = vadd.bf16 %v17627_v42, %v8112_v34  ;;  %12106 = vmatpush3.bf16.msra.mxu1 %v13643_v46  ;;  %12146 = vmatpush3.bf16.msra.mxu0 %v13644_v11  ;;  %v8393_v49 = vadd.bf16 %v17630_v39, %v8114_v17  ;;  %v13655_v46 = vld [vmem:[%s17999_s9 + $0x718] sm:$0xff]   ;;  %v8252_v17 = vcombine.high %v17720_v14, %v17720_v14 }
0x168e   : > { %v8392_v21 = vadd.bf16 %v17633_v8, %v8113_v36  ;;  %v8394_v5 = vadd.bf16 %v17644_v40, %v8115_v20  ;;  %12107 = vmatprep.subr.bf16.mxu1 %v13645_v3  ;;  %12147 = vmatprep.subr.bf16.mxu0 %v13646_v7  ;;  %v13656_v11 = vld [vmem:[%s17999_s9 + $0x798] sm:$0xff]   ;;  %v8340_v31 = vpack.i.b16 %v17720_v14, %v17720_v14 }
0x168f   : > { %v8455_v27 = vmax.bf16 %v18073_v24, %v8391_v63  ;;  %v8457_v0 = vmax.bf16 %v18073_v24, %v8393_v49 }
0x1690   : > { %v7858_v10 = vpop.f32.mrb[32].mxu1  ;;  %v7929_v1 = vpop.f32.mrb[48].mxu0  ;;  %v8456_v4 = vmax.bf16 %v18073_v24, %v8392_v21  ;;  %v8458_v44 = vmax.bf16 %v18073_v24, %v8394_v5 }
0x1691   : > { %12108 = vmatpush3.bf16.msra.mxu1 %v13647_v15  ;;  %12148 = vmatpush3.bf16.msra.mxu0 %v13648_v6  ;;  %v7860_v18 = vpop.f32.mrb[33].mxu1  ;;  %v7931_v60 = vpop.f32.mrb[49].mxu0  ;;  %v13659_v15 = vld [vmem:[%s17999_s9 + $0x720] sm:$0xff]  }
0x1692   : > { %v7862_v54 = vpop.f32.mrb[34].mxu1  ;;  %v7933_v50 = vpop.f32.mrb[50].mxu0  ;;  %9824 = vmatprep.mubr.bf16.mxu1 %v8456_v4  ;;  %9888 = vmatprep.mubr.bf16.mxu0 %v8458_v44  ;;  %v13660_v6 = vld [vmem:[%s17999_s9 + $0x7a0] sm:$0xff]  }
0x1693   : > { %v8128_v48 = vpack.c.bf16 %v7862_v54, %v7858_v10  ;;  %v8130_v19 = vpack.c.bf16 %v7933_v50, %v7929_v1  ;;  %v7864_v2 = vpop.f32.mrb[35].mxu1  ;;  %v7935_v13 = vpop.f32.mrb[51].mxu0  ;;  %12109 = vmatprep.subr.bf16.mxu1 %v13649_v29  ;;  %12149 = vmatprep.subr.bf16.mxu0 %v13650_v35  ;;  %v13661_v10 = vld [vmem:[%s17999_s9 + $0x768] sm:$0xff]   ;;  %v8361_v54 = vpack.i.b16 %v8254_v22, %v8254_v22  ;;  %v13672_v22 = vld [vmem:[%s17999_s9 + $0x738] sm:$0xff]  }
0x1694   : > { %v8129_v38 = vpack.c.bf16 %v7864_v2, %v7860_v18  ;;  %v8131_v16 = vpack.c.bf16 %v7935_v13, %v7931_v60  ;;  %9825 = vmatmul.mubr.bf16.gmra.mrb[92].mxu1 %v8455_v27  ;;  %9889 = vmatmul.mubr.bf16.gmra.mrb[108].mxu0 %v8457_v0  ;;  %v13662_v1 = vld [vmem:[%s17999_s9 + $0x7e8] sm:$0xff]   ;;  %v17784_v13 = vrot.slane %v8340_v31, %v18077_v43 }
0x1695   : > { %v8407_v55 = vadd.bf16 %v17627_v42, %v8128_v48  ;;  %v8409_v28 = vadd.bf16 %v17630_v39, %v8130_v19  ;;  %12110 = vmatpush3.bf16.msra.mxu1 %v13651_v59  ;;  %12150 = vmatpush3.bf16.msra.mxu0 %v13652_v9  ;;  %v8354_v59 = vpack.i.b16 %v8252_v17, %v8252_v17  ;;  %v13663_v27 = vld [vmem:[%s17999_s9 + $0x728] sm:$0xff]  }
0x1696   : > { %v8408_v25 = vadd.bf16 %v17633_v8, %v8129_v38  ;;  %v8410_v23 = vadd.bf16 %v17644_v40, %v8131_v16  ;;  %12111 = vmatprep.subr.bf16.mxu1 %v13653_v47  ;;  %12151 = vmatprep.subr.bf16.mxu0 %v13654_v37  ;;  %v13664_v0 = vld [vmem:[%s17999_s9 + $0x7a8] sm:$0xff]   ;;  %v13666_v47 = vld [vmem:[%s17999_s9 + $0x770] sm:$0xff]  }
0x1697   : > { %v8471_v53 = vmax.bf16 %v18073_v24, %v8407_v55  ;;  %v8473_v36 = vmax.bf16 %v18073_v24, %v8409_v28  ;;  %v13667_v37 = vld [vmem:[%s17999_s9 + $0x7f0] sm:$0xff]   ;;  %v17787_v14 = vrot.slane %v8354_v59, %v18077_v43 }
0x1698   : > { %v7868_v61 = vpop.f32.mrb[36].mxu1  ;;  %v7939_v3 = vpop.f32.mrb[52].mxu0  ;;  %v8472_v7 = vmax.bf16 %v18073_v24, %v8408_v25  ;;  %v8474_v34 = vmax.bf16 %v18073_v24, %v8410_v23  ;;  %v13668_v16 = vld [vmem:[%s17999_s9 + $0x730] sm:$0xff]   ;;  %v17801_v25 = vrot.slane %v8361_v54, %v18077_v43  ;;  %v13670_v23 = vld [vmem:[%s17999_s9 + $0x778] sm:$0xff]  }
0x1699   : > { %v8144_v20 = vpack.c.bf16 %v7868_v61, %v7868_v61  ;;  %12112 = vmatpush3.bf16.msra.mxu1 %v13655_v46  ;;  %12152 = vmatpush3.bf16.msra.mxu0 %v13656_v11  ;;  %v7870_v26 = vpop.f32.mrb[37].mxu1  ;;  %v7941_v63 = vpop.f32.mrb[53].mxu0  ;;  %v8146_v49 = vpack.c.bf16 %v7939_v3, %v7939_v3 }
0x169a   : > { %v8145_v21 = vpack.c.bf16 %v7870_v26, %v7870_v26  ;;  %v8147_v5 = vpack.c.bf16 %v7941_v63, %v7941_v63  ;;  %v7872_v29 = vpop.f32.mrb[38].mxu1  ;;  %v7943_v35 = vpop.f32.mrb[54].mxu0  ;;  %9832 = vmatprep.mubr.bf16.mxu1 %v8472_v7  ;;  %9896 = vmatprep.mubr.bf16.mxu0 %v8474_v34 }
0x169b   : > { %v7873_v4 = vpop.f32.mrb[39].mxu1  ;;  %v7944_v44 = vpop.f32.mrb[55].mxu0  ;;  %12113 = vmatprep.subr.bf16.mxu1 %v13657_v32  ;;  %12153 = vmatprep.subr.bf16.mxu0 %v13658_v12  ;;  %v8423_v9 = vadd.bf16 %v17627_v42, %v8144_v20  ;;  %v13671_v32 = vld [vmem:[%s17999_s9 + $0x7f8] sm:$0xff]  }
0x169c   : > { %v8424_v18 = vadd.bf16 %v17633_v8, %v8145_v21  ;;  %v8426_v60 = vadd.bf16 %v17644_v40, %v8147_v5  ;;  %9833 = vmatmul.mubr.bf16.gmra.mrb[96].mxu1 %v8471_v53  ;;  %9897 = vmatmul.mubr.bf16.gmra.mrb[112].mxu0 %v8473_v36  ;;  %v8347_v8 = vpack.i.b16 %v17723_v52, %v17723_v52  ;;  %v13669_v52 = vld [vmem:[%s17999_s9 + $0x7b0] sm:$0xff]   ;;  %v13673_v53 = vld [vmem:[%s17999_s9 + $0x7b8] sm:$0xff]  }
0x169d   : > { %12114 = vmatpush3.bf16.msra.mxu1 %v13659_v15  ;;  %12154 = vmatpush3.bf16.msra.mxu0 %v13660_v6  ;;  %v8425_v40 = vadd.bf16 %v17630_v39, %v8146_v49  ;;  %v8487_v55 = vmax.bf16 %v18073_v24, %v8423_v9 }
0x169e   : > { %12115 = vmatprep.subr.bf16.mxu1 %v13661_v10  ;;  %12155 = vmatprep.subr.bf16.mxu0 %v13662_v1  ;;  %v8488_v42 = vmax.bf16 %v18073_v24, %v8424_v18  ;;  %v8490_v50 = vmax.bf16 %v18073_v24, %v8426_v60  ;;  %v17790_v38 = vrot.slane %v8347_v8, %v18077_v43 }
0x169f   : > { %v8489_v28 = vmax.bf16 %v18073_v24, %v8425_v40 }
0x16a0   : > { %v7980_v48 = vpop.f32.mrb[40].mxu1  ;;  %v8051_v19 = vpop.f32.mrb[56].mxu0  ;;  %9840 = vmatprep.mubr.bf16.mxu1 %v8488_v42  ;;  %9904 = vmatprep.mubr.bf16.mxu0 %v8490_v50 }
0x16a1   : > { %12116 = vmatpush3.bf16.msra.mxu1 %v13663_v27  ;;  %12156 = vmatpush3.bf16.msra.mxu0 %v13664_v0  ;;  %v7982_v39 = vpop.f32.mrb[41].mxu1  ;;  %v8053_v2 = vpop.f32.mrb[57].mxu0 }
0x16a2   : > { %v7984_v46 = vpop.f32.mrb[42].mxu1  ;;  %v8055_v11 = vpop.f32.mrb[58].mxu0  ;;  %12117 = vmatprep.subr.bf16.mxu1 %v13666_v47  ;;  %12157 = vmatprep.subr.bf16.mxu0 %v13667_v37 }
0x16a3   : > { %v8100_v12 = vpack.c.bf16 %v7984_v46, %v7980_v48  ;;  %v8102_v61 = vpack.c.bf16 %v8055_v11, %v8051_v19  ;;  %v7986_v3 = vpop.f32.mrb[43].mxu1  ;;  %v8057_v7 = vpop.f32.mrb[59].mxu0 }
0x16a4   : > { %v8101_v34 = vpack.c.bf16 %v7986_v3, %v7982_v39  ;;  %v8103_v17 = vpack.c.bf16 %v8057_v7, %v8053_v2  ;;  %9841 = vmatmul.mubr.bf16.gmra.mrb[100].mxu1 %v8487_v55  ;;  %9905 = vmatmul.mubr.bf16.gmra.mrb[116].mxu0 %v8489_v28 }
0x16a5   : > { %v8379_v43 = vadd.bf16 %v17784_v13, %v8100_v12  ;;  %12118 = vmatpush3.bf16.msra.mxu1 %v13668_v16  ;;  %12158 = vmatpush3.bf16.msra.mxu0 %v13669_v52  ;;  %v8381_v36 = vadd.bf16 %v17787_v14, %v8102_v61 }
0x16a6   : > { %v8380_v20 = vadd.bf16 %v17790_v38, %v8101_v34  ;;  %v8382_v26 = vadd.bf16 %v17801_v25, %v8103_v17  ;;  %12119 = vmatprep.subr.bf16.mxu1 %v13670_v23  ;;  %12159 = vmatprep.subr.bf16.mxu0 %v13671_v32 }
0x16a7   : > { %v8443_v29 = vmax.bf16 %v18073_v24, %v8379_v43  ;;  %v8445_v35 = vmax.bf16 %v18073_v24, %v8381_v36 }
0x16a8   : > { %v7990_v63 = vpop.f32.mrb[44].mxu1  ;;  %v8061_v15 = vpop.f32.mrb[60].mxu0  ;;  %v8444_v6 = vmax.bf16 %v18073_v24, %v8380_v20  ;;  %v8446_v49 = vmax.bf16 %v18073_v24, %v8382_v26 }
0x16a9   : > { %12120 = vmatpush3.bf16.msra.mxu1 %v13672_v22  ;;  %12160 = vmatpush3.bf16.msra.mxu0 %v13673_v53  ;;  %v7992_v21 = vpop.f32.mrb[45].mxu1  ;;  %v8063_v5 = vpop.f32.mrb[61].mxu0 }
0x16aa   : > { %v7994_v10 = vpop.f32.mrb[46].mxu1  ;;  %v8065_v1 = vpop.f32.mrb[62].mxu0  ;;  %9944 = vmatprep.mubr.bf16.mxu1 %v8444_v6  ;;  %10008 = vmatprep.mubr.bf16.mxu0 %v8446_v49 }
0x16ab   : > { %v8116_v4 = vpack.c.bf16 %v7994_v10, %v7990_v63  ;;  %v8118_v44 = vpack.c.bf16 %v8065_v1, %v8061_v15  ;;  %v7996_v31 = vpop.f32.mrb[47].mxu1  ;;  %v8067_v18 = vpop.f32.mrb[63].mxu0  ;;  %13002 = vmatprep.subr.bf16.mxu1 %v18072_v57 }
0x16ac   : > { %v8117_v60 = vpack.c.bf16 %v7996_v31, %v7992_v21  ;;  %v8119_v59 = vpack.c.bf16 %v8067_v18, %v8063_v5  ;;  %9945 = vmatmul.mubr.bf16.vlgmr.msra.gmra.mrb[104].mxu1 %v8443_v29  ;;  %10009 = vmatmul.mubr.bf16.vlgmr.msra.gmra.mrb[120].mxu0 %v8445_v35 }
0x16ad   : > { %v8395_v9 = vadd.bf16 %v17784_v13, %v8116_v4  ;;  %v8397_v27 = vadd.bf16 %v17787_v14, %v8118_v44 }
0x16ae   : > { %v8396_v0 = vadd.bf16 %v17790_v38, %v8117_v60  ;;  %v8398_v8 = vadd.bf16 %v17801_v25, %v8119_v59 }
0x16af   : > { %v8459_v48 = vmax.bf16 %v18073_v24, %v8395_v9  ;;  %v8461_v19 = vmax.bf16 %v18073_v24, %v8397_v27 }
0x16b0   : > { %v8000_v54 = vpop.f32.mrb[48].mxu1  ;;  %v8071_v40 = vpop.f32.mrb[64].mxu0  ;;  %v8460_v42 = vmax.bf16 %v18073_v24, %v8396_v0  ;;  %v8462_v50 = vmax.bf16 %v18073_v24, %v8398_v8 }
0x16b1   : > { %v8002_v47 = vpop.f32.mrb[49].mxu1  ;;  %v8073_v37 = vpop.f32.mrb[65].mxu0 }
0x16b2   : > { %v8004_v39 = vpop.f32.mrb[50].mxu1  ;;  %v8075_v2 = vpop.f32.mrb[66].mxu0  ;;  %9952 = vmatprep.mubr.bf16.mxu1 %v8460_v42  ;;  %10016 = vmatprep.mubr.bf16.mxu0 %v8462_v50 }
0x16b3   : > { %v8132_v16 = vpack.c.bf16 %v8004_v39, %v8000_v54  ;;  %v8134_v52 = vpack.c.bf16 %v8075_v2, %v8071_v40  ;;  %v8006_v55 = vpop.f32.mrb[51].mxu1  ;;  %v8077_v28 = vpop.f32.mrb[67].mxu0 }
0x16b4   : > { %v8133_v46 = vpack.c.bf16 %v8006_v55, %v8002_v47  ;;  %v8135_v11 = vpack.c.bf16 %v8077_v28, %v8073_v37  ;;  %9953 = vmatmul.mubr.bf16.gmra.mrb[108].mxu1 %v8459_v48  ;;  %10017 = vmatmul.mubr.bf16.gmra.mrb[124].mxu0 %v8461_v19 }
0x16b5   : > { %v8411_v23 = vadd.bf16 %v17784_v13, %v8132_v16  ;;  %v8413_v32 = vadd.bf16 %v17787_v14, %v8134_v52 }
0x16b6   : > { %v8412_v12 = vadd.bf16 %v17790_v38, %v8133_v46  ;;  %v8414_v61 = vadd.bf16 %v17801_v25, %v8135_v11 }
0x16b7   : > { %v8475_v43 = vmax.bf16 %v18073_v24, %v8411_v23  ;;  %v8477_v22 = vmax.bf16 %v18073_v24, %v8413_v32 }
0x16b8   : > { %v8010_v3 = vpop.f32.mrb[52].mxu1  ;;  %v8081_v7 = vpop.f32.mrb[68].mxu0  ;;  %v8476_v34 = vmax.bf16 %v18073_v24, %v8412_v12  ;;  %v8478_v17 = vmax.bf16 %v18073_v24, %v8414_v61 }
0x16b9   : > { %v8148_v53 = vpack.c.bf16 %v8010_v3, %v8010_v3  ;;  %v8012_v36 = vpop.f32.mrb[53].mxu1  ;;  %v8083_v20 = vpop.f32.mrb[69].mxu0  ;;  %v8150_v26 = vpack.c.bf16 %v8081_v7, %v8081_v7 }
0x16ba   : > { %v8149_v63 = vpack.c.bf16 %v8012_v36, %v8012_v36  ;;  %v8151_v15 = vpack.c.bf16 %v8083_v20, %v8083_v20  ;;  %v8014_v6 = vpop.f32.mrb[54].mxu1  ;;  %v8085_v49 = vpop.f32.mrb[70].mxu0  ;;  %9960 = vmatprep.mubr.bf16.mxu1 %v8476_v34  ;;  %10024 = vmatprep.mubr.bf16.mxu0 %v8478_v17 }
0x16bb   : > { %v8015_v21 = vpop.f32.mrb[55].mxu1  ;;  %v8086_v5 = vpop.f32.mrb[71].mxu0  ;;  %v8427_v10 = vadd.bf16 %v17784_v13, %v8148_v53  ;;  %v8429_v1 = vadd.bf16 %v17787_v14, %v8150_v26  ;;  %v11158_v13 = vld [vmem:[%s18000_s10 + $0x1] ss:$0 sm:$0xff] }
0x16bc   : > { %v8428_v29 = vadd.bf16 %v17790_v38, %v8149_v63  ;;  %v8430_v35 = vadd.bf16 %v17801_v25, %v8151_v15  ;;  %9961 = vmatmul.mubr.bf16.gmra.mrb[112].mxu1 %v8475_v43  ;;  %10025 = vmatmul.mubr.bf16.gmra.mrb[128].mxu0 %v8477_v22 }
0x16bd   : > { %v8491_v31 = vmax.bf16 %v18073_v24, %v8427_v10  ;;  %v8493_v18 = vmax.bf16 %v18073_v24, %v8429_v1 }
0x16be   : > { %v8492_v4 = vmax.bf16 %v18073_v24, %v8428_v29  ;;  %v8494_v44 = vmax.bf16 %v18073_v24, %v8430_v35 }
0x16c0   : > { %9968 = vmatprep.mubr.bf16.mxu1 %v8492_v4  ;;  %10032 = vmatprep.mubr.bf16.mxu0 %v8494_v44 }
0x16c4   : > { %9969 = vmatmul.mubr.bf16.gmra.mrb[116].mxu1 %v8491_v31  ;;  %10033 = vmatmul.mubr.bf16.gmra.mrb[132].mxu0 %v8493_v18 }
0x16c5   : > { %12820 = vmatprep.mubr.msk.f32.mxu1 %vm14021_vm1, %v18071_v58 }
0x171e   : > { %v11881_v38 = vpop.f32.mrb[56].mxu1  ;;  %v11921_v25 = vpop.f32.mrb[72].mxu0 }
0x171f   : > { %v11882_v14 = vpop.f32.mrb[57].mxu1  ;;  %v11922_v60 = vpop.f32.mrb[73].mxu0 }
0x1720   : > { %v11883_v59 = vadd.f32 %v11882_v14, %v11881_v38  ;;  %v11923_v9 = vadd.f32 %v11922_v60, %v11921_v25  ;;  %v11884_v27 = vpop.f32.mrb[58].mxu1  ;;  %v11924_v0 = vpop.f32.mrb[74].mxu0 }
0x1721   : > { %v11885_v8 = vpop.f32.mrb[59].mxu1  ;;  %v11925_v54 = vpop.f32.mrb[75].mxu0 }
0x1722   : > { %v9563_v24 = vadd.f32 %v11883_v59, %v11158_v13  ;;  %v11886_v40 = vadd.f32 %v11885_v8, %v11884_v27  ;;  %v11926_v42 = vadd.f32 %v11925_v54, %v11924_v0 }
0x1724   : > { %v9627_v50 = vadd.f32 %v11923_v9, %v9563_v24  ;;  %v9566_v47 = vadd.f32 %v11886_v40, %v11158_v13 }
0x1726   : > { %v9630_v37 = vadd.f32 %v11926_v42, %v9566_v47  ;;  %v11887_v48 = vpop.f32.mrb[60].mxu1  ;;  %v11927_v19 = vpop.f32.mrb[76].mxu0 }
0x1727   : > { %v11888_v39 = vpop.f32.mrb[61].mxu1  ;;  %v11928_v2 = vpop.f32.mrb[77].mxu0 }
0x1728   : > { %v11889_v16 = vadd.f32 %v11888_v39, %v11887_v48  ;;  %v11929_v52 = vadd.f32 %v11928_v2, %v11927_v19  ;;  %v11890_v55 = vpop.f32.mrb[62].mxu1  ;;  %v11930_v28 = vpop.f32.mrb[78].mxu0 }
0x1729   : > { %v11891_v46 = vpop.f32.mrb[63].mxu1  ;;  %v11931_v11 = vpop.f32.mrb[79].mxu0 }
0x172a   : > { %v9571_v23 = vadd.f32 %v11889_v16, %v11158_v13  ;;  %v11892_v32 = vadd.f32 %v11891_v46, %v11890_v55  ;;  %v11932_v12 = vadd.f32 %v11931_v11, %v11930_v28 }
0x172c   : > { %v9635_v61 = vadd.f32 %v11929_v52, %v9571_v23  ;;  %v9574_v3 = vadd.f32 %v11892_v32, %v11158_v13 }
0x172e   : > { %v9638_v7 = vadd.f32 %v11932_v12, %v9574_v3  ;;  %v11893_v34 = vpop.f32.mrb[64].mxu1  ;;  %v11933_v17 = vpop.f32.mrb[80].mxu0 }
0x172f   : > { %v11894_v43 = vpop.f32.mrb[65].mxu1  ;;  %v11934_v22 = vpop.f32.mrb[81].mxu0 }
0x1730   : > { %v11895_v53 = vadd.f32 %v11894_v43, %v11893_v34  ;;  %v11935_v36 = vadd.f32 %v11934_v22, %v11933_v17  ;;  %v11896_v20 = vpop.f32.mrb[66].mxu1  ;;  %v11936_v26 = vpop.f32.mrb[82].mxu0 }
0x1731   : > { %v11897_v63 = vpop.f32.mrb[67].mxu1  ;;  %v11937_v15 = vpop.f32.mrb[83].mxu0 }
0x1732   : > { %v9579_v6 = vadd.f32 %v11895_v53, %v11158_v13  ;;  %v11898_v49 = vadd.f32 %v11897_v63, %v11896_v20  ;;  %v11938_v21 = vadd.f32 %v11937_v15, %v11936_v26 }
0x1734   : > { %v9643_v5 = vadd.f32 %v11935_v36, %v9579_v6  ;;  %v9582_v29 = vadd.f32 %v11898_v49, %v11158_v13 }
0x1736   : > { %v9646_v35 = vadd.f32 %v11938_v21, %v9582_v29  ;;  %v11899_v10 = vpop.f32.mrb[68].mxu1  ;;  %v11939_v1 = vpop.f32.mrb[84].mxu0 }
0x1737   : > { %v11900_v4 = vpop.f32.mrb[69].mxu1  ;;  %v11940_v44 = vpop.f32.mrb[85].mxu0 }
0x1738   : > { %v11901_v31 = vadd.f32 %v11900_v4, %v11899_v10  ;;  %v11941_v18 = vadd.f32 %v11940_v44, %v11939_v1  ;;  %v11902_v38 = vpop.f32.mrb[70].mxu1  ;;  %v11942_v25 = vpop.f32.mrb[86].mxu0 }
0x1739   : > { %v11903_v14 = vpop.f32.mrb[71].mxu1  ;;  %v11943_v60 = vpop.f32.mrb[87].mxu0 }
0x173a   : > { %v9587_v59 = vadd.f32 %v11901_v31, %v11158_v13 }
0x173c   : > { %v9651_v9 = vadd.f32 %v11941_v18, %v9587_v59 }
0x173f   : > { %v11961_v27 = vpop.f32.mrb[72].mxu1  ;;  %v12001_v0 = vpop.f32.mrb[88].mxu0 }
0x1740   : > { %v11962_v8 = vpop.f32.mrb[73].mxu1  ;;  %v12002_v54 = vpop.f32.mrb[89].mxu0 }
0x1741   : > { %v11963_v24 = vadd.f32 %v11962_v8, %v11961_v27  ;;  %v12003_v40 = vadd.f32 %v12002_v54, %v12001_v0  ;;  %v11964_v42 = vpop.f32.mrb[74].mxu1  ;;  %v12004_v47 = vpop.f32.mrb[90].mxu0 }
0x1742   : > { %v11965_v48 = vpop.f32.mrb[75].mxu1  ;;  %v12005_v19 = vpop.f32.mrb[91].mxu0 }
0x1743   : > { %v9691_v39 = vadd.f32 %v11963_v24, %v9627_v50  ;;  %v11966_v2 = vadd.f32 %v11965_v48, %v11964_v42  ;;  %v12006_v16 = vadd.f32 %v12005_v19, %v12004_v47 }
0x1745   : > { %v9755_v52 = vadd.f32 %v12003_v40, %v9691_v39  ;;  %v9694_v55 = vadd.f32 %v11966_v2, %v9630_v37 }
0x1747   : > { %v9758_v28 = vadd.f32 %v12006_v16, %v9694_v55  ;;  %v11967_v46 = vpop.f32.mrb[76].mxu1  ;;  %v12007_v11 = vpop.f32.mrb[92].mxu0 }
0x1748   : > { %v11968_v13 = vpop.f32.mrb[77].mxu1  ;;  %v12008_v23 = vpop.f32.mrb[93].mxu0 }
0x1749   : > { %v11969_v32 = vadd.f32 %v11968_v13, %v11967_v46  ;;  %v12009_v12 = vadd.f32 %v12008_v23, %v12007_v11  ;;  %v11970_v3 = vpop.f32.mrb[78].mxu1  ;;  %v12010_v34 = vpop.f32.mrb[94].mxu0 }
0x174a   : > { %v11971_v17 = vpop.f32.mrb[79].mxu1  ;;  %v12011_v43 = vpop.f32.mrb[95].mxu0 }
0x174b   : > { %v9699_v22 = vadd.f32 %v11969_v32, %v9635_v61  ;;  %v11972_v53 = vadd.f32 %v11971_v17, %v11970_v3  ;;  %v12012_v36 = vadd.f32 %v12011_v43, %v12010_v34 }
0x174d   : > { %v9763_v20 = vadd.f32 %v12009_v12, %v9699_v22  ;;  %v9702_v50 = vadd.f32 %v11972_v53, %v9638_v7 }
0x174f   : > { %v9766_v26 = vadd.f32 %v12012_v36, %v9702_v50  ;;  %v11973_v63 = vpop.f32.mrb[80].mxu1  ;;  %v12013_v15 = vpop.f32.mrb[96].mxu0 }
0x1750   : > { %v11974_v37 = vpop.f32.mrb[81].mxu1  ;;  %v12014_v6 = vpop.f32.mrb[97].mxu0 }
0x1751   : > { %v11975_v49 = vadd.f32 %v11974_v37, %v11973_v63  ;;  %v12015_v21 = vadd.f32 %v12014_v6, %v12013_v15  ;;  %v11976_v29 = vpop.f32.mrb[82].mxu1  ;;  %v12016_v10 = vpop.f32.mrb[98].mxu0 }
0x1752   : > { %v11977_v1 = vpop.f32.mrb[83].mxu1  ;;  %v12017_v4 = vpop.f32.mrb[99].mxu0 }
0x1753   : > { %v9707_v44 = vadd.f32 %v11975_v49, %v9643_v5  ;;  %v11978_v31 = vadd.f32 %v11977_v1, %v11976_v29  ;;  %v12018_v18 = vadd.f32 %v12017_v4, %v12016_v10 }
0x1755   : > { %v9771_v38 = vadd.f32 %v12015_v21, %v9707_v44  ;;  %v9710_v61 = vadd.f32 %v11978_v31, %v9646_v35 }
0x1757   : > { %v9774_v25 = vadd.f32 %v12018_v18, %v9710_v61  ;;  %v11979_v14 = vpop.f32.mrb[84].mxu1  ;;  %v12019_v60 = vpop.f32.mrb[100].mxu0 }
0x1758   : > { %v11980_v7 = vpop.f32.mrb[85].mxu1  ;;  %v12020_v59 = vpop.f32.mrb[101].mxu0 }
0x1759   : > { %v11981_v27 = vadd.f32 %v11980_v7, %v11979_v14  ;;  %v12021_v0 = vadd.f32 %v12020_v59, %v12019_v60  ;;  %v11982_v8 = vpop.f32.mrb[86].mxu1  ;;  %v12022_v54 = vpop.f32.mrb[102].mxu0 }
0x175a   : > { %v11983_v24 = vpop.f32.mrb[87].mxu1  ;;  %v12023_v40 = vpop.f32.mrb[103].mxu0 }
0x175b   : > { %v9715_v42 = vadd.f32 %v11981_v27, %v9651_v9 }
0x175d   : > { %v9779_v47 = vadd.f32 %v12021_v0, %v9715_v42 }
0x175f   : > { %v12041_v48 = vpop.f32.mrb[88].mxu1  ;;  %v12081_v19 = vpop.f32.mrb[104].mxu0 }
0x1760   : > { %v12042_v5 = vpop.f32.mrb[89].mxu1  ;;  %v12082_v39 = vpop.f32.mrb[105].mxu0 }
0x1761   : > { %v12043_v2 = vadd.f32 %v12042_v5, %v12041_v48  ;;  %v12083_v16 = vadd.f32 %v12082_v39, %v12081_v19  ;;  %v12044_v35 = vpop.f32.mrb[90].mxu1  ;;  %v12084_v55 = vpop.f32.mrb[106].mxu0 }
0x1762   : > { %v12045_v46 = vpop.f32.mrb[91].mxu1  ;;  %v12085_v11 = vpop.f32.mrb[107].mxu0 }
0x1763   : > { %v9819_v13 = vadd.f32 %v12043_v2, %v9755_v52  ;;  %v12046_v23 = vadd.f32 %v12045_v46, %v12044_v35  ;;  %v12086_v32 = vadd.f32 %v12085_v11, %v12084_v55 }
0x1765   : > { %v9883_v12 = vadd.f32 %v12083_v16, %v9819_v13  ;;  %v9822_v3 = vadd.f32 %v12046_v23, %v9758_v28 }
0x1767   : > { %v9886_v34 = vadd.f32 %v12086_v32, %v9822_v3  ;;  %v12047_v17 = vpop.f32.mrb[92].mxu1  ;;  %v12087_v43 = vpop.f32.mrb[108].mxu0 }
0x1768   : > { %v12048_v9 = vpop.f32.mrb[93].mxu1  ;;  %v12088_v22 = vpop.f32.mrb[109].mxu0 }
0x1769   : > { %v12049_v53 = vadd.f32 %v12048_v9, %v12047_v17  ;;  %v12089_v36 = vadd.f32 %v12088_v22, %v12087_v43  ;;  %v12050_v50 = vpop.f32.mrb[94].mxu1  ;;  %v12090_v63 = vpop.f32.mrb[110].mxu0 }
0x176a   : > { %v12051_v15 = vpop.f32.mrb[95].mxu1  ;;  %v12091_v37 = vpop.f32.mrb[111].mxu0 }
0x176b   : > { %v9827_v6 = vadd.f32 %v12049_v53, %v9763_v20  ;;  %v12052_v49 = vadd.f32 %v12051_v15, %v12050_v50  ;;  %v12092_v21 = vadd.f32 %v12091_v37, %v12090_v63 }
0x176d   : > { %v9891_v29 = vadd.f32 %v12089_v36, %v9827_v6  ;;  %v9830_v52 = vadd.f32 %v12052_v49, %v9766_v26 }
0x176f   : > { %v17853_v10 = vadd.f32 %v12092_v21, %v9830_v52  ;;  %v12053_v1 = vpop.f32.mrb[96].mxu1  ;;  %v12093_v28 = vpop.f32.mrb[112].mxu0 }
0x1770   : > { %v12054_v4 = vpop.f32.mrb[97].mxu1  ;;  %v12094_v44 = vpop.f32.mrb[113].mxu0 }
0x1771   : > { %v12055_v31 = vadd.f32 %v12054_v4, %v12053_v1  ;;  %v12095_v18 = vadd.f32 %v12094_v44, %v12093_v28  ;;  %v12056_v61 = vpop.f32.mrb[98].mxu1  ;;  %v12096_v14 = vpop.f32.mrb[114].mxu0 }
0x1772   : > { %v12057_v60 = vpop.f32.mrb[99].mxu1  ;;  %v12097_v7 = vpop.f32.mrb[115].mxu0 }
0x1773   : > { %v9835_v59 = vadd.f32 %v12055_v31, %v9771_v38  ;;  %v12058_v27 = vadd.f32 %v12057_v60, %v12056_v61  ;;  %v12098_v0 = vadd.f32 %v12097_v7, %v12096_v14 }
0x1775   : > { %v17855_v20 = vadd.f32 %v12095_v18, %v9835_v59  ;;  %v9838_v8 = vadd.f32 %v12058_v27, %v9774_v25 }
0x1777   : > { %v17857_v54 = vadd.f32 %v12098_v0, %v9838_v8  ;;  %v12059_v26 = vpop.f32.mrb[100].mxu1  ;;  %v12099_v24 = vpop.f32.mrb[116].mxu0 }
0x1778   : > { %v12060_v40 = vpop.f32.mrb[101].mxu1  ;;  %v12100_v42 = vpop.f32.mrb[117].mxu0 }
0x1779   : > { %v12061_v48 = vadd.f32 %v12060_v40, %v12059_v26  ;;  %v12101_v19 = vadd.f32 %v12100_v42, %v12099_v24  ;;  %v12062_v5 = vpop.f32.mrb[102].mxu1  ;;  %v12102_v39 = vpop.f32.mrb[118].mxu0 }
0x177a   : > { %v12063_v2 = vpop.f32.mrb[103].mxu1  ;;  %v12103_v16 = vpop.f32.mrb[119].mxu0 }
0x177b   : > { %v9843_v35 = vadd.f32 %v12061_v48, %v9779_v47 }
0x177d   : > { %v17859_v55 = vadd.f32 %v12101_v19, %v9843_v35 }
0x177f   : > { %v12121_v38 = vpop.f32.mrb[104].mxu1  ;;  %v12161_v46 = vpop.f32.mrb[120].mxu0 }
0x1780   : > { %v12122_v11 = vpop.f32.mrb[105].mxu1  ;;  %v12162_v13 = vpop.f32.mrb[121].mxu0 }
0x1781   : > { %v12123_v25 = vadd.f32 %v12122_v11, %v12121_v38  ;;  %v12163_v23 = vadd.f32 %v12162_v13, %v12161_v46  ;;  %v12124_v32 = vpop.f32.mrb[106].mxu1  ;;  %v12164_v3 = vpop.f32.mrb[122].mxu0 }
0x1782   : > { %v12125_v17 = vpop.f32.mrb[107].mxu1  ;;  %v12165_v43 = vpop.f32.mrb[123].mxu0 }
0x1783   : > { %v9947_v9 = vadd.f32 %v12123_v25, %v9883_v12  ;;  %v12126_v22 = vadd.f32 %v12125_v17, %v12124_v32  ;;  %v12166_v53 = vadd.f32 %v12165_v43, %v12164_v3 }
0x1785   : > { %v10011_v36 = vadd.f32 %v12163_v23, %v9947_v9  ;;  %v9950_v50 = vadd.f32 %v12126_v22, %v9886_v34 }
0x1787   : > { %v10014_v63 = vadd.f32 %v12166_v53, %v9950_v50  ;;  %v12127_v15 = vpop.f32.mrb[108].mxu1  ;;  %v12167_v47 = vpop.f32.mrb[124].mxu0  ;;  %v17862_v37 = vadd.f32 %v10011_v36, %v17012_v33 }
0x1788   : > { %v12128_v6 = vpop.f32.mrb[109].mxu1  ;;  %v12168_v49 = vpop.f32.mrb[125].mxu0 }
0x1789   : > { %v12129_v21 = vadd.f32 %v12128_v6, %v12127_v15  ;;  %v12169_v52 = vadd.f32 %v12168_v49, %v12167_v47  ;;  %v12130_v1 = vpop.f32.mrb[110].mxu1  ;;  %v12170_v28 = vpop.f32.mrb[126].mxu0  ;;  %v10051_v4 = vsel %vm587_vm0, %v17862_v37, 0.0  ;;  %v10041_v12 = vadd.f32 %v10014_v63, %v17015_v45 }
0x178a   : > { %v12131_v44 = vpop.f32.mrb[111].mxu1  ;;  %v12171_v31 = vpop.f32.mrb[127].mxu0  ;;  %10052 = vadd.xlane.f32.xlu0 %v10051_v4 }
0x178b   : > { %v9955_v34 = vadd.f32 %v12129_v21, %v9891_v29  ;;  %v12132_v18 = vadd.f32 %v12131_v44, %v12130_v1  ;;  %v12172_v61 = vadd.f32 %v12171_v31, %v12170_v28  ;;  %v10054_v33 = vsel %vm587_vm0, %v10041_v12, 0.0 }
0x178c   : > { %10055 = vadd.xlane.f32.xlu1 %v10054_v33 }
0x178d   : > { %v10019_v14 = vadd.f32 %v12169_v52, %v9955_v34  ;;  %v9958_v60 = vadd.f32 %v12132_v18, %v17853_v10 }
0x178f   : > { %v10022_v7 = vadd.f32 %v12172_v61, %v9958_v60  ;;  %v12133_v59 = vpop.f32.mrb[112].mxu1  ;;  %v12173_v27 = vpop.f32.mrb[128].mxu0  ;;  %v10042_v0 = vadd.f32 %v10019_v14, %v17058_v62 }
0x1790   : > { %v12134_v8 = vpop.f32.mrb[113].mxu1  ;;  %v12174_v26 = vpop.f32.mrb[129].mxu0 }
0x1791   : > { %v12135_v45 = vadd.f32 %v12134_v8, %v12133_v59  ;;  %v12175_v24 = vadd.f32 %v12174_v26, %v12173_v27  ;;  %v12136_v40 = vpop.f32.mrb[114].mxu1  ;;  %v12176_v42 = vpop.f32.mrb[130].mxu0  ;;  %v10057_v29 = vsel %vm587_vm0, %v10042_v0, 0.0  ;;  %v10043_v48 = vadd.f32 %v10022_v7, %v17055_v30 }
0x1792   : > { %v12137_v19 = vpop.f32.mrb[115].mxu1  ;;  %v12177_v5 = vpop.f32.mrb[131].mxu0  ;;  %10058 = vadd.xlane.f32.xlu0 %v10057_v29 }
0x1793   : > { %v9963_v10 = vadd.f32 %v12135_v45, %v17855_v20  ;;  %v12138_v39 = vadd.f32 %v12137_v19, %v12136_v40  ;;  %v12178_v2 = vadd.f32 %v12177_v5, %v12176_v42  ;;  %v10060_v16 = vsel %vm587_vm0, %v10043_v48, 0.0 }
0x1794   : > { %10061 = vadd.xlane.f32.xlu1 %v10060_v16 }
0x1795   : > { %v10027_v62 = vadd.f32 %v12175_v24, %v9963_v10  ;;  %v9966_v35 = vadd.f32 %v12138_v39, %v17857_v54 }
0x1797   : > { %v10030_v38 = vadd.f32 %v12178_v2, %v9966_v35  ;;  %v12139_v46 = vpop.f32.mrb[116].mxu1  ;;  %v12179_v11 = vpop.f32.mrb[132].mxu0  ;;  %v10044_v13 = vadd.f32 %v10027_v62, %v17086_v41 }
0x1798   : > { %v12140_v25 = vpop.f32.mrb[117].mxu1  ;;  %v12180_v30 = vpop.f32.mrb[133].mxu0 }
0x1799   : > { %v12141_v23 = vadd.f32 %v12140_v25, %v12139_v46  ;;  %v12181_v32 = vadd.f32 %v12180_v30, %v12179_v11  ;;  %v12142_v3 = vpop.f32.mrb[118].mxu1  ;;  %v12182_v17 = vpop.f32.mrb[134].mxu0  ;;  %v10063_v20 = vsel %vm587_vm0, %v10044_v13, 0.0  ;;  %v10045_v43 = vadd.f32 %v10030_v38, %v17082_v51  ;;  %v11289_v30 = vld [vmem:[%s18001_s11 + $0x1] ss:$0 sm:$0xff] }
0x179a   : > { %v12143_v9 = vpop.f32.mrb[119].mxu1  ;;  %v12183_v22 = vpop.f32.mrb[135].mxu0  ;;  %10064 = vadd.xlane.f32.xlu0 %v10063_v20 }
0x179b   : > { %v9971_v54 = vadd.f32 %v12141_v23, %v17859_v55  ;;  %v10066_v53 = vsel %vm587_vm0, %v10045_v43, 0.0 }
0x179c   : > { %10067 = vadd.xlane.f32.xlu1 %v10066_v53  ;;  %v11290_v53 = vld [vmem:[%s18002_s12 + $0x1] ss:$0 sm:$0xff] }
0x179d   : > { %v10035_v36 = vadd.f32 %v12181_v32, %v9971_v54 }
0x179f   : > { %v10046_v41 = vadd.f32 %v10035_v36, %v17100_v56 }
0x17a1   : > { %v10069_v50 = vsel %vm587_vm0, %v10046_v41, 0.0 }
0x17a2   : > { %10070 = vadd.xlane.f32.xlu0 %v10069_v50 }
0x1817   : > { %v10053_v63 = vpop.xlane.xlu0 %10052 }
0x1818   : > { %v10072_v15 = vmul.f32 0.03125, %v10053_v63 }
0x1819   : > { %v10056_v47 = vpop.xlane.xlu1 %10055 }
0x181a   : > { %v10079_v6 = vsub.f32 %v17862_v37, %v10072_v15  ;;  %v10073_v51 = vmul.f32 0.03125, %v10056_v47 }
0x181c   : > { %v10080_v49 = vsub.f32 %v10041_v12, %v10073_v51  ;;  %v10086_v21 = vmul.f32 %v10079_v6, %v10079_v6 }
0x181e   : > { %v10093_v52 = vsel %vm587_vm0, %v10086_v21, 0.0  ;;  %v10087_v55 = vmul.f32 %v10080_v49, %v10080_v49 }
0x181f   : > { %10094 = vadd.xlane.f32.xlu1 %v10093_v52  ;;  %v10059_v1 = vpop.xlane.xlu0 %10058 }
0x1820   : > { %v10074_v28 = vmul.f32 0.03125, %v10059_v1  ;;  %v10096_v4 = vsel %vm587_vm0, %v10087_v55, 0.0 }
0x1821   : > { %v10062_v56 = vpop.xlane.xlu1 %10061  ;;  %10097 = vadd.xlane.f32.xlu0 %v10096_v4 }
0x1822   : > { %v10081_v44 = vsub.f32 %v10042_v0, %v10074_v28  ;;  %v10075_v31 = vmul.f32 0.03125, %v10062_v56 }
0x1824   : > { %v17885_v34 = vsub.f32 %v10043_v48, %v10075_v31  ;;  %v10088_v18 = vmul.f32 %v10081_v44, %v10081_v44 }
0x1826   : > { %v10099_v37 = vsel %vm587_vm0, %v10088_v18, 0.0  ;;  %v10089_v12 = vmul.f32 %v17885_v34, %v17885_v34 }
0x1827   : > { %10100 = vadd.xlane.f32.xlu1 %v10099_v37  ;;  %v10065_v61 = vpop.xlane.xlu0 %10064 }
0x1828   : > { %v10076_v33 = vmul.f32 0.03125, %v10065_v61  ;;  %v10102_v14 = vsel %vm587_vm0, %v10089_v12, 0.0 }
0x1829   : > { %v10068_v60 = vpop.xlane.xlu1 %10067  ;;  %10103 = vadd.xlane.f32.xlu0 %v10102_v14 }
0x182a   : > { %v17891_v7 = vsub.f32 %v10044_v13, %v10076_v33  ;;  %v10077_v59 = vmul.f32 0.03125, %v10068_v60 }
0x182c   : > { %v17893_v27 = vsub.f32 %v10045_v43, %v10077_v59  ;;  %v10090_v0 = vmul.f32 %v17891_v7, %v17891_v7 }
0x182e   : > { %v10105_v8 = vsel %vm587_vm0, %v10090_v0, 0.0  ;;  %v10091_v26 = vmul.f32 %v17893_v27, %v17893_v27 }
0x182f   : > { %10106 = vadd.xlane.f32.xlu1 %v10105_v8  ;;  %v10071_v45 = vpop.xlane.xlu0 %10070  ;;  %v10242_v8 = vld [vmem:[%s18004_s14] sm:$0xff] }
0x1830   : > { %v10078_v24 = vmul.f32 0.03125, %v10071_v45  ;;  %v10108_v40 = vsel %vm587_vm0, %v10091_v26, 0.0  ;;  %v10168_v45 = vld [vmem:[%s18003_s13] sm:$0x1] }
0x1831   : > { %10109 = vadd.xlane.f32.xlu0 %v10108_v40  ;;  %v10244_v40 = vld [vmem:[%s18004_s14 + $0x10] sm:$0xff] }
0x1832   : > { %v17901_v42 = vsub.f32 %v10046_v41, %v10078_v24 }
0x1834   : > { %v10092_v29 = vmul.f32 %v17901_v42, %v17901_v42 }
0x1836   : > { %v10111_v48 = vsel %vm587_vm0, %v10092_v29, 0.0 }
0x1837   : > { %10112 = vadd.xlane.f32.xlu1 %v10111_v48 }
0x18ac   : > { %v10095_v19 = vpop.xlane.xlu1 %10094 }
0x18ad   : > { %v10114_v5 = vmul.f32 0.03125, %v10095_v19 }
0x18ae   : > { %v10098_v10 = vpop.xlane.xlu0 %10097 }
0x18af   : > { %v10121_v39 = vadd.f32 1e-05, %v10114_v5  ;;  %v10115_v2 = vmul.f32 0.03125, %v10098_v10  ;;  %v10246_v5 = vld [vmem:[%s18005_s15] sm:$0x1] }
0x18b1   : > { %13940 = vrsqrt.f32 %v10121_v39  ;;  %v10122_v16 = vadd.f32 1e-05, %v10115_v2 }
0x18b3   : > { %13942 = vrsqrt.f32 %v10122_v16 }
0x18b4   : > { %v10101_v62 = vpop.xlane.xlu1 %10100 }
0x18b5   : > { %v10116_v35 = vmul.f32 0.03125, %v10101_v62 }
0x18b6   : > { %v10104_v38 = vpop.xlane.xlu0 %10103 }
0x18b7   : > { %v10123_v46 = vadd.f32 1e-05, %v10116_v35  ;;  %v10117_v11 = vmul.f32 0.03125, %v10104_v38 }
0x18b9   : > { %13944 = vrsqrt.f32 %v10123_v46  ;;  %v10124_v13 = vadd.f32 1e-05, %v10117_v11 }
0x18bb   : > { %v13941_v25 = vpop.eup %13940  ;;  %13946 = vrsqrt.f32 %v10124_v13 }
0x18bc   : > { %v10135_v23 = vmul.f32 %v13941_v25, %v10079_v6  ;;  %v10107_v32 = vpop.xlane.xlu1 %10106 }
0x18bd   : > { %v13943_v3 = vpop.eup %13942  ;;  %v10118_v17 = vmul.f32 0.03125, %v10107_v32 }
0x18be   : > { %v10136_v20 = vmul.f32 %v13943_v3, %v10080_v49  ;;  %v10110_v43 = vpop.xlane.xlu0 %10109  ;;  %v10148_v9 = vmul.f32 %v11289_v30, %v10135_v23 }
0x18bf   : > { %v10125_v22 = vadd.f32 1e-05, %v10118_v17  ;;  %v10119_v54 = vmul.f32 0.03125, %v10110_v43 }
0x18c0   : > { %v10149_v36 = vmul.f32 %v11289_v30, %v10136_v20  ;;  %v10161_v50 = vadd.f32 %v11290_v53, %v10148_v9 }
0x18c1   : > { %13948 = vrsqrt.f32 %v10125_v22  ;;  %v10126_v41 = vadd.f32 1e-05, %v10119_v54 }
0x18c2   : > { %v10162_v63 = vadd.f32 %v11290_v53, %v10149_v36 }
0x18c3   : > { %v13945_v15 = vpop.eup %13944  ;;  %13950 = vrsqrt.f32 %v10126_v41 }
0x18c4   : > { %v10137_v47 = vmul.f32 %v13945_v15, %v10081_v44  ;;  %v10113_v6 = vpop.xlane.xlu1 %10112  ;;  %v13003_v51 = vpack.c.bf16 %v10162_v63, %v10161_v50 }
0x18c5   : > { %v13947_v21 = vpop.eup %13946  ;;  %v10120_v49 = vmul.f32 0.03125, %v10113_v6 }
0x18c6   : > { %v10138_v52 = vmul.f32 %v13947_v21, %v17885_v34  ;;  %13004 = vmatpush3.bf16.msra.mxu1 %v13003_v51  ;;  %v10150_v55 = vmul.f32 %v11289_v30, %v10137_v47 }
0x18c7   : > { %v10127_v1 = vadd.f32 1e-05, %v10120_v49  ;;  %13005 = vmatprep.subr.bf16.mxu1 %v18072_v57 }
0x18c8   : > { %v10151_v28 = vmul.f32 %v11289_v30, %v10138_v52  ;;  %v10163_v4 = vadd.f32 %v11290_v53, %v10150_v55 }
0x18c9   : > { %13952 = vrsqrt.f32 %v10127_v1 }
0x18ca   : > { %v10164_v56 = vadd.f32 %v11290_v53, %v10151_v28 }
0x18cb   : > { %v13949_v31 = vpop.eup %13948 }
0x18cc   : > { %v10139_v18 = vmul.f32 %v13949_v31, %v17891_v7  ;;  %v13006_v37 = vpack.c.bf16 %v10164_v56, %v10163_v4  ;;  %v10243_v7 = vld [vmem:[%s18004_s14 + $0x8] sm:$0xff] }
0x18cd   : > { %v13951_v44 = vpop.eup %13950  ;;  %v13012_v24 = vpack.c.bf16 %v10243_v7, %v10242_v8 }
0x18ce   : > { %v10140_v12 = vmul.f32 %v13951_v44, %v17893_v27  ;;  %13007 = vmatpush3.bf16.msra.mxu1 %v13006_v37  ;;  %v10152_v61 = vmul.f32 %v11289_v30, %v10139_v18 }
0x18cf   : > { %13008 = vmatprep.subr.bf16.mxu1 %v18072_v57 }
0x18d0   : > { %v10153_v34 = vmul.f32 %v11289_v30, %v10140_v12  ;;  %v10165_v33 = vadd.f32 %v11290_v53, %v10152_v61 }
0x18d2   : > { %v10166_v14 = vadd.f32 %v11290_v53, %v10153_v34 }
0x18d3   : > { %v13953_v60 = vpop.eup %13952 }
0x18d4   : > { %v13009_v59 = vpack.c.bf16 %v10166_v14, %v10165_v33  ;;  %v10141_v0 = vmul.f32 %v13953_v60, %v17901_v42  ;;  %v10245_v42 = vld [vmem:[%s18004_s14 + $0x18] sm:$0xff] }
0x18d5   : > { %v13015_v29 = vpack.c.bf16 %v10245_v42, %v10244_v40 }
0x18d6   : > { %13010 = vmatpush3.bf16.msra.mxu1 %v13009_v59  ;;  %v10154_v27 = vmul.f32 %v11289_v30, %v10141_v0 }
0x18d7   : > { %12818 = vmatprep.subr.mxu1 %v18071_v58 }
0x18d8   : > { %v10167_v26 = vadd.f32 %v11290_v53, %v10154_v27 }
0x18da   : > { %12819 = vmatpush3.msra.mxu1 %v10167_v26 }
0x18db   : > { %12821 = vmatmul.mubr.msk.f32.vlgmr.msra.gmra.mrb[120].mxu1 %vm828_vm5, %v10168_v45  ;;  %13011 = vmatprep.subr.bf16.mxu1 %v18072_v57 }
0x18dc   : > { %13013 = vmatpush3.bf16.msra.mxu1 %v13012_v24  ;;  %12831 = vmatprep.mubr.msk.f32.mxu1 %vm14021_vm1, %v18071_v58 }
0x18dd   : > { %13014 = vmatprep.subr.bf16.mxu1 %v18072_v57 }
0x18e0   : > { %13016 = vmatpush3.bf16.msra.mxu1 %v13015_v29 }
0x19ae   : > { %v10238_v48 = vpop.f32.mrb[120].mxu1 }
0x19af   : > { %v12822_v19 = vpop.f32.mrb[121].mxu1  ;;  %12832 = vmatmul.mubr.msk.f32.vlgmr.msra.gmra.mrb[122].mxu1 %vm587_vm0, %v10238_v48 }
0x1a82   : > { %v10316_v10 = vpop.f32.mrb[122].mxu1 }
0x1a83   : > { %v10317_v39 = vadd.f32 %v10316_v10, %v10246_v5  ;;  %v12833_v58 = vpop.f32.mrb[123].mxu1 }
0x1a85   : > { %10321 = vst.msk [vmem:[%s513_s18] sm:$0x1] %vm10320_vm8, %v10317_v39 }
0x1a86   : > { %13967 = shalt.err (!%p13964_p3)
}
0x1a87   : > { %s13968_s30 = scalar_lea.hbm %s17948_s19, 16  ;;  %s13972_s26 = scalar_lea.hbm %s18006_s16, 32 }
0x1a88   : > { %p13969_p4 = scmp.ne.s32.totalorder %s17948_s19, %s13968_s30  ;;  %p13973_p9 = scmp.lt.u32.totalorder %s17948_s19, %s18006_s16 }
0x1a89   : > { %p13974_p10 = scmp.lt.u32.totalorder %s13972_s26, %s13968_s30  ;;  %p13976_p12 = scmp.lt.u32.totalorder %s13968_s30, %s17948_s19 }
0x1a8a   : > { %p13970_p7 = pnand %p13969_p4, %p14162_p5 }
0x1a8b   : > { %p13975_p11 = por %p13974_p10, %p13973_p9 }
0x1a8c   : > { %p13971_p8 = pneg %p13970_p7 }
0x1a8d   : > { %p13977_p13 = por %p13976_p12, %p13975_p11 }
0x1a8f   : > { %p13978_p0 = pnand %p13977_p13, %p13971_p8 }
0x1a91   : > { %13981 = shalt.err (!%p13978_p0)
}
0x1a92   : > { %13017 = dma.vmem_to_hbm [thread:$0]  (%p14162_p5), %s17950_s27, 16, %s17948_s19, %s10323_s20  }
0x1a93 PF: > { %p13023_p1 = scmp.ge.s32.totalorder %s14016_s24, 2  ;;  %s10347_s29 = sand.u32 1, %s14004_s21  }
0x1a94   : > { %s10348_s17 = scalar_lea.sflag [#allocation3], %s10347_s29 }
0x1a95   : > { %p13020_p2 = pnand %p13023_p1, %p14166_p6 }
0x1a97   : > { %13999 = dma.done.wait (!%p13020_p2), %s10348_s17, 16  }
0x1a98   : > { %14001 = vsyncadd (!%p13020_p2), %s10348_s17, 4294967280  ;;  %s18079_s24 = sld [smem:[#allocation6_spill]]  ;;  %s18080_s30 = sld [smem:[#allocation5_spill]] }
0x1a99   : > { %s18081_s23 = sld [smem:[#allocation7_spill]]  ;;  %s18082_s21 = smov %s14008_s22 }
0x1a9e   : > { %p26_p3 = scmp.ge.s32.totalorder %s18079_s24, 4   ;;  %s18083_s22 = smov %s18080_s30 }
0x1aa0   :  { %28 = sbr.rel (!%p26_p3) target bundleno = 6 (0x6), region = 131 }
0x1aa7   :  { %10352 = vsyncpa [#allocation3], 1 }
0x1aa8   :  { %10354 = vsyncpa [#allocation3 + $0x1], 1 }

</bundles_post_ra>
